<compile_context>
chip_gen: v6e
topology: v6e:2x2x1
jax: 0.10.0
libtpu: 0.0.40
codegen_flags: <defaults>
</compile_context>

<pallas_src>
import functools

import jax
import jax.numpy as jnp
from jax.experimental import pallas as pl
from jax.experimental.pallas import tpu as pltpu

NUM_CHANNEL = 4
K1, K2 = 10, 10          # conv kernel sizes
C1, C2 = 64, 128         # conv output channels
LIN_OUT = 128            # Linear output width
FEAT_N = 120             # number of selected features
FEAT_PAD = 128           # features padded to a full lane tile

# fixed feature-selection indices from the PyTorch forward()
FEAT_IDX = [557, 581, 553, 551, 92, 554, 579, 570, 573, 577, 565, 286, 555, 549,
            13, 550, 63, 580, 556, 564, 0, 576, 567, 552, 578, 588, 597, 566,
            571, 44, 572, 574, 14, 582, 381, 594, 4, 593, 218, 25, 84, 592, 3,
            591, 547, 561, 562, 548, 319, 596, 558, 563, 87, 65, 599, 17, 88, 2,
            49, 309, 6, 81, 15, 590, 589, 43, 273, 420, 546, 568, 400, 277, 202,
            287, 434, 435, 423, 431, 301, 417, 412, 205, 179, 327, 176, 442, 172,
            450, 391, 163, 154, 480, 485, 490, 491, 498, 503, 507, 509, 452, 239,
            388, 219, 303, 292, 310, 316, 320, 322, 324, 326, 330, 336, 263, 262,
            339, 340, 256, 345, 347]


def _round_up(x, m):
    return ((x + m - 1) // m) * m


def _pick_bt(b):
    """Largest per-step sample tile (multiple of 16) that divides b, preferring grid >= 2."""
    for bt in (256, 128, 64, 32, 16):
        if b % bt == 0 and b // bt >= 2:
            return bt
    for bt in (256, 128, 64, 32, 16):
        if b % bt == 0:
            return bt
    return b


def hdc_cnn_kernel(patch_ref, feat_ref, w1_ref, b1_ref, w2_ref, b2_ref,
                   wlin_ref, blin_ref, ws_ref, bs_ref, wf_ref, bf_ref,
                   out_ref, *, l2p, lp):
    l1p, bt, kc = patch_ref.shape            # time-major patches: (L1p, Bt, K1*C_in)

    # --- Conv1d(4 -> 64, k=10) + ReLU : one im2col matmul, M = L1p*Bt ---
    p2 = patch_ref[...].reshape(l1p * bt, kc)            # aligned merge (bt % 16 == 0)
    h1 = jnp.dot(p2, w1_ref[...], preferred_element_type=jnp.float32)
    h1 = jnp.maximum(h1 + b1_ref[...], 0.0)              # (L1p*Bt, C1) f32
    h1b = h1.astype(jnp.bfloat16)

    # --- Conv1d(64 -> 128, k=10) + ReLU : accumulate over the 10 taps ---
    # Rows are time-major (row = l*Bt + b), so the k-th tap is the contiguous,
    # sublane-aligned row window [k*Bt, (k+L2p)*Bt) -- no concats, no relayouts.
    acc2 = jnp.dot(h1b[0:l2p * bt, :], w2_ref[0], preferred_element_type=jnp.float32)
    for k in range(1, K2):
        acc2 = acc2 + jnp.dot(h1b[k * bt:(k + l2p) * bt, :], w2_ref[k],
                              preferred_element_type=jnp.float32)
    h2 = jnp.maximum(acc2 + b2_ref[...], 0.0)             # (L2p*Bt, C2) f32
    # Dropout(0.5): identity at inference time (no RNG applied).
    h2 = h2.reshape(l2p, bt, C2)                          # aligned split -> (time, sample, C2)

    # --- MaxPool1d(2) + flatten + Linear(Lp*C2 -> 128) + ReLU ---
    # Pool pairs via leading-dim indexing, accumulate (Bt, C2) x (C2, 128) matmuls.
    pooled = jnp.maximum(h2[0], h2[1]).astype(jnp.bfloat16)
    xacc = jnp.dot(pooled, wlin_ref[0], preferred_element_type=jnp.float32)
    for p in range(1, lp):
        pooled = jnp.maximum(h2[2 * p], h2[2 * p + 1]).astype(jnp.bfloat16)
        xacc = xacc + jnp.dot(pooled, wlin_ref[p], preferred_element_type=jnp.float32)
    x = jnp.maximum(xacc + blin_ref[...], 0.0)            # (Bt, 128) f32

    # --- HDC projections: two clean (Bt, 128) x (128, D) matmuls ---
    proj_s = jnp.dot(x.astype(jnp.bfloat16), ws_ref[...],
                     preferred_element_type=jnp.float32)
    sample_hv = jnp.cos(proj_s + bs_ref[...]) * jnp.sin(proj_s)
    # TODO(synk): exact torchhd DensityFlocet semantics unavailable; the feature branch is a
    # Sinusoid-style nonlinear projection with the same (120 -> D) signature.
    proj_f = jnp.dot(feat_ref[...], wf_ref[...], preferred_element_type=jnp.float32)
    feat_hv = jnp.cos(proj_f + bf_ref[...]) * jnp.sin(proj_f)

    # --- bundle + bind + hard_quantize ---
    combined = sample_hv + feat_hv + sample_hv * feat_hv
    out_ref[...] = jnp.where(combined > 0.0, 1.0, -1.0).astype(out_ref.dtype)


def init_params(key, L, D):
    """Kernel-ready parameter layouts (matmul weights stored in bfloat16)."""
    L1 = L - K1 + 1
    L2 = L1 - K2 + 1
    Lp = L2 // 2
    keys = jax.random.split(key, 10)

    def n(k, shape, scale=0.1, dtype=jnp.bfloat16):
        return (scale * jax.random.normal(k, shape, jnp.float32)).astype(dtype)

    # feature projection (120 -> D), zero-padded to 128 input lanes
    whdc_f = (jnp.zeros((FEAT_PAD, D), jnp.float32)
              .at[:FEAT_N].set(jax.random.normal(keys[8], (FEAT_N, D), jnp.float32))
              ).astype(jnp.bfloat16)

    return dict(
        # conv1 weight pre-flattened for im2col: row index = k*C_in + c_in
        w1=n(keys[0], (K1 * NUM_CHANNEL, C1)),
        b1=n(keys[1], (1, C1), dtype=jnp.float32),
        # conv2 weight as (tap k, C_in, C_out) for the accumulated-matmul formulation
        w2=n(keys[2], (K2, C1, C2)),
        b2=n(keys[3], (1, C2), dtype=jnp.float32),
        # Linear(Lp*C2 -> 128) as (pool step p, C2, 128); flatten order here is p*C2 + c2
        # (PyTorch flatten of (C2, Lp) is c2*Lp + p -> permute rows if loading torch weights)
        wlin=n(keys[4], (Lp, C2, LIN_OUT)),
        blin=n(keys[5], (1, LIN_OUT), dtype=jnp.float32),
        # Sinusoid(128, D): weight ~ N(0,1), bias ~ U(0, 2*pi)
        whdc_s=jax.random.normal(keys[6], (LIN_OUT, D), jnp.float32).astype(jnp.bfloat16),
        bhdc_s=jax.random.uniform(keys[7], (1, D), jnp.float32, 0.0, 2.0 * jnp.pi),
        whdc_f=whdc_f,
        bhdc_f=jax.random.uniform(keys[9], (1, D), jnp.float32, 0.0, 2.0 * jnp.pi),
    )


@jax.jit
def hdc_cnn_encoder_batch(signals, feat, params):
    """signals: (B, L, NUM_CHANNEL), feat: (B, >=600) -> (B, D) in {-1, +1} (bfloat16)."""
    B0, L, _ = signals.shape
    D = params["whdc_s"].shape[1]
    L1 = L - K1 + 1
    L2 = L1 - K2 + 1
    Lp = L2 // 2
    L2p = _round_up(L2, 8)                 # conv2 rows kept per sample (padded, tile aligned)
    L1p = _round_up(L2p + K2 - 1, 8)       # conv1 rows kept per sample (padded, tile aligned)

    # Pad batch to a multiple of 16 so bf16 blocks and in-kernel reshapes stay tile aligned,
    # then process Bt samples per grid step (Bt = the matmul M dimension).
    B = _round_up(B0, 16)
    Bt = _pick_bt(B)
    if B != B0:
        signals = jnp.pad(signals, ((0, B - B0), (0, 0), (0, 0)))
        feat = jnp.pad(feat, ((0, B - B0), (0, 0)))

    # glue: static-index feature gather, zero-padded to 128 lanes
    feat_sel = feat.astype(jnp.float32)[:, jnp.asarray(FEAT_IDX, jnp.int32)]       # (B, 120)
    feat_pad = jnp.pad(feat_sel, ((0, 0), (0, FEAT_PAD - FEAT_N))).astype(jnp.bfloat16)

    # glue: conv1 im2col patches (static shifts), zero-padded rows, time-major (L1p, B, 40)
    sig = signals.astype(jnp.float32)
    patches = jnp.concatenate([sig[:, k:k + L1, :] for k in range(K1)], axis=-1)   # (B, L1, 40)
    patches = jnp.pad(patches, ((0, 0), (0, L1p - L1), (0, 0)))
    patches_tm = jnp.transpose(patches, (1, 0, 2)).astype(jnp.bfloat16)            # (L1p, B, 40)

    kernel = functools.partial(hdc_cnn_kernel, l2p=L2p, lp=Lp)
    # constant weights/biases: whole-array VMEM residents (not re-DMA'd / double-buffered
    # per grid step). NOTE: at large L / D, tile D with an extra grid axis and raise
    # vmem_limit_bytes (v7x has only 64 MiB physical VMEM).
    wspec = pl.BlockSpec(memory_space=pltpu.MemorySpace.VMEM)

    out = pl.pallas_call(
        kernel,
        out_shape=jax.ShapeDtypeStruct((B, D), jnp.bfloat16),
        grid=(B // Bt,),
        in_specs=[
            pl.BlockSpec((L1p, Bt, K1 * NUM_CHANNEL), lambda b: (0, b, 0)),
            pl.BlockSpec((Bt, FEAT_PAD), lambda b: (b, 0)),
            wspec, wspec, wspec, wspec, wspec, wspec, wspec, wspec, wspec, wspec,
        ],
        out_specs=pl.BlockSpec((Bt, D), lambda b: (b, 0)),
        compiler_params=pltpu.CompilerParams(
            dimension_semantics=("parallel",)),
    )(patches_tm, feat_pad,
      params["w1"], params["b1"], params["w2"], params["b2"],
      params["wlin"], params["blin"],
      params["whdc_s"], params["bhdc_s"], params["whdc_f"], params["bhdc_f"])
    return out[:B0]


def hdc_cnn_encoder(signals, feat, params):
    """Single-sample API matching the PyTorch forward(): (L, C), (>=600,) -> (D,)."""
    return hdc_cnn_encoder_batch(signals[None], feat[None], params)[0]


if __name__ == "__main__":
    key = jax.random.PRNGKey(0)
    k_sig, k_feat, k_par = jax.random.split(key, 3)

    B = 32            # tiled as Bt=16 samples per grid step -> grid=(2,)
    L = 40            # signal length -> conv1: 31 valid rows, conv2: 22, maxpool: 11
    D = 256           # out_dimension (hypervector size), lane-dense multiple of 128

    signals = jax.random.normal(k_sig, (B, L, NUM_CHANNEL), jnp.float32)
    feat = jax.random.normal(k_feat, (B, 600), jnp.float32)
    params = init_params(k_par, L, D)

    out = jax.block_until_ready(hdc_cnn_encoder_batch(signals, feat, params))
    assert out.shape == (B, D)
    assert bool(jnp.all(jnp.abs(out.astype(jnp.float32)) == 1.0))   # hard_quantize -> +/-1

    single = jax.block_until_ready(hdc_cnn_encoder(signals[0], feat[0], params))
    assert single.shape == (D,)

    print("KERNEL_OK")
</pallas_src>

<mosaic_0001>
module attributes {stable_mosaic.version = 11 : i64} {
  func.func @hdc_cnn_kernel(%arg0: i32, %arg1: memref<40x16x40xbf16, #tpu.memory_space<vmem>>, %arg2: memref<16x128xbf16, #tpu.memory_space<vmem>>, %arg3: memref<40x64xbf16, #tpu.memory_space<vmem>>, %arg4: memref<1x64xf32, #tpu.memory_space<vmem>>, %arg5: memref<10x64x128xbf16, #tpu.memory_space<vmem>>, %arg6: memref<1x128xf32, #tpu.memory_space<vmem>>, %arg7: memref<11x128x128xbf16, #tpu.memory_space<vmem>>, %arg8: memref<1x128xf32, #tpu.memory_space<vmem>>, %arg9: memref<128x256xbf16, #tpu.memory_space<vmem>>, %arg10: memref<1x256xf32, #tpu.memory_space<vmem>>, %arg11: memref<128x256xbf16, #tpu.memory_space<vmem>>, %arg12: memref<1x256xf32, #tpu.memory_space<vmem>>, %arg13: memref<16x256xbf16, #tpu.memory_space<vmem>>) attributes {dimension_semantics = [#tpu.dimension_semantics<parallel>], iteration_bounds = array<i64: 2>, scalar_prefetch = 0 : i64, scratch_operands = 0 : i64, tpu.core_type = #tpu.core_type<tc>, window_params = [{transform_indices = @transform_0, window_bounds = array<i64: 40, 16, 40>}, {transform_indices = @transform_1, window_bounds = array<i64: 16, 128>}, {pipeline_mode = #tpu.pipeline_mode<synchronous>, transform_indices = @transform_2, window_bounds = array<i64: 40, 64>}, {pipeline_mode = #tpu.pipeline_mode<synchronous>, transform_indices = @transform_3, window_bounds = array<i64: 1, 64>}, {pipeline_mode = #tpu.pipeline_mode<synchronous>, transform_indices = @transform_4, window_bounds = array<i64: 10, 64, 128>}, {pipeline_mode = #tpu.pipeline_mode<synchronous>, transform_indices = @transform_5, window_bounds = array<i64: 1, 128>}, {pipeline_mode = #tpu.pipeline_mode<synchronous>, transform_indices = @transform_6, window_bounds = array<i64: 11, 128, 128>}, {pipeline_mode = #tpu.pipeline_mode<synchronous>, transform_indices = @transform_7, window_bounds = array<i64: 1, 128>}, {pipeline_mode = #tpu.pipeline_mode<synchronous>, transform_indices = @transform_8, window_bounds = array<i64: 128, 256>}, {pipeline_mode = #tpu.pipeline_mode<synchronous>, transform_indices = @transform_9, window_bounds = array<i64: 1, 256>}, {pipeline_mode = #tpu.pipeline_mode<synchronous>, transform_indices = @transform_10, window_bounds = array<i64: 128, 256>}, {pipeline_mode = #tpu.pipeline_mode<synchronous>, transform_indices = @transform_11, window_bounds = array<i64: 1, 256>}, {transform_indices = @transform_12, window_bounds = array<i64: 16, 256>}]} {
    %c0 = arith.constant 0 : index
    %c0_0 = arith.constant 0 : index
    %c0_1 = arith.constant 0 : index
    %0 = vector.load %arg1[%c0, %c0_0, %c0_1] : memref<40x16x40xbf16, #tpu.memory_space<vmem>>, vector<40x16x40xbf16>
    %1 = vector.shape_cast %0 : vector<40x16x40xbf16> to vector<640x40xbf16>
    %c0_2 = arith.constant 0 : index
    %c0_3 = arith.constant 0 : index
    %2 = vector.load %arg3[%c0_2, %c0_3] : memref<40x64xbf16, #tpu.memory_space<vmem>>, vector<40x64xbf16>
    %cst = arith.constant dense<0.000000e+00> : vector<640x64xf32>
    %3 = tpu.matmul %1, %2, %cst {dimension_numbers = #tpu.dot_dimension_numbers<[1], [0], [0], [1], [0, 0, 1, 1], [], []>} : vector<640x40xbf16>, vector<40x64xbf16>, vector<640x64xf32> -> vector<640x64xf32>
    %c0_4 = arith.constant 0 : index
    %c0_5 = arith.constant 0 : index
    %4 = vector.load %arg4[%c0_4, %c0_5] : memref<1x64xf32, #tpu.memory_space<vmem>>, vector<1x64xf32>
    %5 = vector.broadcast %4 : vector<1x64xf32> to vector<640x64xf32>
    %6 = arith.addf %3, %5 : vector<640x64xf32>
    %cst_6 = arith.constant 0.000000e+00 : f32
    %7 = vector.broadcast %cst_6 : f32 to vector<640x64xf32>
    %8 = arith.maximumf %6, %7 : vector<640x64xf32>
    %9 = arith.truncf %8 : vector<640x64xf32> to vector<640x64xbf16>
    %10 = vector.extract_strided_slice %9 {offsets = [0, 0], sizes = [384, 64], strides = [1, 1]} : vector<640x64xbf16> to vector<384x64xbf16>
    %c0_7 = arith.constant 0 : index
    %c0_8 = arith.constant 0 : index
    %c0_9 = arith.constant 0 : index
    %11 = vector.load %arg5[%c0_7, %c0_8, %c0_9] : memref<10x64x128xbf16, #tpu.memory_space<vmem>>, vector<1x64x128xbf16>
    %12 = vector.shape_cast %11 : vector<1x64x128xbf16> to vector<64x128xbf16>
    %cst_10 = arith.constant dense<0.000000e+00> : vector<384x128xf32>
    %13 = tpu.matmul %10, %12, %cst_10 {dimension_numbers = #tpu.dot_dimension_numbers<[1], [0], [0], [1], [0, 0, 1, 1], [], []>} : vector<384x64xbf16>, vector<64x128xbf16>, vector<384x128xf32> -> vector<384x128xf32>
    %14 = vector.extract_strided_slice %9 {offsets = [16, 0], sizes = [384, 64], strides = [1, 1]} : vector<640x64xbf16> to vector<384x64xbf16>
    %c1 = arith.constant 1 : index
    %c0_11 = arith.constant 0 : index
    %c0_12 = arith.constant 0 : index
    %15 = vector.load %arg5[%c1, %c0_11, %c0_12] : memref<10x64x128xbf16, #tpu.memory_space<vmem>>, vector<1x64x128xbf16>
    %16 = vector.shape_cast %15 : vector<1x64x128xbf16> to vector<64x128xbf16>
    %cst_13 = arith.constant dense<0.000000e+00> : vector<384x128xf32>
    %17 = tpu.matmul %14, %16, %cst_13 {dimension_numbers = #tpu.dot_dimension_numbers<[1], [0], [0], [1], [0, 0, 1, 1], [], []>} : vector<384x64xbf16>, vector<64x128xbf16>, vector<384x128xf32> -> vector<384x128xf32>
    %18 = arith.addf %13, %17 : vector<384x128xf32>
    %19 = vector.extract_strided_slice %9 {offsets = [32, 0], sizes = [384, 64], strides = [1, 1]} : vector<640x64xbf16> to vector<384x64xbf16>
    %c2 = arith.constant 2 : index
    %c0_14 = arith.constant 0 : index
    %c0_15 = arith.constant 0 : index
    %20 = vector.load %arg5[%c2, %c0_14, %c0_15] : memref<10x64x128xbf16, #tpu.memory_space<vmem>>, vector<1x64x128xbf16>
    %21 = vector.shape_cast %20 : vector<1x64x128xbf16> to vector<64x128xbf16>
    %cst_16 = arith.constant dense<0.000000e+00> : vector<384x128xf32>
    %22 = tpu.matmul %19, %21, %cst_16 {dimension_numbers = #tpu.dot_dimension_numbers<[1], [0], [0], [1], [0, 0, 1, 1], [], []>} : vector<384x64xbf16>, vector<64x128xbf16>, vector<384x128xf32> -> vector<384x128xf32>
    %23 = arith.addf %18, %22 : vector<384x128xf32>
    %24 = vector.extract_strided_slice %9 {offsets = [48, 0], sizes = [384, 64], strides = [1, 1]} : vector<640x64xbf16> to vector<384x64xbf16>
    %c3 = arith.constant 3 : index
    %c0_17 = arith.constant 0 : index
    %c0_18 = arith.constant 0 : index
    %25 = vector.load %arg5[%c3, %c0_17, %c0_18] : memref<10x64x128xbf16, #tpu.memory_space<vmem>>, vector<1x64x128xbf16>
    %26 = vector.shape_cast %25 : vector<1x64x128xbf16> to vector<64x128xbf16>
    %cst_19 = arith.constant dense<0.000000e+00> : vector<384x128xf32>
    %27 = tpu.matmul %24, %26, %cst_19 {dimension_numbers = #tpu.dot_dimension_numbers<[1], [0], [0], [1], [0, 0, 1, 1], [], []>} : vector<384x64xbf16>, vector<64x128xbf16>, vector<384x128xf32> -> vector<384x128xf32>
    %28 = arith.addf %23, %27 : vector<384x128xf32>
    %29 = vector.extract_strided_slice %9 {offsets = [64, 0], sizes = [384, 64], strides = [1, 1]} : vector<640x64xbf16> to vector<384x64xbf16>
    %c4 = arith.constant 4 : index
    %c0_20 = arith.constant 0 : index
    %c0_21 = arith.constant 0 : index
    %30 = vector.load %arg5[%c4, %c0_20, %c0_21] : memref<10x64x128xbf16, #tpu.memory_space<vmem>>, vector<1x64x128xbf16>
    %31 = vector.shape_cast %30 : vector<1x64x128xbf16> to vector<64x128xbf16>
    %cst_22 = arith.constant dense<0.000000e+00> : vector<384x128xf32>
    %32 = tpu.matmul %29, %31, %cst_22 {dimension_numbers = #tpu.dot_dimension_numbers<[1], [0], [0], [1], [0, 0, 1, 1], [], []>} : vector<384x64xbf16>, vector<64x128xbf16>, vector<384x128xf32> -> vector<384x128xf32>
    %33 = arith.addf %28, %32 : vector<384x128xf32>
    %34 = vector.extract_strided_slice %9 {offsets = [80, 0], sizes = [384, 64], strides = [1, 1]} : vector<640x64xbf16> to vector<384x64xbf16>
    %c5 = arith.constant 5 : index
    %c0_23 = arith.constant 0 : index
    %c0_24 = arith.constant 0 : index
    %35 = vector.load %arg5[%c5, %c0_23, %c0_24] : memref<10x64x128xbf16, #tpu.memory_space<vmem>>, vector<1x64x128xbf16>
    %36 = vector.shape_cast %35 : vector<1x64x128xbf16> to vector<64x128xbf16>
    %cst_25 = arith.constant dense<0.000000e+00> : vector<384x128xf32>
    %37 = tpu.matmul %34, %36, %cst_25 {dimension_numbers = #tpu.dot_dimension_numbers<[1], [0], [0], [1], [0, 0, 1, 1], [], []>} : vector<384x64xbf16>, vector<64x128xbf16>, vector<384x128xf32> -> vector<384x128xf32>
    %38 = arith.addf %33, %37 : vector<384x128xf32>
    %39 = vector.extract_strided_slice %9 {offsets = [96, 0], sizes = [384, 64], strides = [1, 1]} : vector<640x64xbf16> to vector<384x64xbf16>
    %c6 = arith.constant 6 : index
    %c0_26 = arith.constant 0 : index
    %c0_27 = arith.constant 0 : index
    %40 = vector.load %arg5[%c6, %c0_26, %c0_27] : memref<10x64x128xbf16, #tpu.memory_space<vmem>>, vector<1x64x128xbf16>
    %41 = vector.shape_cast %40 : vector<1x64x128xbf16> to vector<64x128xbf16>
    %cst_28 = arith.constant dense<0.000000e+00> : vector<384x128xf32>
    %42 = tpu.matmul %39, %41, %cst_28 {dimension_numbers = #tpu.dot_dimension_numbers<[1], [0], [0], [1], [0, 0, 1, 1], [], []>} : vector<384x64xbf16>, vector<64x128xbf16>, vector<384x128xf32> -> vector<384x128xf32>
    %43 = arith.addf %38, %42 : vector<384x128xf32>
    %44 = vector.extract_strided_slice %9 {offsets = [112, 0], sizes = [384, 64], strides = [1, 1]} : vector<640x64xbf16> to vector<384x64xbf16>
    %c7 = arith.constant 7 : index
    %c0_29 = arith.constant 0 : index
    %c0_30 = arith.constant 0 : index
    %45 = vector.load %arg5[%c7, %c0_29, %c0_30] : memref<10x64x128xbf16, #tpu.memory_space<vmem>>, vector<1x64x128xbf16>
    %46 = vector.shape_cast %45 : vector<1x64x128xbf16> to vector<64x128xbf16>
    %cst_31 = arith.constant dense<0.000000e+00> : vector<384x128xf32>
    %47 = tpu.matmul %44, %46, %cst_31 {dimension_numbers = #tpu.dot_dimension_numbers<[1], [0], [0], [1], [0, 0, 1, 1], [], []>} : vector<384x64xbf16>, vector<64x128xbf16>, vector<384x128xf32> -> vector<384x128xf32>
    %48 = arith.addf %43, %47 : vector<384x128xf32>
    %49 = vector.extract_strided_slice %9 {offsets = [128, 0], sizes = [384, 64], strides = [1, 1]} : vector<640x64xbf16> to vector<384x64xbf16>
    %c8 = arith.constant 8 : index
    %c0_32 = arith.constant 0 : index
    %c0_33 = arith.constant 0 : index
    %50 = vector.load %arg5[%c8, %c0_32, %c0_33] : memref<10x64x128xbf16, #tpu.memory_space<vmem>>, vector<1x64x128xbf16>
    %51 = vector.shape_cast %50 : vector<1x64x128xbf16> to vector<64x128xbf16>
    %cst_34 = arith.constant dense<0.000000e+00> : vector<384x128xf32>
    %52 = tpu.matmul %49, %51, %cst_34 {dimension_numbers = #tpu.dot_dimension_numbers<[1], [0], [0], [1], [0, 0, 1, 1], [], []>} : vector<384x64xbf16>, vector<64x128xbf16>, vector<384x128xf32> -> vector<384x128xf32>
    %53 = arith.addf %48, %52 : vector<384x128xf32>
    %54 = vector.extract_strided_slice %9 {offsets = [144, 0], sizes = [384, 64], strides = [1, 1]} : vector<640x64xbf16> to vector<384x64xbf16>
    %c9 = arith.constant 9 : index
    %c0_35 = arith.constant 0 : index
    %c0_36 = arith.constant 0 : index
    %55 = vector.load %arg5[%c9, %c0_35, %c0_36] : memref<10x64x128xbf16, #tpu.memory_space<vmem>>, vector<1x64x128xbf16>
    %56 = vector.shape_cast %55 : vector<1x64x128xbf16> to vector<64x128xbf16>
    %cst_37 = arith.constant dense<0.000000e+00> : vector<384x128xf32>
    %57 = tpu.matmul %54, %56, %cst_37 {dimension_numbers = #tpu.dot_dimension_numbers<[1], [0], [0], [1], [0, 0, 1, 1], [], []>} : vector<384x64xbf16>, vector<64x128xbf16>, vector<384x128xf32> -> vector<384x128xf32>
    %58 = arith.addf %53, %57 : vector<384x128xf32>
    %c0_38 = arith.constant 0 : index
    %c0_39 = arith.constant 0 : index
    %59 = vector.load %arg6[%c0_38, %c0_39] : memref<1x128xf32, #tpu.memory_space<vmem>>, vector<1x128xf32>
    %60 = vector.broadcast %59 : vector<1x128xf32> to vector<384x128xf32>
    %61 = arith.addf %58, %60 : vector<384x128xf32>
    %cst_40 = arith.constant 0.000000e+00 : f32
    %62 = vector.broadcast %cst_40 : f32 to vector<384x128xf32>
    %63 = arith.maximumf %61, %62 : vector<384x128xf32>
    %64 = vector.shape_cast %63 : vector<384x128xf32> to vector<24x16x128xf32>
    %65 = vector.extract_strided_slice %64 {offsets = [0, 0, 0], sizes = [1, 16, 128], strides = [1, 1, 1]} : vector<24x16x128xf32> to vector<1x16x128xf32>
    %66 = vector.shape_cast %65 : vector<1x16x128xf32> to vector<16x128xf32>
    %67 = vector.extract_strided_slice %64 {offsets = [1, 0, 0], sizes = [1, 16, 128], strides = [1, 1, 1]} : vector<24x16x128xf32> to vector<1x16x128xf32>
    %68 = vector.shape_cast %67 : vector<1x16x128xf32> to vector<16x128xf32>
    %69 = arith.maximumf %66, %68 : vector<16x128xf32>
    %70 = arith.truncf %69 : vector<16x128xf32> to vector<16x128xbf16>
    %c0_41 = arith.constant 0 : index
    %c0_42 = arith.constant 0 : index
    %c0_43 = arith.constant 0 : index
    %71 = vector.load %arg7[%c0_41, %c0_42, %c0_43] : memref<11x128x128xbf16, #tpu.memory_space<vmem>>, vector<1x128x128xbf16>
    %72 = vector.shape_cast %71 : vector<1x128x128xbf16> to vector<128x128xbf16>
    %cst_44 = arith.constant dense<0.000000e+00> : vector<16x128xf32>
    %73 = tpu.matmul %70, %72, %cst_44 {dimension_numbers = #tpu.dot_dimension_numbers<[1], [0], [0], [1], [0, 0, 1, 1], [], []>} : vector<16x128xbf16>, vector<128x128xbf16>, vector<16x128xf32> -> vector<16x128xf32>
    %74 = vector.extract_strided_slice %64 {offsets = [2, 0, 0], sizes = [1, 16, 128], strides = [1, 1, 1]} : vector<24x16x128xf32> to vector<1x16x128xf32>
    %75 = vector.shape_cast %74 : vector<1x16x128xf32> to vector<16x128xf32>
    %76 = vector.extract_strided_slice %64 {offsets = [3, 0, 0], sizes = [1, 16, 128], strides = [1, 1, 1]} : vector<24x16x128xf32> to vector<1x16x128xf32>
    %77 = vector.shape_cast %76 : vector<1x16x128xf32> to vector<16x128xf32>
    %78 = arith.maximumf %75, %77 : vector<16x128xf32>
    %79 = arith.truncf %78 : vector<16x128xf32> to vector<16x128xbf16>
    %c1_45 = arith.constant 1 : index
    %c0_46 = arith.constant 0 : index
    %c0_47 = arith.constant 0 : index
    %80 = vector.load %arg7[%c1_45, %c0_46, %c0_47] : memref<11x128x128xbf16, #tpu.memory_space<vmem>>, vector<1x128x128xbf16>
    %81 = vector.shape_cast %80 : vector<1x128x128xbf16> to vector<128x128xbf16>
    %cst_48 = arith.constant dense<0.000000e+00> : vector<16x128xf32>
    %82 = tpu.matmul %79, %81, %cst_48 {dimension_numbers = #tpu.dot_dimension_numbers<[1], [0], [0], [1], [0, 0, 1, 1], [], []>} : vector<16x128xbf16>, vector<128x128xbf16>, vector<16x128xf32> -> vector<16x128xf32>
    %83 = arith.addf %73, %82 : vector<16x128xf32>
    %84 = vector.extract_strided_slice %64 {offsets = [4, 0, 0], sizes = [1, 16, 128], strides = [1, 1, 1]} : vector<24x16x128xf32> to vector<1x16x128xf32>
    %85 = vector.shape_cast %84 : vector<1x16x128xf32> to vector<16x128xf32>
    %86 = vector.extract_strided_slice %64 {offsets = [5, 0, 0], sizes = [1, 16, 128], strides = [1, 1, 1]} : vector<24x16x128xf32> to vector<1x16x128xf32>
    %87 = vector.shape_cast %86 : vector<1x16x128xf32> to vector<16x128xf32>
    %88 = arith.maximumf %85, %87 : vector<16x128xf32>
    %89 = arith.truncf %88 : vector<16x128xf32> to vector<16x128xbf16>
    %c2_49 = arith.constant 2 : index
    %c0_50 = arith.constant 0 : index
    %c0_51 = arith.constant 0 : index
    %90 = vector.load %arg7[%c2_49, %c0_50, %c0_51] : memref<11x128x128xbf16, #tpu.memory_space<vmem>>, vector<1x128x128xbf16>
    %91 = vector.shape_cast %90 : vector<1x128x128xbf16> to vector<128x128xbf16>
    %cst_52 = arith.constant dense<0.000000e+00> : vector<16x128xf32>
    %92 = tpu.matmul %89, %91, %cst_52 {dimension_numbers = #tpu.dot_dimension_numbers<[1], [0], [0], [1], [0, 0, 1, 1], [], []>} : vector<16x128xbf16>, vector<128x128xbf16>, vector<16x128xf32> -> vector<16x128xf32>
    %93 = arith.addf %83, %92 : vector<16x128xf32>
    %94 = vector.extract_strided_slice %64 {offsets = [6, 0, 0], sizes = [1, 16, 128], strides = [1, 1, 1]} : vector<24x16x128xf32> to vector<1x16x128xf32>
    %95 = vector.shape_cast %94 : vector<1x16x128xf32> to vector<16x128xf32>
    %96 = vector.extract_strided_slice %64 {offsets = [7, 0, 0], sizes = [1, 16, 128], strides = [1, 1, 1]} : vector<24x16x128xf32> to vector<1x16x128xf32>
    %97 = vector.shape_cast %96 : vector<1x16x128xf32> to vector<16x128xf32>
    %98 = arith.maximumf %95, %97 : vector<16x128xf32>
    %99 = arith.truncf %98 : vector<16x128xf32> to vector<16x128xbf16>
    %c3_53 = arith.constant 3 : index
    %c0_54 = arith.constant 0 : index
    %c0_55 = arith.constant 0 : index
    %100 = vector.load %arg7[%c3_53, %c0_54, %c0_55] : memref<11x128x128xbf16, #tpu.memory_space<vmem>>, vector<1x128x128xbf16>
    %101 = vector.shape_cast %100 : vector<1x128x128xbf16> to vector<128x128xbf16>
    %cst_56 = arith.constant dense<0.000000e+00> : vector<16x128xf32>
    %102 = tpu.matmul %99, %101, %cst_56 {dimension_numbers = #tpu.dot_dimension_numbers<[1], [0], [0], [1], [0, 0, 1, 1], [], []>} : vector<16x128xbf16>, vector<128x128xbf16>, vector<16x128xf32> -> vector<16x128xf32>
    %103 = arith.addf %93, %102 : vector<16x128xf32>
    %104 = vector.extract_strided_slice %64 {offsets = [8, 0, 0], sizes = [1, 16, 128], strides = [1, 1, 1]} : vector<24x16x128xf32> to vector<1x16x128xf32>
    %105 = vector.shape_cast %104 : vector<1x16x128xf32> to vector<16x128xf32>
    %106 = vector.extract_strided_slice %64 {offsets = [9, 0, 0], sizes = [1, 16, 128], strides = [1, 1, 1]} : vector<24x16x128xf32> to vector<1x16x128xf32>
    %107 = vector.shape_cast %106 : vector<1x16x128xf32> to vector<16x128xf32>
    %108 = arith.maximumf %105, %107 : vector<16x128xf32>
    %109 = arith.truncf %108 : vector<16x128xf32> to vector<16x128xbf16>
    %c4_57 = arith.constant 4 : index
    %c0_58 = arith.constant 0 : index
    %c0_59 = arith.constant 0 : index
    %110 = vector.load %arg7[%c4_57, %c0_58, %c0_59] : memref<11x128x128xbf16, #tpu.memory_space<vmem>>, vector<1x128x128xbf16>
    %111 = vector.shape_cast %110 : vector<1x128x128xbf16> to vector<128x128xbf16>
    %cst_60 = arith.constant dense<0.000000e+00> : vector<16x128xf32>
    %112 = tpu.matmul %109, %111, %cst_60 {dimension_numbers = #tpu.dot_dimension_numbers<[1], [0], [0], [1], [0, 0, 1, 1], [], []>} : vector<16x128xbf16>, vector<128x128xbf16>, vector<16x128xf32> -> vector<16x128xf32>
    %113 = arith.addf %103, %112 : vector<16x128xf32>
    %114 = vector.extract_strided_slice %64 {offsets = [10, 0, 0], sizes = [1, 16, 128], strides = [1, 1, 1]} : vector<24x16x128xf32> to vector<1x16x128xf32>
    %115 = vector.shape_cast %114 : vector<1x16x128xf32> to vector<16x128xf32>
    %116 = vector.extract_strided_slice %64 {offsets = [11, 0, 0], sizes = [1, 16, 128], strides = [1, 1, 1]} : vector<24x16x128xf32> to vector<1x16x128xf32>
    %117 = vector.shape_cast %116 : vector<1x16x128xf32> to vector<16x128xf32>
    %118 = arith.maximumf %115, %117 : vector<16x128xf32>
    %119 = arith.truncf %118 : vector<16x128xf32> to vector<16x128xbf16>
    %c5_61 = arith.constant 5 : index
    %c0_62 = arith.constant 0 : index
    %c0_63 = arith.constant 0 : index
    %120 = vector.load %arg7[%c5_61, %c0_62, %c0_63] : memref<11x128x128xbf16, #tpu.memory_space<vmem>>, vector<1x128x128xbf16>
    %121 = vector.shape_cast %120 : vector<1x128x128xbf16> to vector<128x128xbf16>
    %cst_64 = arith.constant dense<0.000000e+00> : vector<16x128xf32>
    %122 = tpu.matmul %119, %121, %cst_64 {dimension_numbers = #tpu.dot_dimension_numbers<[1], [0], [0], [1], [0, 0, 1, 1], [], []>} : vector<16x128xbf16>, vector<128x128xbf16>, vector<16x128xf32> -> vector<16x128xf32>
    %123 = arith.addf %113, %122 : vector<16x128xf32>
    %124 = vector.extract_strided_slice %64 {offsets = [12, 0, 0], sizes = [1, 16, 128], strides = [1, 1, 1]} : vector<24x16x128xf32> to vector<1x16x128xf32>
    %125 = vector.shape_cast %124 : vector<1x16x128xf32> to vector<16x128xf32>
    %126 = vector.extract_strided_slice %64 {offsets = [13, 0, 0], sizes = [1, 16, 128], strides = [1, 1, 1]} : vector<24x16x128xf32> to vector<1x16x128xf32>
    %127 = vector.shape_cast %126 : vector<1x16x128xf32> to vector<16x128xf32>
    %128 = arith.maximumf %125, %127 : vector<16x128xf32>
    %129 = arith.truncf %128 : vector<16x128xf32> to vector<16x128xbf16>
    %c6_65 = arith.constant 6 : index
    %c0_66 = arith.constant 0 : index
    %c0_67 = arith.constant 0 : index
    %130 = vector.load %arg7[%c6_65, %c0_66, %c0_67] : memref<11x128x128xbf16, #tpu.memory_space<vmem>>, vector<1x128x128xbf16>
    %131 = vector.shape_cast %130 : vector<1x128x128xbf16> to vector<128x128xbf16>
    %cst_68 = arith.constant dense<0.000000e+00> : vector<16x128xf32>
    %132 = tpu.matmul %129, %131, %cst_68 {dimension_numbers = #tpu.dot_dimension_numbers<[1], [0], [0], [1], [0, 0, 1, 1], [], []>} : vector<16x128xbf16>, vector<128x128xbf16>, vector<16x128xf32> -> vector<16x128xf32>
    %133 = arith.addf %123, %132 : vector<16x128xf32>
    %134 = vector.extract_strided_slice %64 {offsets = [14, 0, 0], sizes = [1, 16, 128], strides = [1, 1, 1]} : vector<24x16x128xf32> to vector<1x16x128xf32>
    %135 = vector.shape_cast %134 : vector<1x16x128xf32> to vector<16x128xf32>
    %136 = vector.extract_strided_slice %64 {offsets = [15, 0, 0], sizes = [1, 16, 128], strides = [1, 1, 1]} : vector<24x16x128xf32> to vector<1x16x128xf32>
    %137 = vector.shape_cast %136 : vector<1x16x128xf32> to vector<16x128xf32>
    %138 = arith.maximumf %135, %137 : vector<16x128xf32>
    %139 = arith.truncf %138 : vector<16x128xf32> to vector<16x128xbf16>
    %c7_69 = arith.constant 7 : index
    %c0_70 = arith.constant 0 : index
    %c0_71 = arith.constant 0 : index
    %140 = vector.load %arg7[%c7_69, %c0_70, %c0_71] : memref<11x128x128xbf16, #tpu.memory_space<vmem>>, vector<1x128x128xbf16>
    %141 = vector.shape_cast %140 : vector<1x128x128xbf16> to vector<128x128xbf16>
    %cst_72 = arith.constant dense<0.000000e+00> : vector<16x128xf32>
    %142 = tpu.matmul %139, %141, %cst_72 {dimension_numbers = #tpu.dot_dimension_numbers<[1], [0], [0], [1], [0, 0, 1, 1], [], []>} : vector<16x128xbf16>, vector<128x128xbf16>, vector<16x128xf32> -> vector<16x128xf32>
    %143 = arith.addf %133, %142 : vector<16x128xf32>
    %144 = vector.extract_strided_slice %64 {offsets = [16, 0, 0], sizes = [1, 16, 128], strides = [1, 1, 1]} : vector<24x16x128xf32> to vector<1x16x128xf32>
    %145 = vector.shape_cast %144 : vector<1x16x128xf32> to vector<16x128xf32>
    %146 = vector.extract_strided_slice %64 {offsets = [17, 0, 0], sizes = [1, 16, 128], strides = [1, 1, 1]} : vector<24x16x128xf32> to vector<1x16x128xf32>
    %147 = vector.shape_cast %146 : vector<1x16x128xf32> to vector<16x128xf32>
    %148 = arith.maximumf %145, %147 : vector<16x128xf32>
    %149 = arith.truncf %148 : vector<16x128xf32> to vector<16x128xbf16>
    %c8_73 = arith.constant 8 : index
    %c0_74 = arith.constant 0 : index
    %c0_75 = arith.constant 0 : index
    %150 = vector.load %arg7[%c8_73, %c0_74, %c0_75] : memref<11x128x128xbf16, #tpu.memory_space<vmem>>, vector<1x128x128xbf16>
    %151 = vector.shape_cast %150 : vector<1x128x128xbf16> to vector<128x128xbf16>
    %cst_76 = arith.constant dense<0.000000e+00> : vector<16x128xf32>
    %152 = tpu.matmul %149, %151, %cst_76 {dimension_numbers = #tpu.dot_dimension_numbers<[1], [0], [0], [1], [0, 0, 1, 1], [], []>} : vector<16x128xbf16>, vector<128x128xbf16>, vector<16x128xf32> -> vector<16x128xf32>
    %153 = arith.addf %143, %152 : vector<16x128xf32>
    %154 = vector.extract_strided_slice %64 {offsets = [18, 0, 0], sizes = [1, 16, 128], strides = [1, 1, 1]} : vector<24x16x128xf32> to vector<1x16x128xf32>
    %155 = vector.shape_cast %154 : vector<1x16x128xf32> to vector<16x128xf32>
    %156 = vector.extract_strided_slice %64 {offsets = [19, 0, 0], sizes = [1, 16, 128], strides = [1, 1, 1]} : vector<24x16x128xf32> to vector<1x16x128xf32>
    %157 = vector.shape_cast %156 : vector<1x16x128xf32> to vector<16x128xf32>
    %158 = arith.maximumf %155, %157 : vector<16x128xf32>
    %159 = arith.truncf %158 : vector<16x128xf32> to vector<16x128xbf16>
    %c9_77 = arith.constant 9 : index
    %c0_78 = arith.constant 0 : index
    %c0_79 = arith.constant 0 : index
    %160 = vector.load %arg7[%c9_77, %c0_78, %c0_79] : memref<11x128x128xbf16, #tpu.memory_space<vmem>>, vector<1x128x128xbf16>
    %161 = vector.shape_cast %160 : vector<1x128x128xbf16> to vector<128x128xbf16>
    %cst_80 = arith.constant dense<0.000000e+00> : vector<16x128xf32>
    %162 = tpu.matmul %159, %161, %cst_80 {dimension_numbers = #tpu.dot_dimension_numbers<[1], [0], [0], [1], [0, 0, 1, 1], [], []>} : vector<16x128xbf16>, vector<128x128xbf16>, vector<16x128xf32> -> vector<16x128xf32>
    %163 = arith.addf %153, %162 : vector<16x128xf32>
    %164 = vector.extract_strided_slice %64 {offsets = [20, 0, 0], sizes = [1, 16, 128], strides = [1, 1, 1]} : vector<24x16x128xf32> to vector<1x16x128xf32>
    %165 = vector.shape_cast %164 : vector<1x16x128xf32> to vector<16x128xf32>
    %166 = vector.extract_strided_slice %64 {offsets = [21, 0, 0], sizes = [1, 16, 128], strides = [1, 1, 1]} : vector<24x16x128xf32> to vector<1x16x128xf32>
    %167 = vector.shape_cast %166 : vector<1x16x128xf32> to vector<16x128xf32>
    %168 = arith.maximumf %165, %167 : vector<16x128xf32>
    %169 = arith.truncf %168 : vector<16x128xf32> to vector<16x128xbf16>
    %c10 = arith.constant 10 : index
    %c0_81 = arith.constant 0 : index
    %c0_82 = arith.constant 0 : index
    %170 = vector.load %arg7[%c10, %c0_81, %c0_82] : memref<11x128x128xbf16, #tpu.memory_space<vmem>>, vector<1x128x128xbf16>
    %171 = vector.shape_cast %170 : vector<1x128x128xbf16> to vector<128x128xbf16>
    %cst_83 = arith.constant dense<0.000000e+00> : vector<16x128xf32>
    %172 = tpu.matmul %169, %171, %cst_83 {dimension_numbers = #tpu.dot_dimension_numbers<[1], [0], [0], [1], [0, 0, 1, 1], [], []>} : vector<16x128xbf16>, vector<128x128xbf16>, vector<16x128xf32> -> vector<16x128xf32>
    %173 = arith.addf %163, %172 : vector<16x128xf32>
    %c0_84 = arith.constant 0 : index
    %c0_85 = arith.constant 0 : index
    %174 = vector.load %arg8[%c0_84, %c0_85] : memref<1x128xf32, #tpu.memory_space<vmem>>, vector<1x128xf32>
    %175 = vector.broadcast %174 : vector<1x128xf32> to vector<16x128xf32>
    %176 = arith.addf %173, %175 : vector<16x128xf32>
    %cst_86 = arith.constant 0.000000e+00 : f32
    %177 = vector.broadcast %cst_86 : f32 to vector<16x128xf32>
    %178 = arith.maximumf %176, %177 : vector<16x128xf32>
    %179 = arith.truncf %178 : vector<16x128xf32> to vector<16x128xbf16>
    %c0_87 = arith.constant 0 : index
    %c0_88 = arith.constant 0 : index
    %180 = vector.load %arg9[%c0_87, %c0_88] : memref<128x256xbf16, #tpu.memory_space<vmem>>, vector<128x256xbf16>
    %cst_89 = arith.constant dense<0.000000e+00> : vector<16x256xf32>
    %181 = tpu.matmul %179, %180, %cst_89 {dimension_numbers = #tpu.dot_dimension_numbers<[1], [0], [0], [1], [0, 0, 1, 1], [], []>} : vector<16x128xbf16>, vector<128x256xbf16>, vector<16x256xf32> -> vector<16x256xf32>
    %c0_90 = arith.constant 0 : index
    %c0_91 = arith.constant 0 : index
    %182 = vector.load %arg10[%c0_90, %c0_91] : memref<1x256xf32, #tpu.memory_space<vmem>>, vector<1x256xf32>
    %183 = vector.broadcast %182 : vector<1x256xf32> to vector<16x256xf32>
    %184 = arith.addf %181, %183 : vector<16x256xf32>
    %185 = math.cos %184 : vector<16x256xf32>
    %186 = math.sin %181 : vector<16x256xf32>
    %187 = arith.mulf %185, %186 : vector<16x256xf32>
    %c0_92 = arith.constant 0 : index
    %c0_93 = arith.constant 0 : index
    %188 = vector.load %arg2[%c0_92, %c0_93] : memref<16x128xbf16, #tpu.memory_space<vmem>>, vector<16x128xbf16>
    %c0_94 = arith.constant 0 : index
    %c0_95 = arith.constant 0 : index
    %189 = vector.load %arg11[%c0_94, %c0_95] : memref<128x256xbf16, #tpu.memory_space<vmem>>, vector<128x256xbf16>
    %cst_96 = arith.constant dense<0.000000e+00> : vector<16x256xf32>
    %190 = tpu.matmul %188, %189, %cst_96 {dimension_numbers = #tpu.dot_dimension_numbers<[1], [0], [0], [1], [0, 0, 1, 1], [], []>} : vector<16x128xbf16>, vector<128x256xbf16>, vector<16x256xf32> -> vector<16x256xf32>
    %c0_97 = arith.constant 0 : index
    %c0_98 = arith.constant 0 : index
    %191 = vector.load %arg12[%c0_97, %c0_98] : memref<1x256xf32, #tpu.memory_space<vmem>>, vector<1x256xf32>
    %192 = vector.broadcast %191 : vector<1x256xf32> to vector<16x256xf32>
    %193 = arith.addf %190, %192 : vector<16x256xf32>
    %194 = math.cos %193 : vector<16x256xf32>
    %195 = math.sin %190 : vector<16x256xf32>
    %196 = arith.mulf %194, %195 : vector<16x256xf32>
    %197 = arith.addf %187, %196 : vector<16x256xf32>
    %198 = arith.mulf %187, %196 : vector<16x256xf32>
    %199 = arith.addf %197, %198 : vector<16x256xf32>
    %cst_99 = arith.constant 0.000000e+00 : f32
    %200 = vector.broadcast %cst_99 : f32 to vector<16x256xf32>
    %201 = arith.cmpf ogt, %199, %200 : vector<16x256xf32>
    %cst_100 = arith.constant 1.000000e+00 : f32
    %cst_101 = arith.constant -1.000000e+00 : f32
    %202 = vector.broadcast %cst_100 : f32 to vector<16x256xf32>
    %203 = vector.broadcast %cst_101 : f32 to vector<16x256xf32>
    %204 = arith.select %201, %202, %203 : vector<16x256xi1>, vector<16x256xf32>
    %205 = arith.truncf %204 : vector<16x256xf32> to vector<16x256xbf16>
    %c0_102 = arith.constant 0 : index
    %c0_103 = arith.constant 0 : index
    %206 = vector.load %arg13[%c0_102, %c0_103] : memref<16x256xbf16, #tpu.memory_space<vmem>>, vector<16x256xbf16>
    tpu.vector_store %arg13[%c0_102, %c0_103], %205 {strides = array<i32>} : memref<16x256xbf16, #tpu.memory_space<vmem>>, vector<16x256xbf16>,
    return
  }
  func.func @transform_0(%arg0: i32) -> (i32, i32, i32) {
    %c0_i32 = arith.constant 0 : i32
    %c0_i32_0 = arith.constant 0 : i32
    %c0_i32_1 = arith.constant 0 : i32
    return %c0_i32, %arg0, %c0_i32_0 : i32, i32, i32
  }
  func.func @transform_1(%arg0: i32) -> (i32, i32) {
    %c0_i32 = arith.constant 0 : i32
    %c0_i32_0 = arith.constant 0 : i32
    return %arg0, %c0_i32 : i32, i32
  }
  func.func @transform_2(%arg0: i32) -> (i32, i32) {
    %c0_i32 = arith.constant 0 : i32
    %c0_i32_0 = arith.constant 0 : i32
    %c0_i32_1 = arith.constant 0 : i32
    return %c0_i32, %c0_i32_0 : i32, i32
  }
  func.func @transform_3(%arg0: i32) -> (i32, i32) {
    %c0_i32 = arith.constant 0 : i32
    %c0_i32_0 = arith.constant 0 : i32
    %c0_i32_1 = arith.constant 0 : i32
    return %c0_i32, %c0_i32_0 : i32, i32
  }
  func.func @transform_4(%arg0: i32) -> (i32, i32, i32) {
    %c0_i32 = arith.constant 0 : i32
    %c0_i32_0 = arith.constant 0 : i32
    %c0_i32_1 = arith.constant 0 : i32
    %c0_i32_2 = arith.constant 0 : i32
    return %c0_i32, %c0_i32_0, %c0_i32_1 : i32, i32, i32
  }
  func.func @transform_5(%arg0: i32) -> (i32, i32) {
    %c0_i32 = arith.constant 0 : i32
    %c0_i32_0 = arith.constant 0 : i32
    %c0_i32_1 = arith.constant 0 : i32
    return %c0_i32, %c0_i32_0 : i32, i32
  }
  func.func @transform_6(%arg0: i32) -> (i32, i32, i32) {
    %c0_i32 = arith.constant 0 : i32
    %c0_i32_0 = arith.constant 0 : i32
    %c0_i32_1 = arith.constant 0 : i32
    %c0_i32_2 = arith.constant 0 : i32
    return %c0_i32, %c0_i32_0, %c0_i32_1 : i32, i32, i32
  }
  func.func @transform_7(%arg0: i32) -> (i32, i32) {
    %c0_i32 = arith.constant 0 : i32
    %c0_i32_0 = arith.constant 0 : i32
    %c0_i32_1 = arith.constant 0 : i32
    return %c0_i32, %c0_i32_0 : i32, i32
  }
  func.func @transform_8(%arg0: i32) -> (i32, i32) {
    %c0_i32 = arith.constant 0 : i32
    %c0_i32_0 = arith.constant 0 : i32
    %c0_i32_1 = arith.constant 0 : i32
    return %c0_i32, %c0_i32_0 : i32, i32
  }
  func.func @transform_9(%arg0: i32) -> (i32, i32) {
    %c0_i32 = arith.constant 0 : i32
    %c0_i32_0 = arith.constant 0 : i32
    %c0_i32_1 = arith.constant 0 : i32
    return %c0_i32, %c0_i32_0 : i32, i32
  }
  func.func @transform_10(%arg0: i32) -> (i32, i32) {
    %c0_i32 = arith.constant 0 : i32
    %c0_i32_0 = arith.constant 0 : i32
    %c0_i32_1 = arith.constant 0 : i32
    return %c0_i32, %c0_i32_0 : i32, i32
  }
  func.func @transform_11(%arg0: i32) -> (i32, i32) {
    %c0_i32 = arith.constant 0 : i32
    %c0_i32_0 = arith.constant 0 : i32
    %c0_i32_1 = arith.constant 0 : i32
    return %c0_i32, %c0_i32_0 : i32, i32
  }
  func.func @transform_12(%arg0: i32) -> (i32, i32) {
    %c0_i32 = arith.constant 0 : i32
    %c0_i32_0 = arith.constant 0 : i32
    return %arg0, %c0_i32 : i32, i32
  }
}

</mosaic_0001>

<bundles_post_ra>
// kernel: hdc_cnn_encoder_batch.1
= control target key start
LH: loop header
LB: loop body
LE: loop exit
PB: predicated region body
PF: predicated region fallthrough
CT: control target
= control target key end

     0   :  { %s15308_s0 = inlined_call_operand.vmem [shape: bf16[40,32,40], index: 0, kind: input, shape index: {}]   ;;  %s15309_s1 = inlined_call_operand.vmem [shape: bf16[32,128], index: 1, kind: input, shape index: {}]   ;;  %s15310_s2 = inlined_call_operand.vmem [shape: bf16[40,64], index: 2, kind: input, shape index: {}]   ;;  %s15311_s3 = inlined_call_operand.vmem [shape: f32[1,64], index: 3, kind: input, shape index: {}]   ;;  %s15312_s4 = inlined_call_operand.vmem [shape: bf16[10,64,128], index: 4, kind: input, shape index: {}]   ;;  %s15313_s5 = inlined_call_operand.vmem [shape: f32[1,128], index: 5, kind: input, shape index: {}]   ;;  %s15314_s6 = inlined_call_operand.vmem [shape: bf16[11,128,128], index: 6, kind: input, shape index: {}]   ;;  %s15315_s7 = inlined_call_operand.vmem [shape: f32[1,128], index: 7, kind: input, shape index: {}]   ;;  %s15316_s8 = inlined_call_operand.vmem [shape: bf16[128,256], index: 8, kind: input, shape index: {}]   ;;  %s15317_s9 = inlined_call_operand.vmem [shape: f32[1,256], index: 9, kind: input, shape index: {}]   ;;  %s15318_s10 = inlined_call_operand.vmem [shape: bf16[128,256], index: 10, kind: input, shape index: {}]   ;;  %s15319_s11 = inlined_call_operand.vmem [shape: f32[1,256], index: 11, kind: input, shape index: {}]   ;;  %s15320_s12 = inlined_call_operand.hbm [shape: bf16[32,256], index: 12, kind: output, shape index: {}]  }
   0x1   :  { %15420 = sst [smem:[#allocation165_spill]] %s15308_s0 }
   0x2   :  { %15421 = sst [smem:[#allocation166_spill]] %s15310_s2 }
   0x3   :  { %15422 = sst [smem:[#allocation167_spill]] %s15311_s3 }
   0x4   :  { %17 = vsyncpa [#allocation4], 0 }
   0x5   :  { %19 = vsyncpa [#allocation4 + $0x1], 0  ;;  %s10728_s21 = smov 0   ;;  %s10730_s22 = smov 0  }
   0x6   :  { %s10732_s23 = smov 0   ;;  %s10734_s24 = smov 0  }
   0x7 LB: > { %s10749_s25 = sadd.s32 4294967295, %s10648_s24   ;;  %s8092_s26 = sadd.s32 4294967294, %s10648_s24   ;;  %s10648_s24 = sphi %s10734_s24, %s16075_s24   ;;  %s10644_s23 = sphi %s10732_s23, %s16074_s23   ;;  %s10640_s22 = sphi %s10730_s22, %s16073_s22   ;;  %s10636_s21 = sphi %s10728_s21, %s16072_s21  }
   0x8   : > { %s10753_s27 = sadd.s32 1, %s10648_s24   ;;  %s32_s28 = sadd.s32 1, %s10644_s23 }
   0x9   : > { %s29_s29 = ssub.s32 %s10648_s24, %s10753_s27  ;;  %p39_p0 = scmp.ne.s32.totalorder %s10644_s23, %s10640_s22 }
   0xa   : > { %p30_p1 = scmp.eq.s32.totalorder %s29_s29, 0  ;;  %p40_p2 = scmp.eq.s32.totalorder %s10648_s24, 0 }
   0xb   : > { %p305_p3 = scmp.eq.s32.totalorder %s10749_s25, 1  ;;  %p310_p4 = scmp.ne.s32.totalorder %s10640_s22, %s10636_s21 }
   0xc   : > { %s10765_s30 = scalar_select %p30_p1, %s10644_s23, %s32_s28  }
   0xd   : > { %p41_p5 = por %p40_p2, %p39_p0  ;;  %p10767_p6 = por %p305_p3, %p39_p0 }
   0xe   : > { %p311_p7 = scmp.eq.s32.totalorder %s8092_s26, 1  ;;  %p8094_p9 = scmp.ge.s32.totalorder %s10648_s24, 2 }
  0x10   : > { %p10771_p8 = por %p311_p7, %p310_p4  ;;  %357 = sbr.rel (%p8094_p9) target bundleno = 51 (0x33), region = 56 }
  0x15   : > { %360 = sbr.rel (!%p41_p5) target bundleno = 51 (0x33), region = 60  ;;  %s362_s15 = sand.u32 (%p41_p5), 1, %s10644_s23  }
  0x16   : > { %s8892_s16 = sshll.u32 (%p41_p5), %s10648_s24, 3  ;;  %s10186_s17 = smul.u32 (%p41_p5), 320, %s362_s15 }
  0x17   : > { %s15425_s0 = sld [smem:[#allocation165_spill]] (%p41_p5) }
  0x18   : > { %s10791_s26 = scalar_lea.vmem (%p41_p5), [#allocation2], %s10186_s17 }
  0x1d   : > { %s10783_s20 = scalar_lea.vmem %s15425_s0, %s8892_s16 }
  0x1e   : > { %v384_v0 = vld [vmem:[%s10783_s20] sm:$0xff]   ;;  %v388_v1 = vld [vmem:[%s10783_s20 + $0x10] sm:$0xff]  }
  0x1f   : > { %v392_v2 = vld [vmem:[%s10783_s20 + $0x20] sm:$0xff]   ;;  %v396_v3 = vld [vmem:[%s10783_s20 + $0x30] sm:$0xff]   ;;  %385 = vst [vmem:[%s10791_s26] sm:$0xff] %v384_v0   ;;  %389 = vst [vmem:[%s10791_s26 + $0x8] sm:$0xff] %v388_v1  }
  0x20   : > { %v400_v4 = vld [vmem:[%s10783_s20 + $0x40] sm:$0xff]   ;;  %v404_v5 = vld [vmem:[%s10783_s20 + $0x50] sm:$0xff]   ;;  %393 = vst [vmem:[%s10791_s26 + $0x10] sm:$0xff] %v392_v2   ;;  %397 = vst [vmem:[%s10791_s26 + $0x18] sm:$0xff] %v396_v3  }
  0x21   : > { %401 = vst [vmem:[%s10791_s26 + $0x20] sm:$0xff] %v400_v4   ;;  %405 = vst [vmem:[%s10791_s26 + $0x28] sm:$0xff] %v404_v5   ;;  %v408_v6 = vld [vmem:[%s10783_s20 + $0x60] sm:$0xff]   ;;  %v412_v7 = vld [vmem:[%s10783_s20 + $0x70] sm:$0xff]  }
  0x22   : > { %v416_v8 = vld [vmem:[%s10783_s20 + $0x80] sm:$0xff]   ;;  %409 = vst [vmem:[%s10791_s26 + $0x30] sm:$0xff] %v408_v6   ;;  %413 = vst [vmem:[%s10791_s26 + $0x38] sm:$0xff] %v412_v7   ;;  %v420_v9 = vld [vmem:[%s10783_s20 + $0x90] sm:$0xff]  }
  0x23   : > { %417 = vst [vmem:[%s10791_s26 + $0x40] sm:$0xff] %v416_v8   ;;  %v424_v10 = vld [vmem:[%s10783_s20 + $0xa0] sm:$0xff]   ;;  %v428_v11 = vld [vmem:[%s10783_s20 + $0xb0] sm:$0xff]   ;;  %421 = vst [vmem:[%s10791_s26 + $0x48] sm:$0xff] %v420_v9  }
  0x24   : > { %425 = vst [vmem:[%s10791_s26 + $0x50] sm:$0xff] %v424_v10   ;;  %429 = vst [vmem:[%s10791_s26 + $0x58] sm:$0xff] %v428_v11   ;;  %v432_v12 = vld [vmem:[%s10783_s20 + $0xc0] sm:$0xff]   ;;  %v436_v13 = vld [vmem:[%s10783_s20 + $0xd0] sm:$0xff]  }
  0x25   : > { %v440_v14 = vld [vmem:[%s10783_s20 + $0xe0] sm:$0xff]   ;;  %433 = vst [vmem:[%s10791_s26 + $0x60] sm:$0xff] %v432_v12   ;;  %437 = vst [vmem:[%s10791_s26 + $0x68] sm:$0xff] %v436_v13   ;;  %v444_v15 = vld [vmem:[%s10783_s20 + $0xf0] sm:$0xff]  }
  0x26   : > { %441 = vst [vmem:[%s10791_s26 + $0x70] sm:$0xff] %v440_v14   ;;  %v448_v16 = vld [vmem:[%s10783_s20 + $0x100] sm:$0xff]   ;;  %v452_v17 = vld [vmem:[%s10783_s20 + $0x110] sm:$0xff]   ;;  %445 = vst [vmem:[%s10791_s26 + $0x78] sm:$0xff] %v444_v15  }
  0x27   : > { %449 = vst [vmem:[%s10791_s26 + $0x80] sm:$0xff] %v448_v16   ;;  %453 = vst [vmem:[%s10791_s26 + $0x88] sm:$0xff] %v452_v17   ;;  %v456_v18 = vld [vmem:[%s10783_s20 + $0x120] sm:$0xff]   ;;  %v460_v19 = vld [vmem:[%s10783_s20 + $0x130] sm:$0xff]  }
  0x28   : > { %v464_v20 = vld [vmem:[%s10783_s20 + $0x140] sm:$0xff]   ;;  %457 = vst [vmem:[%s10791_s26 + $0x90] sm:$0xff] %v456_v18   ;;  %461 = vst [vmem:[%s10791_s26 + $0x98] sm:$0xff] %v460_v19   ;;  %v468_v21 = vld [vmem:[%s10783_s20 + $0x150] sm:$0xff]  }
  0x29   : > { %465 = vst [vmem:[%s10791_s26 + $0xa0] sm:$0xff] %v464_v20   ;;  %v472_v22 = vld [vmem:[%s10783_s20 + $0x160] sm:$0xff]   ;;  %v476_v23 = vld [vmem:[%s10783_s20 + $0x170] sm:$0xff]   ;;  %469 = vst [vmem:[%s10791_s26 + $0xa8] sm:$0xff] %v468_v21  }
  0x2a   : > { %473 = vst [vmem:[%s10791_s26 + $0xb0] sm:$0xff] %v472_v22   ;;  %477 = vst [vmem:[%s10791_s26 + $0xb8] sm:$0xff] %v476_v23   ;;  %v480_v24 = vld [vmem:[%s10783_s20 + $0x180] sm:$0xff]   ;;  %v484_v25 = vld [vmem:[%s10783_s20 + $0x190] sm:$0xff]  }
  0x2b   : > { %v488_v26 = vld [vmem:[%s10783_s20 + $0x1a0] sm:$0xff]   ;;  %481 = vst [vmem:[%s10791_s26 + $0xc0] sm:$0xff] %v480_v24   ;;  %485 = vst [vmem:[%s10791_s26 + $0xc8] sm:$0xff] %v484_v25   ;;  %v492_v27 = vld [vmem:[%s10783_s20 + $0x1b0] sm:$0xff]  }
  0x2c   : > { %489 = vst [vmem:[%s10791_s26 + $0xd0] sm:$0xff] %v488_v26   ;;  %v496_v28 = vld [vmem:[%s10783_s20 + $0x1c0] sm:$0xff]   ;;  %v500_v29 = vld [vmem:[%s10783_s20 + $0x1d0] sm:$0xff]   ;;  %493 = vst [vmem:[%s10791_s26 + $0xd8] sm:$0xff] %v492_v27  }
  0x2d   : > { %497 = vst [vmem:[%s10791_s26 + $0xe0] sm:$0xff] %v496_v28   ;;  %501 = vst [vmem:[%s10791_s26 + $0xe8] sm:$0xff] %v500_v29   ;;  %v504_v30 = vld [vmem:[%s10783_s20 + $0x1e0] sm:$0xff]   ;;  %v508_v31 = vld [vmem:[%s10783_s20 + $0x1f0] sm:$0xff]  }
  0x2e   : > { %v512_v32 = vld [vmem:[%s10783_s20 + $0x200] sm:$0xff]   ;;  %505 = vst [vmem:[%s10791_s26 + $0xf0] sm:$0xff] %v504_v30   ;;  %509 = vst [vmem:[%s10791_s26 + $0xf8] sm:$0xff] %v508_v31   ;;  %v516_v33 = vld [vmem:[%s10783_s20 + $0x210] sm:$0xff]  }
  0x2f   : > { %513 = vst [vmem:[%s10791_s26 + $0x100] sm:$0xff] %v512_v32   ;;  %v520_v34 = vld [vmem:[%s10783_s20 + $0x220] sm:$0xff]   ;;  %v524_v35 = vld [vmem:[%s10783_s20 + $0x230] sm:$0xff]   ;;  %517 = vst [vmem:[%s10791_s26 + $0x108] sm:$0xff] %v516_v33  }
  0x30   : > { %521 = vst [vmem:[%s10791_s26 + $0x110] sm:$0xff] %v520_v34   ;;  %525 = vst [vmem:[%s10791_s26 + $0x118] sm:$0xff] %v524_v35   ;;  %v528_v36 = vld [vmem:[%s10783_s20 + $0x240] sm:$0xff]   ;;  %v532_v37 = vld [vmem:[%s10783_s20 + $0x250] sm:$0xff]  }
  0x31   : > { %v536_v38 = vld [vmem:[%s10783_s20 + $0x260] sm:$0xff]   ;;  %529 = vst [vmem:[%s10791_s26 + $0x120] sm:$0xff] %v528_v36   ;;  %533 = vst [vmem:[%s10791_s26 + $0x128] sm:$0xff] %v532_v37   ;;  %v540_v39 = vld [vmem:[%s10783_s20 + $0x270] sm:$0xff]  }
  0x32   : > { %537 = vst [vmem:[%s10791_s26 + $0x130] sm:$0xff] %v536_v38   ;;  %541 = vst [vmem:[%s10791_s26 + $0x138] sm:$0xff] %v540_v39  }
  0x33 PF: > { %p8097_p10 = scmp.ge.s32.totalorder %s10648_s24, 1  ;;  %p735_p11 = scmp.lt.s32.totalorder %s10648_s24, 3 }
  0x35   : > { %p736_p12 = pnand %p8097_p10, %p735_p11 }
  0x37   : > { %739 = sbr.rel (%p736_p12) target bundleno = 1827 (0x723), region = 105 }
  0x3c   : > { %s15426_s2 = sld [smem:[#allocation166_spill]]  ;;  %vm1225_vm0 = vcmask 1043456   ;;  %s10879_s19 = sand.u32 1, %s10640_s22   ;;  %vm1104_vm1 = vcmask 326656   ;;  %v10342_v0 = vld [vmem:[%s15312_s4 + $0x38] sm:$0xff]   ;;  %v10346_v3 = vld [vmem:[%s15312_s4 + $0x30] sm:$0xff]  }
  0x3d   : > { %s10187_s20 = smul.u32 320, %s10879_s19  ;;  %v10345_v2 = vld [vmem:[%s15312_s4 + $0x58] sm:$0xff]   ;;  %9405 = vmatprep.subr.bf16.mxu1 %v10342_v0  ;;  %v10347_v4 = vld [vmem:[%s15312_s4 + $0x50] sm:$0xff]   ;;  %v10348_v6 = vld [vmem:[%s15312_s4 + $0x28] sm:$0xff]   ;;  %s15427_s3 = sld [smem:[#allocation167_spill]]  ;;  %vm1708_vm2 = vcmask 523264  }
  0x3e   : > { %9406 = vmatpush3.bf16.msra.mxu1 %v10342_v0  ;;  %v10351_v8 = vld [vmem:[%s15312_s4 + $0x48] sm:$0xff]   ;;  %v10352_v9 = vld [vmem:[%s15312_s4 + $0x20] sm:$0xff]   ;;  %v10961_v13 = vld [vmem:[%s15312_s4 + $0x18] sm:$0xff]   ;;  %vm10651_vm3 = vmmov 0   ;;  %s8099_s28 = sshll.u32 %s10749_s25, 1  ;;  %s8896_s18 = sshll.u32 %s10749_s25, 8 }
  0x3f   : > { %s10882_s26 = scalar_lea.vmem [#allocation2], %s10187_s20  ;;  %9407 = vmatprep.subr.bf16.mxu1 %v10346_v3  ;;  %v10353_v10 = vld [vmem:[%s15312_s4 + $0x40] sm:$0xff]   ;;  %v10358_v29 = vld [vmem:[%s15312_s4 + $0x98] sm:$0xff]   ;;  %v10356_v0 = vld [vmem:[%s15312_s4 + $0x8] sm:$0xff]   ;;  %p790_p13 = scmp.lt.s32.totalorder %s8099_s28, 3 }
  0x40   : > { %v10306_v44 = vld [vmem:[%s10882_s26] sm:$0xff]   ;;  %v10307_v45 = vld [vmem:[%s10882_s26 + $0x8] sm:$0xff]   ;;  %v10308_v46 = vld [vmem:[%s10882_s26 + $0x10] sm:$0xff]   ;;  %s7998_s15 = scalar_lea.sflag [#allocation4], %s10879_s19  ;;  %s10660_s16 = smov [#allocation3]  }
  0x41   : > { %9325 = vmatprep.mubr.msk.bf16.mxu0 %vm1104_vm1, %v10306_v44  ;;  %v10309_v47 = vld [vmem:[%s10882_s26 + $0x18] sm:$0xff]   ;;  %v10310_v48 = vld [vmem:[%s10882_s26 + $0x20] sm:$0xff]   ;;  %v10311_v49 = vld [vmem:[%s10882_s26 + $0x28] sm:$0xff]   ;;  %s16077_s28 = smov (!%p790_p13, %s8099_s28), 3  ;;  %s10592_s0 = sshll.u32 %s10660_s16, 4  ;;  %s10593_s0 = int_to_ptr.vmem [resolvable:$false] %s10592_s0 }
  0x42   : > { %v10303_v40 = vld [vmem:[%s15426_s2 + $0x10] ss:$0 sps:$4 sm:$0xff]   ;;  %v10304_v41 = vld [vmem:[%s15426_s2 + $0x8] sm:$0xff]   ;;  %v10305_v43 = vld [vmem:[%s15426_s2] sm:$0xff]   ;;  %9408 = vmatpush3.bf16.msra.mxu1 %v10346_v3  ;;  %s8100_s29 = sshll.u32 %s16077_s28, 2  ;;  %s10594_s17 = scalar_lea.vmem %s10593_s0, 512 }
  0x43   : > { %10185 = vmatprep.subr.msk.bf16.mxu0 %vm1225_vm0, %v10303_v40  ;;  %v1227_v42 = vsel %vm1225_vm0, %v10303_v40, 0  ;;  %v10312_v50 = vld [vmem:[%s10882_s26 + $0x30] sm:$0xff]   ;;  %v10313_v51 = vld [vmem:[%s10882_s26 + $0x38] sm:$0xff]   ;;  %v10314_v52 = vld [vmem:[%s10882_s26 + $0x40] sm:$0xff]   ;;  %9409 = vmatprep.subr.bf16.mxu1 %v10348_v6 }
  0x44   : > { %9320 = vmatpush3.bf16.msra.mxu0 %v1227_v42  ;;  %v10315_v53 = vld [vmem:[%s10882_s26 + $0x48] sm:$0xff]   ;;  %v10316_v54 = vld [vmem:[%s10882_s26 + $0x50] sm:$0xff]   ;;  %v10317_v55 = vld [vmem:[%s10882_s26 + $0x58] sm:$0xff]  }
  0x45   : > { %9321 = vmatprep.subr.bf16.mxu0 %v10304_v41  ;;  %v10318_v56 = vld [vmem:[%s10882_s26 + $0x60] sm:$0xff]   ;;  %v10319_v57 = vld [vmem:[%s10882_s26 + $0x68] sm:$0xff]   ;;  %v10320_v58 = vld [vmem:[%s10882_s26 + $0x70] sm:$0xff]  }
  0x46   : > { %v10321_v59 = vld [vmem:[%s10882_s26 + $0x78] sm:$0xff]   ;;  %v10322_v60 = vld [vmem:[%s10882_s26 + $0x80] sm:$0xff]   ;;  %v10323_v61 = vld [vmem:[%s10882_s26 + $0x88] sm:$0xff]   ;;  %9410 = vmatpush3.bf16.msra.mxu1 %v10348_v6 }
  0x47   : > { %v10324_v62 = vld [vmem:[%s10882_s26 + $0x90] sm:$0xff]   ;;  %v10325_v63 = vld [vmem:[%s10882_s26 + $0x98] sm:$0xff]   ;;  %v10326_v1 = vld [vmem:[%s10882_s26 + $0xa0] sm:$0xff]   ;;  %9411 = vmatprep.subr.bf16.mxu1 %v10352_v9 }
  0x48   : > { %9322 = vmatpush3.bf16.msra.mxu0 %v10304_v41  ;;  %v10327_v5 = vld [vmem:[%s10882_s26 + $0xa8] sm:$0xff]   ;;  %v10328_v7 = vld [vmem:[%s10882_s26 + $0xb0] sm:$0xff]   ;;  %v10329_v11 = vld [vmem:[%s10882_s26 + $0xb8] sm:$0xff]  }
  0x49   : > { %9323 = vmatprep.subr.bf16.mxu0 %v10305_v43  ;;  %v10330_v12 = vld [vmem:[%s10882_s26 + $0xc0] sm:$0xff]   ;;  %v10331_v14 = vld [vmem:[%s10882_s26 + $0xc8] sm:$0xff]   ;;  %v10332_v15 = vld [vmem:[%s10882_s26 + $0xd0] sm:$0xff]  }
  0x4a   : > { %9412 = vmatpush3.bf16.msra.mxu1 %v10352_v9  ;;  %v10333_v16 = vld [vmem:[%s10882_s26 + $0xd8] sm:$0xff]   ;;  %v10334_v17 = vld [vmem:[%s10882_s26 + $0xe0] sm:$0xff]   ;;  %v10335_v18 = vld [vmem:[%s10882_s26 + $0xe8] sm:$0xff]  }
  0x4b   : > { %9461 = vmatprep.subr.bf16.mxu1 %v10961_v13  ;;  %v10336_v19 = vld [vmem:[%s10882_s26 + $0xf0] sm:$0xff]   ;;  %v10337_v20 = vld [vmem:[%s10882_s26 + $0xf8] sm:$0xff]   ;;  %v10338_v21 = vld [vmem:[%s10882_s26 + $0x100] sm:$0xff]  }
  0x4c   : > { %9324 = vmatpush3.bf16.msra.mxu0 %v10305_v43  ;;  %v10339_v22 = vld [vmem:[%s10882_s26 + $0x108] sm:$0xff]   ;;  %v10340_v23 = vld [vmem:[%s10882_s26 + $0x110] sm:$0xff]   ;;  %v10341_v24 = vld [vmem:[%s10882_s26 + $0x118] sm:$0xff]  }
  0x4d   : > { %9517 = vmatprep.subr.bf16.mxu0 %v10345_v2  ;;  %v10343_v25 = vld [vmem:[%s10882_s26 + $0x120] sm:$0xff]   ;;  %v10344_v26 = vld [vmem:[%s10882_s26 + $0x128] sm:$0xff]   ;;  %v10349_v27 = vld [vmem:[%s10882_s26 + $0x130] sm:$0xff]  }
  0x4e   : > { %v10350_v28 = vld [vmem:[%s10882_s26 + $0x138] sm:$0xff]   ;;  %v11000_v31 = vld [vmem:[%s15427_s3] ss:$0 sm:$0xff] }
  0x4f   : > { %9326 = vmatmul.mubr.msk.bf16.vlgmr.msra.gmra.mxu0 %vm1104_vm1, %v10307_v45 }
  0x50   : > { %9329 = vmatprep.mubr.msk.bf16.mxu0 %vm1104_vm1, %v10308_v46  ;;  %9518 = vmatpush3.bf16.msra.mxu0 %v10345_v2 }
  0x51   : > { %9519 = vmatprep.subr.bf16.mxu0 %v10347_v4 }
  0x54   : > { %9520 = vmatpush3.bf16.msra.mxu0 %v10347_v4 }
  0x55   : > { %9521 = vmatprep.subr.bf16.mxu0 %v10351_v8 }
  0x57   : > { %9330 = vmatmul.mubr.msk.bf16.gmra.mxu0 %vm1104_vm1, %v10309_v47 }
  0x58   : > { %9333 = vmatprep.mubr.msk.bf16.mxu0 %vm1104_vm1, %v10310_v48  ;;  %9522 = vmatpush3.bf16.msra.mxu0 %v10351_v8  ;;  %v10357_v8 = vld [vmem:[%s15312_s4] sm:$0xff]  }
  0x59   : > { %9523 = vmatprep.subr.bf16.mxu0 %v10353_v10 }
  0x5c   : > { %9524 = vmatpush3.bf16.msra.mxu0 %v10353_v10 }
  0x5d   : > { %9629 = vmatprep.subr.bf16.mxu0 %v10358_v29 }
  0x5f   : > { %9334 = vmatmul.mubr.msk.bf16.gmra.mxu0 %vm1104_vm1, %v10311_v49 }
  0x60   : > { %9337 = vmatprep.mubr.msk.bf16.mxu0 %vm1104_vm1, %v10312_v50 }
  0x67   : > { %9338 = vmatmul.mubr.msk.bf16.gmra.mxu0 %vm1104_vm1, %v10313_v51 }
  0x68   : > { %9341 = vmatprep.mubr.msk.bf16.mxu0 %vm1104_vm1, %v10314_v52 }
  0x6f   : > { %9342 = vmatmul.mubr.msk.bf16.gmra.mxu0 %vm1104_vm1, %v10315_v53 }
  0x70   : > { %9345 = vmatprep.mubr.msk.bf16.mxu0 %vm1104_vm1, %v10316_v54 }
  0x77   : > { %9346 = vmatmul.mubr.msk.bf16.gmra.mxu0 %vm1104_vm1, %v10317_v55  ;;  %v10355_v55 = vld [vmem:[%s15312_s4 + $0x10] sm:$0xff]  }
  0x78   : > { %9349 = vmatprep.mubr.msk.bf16.mxu0 %vm1104_vm1, %v10318_v56 }
  0x7f   : > { %9350 = vmatmul.mubr.msk.bf16.gmra.mxu0 %vm1104_vm1, %v10319_v57 }
  0x80   : > { %9353 = vmatprep.mubr.msk.bf16.mxu0 %vm1104_vm1, %v10320_v58 }
  0x87   : > { %9354 = vmatmul.mubr.msk.bf16.gmra.mxu0 %vm1104_vm1, %v10321_v59 }
  0x88   : > { %9357 = vmatprep.mubr.msk.bf16.mxu0 %vm1104_vm1, %v10322_v60  ;;  %v10359_v60 = vld [vmem:[%s15312_s4 + $0x90] sm:$0xff]  }
  0x8f   : > { %9358 = vmatmul.mubr.msk.bf16.gmra.mxu0 %vm1104_vm1, %v10323_v61 }
  0x90   : > { %9361 = vmatprep.mubr.msk.bf16.mxu0 %vm1104_vm1, %v10324_v62 }
  0x97   : > { %9362 = vmatmul.mubr.msk.bf16.gmra.mxu0 %vm1104_vm1, %v10325_v63 }
  0x98   : > { %9365 = vmatprep.mubr.msk.bf16.mxu0 %vm1104_vm1, %v10326_v1 }
  0x9f   : > { %9366 = vmatmul.mubr.msk.bf16.gmra.mxu0 %vm1104_vm1, %v10327_v5 }
  0xa0   : > { %9369 = vmatprep.mubr.msk.bf16.mxu0 %vm1104_vm1, %v10328_v7 }
  0xa7   : > { %9370 = vmatmul.mubr.msk.bf16.gmra.mxu0 %vm1104_vm1, %v10329_v11  ;;  %v10360_v11 = vld [vmem:[%s15312_s4 + $0x88] sm:$0xff]  }
  0xa8   : > { %9373 = vmatprep.mubr.msk.bf16.mxu0 %vm1104_vm1, %v10330_v12 }
  0xaf   : > { %9374 = vmatmul.mubr.msk.bf16.gmra.mxu0 %vm1104_vm1, %v10331_v14 }
  0xb0   : > { %9377 = vmatprep.mubr.msk.bf16.mxu0 %vm1104_vm1, %v10332_v15 }
  0xb7   : > { %9378 = vmatmul.mubr.msk.bf16.gmra.mxu0 %vm1104_vm1, %v10333_v16  ;;  %v10361_v16 = vld [vmem:[%s15312_s4 + $0x80] sm:$0xff]  }
  0xb8   : > { %9381 = vmatprep.mubr.msk.bf16.mxu0 %vm1104_vm1, %v10334_v17 }
  0xbf   : > { %9382 = vmatmul.mubr.msk.bf16.gmra.mxu0 %vm1104_vm1, %v10335_v18  ;;  %v11070_v18 = vld [vmem:[%s15312_s4 + $0x78] sm:$0xff]  }
  0xc0   : > { %9385 = vmatprep.mubr.msk.bf16.mxu0 %vm1104_vm1, %v10336_v19 }
  0xc7   : > { %9386 = vmatmul.mubr.msk.bf16.gmra.mxu0 %vm1104_vm1, %v10337_v20 }
  0xc8   : > { %9389 = vmatprep.mubr.msk.bf16.mxu0 %vm1104_vm1, %v10338_v21 }
  0xcf   : > { %9390 = vmatmul.mubr.msk.bf16.gmra.mxu0 %vm1104_vm1, %v10339_v22 }
  0xd0   : > { %9393 = vmatprep.mubr.msk.bf16.mxu0 %vm1104_vm1, %v10340_v23 }
  0xd7   : > { %9394 = vmatmul.mubr.msk.bf16.gmra.mxu0 %vm1104_vm1, %v10341_v24 }
  0xd8   : > { %9397 = vmatprep.mubr.msk.bf16.mxu0 %vm1104_vm1, %v10343_v25 }
  0xdf   : > { %9398 = vmatmul.mubr.msk.bf16.gmra.mxu0 %vm1104_vm1, %v10344_v26 }
  0xe0   : > { %9401 = vmatprep.mubr.msk.bf16.mxu0 %vm1104_vm1, %v10349_v27 }
  0xe7   : > { %9402 = vmatmul.mubr.msk.bf16.gmra.mxu0 %vm1104_vm1, %v10350_v28 }
 0x10f   : > { %v9327_v30 = vpop.f32.mrf.mxu0 }
 0x110   : > { %v1272_v33 = vadd.f32 %v9327_v30, %v11000_v31 }
 0x111   : > { %v11002_v32 = vpop.f32.mrf.mxu0 }
 0x112   : > { %v1570_v37 = vmax.f32 %v1272_v33, 0.0 }
 0x113   : > { %v9328_v34 = vpop.f32.mrf.mxu0 }
 0x114   : > { %v1275_v35 = vadd.f32 %v9328_v34, %v11000_v31 }
 0x115   : > { %v11006_v36 = vpop.f32.mrf.mxu0 }
 0x116   : > { %v1571_v38 = vmax.f32 %v1275_v35, 0.0 }
 0x117   : > { %v9331_v39 = vpop.f32.mrf.mxu0 }
 0x118   : > { %v11008_v40 = vpack.c.bf16 %v1571_v38, %v1570_v37  ;;  %v1288_v45 = vadd.f32 %v9331_v39, %v11000_v31 }
 0x119   : > { %v1279_v41 = vpop.f32.mrf.mxu0 }
 0x11a   : > { %9413 = vmatprep.mubr.msk.bf16.mxu1 %vm1708_vm2, %v11008_v40  ;;  %v1280_v43 = vadd.f32 %v11000_v31, %v1279_v41  ;;  %v1574_v52 = vmax.f32 %v1288_v45, 0.0 }
 0x11b   : > { %v9332_v42 = vpop.f32.mrf.mxu0 }
 0x11c   : > { %v1291_v44 = vadd.f32 %v9332_v42, %v11000_v31  ;;  %v1572_v50 = vmax.f32 %v1280_v43, 0.0 }
 0x11d   : > { %v1282_v46 = vpop.f32.mrf.mxu0 }
 0x11e   : > { %v1283_v47 = vadd.f32 %v11000_v31, %v1282_v46  ;;  %v1575_v48 = vmax.f32 %v1291_v44, 0.0 }
 0x11f   : > { %v9335_v49 = vpop.f32.mrf.mxu0 }
 0x120   : > { %v1573_v51 = vmax.f32 %v1283_v47, 0.0  ;;  %v11021_v56 = vpack.c.bf16 %v1575_v48, %v1574_v52  ;;  %v1304_v61 = vadd.f32 %v9335_v49, %v11000_v31 }
 0x121   : > { %v1295_v53 = vpop.f32.mrf.mxu0 }
 0x122   : > { %v11016_v54 = vpack.c.bf16 %v1573_v51, %v1572_v50  ;;  %v1296_v58 = vadd.f32 %v11000_v31, %v1295_v53  ;;  %v1578_v5 = vmax.f32 %v1304_v61, 0.0 }
 0x123   : > { %v9336_v57 = vpop.f32.mrf.mxu0 }
 0x124   : > { %v1307_v59 = vadd.f32 %v9336_v57, %v11000_v31  ;;  %9414 = vmatmul.mubr.msk.bf16.vlgmr.msra.gmra.mxu1 %vm1708_vm2, %v11016_v54  ;;  %9525 = vmatprep.mubr.msk.bf16.mxu0 %vm1708_vm2, %v11016_v54  ;;  %v1576_v3 = vmax.f32 %v1296_v58, 0.0 }
 0x125   : > { %9462 = vmatpush3.bf16.msra.mxu1 %v10961_v13  ;;  %v1298_v62 = vpop.f32.mrf.mxu0  ;;  %9417 = vmatprep.mubr.msk.bf16.mxu1 %vm1708_vm2, %v11021_v56 }
 0x126   : > { %v1299_v63 = vadd.f32 %v11000_v31, %v1298_v62  ;;  %9526 = vmatmul.mubr.msk.bf16.vlgmr.msra.gmra.mxu0 %vm1708_vm2, %v11021_v56  ;;  %9463 = vmatprep.subr.bf16.mxu1 %v10355_v55  ;;  %v1579_v1 = vmax.f32 %v1307_v59, 0.0 }
 0x127   : > { %v9339_v2 = vpop.f32.mrf.mxu0  ;;  %9630 = vmatpush3.bf16.msra.mxu0 %v10358_v29 }
 0x128   : > { %v1577_v4 = vmax.f32 %v1299_v63, 0.0  ;;  %9631 = vmatprep.subr.bf16.mxu0 %v10359_v60  ;;  %v11047_v9 = vpack.c.bf16 %v1579_v1, %v1578_v5  ;;  %v1320_v14 = vadd.f32 %v9339_v2, %v11000_v31 }
 0x129   : > { %v1311_v6 = vpop.f32.mrf.mxu0  ;;  %9464 = vmatpush3.bf16.msra.mxu1 %v10355_v55 }
 0x12a   : > { %v11042_v7 = vpack.c.bf16 %v1577_v4, %v1576_v3  ;;  %9465 = vmatprep.subr.bf16.mxu1 %v10356_v0  ;;  %v1312_v12 = vadd.f32 %v11000_v31, %v1311_v6  ;;  %v1582_v23 = vmax.f32 %v1320_v14, 0.0 }
 0x12b   : > { %v9340_v10 = vpop.f32.mrf.mxu0  ;;  %9632 = vmatpush3.bf16.msra.mxu0 %v10359_v60 }
 0x12c   : > { %v1323_v13 = vadd.f32 %v9340_v10, %v11000_v31  ;;  %9418 = vmatmul.mubr.msk.bf16.gmra.mxu1 %vm1708_vm2, %v11042_v7  ;;  %9529 = vmatprep.mubr.msk.bf16.mxu0 %vm1708_vm2, %v11042_v7  ;;  %v1580_v21 = vmax.f32 %v1312_v12, 0.0 }
 0x12d   : > { %v1314_v15 = vpop.f32.mrf.mxu0  ;;  %9421 = vmatprep.mubr.msk.bf16.mxu1 %vm1708_vm2, %v11047_v9  ;;  %9466 = vmatpush3.bf16.msra.mxu1 %v10356_v0 }
 0x12e   : > { %v1315_v17 = vadd.f32 %v11000_v31, %v1314_v15  ;;  %9530 = vmatmul.mubr.msk.bf16.gmra.mxu0 %vm1708_vm2, %v11047_v9  ;;  %9467 = vmatprep.subr.bf16.mxu1 %v10357_v8  ;;  %v1583_v19 = vmax.f32 %v1323_v13, 0.0 }
 0x12f   : > { %v9343_v20 = vpop.f32.mrf.mxu0  ;;  %9633 = vmatprep.subr.bf16.mxu0 %v10360_v11 }
 0x130   : > { %v1581_v22 = vmax.f32 %v1315_v17, 0.0  ;;  %9634 = vmatpush3.bf16.msra.mxu0 %v10360_v11  ;;  %v11075_v26 = vpack.c.bf16 %v1583_v19, %v1582_v23  ;;  %v1336_v30 = vadd.f32 %v9343_v20, %v11000_v31 }
 0x131   : > { %v1327_v24 = vpop.f32.mrf.mxu0  ;;  %9468 = vmatpush3.bf16.msra.mxu1 %v10357_v8  ;;  %9635 = vmatprep.subr.bf16.mxu0 %v10361_v16 }
 0x132   : > { %v11072_v25 = vpack.c.bf16 %v1581_v22, %v1580_v21  ;;  %9573 = vmatprep.subr.bf16.mxu1 %v11070_v18  ;;  %v1328_v28 = vadd.f32 %v11000_v31, %v1327_v24  ;;  %v1586_v41 = vmax.f32 %v1336_v30, 0.0 }
 0x133   : > { %v9344_v27 = vpop.f32.mrf.mxu0 }
 0x134   : > { %v1339_v29 = vadd.f32 %v9344_v27, %v11000_v31  ;;  %9422 = vmatmul.mubr.msk.bf16.gmra.mxu1 %vm1708_vm2, %v11072_v25  ;;  %9533 = vmatprep.mubr.msk.bf16.mxu0 %vm1708_vm2, %v11072_v25  ;;  %v1584_v38 = vmax.f32 %v1328_v28, 0.0 }
 0x135   : > { %v1330_v33 = vpop.f32.mrf.mxu0  ;;  %9425 = vmatprep.mubr.msk.bf16.mxu1 %vm1708_vm2, %v11075_v26  ;;  %9636 = vmatpush3.bf16.msra.mxu0 %v10361_v16 }
 0x136   : > { %v1331_v34 = vadd.f32 %v11000_v31, %v1330_v33  ;;  %9534 = vmatmul.mubr.msk.bf16.gmra.mxu0 %vm1708_vm2, %v11075_v26  ;;  %v1587_v35 = vmax.f32 %v1339_v29, 0.0 }
 0x137   : > { %v9347_v37 = vpop.f32.mrf.mxu0 }
 0x138   : > { %v1585_v39 = vmax.f32 %v1331_v34, 0.0  ;;  %v11091_v44 = vpack.c.bf16 %v1587_v35, %v1586_v41  ;;  %v1352_v48 = vadd.f32 %v9347_v37, %v11000_v31  ;;  %v11150_v35 = vld [vmem:[%s15312_s4 + $0xd8] sm:$0xff]  }
 0x139   : > { %v1343_v42 = vpop.f32.mrf.mxu0  ;;  %9741 = vmatprep.subr.bf16.mxu0 %v11150_v35 }
 0x13a   : > { %v11089_v43 = vpack.c.bf16 %v1585_v39, %v1584_v38  ;;  %v1344_v46 = vadd.f32 %v11000_v31, %v1343_v42  ;;  %v1590_v57 = vmax.f32 %v1352_v48, 0.0 }
 0x13b   : > { %v9348_v45 = vpop.f32.mrf.mxu0 }
 0x13c   : > { %v1355_v47 = vadd.f32 %v9348_v45, %v11000_v31  ;;  %9426 = vmatmul.mubr.msk.bf16.gmra.mxu1 %vm1708_vm2, %v11089_v43  ;;  %9537 = vmatprep.mubr.msk.bf16.mxu0 %vm1708_vm2, %v11089_v43  ;;  %v1588_v53 = vmax.f32 %v1344_v46, 0.0 }
 0x13d   : > { %v1346_v49 = vpop.f32.mrf.mxu0  ;;  %9429 = vmatprep.mubr.msk.bf16.mxu1 %vm1708_vm2, %v11091_v44 }
 0x13e   : > { %v1347_v50 = vadd.f32 %v11000_v31, %v1346_v49  ;;  %9538 = vmatmul.mubr.msk.bf16.gmra.mxu0 %vm1708_vm2, %v11091_v44  ;;  %v1591_v51 = vmax.f32 %v1355_v47, 0.0 }
 0x13f   : > { %v9351_v52 = vpop.f32.mrf.mxu0 }
 0x140   : > { %v1589_v55 = vmax.f32 %v1347_v50, 0.0  ;;  %v11107_v60 = vpack.c.bf16 %v1591_v51, %v1590_v57  ;;  %v1368_v0 = vadd.f32 %v9351_v52, %v11000_v31 }
 0x141   : > { %v1359_v58 = vpop.f32.mrf.mxu0 }
 0x142   : > { %v11105_v59 = vpack.c.bf16 %v1589_v55, %v1588_v53  ;;  %v1360_v62 = vadd.f32 %v11000_v31, %v1359_v58  ;;  %v1594_v8 = vmax.f32 %v1368_v0, 0.0 }
 0x143   : > { %v9352_v61 = vpop.f32.mrf.mxu0 }
 0x144   : > { %v1371_v63 = vadd.f32 %v9352_v61, %v11000_v31  ;;  %9430 = vmatmul.mubr.msk.bf16.gmra.mxu1 %vm1708_vm2, %v11105_v59  ;;  %9541 = vmatprep.mubr.msk.bf16.mxu0 %vm1708_vm2, %v11105_v59  ;;  %v1592_v5 = vmax.f32 %v1360_v62, 0.0 }
 0x145   : > { %v1362_v1 = vpop.f32.mrf.mxu0  ;;  %9433 = vmatprep.mubr.msk.bf16.mxu1 %vm1708_vm2, %v11107_v60 }
 0x146   : > { %v1363_v2 = vadd.f32 %v11000_v31, %v1362_v1  ;;  %9542 = vmatmul.mubr.msk.bf16.gmra.mxu0 %vm1708_vm2, %v11107_v60  ;;  %v1595_v3 = vmax.f32 %v1371_v63, 0.0 }
 0x147   : > { %v9355_v4 = vpop.f32.mrf.mxu0 }
 0x148   : > { %v1593_v6 = vmax.f32 %v1363_v2, 0.0  ;;  %v11123_v12 = vpack.c.bf16 %v1595_v3, %v1594_v8  ;;  %v1384_v16 = vadd.f32 %v9355_v4, %v11000_v31 }
 0x149   : > { %v1375_v10 = vpop.f32.mrf.mxu0 }
 0x14a   : > { %v11121_v11 = vpack.c.bf16 %v1593_v6, %v1592_v5  ;;  %15429 = vst [vmem:[#allocation7_spill] sm:$0xff] %v11123_v12  ;;  %v1376_v14 = vadd.f32 %v11000_v31, %v1375_v10  ;;  %v1598_v24 = vmax.f32 %v1384_v16, 0.0 }
 0x14b   : > { %v9356_v13 = vpop.f32.mrf.mxu0 }
 0x14c   : > { %15428 = vst [vmem:[#allocation6_spill] sm:$0xff] %v11121_v11  ;;  %v1387_v15 = vadd.f32 %v9356_v13, %v11000_v31  ;;  %9434 = vmatmul.mubr.msk.bf16.gmra.mxu1 %vm1708_vm2, %v11121_v11  ;;  %9545 = vmatprep.mubr.msk.bf16.mxu0 %vm1708_vm2, %v11121_v11  ;;  %v1596_v22 = vmax.f32 %v1376_v14, 0.0 }
 0x14d   : > { %v1378_v17 = vpop.f32.mrf.mxu0  ;;  %9437 = vmatprep.mubr.msk.bf16.mxu1 %vm1708_vm2, %v11123_v12 }
 0x14e   : > { %v1379_v19 = vadd.f32 %v11000_v31, %v1378_v17  ;;  %9546 = vmatmul.mubr.msk.bf16.gmra.mxu0 %vm1708_vm2, %v11123_v12  ;;  %v1599_v20 = vmax.f32 %v1387_v15, 0.0 }
 0x14f   : > { %v9359_v21 = vpop.f32.mrf.mxu0 }
 0x150   : > { %v1597_v23 = vmax.f32 %v1379_v19, 0.0  ;;  %v11139_v29 = vpack.c.bf16 %v1599_v20, %v1598_v24  ;;  %v1400_v37 = vadd.f32 %v9359_v21, %v11000_v31 }
 0x151   : > { %v1391_v27 = vpop.f32.mrf.mxu0 }
 0x152   : > { %v11137_v28 = vpack.c.bf16 %v1597_v23, %v1596_v22  ;;  %15431 = vst [vmem:[#allocation9_spill] sm:$0xff] %v11139_v29  ;;  %v1392_v33 = vadd.f32 %v11000_v31, %v1391_v27  ;;  %v1602_v47 = vmax.f32 %v1400_v37, 0.0 }
 0x153   : > { %v9360_v30 = vpop.f32.mrf.mxu0 }
 0x154   : > { %15430 = vst [vmem:[#allocation8_spill] sm:$0xff] %v11137_v28  ;;  %v1403_v34 = vadd.f32 %v9360_v30, %v11000_v31  ;;  %9438 = vmatmul.mubr.msk.bf16.gmra.mxu1 %vm1708_vm2, %v11137_v28  ;;  %9549 = vmatprep.mubr.msk.bf16.mxu0 %vm1708_vm2, %v11137_v28  ;;  %v1600_v45 = vmax.f32 %v1392_v33, 0.0 }
 0x155   : > { %v1394_v38 = vpop.f32.mrf.mxu0  ;;  %9441 = vmatprep.mubr.msk.bf16.mxu1 %vm1708_vm2, %v11139_v29 }
 0x156   : > { %v1395_v39 = vadd.f32 %v11000_v31, %v1394_v38  ;;  %9550 = vmatmul.mubr.msk.bf16.gmra.mxu0 %vm1708_vm2, %v11139_v29  ;;  %v1603_v41 = vmax.f32 %v1403_v34, 0.0 }
 0x157   : > { %v9363_v42 = vpop.f32.mrf.mxu0 }
 0x158   : > { %v1601_v46 = vmax.f32 %v1395_v39, 0.0  ;;  %v11161_v50 = vpack.c.bf16 %v1603_v41, %v1602_v47  ;;  %v1416_v55 = vadd.f32 %v9363_v42, %v11000_v31 }
 0x159   : > { %v1407_v48 = vpop.f32.mrf.mxu0 }
 0x15a   : > { %v11159_v49 = vpack.c.bf16 %v1601_v46, %v1600_v45  ;;  %15433 = vst [vmem:[#allocation11_spill] sm:$0xff] %v11161_v50  ;;  %v1408_v52 = vadd.f32 %v11000_v31, %v1407_v48  ;;  %v1606_v1 = vmax.f32 %v1416_v55, 0.0  ;;  %v1267_v48 = vadd.f32 %v11000_v31, %v11006_v36 }
 0x15b   : > { %v9364_v51 = vpop.f32.mrf.mxu0 }
 0x15c   : > { %15432 = vst [vmem:[#allocation10_spill] sm:$0xff] %v11159_v49  ;;  %v1419_v53 = vadd.f32 %v9364_v51, %v11000_v31  ;;  %9442 = vmatmul.mubr.msk.bf16.gmra.mxu1 %vm1708_vm2, %v11159_v49  ;;  %9553 = vmatprep.mubr.msk.bf16.mxu0 %vm1708_vm2, %v11159_v49  ;;  %v1604_v63 = vmax.f32 %v1408_v52, 0.0 }
 0x15d   : > { %v1410_v57 = vpop.f32.mrf.mxu0  ;;  %9445 = vmatprep.mubr.msk.bf16.mxu1 %vm1708_vm2, %v11161_v50 }
 0x15e   : > { %v1411_v58 = vadd.f32 %v11000_v31, %v1410_v57  ;;  %9554 = vmatmul.mubr.msk.bf16.gmra.mxu0 %vm1708_vm2, %v11161_v50  ;;  %v1607_v61 = vmax.f32 %v1419_v53, 0.0  ;;  %v1264_v57 = vadd.f32 %v11000_v31, %v11002_v32 }
 0x15f   : > { %v9367_v62 = vpop.f32.mrf.mxu0 }
 0x160   : > { %v1605_v0 = vmax.f32 %v1411_v58, 0.0  ;;  %v11177_v4 = vpack.c.bf16 %v1607_v61, %v1606_v1  ;;  %v1432_v10 = vadd.f32 %v9367_v62, %v11000_v31  ;;  %v1569_v62 = vmax.f32 %v1267_v48, 0.0 }
 0x161   : > { %v1423_v2 = vpop.f32.mrf.mxu0 }
 0x162   : > { %v11175_v3 = vpack.c.bf16 %v1605_v0, %v1604_v63  ;;  %15435 = vst [vmem:[#allocation13_spill] sm:$0xff] %v11177_v4  ;;  %v1424_v6 = vadd.f32 %v11000_v31, %v1423_v2  ;;  %v1610_v20 = vmax.f32 %v1432_v10, 0.0 }
 0x163   : > { %v9368_v5 = vpop.f32.mrf.mxu0 }
 0x164   : > { %15434 = vst [vmem:[#allocation12_spill] sm:$0xff] %v11175_v3  ;;  %v1435_v8 = vadd.f32 %v9368_v5, %v11000_v31  ;;  %9446 = vmatmul.mubr.msk.bf16.gmra.mxu1 %vm1708_vm2, %v11175_v3  ;;  %9557 = vmatprep.mubr.msk.bf16.mxu0 %vm1708_vm2, %v11175_v3  ;;  %v1608_v17 = vmax.f32 %v1424_v6, 0.0  ;;  %v1568_v6 = vmax.f32 %v1264_v57, 0.0  ;;  %v10369_v57 = vld [vmem:[%s15312_s4 + $0xc0] sm:$0xff]  }
 0x165   : > { %v1426_v13 = vpop.f32.mrf.mxu0  ;;  %9449 = vmatprep.mubr.msk.bf16.mxu1 %vm1708_vm2, %v11177_v4 }
 0x166   : > { %v1427_v14 = vadd.f32 %v11000_v31, %v1426_v13  ;;  %9558 = vmatmul.mubr.msk.bf16.gmra.mxu0 %vm1708_vm2, %v11177_v4  ;;  %v1611_v15 = vmax.f32 %v1435_v8, 0.0  ;;  %v1634_v13 = vpack.c.bf16 %v1569_v62, %v1568_v6 }
 0x167   : > { %v9371_v16 = vpop.f32.mrf.mxu0 }
 0x168   : > { %v1609_v19 = vmax.f32 %v1427_v14, 0.0  ;;  %v11193_v23 = vpack.c.bf16 %v1611_v15, %v1610_v20  ;;  %v1448_v33 = vadd.f32 %v9371_v16, %v11000_v31 }
 0x169   : > { %v1439_v21 = vpop.f32.mrf.mxu0 }
 0x16a   : > { %v11191_v22 = vpack.c.bf16 %v1609_v19, %v1608_v17  ;;  %15437 = vst [vmem:[#allocation15_spill] sm:$0xff] %v11193_v23  ;;  %v1440_v27 = vadd.f32 %v11000_v31, %v1439_v21  ;;  %v1614_v45 = vmax.f32 %v1448_v33, 0.0  ;;  %v10363_v33 = vld [vmem:[%s15312_s4 + $0x70] sm:$0xff]  }
 0x16b   : > { %v9372_v24 = vpop.f32.mrf.mxu0 }
 0x16c   : > { %15436 = vst [vmem:[#allocation14_spill] sm:$0xff] %v11191_v22  ;;  %v1451_v30 = vadd.f32 %v9372_v24, %v11000_v31  ;;  %9450 = vmatmul.mubr.msk.bf16.gmra.mxu1 %vm1708_vm2, %v11191_v22  ;;  %9561 = vmatprep.mubr.msk.bf16.mxu0 %vm1708_vm2, %v11191_v22  ;;  %v1612_v41 = vmax.f32 %v1440_v27, 0.0 }
 0x16d   : > { %v1442_v34 = vpop.f32.mrf.mxu0  ;;  %9453 = vmatprep.mubr.msk.bf16.mxu1 %vm1708_vm2, %v11193_v23 }
 0x16e   : > { %v1443_v37 = vadd.f32 %v11000_v31, %v1442_v34  ;;  %9562 = vmatmul.mubr.msk.bf16.gmra.mxu0 %vm1708_vm2, %v11193_v23  ;;  %v1615_v38 = vmax.f32 %v1451_v30, 0.0 }
 0x16f   : > { %v9375_v39 = vpop.f32.mrf.mxu0 }
 0x170   : > { %v1613_v42 = vmax.f32 %v1443_v37, 0.0  ;;  %v11211_v51 = vpack.c.bf16 %v1615_v38, %v1614_v45  ;;  %v1464_v36 = vadd.f32 %v9375_v39, %v11000_v31  ;;  %v10367_v39 = vld [vmem:[%s15312_s4 + $0xd0] sm:$0xff]  }
 0x171   : > { %v1455_v46 = vpop.f32.mrf.mxu0 }
 0x172   : > { %v11207_v47 = vpack.c.bf16 %v1613_v42, %v1612_v41  ;;  %15439 = vst [vmem:[#allocation17_spill] sm:$0xff] %v11211_v51  ;;  %v1456_v53 = vadd.f32 %v11000_v31, %v1455_v46  ;;  %v1618_v8 = vmax.f32 %v1464_v36, 0.0  ;;  %v10368_v46 = vld [vmem:[%s15312_s4 + $0xc8] sm:$0xff]  }
 0x173   : > { %v9376_v52 = vpop.f32.mrf.mxu0 }
 0x174   : > { %15438 = vst [vmem:[#allocation16_spill] sm:$0xff] %v11207_v47  ;;  %v1467_v55 = vadd.f32 %v9376_v52, %v11000_v31  ;;  %9454 = vmatmul.mubr.msk.bf16.gmra.mxu1 %vm1708_vm2, %v11207_v47  ;;  %9565 = vmatprep.mubr.msk.bf16.mxu0 %vm1708_vm2, %v11207_v47  ;;  %v1616_v0 = vmax.f32 %v1456_v53, 0.0  ;;  %v10365_v52 = vld [vmem:[%s15312_s4 + $0x60] sm:$0xff]  }
 0x175   : > { %v1458_v58 = vpop.f32.mrf.mxu0  ;;  %9457 = vmatprep.mubr.msk.bf16.mxu1 %vm1708_vm2, %v11211_v51 }
 0x176   : > { %v1459_v61 = vadd.f32 %v11000_v31, %v1458_v58  ;;  %9566 = vmatmul.mubr.msk.bf16.gmra.mxu0 %vm1708_vm2, %v11211_v51  ;;  %v1619_v1 = vmax.f32 %v1467_v55, 0.0 }
 0x177   : > { %v9379_v63 = vpop.f32.mrf.mxu0 }
 0x178   : > { %v1617_v2 = vmax.f32 %v1459_v61, 0.0  ;;  %v1480_v5 = vadd.f32 %v9379_v63, %v11000_v31  ;;  %v11232_v15 = vpack.c.bf16 %v1619_v1, %v1618_v8  ;;  %v11299_v61 = vld [vmem:[%s15312_s4 + $0xb8] sm:$0xff]  }
 0x179   : > { %v11228_v32 = vpop.f32.mrf.mxu0 }
 0x17a   : > { %v11230_v10 = vpack.c.bf16 %v1617_v2, %v1616_v0  ;;  %15441 = vst [vmem:[#allocation19_spill] sm:$0xff] %v11232_v15  ;;  %v1622_v16 = vmax.f32 %v1480_v5, 0.0 }
 0x17b   : > { %v9380_v14 = vpop.f32.mrf.mxu0 }
 0x17c   : > { %15440 = vst [vmem:[#allocation18_spill] sm:$0xff] %v11230_v10  ;;  %9458 = vmatmul.mubr.msk.bf16.gmra.mxu1 %vm1708_vm2, %v11230_v10  ;;  %9569 = vmatprep.mubr.msk.bf16.mxu0 %vm1708_vm2, %v11230_v10  ;;  %v1483_v17 = vadd.f32 %v9380_v14, %v11000_v31 }
 0x17d   : > { %9469 = vmatprep.mubr.msk.bf16.mxu1 %vm1708_vm2, %v1634_v13  ;;  %v11240_v19 = vpop.f32.mrf.mxu0 }
 0x17e   : > { %9570 = vmatmul.mubr.msk.bf16.gmra.mxu0 %vm1708_vm2, %v11232_v15  ;;  %v1623_v20 = vmax.f32 %v1483_v17, 0.0 }
 0x17f   : > { %9637 = vmatprep.mubr.msk.bf16.mxu0 %vm1708_vm2, %v11042_v7  ;;  %v9383_v21 = vpop.f32.mrf.mxu0 }
 0x180   : > { %v11246_v24 = vpack.c.bf16 %v1623_v20, %v1622_v16  ;;  %v1496_v27 = vadd.f32 %v9383_v21, %v11000_v31 }
 0x181   : > { %v11249_v30 = vpop.f32.mrf.mxu0 }
 0x182   : > { %v1626_v37 = vmax.f32 %v1496_v27, 0.0 }
 0x183   : > { %v9384_v34 = vpop.f32.mrf.mxu0 }
 0x184   : > { %9470 = vmatmul.mubr.msk.bf16.vlgmr.msra.gmra.mxu1 %vm1708_vm2, %v11008_v40  ;;  %v1499_v38 = vadd.f32 %v9384_v34, %v11000_v31  ;;  %v10364_v40 = vld [vmem:[%s15312_s4 + $0x68] sm:$0xff]  }
 0x185   : > { %9574 = vmatpush3.bf16.msra.mxu1 %v11070_v18  ;;  %9473 = vmatprep.mubr.msk.bf16.mxu1 %vm1708_vm2, %v11016_v54  ;;  %v11263_v41 = vpop.f32.mrf.mxu0 }
 0x186   : > { %9638 = vmatmul.mubr.msk.bf16.vlgmr.msra.gmra.mxu0 %vm1708_vm2, %v11047_v9  ;;  %9575 = vmatprep.subr.bf16.mxu1 %v10363_v33  ;;  %v1627_v42 = vmax.f32 %v1499_v38, 0.0  ;;  %v1472_v38 = vadd.f32 %v11000_v31, %v11228_v32  ;;  %v10371_v32 = vld [vmem:[%s15312_s4 + $0xb0] sm:$0xff]  }
 0x187   : > { %9641 = vmatprep.mubr.msk.bf16.mxu0 %vm1708_vm2, %v11072_v25  ;;  %v9387_v45 = vpop.f32.mrf.mxu0  ;;  %9742 = vmatpush3.bf16.msra.mxu0 %v11150_v35 }
 0x188   : > { %v11273_v18 = vpack.c.bf16 %v1627_v42, %v1626_v37  ;;  %v1512_v54 = vadd.f32 %v9387_v45, %v11000_v31  ;;  %9743 = vmatprep.subr.bf16.mxu0 %v10367_v39  ;;  %v10374_v37 = vld [vmem:[%s15312_s4 + $0x118] sm:$0xff]  }
 0x189   : > { %9576 = vmatpush3.bf16.msra.mxu1 %v10363_v33  ;;  %v11279_v48 = vpop.f32.mrf.mxu0 }
 0x18a   : > { %15442 = vst [vmem:[#allocation20_spill] sm:$0xff] %v11273_v18  ;;  %9577 = vmatprep.subr.bf16.mxu1 %v10364_v40  ;;  %v1630_v35 = vmax.f32 %v1512_v54, 0.0  ;;  %v10375_v54 = vld [vmem:[%s15312_s4 + $0x110] sm:$0xff]  }
 0x18b   : > { %v9388_v53 = vpop.f32.mrf.mxu0  ;;  %9744 = vmatpush3.bf16.msra.mxu0 %v10367_v39  ;;  %v1475_v39 = vadd.f32 %v11000_v31, %v11240_v19 }
 0x18c   : > { %9474 = vmatmul.mubr.msk.bf16.gmra.mxu1 %vm1708_vm2, %v11021_v56  ;;  %v1515_v55 = vadd.f32 %v9388_v53, %v11000_v31  ;;  %9745 = vmatprep.subr.bf16.mxu0 %v10368_v46 }
 0x18d   : > { %9477 = vmatprep.mubr.msk.bf16.mxu1 %vm1708_vm2, %v11042_v7  ;;  %9578 = vmatpush3.bf16.msra.mxu1 %v10364_v40  ;;  %v11292_v58 = vpop.f32.mrf.mxu0  ;;  %v1620_v40 = vmax.f32 %v1472_v38, 0.0  ;;  %v1621_v42 = vmax.f32 %v1475_v39, 0.0 }
 0x18e   : > { %9642 = vmatmul.mubr.msk.bf16.gmra.mxu0 %vm1708_vm2, %v11075_v26  ;;  %v1631_v36 = vmax.f32 %v1515_v55, 0.0  ;;  %9579 = vmatprep.subr.bf16.mxu1 %v10365_v52 }
 0x18f   : > { %9645 = vmatprep.mubr.msk.bf16.mxu0 %vm1708_vm2, %v11089_v43  ;;  %v9391_v62 = vpop.f32.mrf.mxu0  ;;  %9746 = vmatpush3.bf16.msra.mxu0 %v10368_v46  ;;  %v11381_v45 = vpack.c.bf16 %v1621_v42, %v1620_v40 }
 0x190   : > { %v11303_v63 = vpack.c.bf16 %v1631_v36, %v1630_v35  ;;  %9747 = vmatprep.subr.bf16.mxu0 %v10369_v57  ;;  %v10376_v35 = vld [vmem:[%s15312_s4 + $0x108] sm:$0xff]   ;;  %v10373_v36 = vld [vmem:[%s15312_s4 + $0xa0] sm:$0xff]  }
 0x191   : > { %v11305_v0 = vpop.f32.mrf.mxu0  ;;  %9580 = vmatpush3.bf16.msra.mxu1 %v10365_v52 }
 0x192   : > { %15443 = vst [vmem:[#allocation21_spill] sm:$0xff] %v11303_v63  ;;  %15444 = vst [vmem:[#allocation22_spill] sm:$0xff] %v11305_v0  ;;  %9685 = vmatprep.subr.bf16.mxu1 %v11299_v61 }
 0x193   : > { %v9392_v1 = vpop.f32.mrf.mxu0  ;;  %9748 = vmatpush3.bf16.msra.mxu0 %v10369_v57 }
 0x194   : > { %9478 = vmatmul.mubr.msk.bf16.gmra.mxu1 %vm1708_vm2, %v11047_v9  ;;  %9853 = vmatprep.subr.bf16.mxu0 %v10374_v37  ;;  %v10377_v1 = vld [vmem:[%s15312_s4 + $0x100] sm:$0xff]  }
 0x195   : > { %9481 = vmatprep.mubr.msk.bf16.mxu1 %vm1708_vm2, %v11072_v25  ;;  %v11312_v2 = vpop.f32.mrf.mxu0 }
 0x196   : > { %15445 = vst [vmem:[#allocation23_spill] sm:$0xff] %v11312_v2  ;;  %9646 = vmatmul.mubr.msk.bf16.gmra.mxu0 %vm1708_vm2, %v11091_v44 }
 0x197   : > { %9649 = vmatprep.mubr.msk.bf16.mxu0 %vm1708_vm2, %v11105_v59  ;;  %v9395_v5 = vpop.f32.mrf.mxu0 }
 0x199   : > { %v1533_v6 = vpop.f32.mrf.mxu0 }
 0x19b   : > { %v9396_v8 = vpop.f32.mrf.mxu0 }
 0x19c   : > { %9482 = vmatmul.mubr.msk.bf16.gmra.mxu1 %vm1708_vm2, %v11075_v26  ;;  %v11457_v8 = vld [vmem:[%s15312_s4 + $0xf8] sm:$0xff]  }
 0x19d   : > { %9485 = vmatprep.mubr.msk.bf16.mxu1 %vm1708_vm2, %v11089_v43  ;;  %v1535_v13 = vpop.f32.mrf.mxu0 }
 0x19e   : > { %9650 = vmatmul.mubr.msk.bf16.gmra.mxu0 %vm1708_vm2, %v11107_v60 }
 0x19f   : > { %9653 = vmatprep.mubr.msk.bf16.mxu0 %vm1708_vm2, %v11121_v11  ;;  %v9399_v14 = vpop.f32.mrf.mxu0 }
 0x1a1   : > { %v1545_v16 = vpop.f32.mrf.mxu0 }
 0x1a3   : > { %v9400_v17 = vpop.f32.mrf.mxu0 }
 0x1a4   : > { %9486 = vmatmul.mubr.msk.bf16.gmra.mxu1 %vm1708_vm2, %v11091_v44 }
 0x1a5   : > { %9489 = vmatprep.mubr.msk.bf16.mxu1 %vm1708_vm2, %v11105_v59  ;;  %v1547_v20 = vpop.f32.mrf.mxu0 }
 0x1a6   : > { %9654 = vmatmul.mubr.msk.bf16.gmra.mxu0 %vm1708_vm2, %v11123_v12 }
 0x1a7   : > { %9657 = vmatprep.mubr.msk.bf16.mxu0 %vm1708_vm2, %v11137_v28  ;;  %v9403_v21 = vpop.f32.mrf.mxu0 }
 0x1a9   : > { %v1557_v27 = vpop.f32.mrf.mxu0 }
 0x1ab   : > { %v9404_v33 = vpop.f32.mrf.mxu0 }
 0x1ac   : > { %9490 = vmatmul.mubr.msk.bf16.gmra.mxu1 %vm1708_vm2, %v11107_v60 }
 0x1ad   : > { %9493 = vmatprep.mubr.msk.bf16.mxu1 %vm1708_vm2, %v11121_v11  ;;  %v1559_v34 = vpop.f32.mrf.mxu0 }
 0x1ae   : > { %9658 = vmatmul.mubr.msk.bf16.gmra.mxu0 %vm1708_vm2, %v11139_v29 }
 0x1af   : > { %9661 = vmatprep.mubr.msk.bf16.mxu0 %vm1708_vm2, %v11159_v49 }
 0x1b4   : > { %9494 = vmatmul.mubr.msk.bf16.gmra.mxu1 %vm1708_vm2, %v11123_v12 }
 0x1b5   : > { %9497 = vmatprep.mubr.msk.bf16.mxu1 %vm1708_vm2, %v11137_v28 }
 0x1b6   : > { %9662 = vmatmul.mubr.msk.bf16.gmra.mxu0 %vm1708_vm2, %v11161_v50 }
 0x1b7   : > { %9665 = vmatprep.mubr.msk.bf16.mxu0 %vm1708_vm2, %v11175_v3 }
 0x1bc   : > { %9498 = vmatmul.mubr.msk.bf16.gmra.mxu1 %vm1708_vm2, %v11139_v29 }
 0x1bd   : > { %9501 = vmatprep.mubr.msk.bf16.mxu1 %vm1708_vm2, %v11159_v49 }
 0x1be   : > { %9666 = vmatmul.mubr.msk.bf16.gmra.mxu0 %vm1708_vm2, %v11177_v4 }
 0x1bf   : > { %9669 = vmatprep.mubr.msk.bf16.mxu0 %vm1708_vm2, %v11191_v22 }
 0x1c4   : > { %9502 = vmatmul.mubr.msk.bf16.gmra.mxu1 %vm1708_vm2, %v11161_v50 }
 0x1c5   : > { %9505 = vmatprep.mubr.msk.bf16.mxu1 %vm1708_vm2, %v11175_v3 }
 0x1c6   : > { %9670 = vmatmul.mubr.msk.bf16.gmra.mxu0 %vm1708_vm2, %v11193_v23 }
 0x1c7   : > { %9673 = vmatprep.mubr.msk.bf16.mxu0 %vm1708_vm2, %v11207_v47 }
 0x1cc   : > { %9506 = vmatmul.mubr.msk.bf16.gmra.mxu1 %vm1708_vm2, %v11177_v4 }
 0x1cd   : > { %9509 = vmatprep.mubr.msk.bf16.mxu1 %vm1708_vm2, %v11191_v22 }
 0x1ce   : > { %9674 = vmatmul.mubr.msk.bf16.gmra.mxu0 %vm1708_vm2, %v11211_v51 }
 0x1cf   : > { %9677 = vmatprep.mubr.msk.bf16.mxu0 %vm1708_vm2, %v11230_v10 }
 0x1d4   : > { %9510 = vmatmul.mubr.msk.bf16.gmra.mxu1 %vm1708_vm2, %v11193_v23 }
 0x1d5   : > { %9513 = vmatprep.mubr.msk.bf16.mxu1 %vm1708_vm2, %v11207_v47 }
 0x1d6   : > { %9678 = vmatmul.mubr.msk.bf16.gmra.mxu0 %vm1708_vm2, %v11232_v15 }
 0x1d7   : > { %9681 = vmatprep.mubr.msk.bf16.mxu0 %vm1708_vm2, %v11381_v45 }
 0x1dc   : > { %9514 = vmatmul.mubr.msk.bf16.gmra.mxu1 %vm1708_vm2, %v11211_v51 }
 0x1dd   : > { %9581 = vmatprep.mubr.msk.bf16.mxu1 %vm1708_vm2, %v11021_v56 }
 0x1de   : > { %9682 = vmatmul.mubr.msk.bf16.gmra.mxu0 %vm1708_vm2, %v11246_v24 }
 0x1df   : > { %9749 = vmatprep.mubr.msk.bf16.mxu0 %vm1708_vm2, %v11072_v25 }
 0x1e4   : > { %v11402_v19 = vpop.f32.mrf.mxu1  ;;  %9582 = vmatmul.mubr.msk.bf16.vlgmr.msra.gmra.mxu1 %vm1708_vm2, %v11042_v7  ;;  %v10372_v7 = vld [vmem:[%s15312_s4 + $0xa8] sm:$0xff]  }
 0x1e5   : > { %9686 = vmatpush3.bf16.msra.mxu1 %v11299_v61  ;;  %9585 = vmatprep.mubr.msk.bf16.mxu1 %vm1708_vm2, %v11047_v9 }
 0x1e6   : > { %v11412_v56 = vpop.f32.mrf.mxu0  ;;  %9750 = vmatmul.mubr.msk.bf16.vlgmr.msra.gmra.mxu0 %vm1708_vm2, %v11075_v26  ;;  %v11416_v46 = vpop.f32.mrf.mxu1  ;;  %9687 = vmatprep.subr.bf16.mxu1 %v10371_v32 }
 0x1e7   : > { %9753 = vmatprep.mubr.msk.bf16.mxu0 %vm1708_vm2, %v11089_v43  ;;  %9854 = vmatpush3.bf16.msra.mxu0 %v10374_v37 }
 0x1e8   : > { %v11423_v52 = vpop.f32.mrf.mxu0  ;;  %v11425_v53 = vpop.f32.mrf.mxu1  ;;  %9855 = vmatprep.subr.bf16.mxu0 %v10375_v54 }
 0x1e9   : > { %9688 = vmatpush3.bf16.msra.mxu1 %v10371_v32 }
 0x1ea   : > { %v11430_v55 = vpop.f32.mrf.mxu0  ;;  %v11432_v57 = vpop.f32.mrf.mxu1  ;;  %9689 = vmatprep.subr.bf16.mxu1 %v10372_v7 }
 0x1eb   : > { %9856 = vmatpush3.bf16.msra.mxu0 %v10375_v54 }
 0x1ec   : > { %v11437_v61 = vpop.f32.mrf.mxu0  ;;  %v11439_v62 = vpop.f32.mrf.mxu1  ;;  %9586 = vmatmul.mubr.msk.bf16.gmra.mxu1 %vm1708_vm2, %v11072_v25  ;;  %9857 = vmatprep.subr.bf16.mxu0 %v10376_v35 }
 0x1ed   : > { %9589 = vmatprep.mubr.msk.bf16.mxu1 %vm1708_vm2, %v11075_v26  ;;  %9690 = vmatpush3.bf16.msra.mxu1 %v10372_v7 }
 0x1ee   : > { %v11448_v5 = vpop.f32.mrf.mxu0  ;;  %9754 = vmatmul.mubr.msk.bf16.gmra.mxu0 %vm1708_vm2, %v11091_v44  ;;  %v11452_v6 = vpop.f32.mrf.mxu1  ;;  %9691 = vmatprep.subr.bf16.mxu1 %v10373_v36 }
 0x1ef   : > { %9757 = vmatprep.mubr.msk.bf16.mxu0 %vm1708_vm2, %v11105_v59  ;;  %9858 = vmatpush3.bf16.msra.mxu0 %v10376_v35 }
 0x1f0   : > { %v11461_v13 = vpop.f32.mrf.mxu0  ;;  %v11463_v14 = vpop.f32.mrf.mxu1  ;;  %9859 = vmatprep.subr.bf16.mxu0 %v10377_v1 }
 0x1f1   : > { %9692 = vmatpush3.bf16.msra.mxu1 %v10373_v36 }
 0x1f2   : > { %v11465_v16 = vpop.f32.mrf.mxu0  ;;  %v11467_v17 = vpop.f32.mrf.mxu1  ;;  %9797 = vmatprep.subr.bf16.mxu1 %v11457_v8 }
 0x1f3   : > { %9860 = vmatpush3.bf16.msra.mxu0 %v10377_v1 }
 0x1f4   : > { %v11470_v20 = vpop.f32.mrf.mxu0  ;;  %v11472_v21 = vpop.f32.mrf.mxu1  ;;  %9590 = vmatmul.mubr.msk.bf16.gmra.mxu1 %vm1708_vm2, %v11089_v43 }
 0x1f5   : > { %9593 = vmatprep.mubr.msk.bf16.mxu1 %vm1708_vm2, %v11091_v44 }
 0x1f6   : > { %v11478_v27 = vpop.f32.mrf.mxu0  ;;  %9758 = vmatmul.mubr.msk.bf16.gmra.mxu0 %vm1708_vm2, %v11107_v60  ;;  %v11482_v33 = vpop.f32.mrf.mxu1 }
 0x1f7   : > { %9761 = vmatprep.mubr.msk.bf16.mxu0 %vm1708_vm2, %v11121_v11 }
 0x1f8   : > { %v11486_v34 = vpop.f32.mrf.mxu0  ;;  %v11488_v37 = vpop.f32.mrf.mxu1 }
 0x1f9   : > { %15446 = vst [vmem:[#allocation24_spill] sm:$0xff] %v11486_v34 }
 0x1fa   : > { %v11490_v38 = vpop.f32.mrf.mxu0  ;;  %v11492_v39 = vpop.f32.mrf.mxu1 }
 0x1fb   : > { %15447 = vst [vmem:[#allocation25_spill] sm:$0xff] %v11490_v38  ;;  %15448 = vst [vmem:[#allocation26_spill] sm:$0xff] %v11492_v39 }
 0x1fc   : > { %v11494_v40 = vpop.f32.mrf.mxu0  ;;  %v11496_v42 = vpop.f32.mrf.mxu1  ;;  %9594 = vmatmul.mubr.msk.bf16.gmra.mxu1 %vm1708_vm2, %v11105_v59 }
 0x1fd   : > { %15449 = vst [vmem:[#allocation27_spill] sm:$0xff] %v11494_v40  ;;  %15450 = vst [vmem:[#allocation28_spill] sm:$0xff] %v11496_v42  ;;  %9597 = vmatprep.mubr.msk.bf16.mxu1 %vm1708_vm2, %v11107_v60 }
 0x1fe   : > { %v11502_v32 = vpop.f32.mrf.mxu0  ;;  %9762 = vmatmul.mubr.msk.bf16.gmra.mxu0 %vm1708_vm2, %v11123_v12  ;;  %v11506_v54 = vpop.f32.mrf.mxu1 }
 0x1ff   : > { %15451 = vst [vmem:[#allocation29_spill] sm:$0xff] %v11502_v32  ;;  %15452 = vst [vmem:[#allocation30_spill] sm:$0xff] %v11506_v54  ;;  %9765 = vmatprep.mubr.msk.bf16.mxu0 %vm1708_vm2, %v11137_v28 }
 0x200   : > { %v11510_v7 = vpop.f32.mrf.mxu0  ;;  %v11512_v35 = vpop.f32.mrf.mxu1 }
 0x201   : > { %15453 = vst [vmem:[#allocation31_spill] sm:$0xff] %v11510_v7  ;;  %15454 = vst [vmem:[#allocation32_spill] sm:$0xff] %v11512_v35 }
 0x202   : > { %v11514_v36 = vpop.f32.mrf.mxu0  ;;  %v11516_v1 = vpop.f32.mrf.mxu1 }
 0x203   : > { %15455 = vst [vmem:[#allocation33_spill] sm:$0xff] %v11514_v36  ;;  %15456 = vst [vmem:[#allocation34_spill] sm:$0xff] %v11516_v1 }
 0x204   : > { %v11518_v2 = vpop.f32.mrf.mxu0  ;;  %v11520_v0 = vpop.f32.mrf.mxu1  ;;  %9598 = vmatmul.mubr.msk.bf16.gmra.mxu1 %vm1708_vm2, %v11121_v11 }
 0x205   : > { %15457 = vst [vmem:[#allocation35_spill] sm:$0xff] %v11518_v2  ;;  %15458 = vst [vmem:[#allocation36_spill] sm:$0xff] %v11520_v0  ;;  %9601 = vmatprep.mubr.msk.bf16.mxu1 %vm1708_vm2, %v11123_v12 }
 0x206   : > { %v11526_v32 = vpop.f32.mrf.mxu0  ;;  %9766 = vmatmul.mubr.msk.bf16.gmra.mxu0 %vm1708_vm2, %v11139_v29  ;;  %v11530_v7 = vpop.f32.mrf.mxu1 }
 0x207   : > { %15459 = vst [vmem:[#allocation37_spill] sm:$0xff] %v11526_v32  ;;  %15460 = vst [vmem:[#allocation38_spill] sm:$0xff] %v11530_v7  ;;  %9769 = vmatprep.mubr.msk.bf16.mxu0 %vm1708_vm2, %v11159_v49 }
 0x208   : > { %v11534_v36 = vpop.f32.mrf.mxu0  ;;  %v11536_v2 = vpop.f32.mrf.mxu1 }
 0x209   : > { %15461 = vst [vmem:[#allocation39_spill] sm:$0xff] %v11534_v36  ;;  %15462 = vst [vmem:[#allocation40_spill] sm:$0xff] %v11536_v2 }
 0x20a   : > { %v11538_v0 = vpop.f32.mrf.mxu0  ;;  %v11540_v1 = vpop.f32.mrf.mxu1 }
 0x20b   : > { %15463 = vst [vmem:[#allocation41_spill] sm:$0xff] %v11538_v0  ;;  %15464 = vst [vmem:[#allocation42_spill] sm:$0xff] %v11540_v1 }
 0x20c   : > { %v11542_v35 = vpop.f32.mrf.mxu0  ;;  %v11544_v40 = vpop.f32.mrf.mxu1  ;;  %9602 = vmatmul.mubr.msk.bf16.gmra.mxu1 %vm1708_vm2, %v11137_v28 }
 0x20d   : > { %15465 = vst [vmem:[#allocation43_spill] sm:$0xff] %v11542_v35  ;;  %15466 = vst [vmem:[#allocation44_spill] sm:$0xff] %v11544_v40  ;;  %9605 = vmatprep.mubr.msk.bf16.mxu1 %vm1708_vm2, %v11139_v29 }
 0x20e   : > { %v11550_v32 = vpop.f32.mrf.mxu0  ;;  %9770 = vmatmul.mubr.msk.bf16.gmra.mxu0 %vm1708_vm2, %v11161_v50  ;;  %v11554_v36 = vpop.f32.mrf.mxu1 }
 0x20f   : > { %15467 = vst [vmem:[#allocation45_spill] sm:$0xff] %v11550_v32  ;;  %15468 = vst [vmem:[#allocation46_spill] sm:$0xff] %v11554_v36  ;;  %9773 = vmatprep.mubr.msk.bf16.mxu0 %vm1708_vm2, %v11175_v3 }
 0x210   : > { %v11558_v0 = vpop.f32.mrf.mxu0  ;;  %v11560_v35 = vpop.f32.mrf.mxu1 }
 0x211   : > { %15469 = vst [vmem:[#allocation47_spill] sm:$0xff] %v11558_v0  ;;  %15470 = vst [vmem:[#allocation48_spill] sm:$0xff] %v11560_v35 }
 0x212   : > { %v11562_v40 = vpop.f32.mrf.mxu0  ;;  %v11564_v1 = vpop.f32.mrf.mxu1 }
 0x213   : > { %15471 = vst [vmem:[#allocation49_spill] sm:$0xff] %v11562_v40  ;;  %15472 = vst [vmem:[#allocation50_spill] sm:$0xff] %v11564_v1 }
 0x214   : > { %v11566_v2 = vpop.f32.mrf.mxu0  ;;  %v11568_v7 = vpop.f32.mrf.mxu1  ;;  %9606 = vmatmul.mubr.msk.bf16.gmra.mxu1 %vm1708_vm2, %v11159_v49 }
 0x215   : > { %15473 = vst [vmem:[#allocation51_spill] sm:$0xff] %v11566_v2  ;;  %15474 = vst [vmem:[#allocation52_spill] sm:$0xff] %v11568_v7  ;;  %9609 = vmatprep.mubr.msk.bf16.mxu1 %vm1708_vm2, %v11161_v50 }
 0x216   : > { %v11574_v32 = vpop.f32.mrf.mxu0  ;;  %9774 = vmatmul.mubr.msk.bf16.gmra.mxu0 %vm1708_vm2, %v11177_v4  ;;  %v11578_v0 = vpop.f32.mrf.mxu1 }
 0x217   : > { %15475 = vst [vmem:[#allocation53_spill] sm:$0xff] %v11574_v32  ;;  %15476 = vst [vmem:[#allocation54_spill] sm:$0xff] %v11578_v0  ;;  %9777 = vmatprep.mubr.msk.bf16.mxu0 %vm1708_vm2, %v11191_v22 }
 0x218   : > { %v11582_v40 = vpop.f32.mrf.mxu0  ;;  %v11584_v2 = vpop.f32.mrf.mxu1 }
 0x219   : > { %15477 = vst [vmem:[#allocation55_spill] sm:$0xff] %v11582_v40  ;;  %15478 = vst [vmem:[#allocation56_spill] sm:$0xff] %v11584_v2 }
 0x21a   : > { %v11586_v7 = vpop.f32.mrf.mxu0  ;;  %v11588_v1 = vpop.f32.mrf.mxu1 }
 0x21b   : > { %15479 = vst [vmem:[#allocation57_spill] sm:$0xff] %v11586_v7  ;;  %15480 = vst [vmem:[#allocation58_spill] sm:$0xff] %v11588_v1 }
 0x21c   : > { %v11590_v35 = vpop.f32.mrf.mxu0  ;;  %v11592_v36 = vpop.f32.mrf.mxu1  ;;  %9610 = vmatmul.mubr.msk.bf16.gmra.mxu1 %vm1708_vm2, %v11175_v3 }
 0x21d   : > { %15481 = vst [vmem:[#allocation59_spill] sm:$0xff] %v11590_v35  ;;  %15482 = vst [vmem:[#allocation60_spill] sm:$0xff] %v11592_v36  ;;  %9613 = vmatprep.mubr.msk.bf16.mxu1 %vm1708_vm2, %v11177_v4 }
 0x21e   : > { %v11598_v32 = vpop.f32.mrf.mxu0  ;;  %9778 = vmatmul.mubr.msk.bf16.gmra.mxu0 %vm1708_vm2, %v11193_v23  ;;  %v11602_v40 = vpop.f32.mrf.mxu1 }
 0x21f   : > { %15483 = vst [vmem:[#allocation61_spill] sm:$0xff] %v11598_v32  ;;  %15484 = vst [vmem:[#allocation62_spill] sm:$0xff] %v11602_v40  ;;  %9781 = vmatprep.mubr.msk.bf16.mxu0 %vm1708_vm2, %v11207_v47 }
 0x220   : > { %v11606_v7 = vpop.f32.mrf.mxu0  ;;  %v11608_v35 = vpop.f32.mrf.mxu1 }
 0x221   : > { %15485 = vst [vmem:[#allocation63_spill] sm:$0xff] %v11606_v7  ;;  %15486 = vst [vmem:[#allocation64_spill] sm:$0xff] %v11608_v35  ;;  %v1488_v35 = vadd.f32 %v11000_v31, %v11249_v30 }
 0x222   : > { %v11610_v36 = vpop.f32.mrf.mxu0  ;;  %v11612_v1 = vpop.f32.mrf.mxu1 }
 0x223   : > { %15487 = vst [vmem:[#allocation65_spill] sm:$0xff] %v11610_v36  ;;  %15488 = vst [vmem:[#allocation66_spill] sm:$0xff] %v11612_v1  ;;  %v1624_v30 = vmax.f32 %v1488_v35, 0.0 }
 0x224   : > { %v11614_v2 = vpop.f32.mrf.mxu0  ;;  %v11616_v0 = vpop.f32.mrf.mxu1  ;;  %9614 = vmatmul.mubr.msk.bf16.gmra.mxu1 %vm1708_vm2, %v11191_v22 }
 0x225   : > { %15489 = vst [vmem:[#allocation67_spill] sm:$0xff] %v11614_v2  ;;  %15490 = vst [vmem:[#allocation68_spill] sm:$0xff] %v11616_v0  ;;  %9617 = vmatprep.mubr.msk.bf16.mxu1 %vm1708_vm2, %v11193_v23 }
 0x226   : > { %v11622_v32 = vpop.f32.mrf.mxu0  ;;  %9782 = vmatmul.mubr.msk.bf16.gmra.mxu0 %vm1708_vm2, %v11211_v51  ;;  %v11626_v7 = vpop.f32.mrf.mxu1 }
 0x227   : > { %15491 = vst [vmem:[#allocation69_spill] sm:$0xff] %v11622_v32  ;;  %15492 = vst [vmem:[#allocation70_spill] sm:$0xff] %v11626_v7  ;;  %9785 = vmatprep.mubr.msk.bf16.mxu0 %vm1708_vm2, %v11230_v10  ;;  %v1491_v32 = vadd.f32 %v11000_v31, %v11263_v41 }
 0x228   : > { %v11630_v36 = vpop.f32.mrf.mxu0  ;;  %v11632_v2 = vpop.f32.mrf.mxu1 }
 0x229   : > { %15493 = vst [vmem:[#allocation71_spill] sm:$0xff] %v11630_v36  ;;  %15494 = vst [vmem:[#allocation72_spill] sm:$0xff] %v11632_v2 }
 0x22a   : > { %v11634_v0 = vpop.f32.mrf.mxu0  ;;  %v11636_v1 = vpop.f32.mrf.mxu1 }
 0x22b   : > { %15495 = vst [vmem:[#allocation73_spill] sm:$0xff] %v11634_v0  ;;  %15496 = vst [vmem:[#allocation74_spill] sm:$0xff] %v11636_v1  ;;  %v1625_v1 = vmax.f32 %v1491_v32, 0.0 }
 0x22c   : > { %v11642_v40 = vpop.f32.mrf.mxu0  ;;  %v11644_v7 = vpop.f32.mrf.mxu1  ;;  %9618 = vmatmul.mubr.msk.bf16.gmra.mxu1 %vm1708_vm2, %v11207_v47 }
 0x22d   : > { %15497 = vst [vmem:[#allocation75_spill] sm:$0xff] %v11642_v40  ;;  %15498 = vst [vmem:[#allocation76_spill] sm:$0xff] %v11644_v7  ;;  %9621 = vmatprep.mubr.msk.bf16.mxu1 %vm1708_vm2, %v11211_v51  ;;  %v11666_v2 = vpack.c.bf16 %v1625_v1, %v1624_v30 }
 0x22e   : > { %v11650_v36 = vpop.f32.mrf.mxu0  ;;  %9786 = vmatmul.mubr.msk.bf16.gmra.mxu0 %vm1708_vm2, %v11232_v15  ;;  %v11654_v0 = vpop.f32.mrf.mxu1 }
 0x22f   : > { %15499 = vst [vmem:[#allocation77_spill] sm:$0xff] %v11650_v36  ;;  %15500 = vst [vmem:[#allocation78_spill] sm:$0xff] %v11654_v0  ;;  %9789 = vmatprep.mubr.msk.bf16.mxu0 %vm1708_vm2, %v11381_v45 }
 0x230   : > { %v11658_v31 = vpop.f32.mrf.mxu0  ;;  %v11660_v41 = vpop.f32.mrf.mxu1  ;;  %15505 = vst [vmem:[#allocation83_spill] sm:$0xff] %v11666_v2 }
 0x231   : > { %15501 = vst [vmem:[#allocation79_spill] sm:$0xff] %v11658_v31  ;;  %15502 = vst [vmem:[#allocation80_spill] sm:$0xff] %v11660_v41 }
 0x232   : > { %v11662_v40 = vpop.f32.mrf.mxu0  ;;  %v11664_v7 = vpop.f32.mrf.mxu1 }
 0x233   : > { %15503 = vst [vmem:[#allocation81_spill] sm:$0xff] %v11662_v40  ;;  %15504 = vst [vmem:[#allocation82_spill] sm:$0xff] %v11664_v7 }
 0x234   : > { %v11668_v36 = vpop.f32.mrf.mxu0  ;;  %v11670_v54 = vpop.f32.mrf.mxu1  ;;  %9622 = vmatmul.mubr.msk.bf16.gmra.mxu1 %vm1708_vm2, %v11230_v10 }
 0x235   : > { %15506 = vst [vmem:[#allocation84_spill] sm:$0xff] %v11668_v36  ;;  %15507 = vst [vmem:[#allocation85_spill] sm:$0xff] %v11670_v54  ;;  %9625 = vmatprep.mubr.msk.bf16.mxu1 %vm1708_vm2, %v11232_v15 }
 0x236   : > { %v11676_v32 = vpop.f32.mrf.mxu0  ;;  %9790 = vmatmul.mubr.msk.bf16.gmra.mxu0 %vm1708_vm2, %v11246_v24  ;;  %v11680_v35 = vpop.f32.mrf.mxu1 }
 0x237   : > { %15508 = vst [vmem:[#allocation86_spill] sm:$0xff] %v11676_v32  ;;  %15509 = vst [vmem:[#allocation87_spill] sm:$0xff] %v11680_v35  ;;  %9793 = vmatprep.mubr.msk.bf16.mxu0 %vm1708_vm2, %v11666_v2 }
 0x238   : > { %v11684_v1 = vpop.f32.mrf.mxu0  ;;  %v11686_v30 = vpop.f32.mrf.mxu1 }
 0x239   : > { %15510 = vst [vmem:[#allocation88_spill] sm:$0xff] %v11684_v1  ;;  %15511 = vst [vmem:[#allocation89_spill] sm:$0xff] %v11686_v30 }
 0x23a   : > { %v11688_v36 = vpop.f32.mrf.mxu0  ;;  %v11690_v40 = vpop.f32.mrf.mxu1 }
 0x23b   : > { %15512 = vst [vmem:[#allocation90_spill] sm:$0xff] %v11688_v36  ;;  %15513 = vst [vmem:[#allocation91_spill] sm:$0xff] %v11690_v40 }
 0x23c   : > { %v11692_v54 = vpop.f32.mrf.mxu0  ;;  %v9459_v31 = vpop.f32.mrf.mxu1  ;;  %9626 = vmatmul.mubr.msk.bf16.gmra.mxu1 %vm1708_vm2, %v11381_v45 }
 0x23d   : > { %15514 = vst [vmem:[#allocation92_spill] sm:$0xff] %v11692_v54  ;;  %9693 = vmatprep.mubr.msk.bf16.mxu1 %vm1708_vm2, %v11047_v9  ;;  %v10379_v31 = vld [vmem:[%s15312_s4 + $0xf0] sm:$0xff]  }
 0x23e   : > { %v9571_v32 = vpop.f32.mrf.mxu0  ;;  %9794 = vmatmul.mubr.msk.bf16.gmra.mxu0 %vm1708_vm2, %v11273_v18  ;;  %v1991_v1 = vpop.f32.mrf.mxu1 }
 0x23f   : > { %9861 = vmatprep.mubr.msk.bf16.mxu0 %vm1708_vm2, %v11089_v43 }
 0x240   : > { %v2496_v36 = vpop.f32.mrf.mxu0  ;;  %v9460_v30 = vpop.f32.mrf.mxu1 }
 0x242   : > { %v9572_v40 = vpop.f32.mrf.mxu0  ;;  %v1993_v35 = vpop.f32.mrf.mxu1 }
 0x243   : > { %v10381_v35 = vld [vmem:[%s15312_s4 + $0xe0] sm:$0xff]  }
 0x244   : > { %v2498_v54 = vpop.f32.mrf.mxu0  ;;  %v11705_v7 = vpop.f32.mrf.mxu1  ;;  %9694 = vmatmul.mubr.msk.bf16.vlgmr.msra.gmra.mxu1 %vm1708_vm2, %v11072_v25 }
 0x245   : > { %9798 = vmatpush3.bf16.msra.mxu1 %v11457_v8  ;;  %9697 = vmatprep.mubr.msk.bf16.mxu1 %vm1708_vm2, %v11075_v26  ;;  %v10380_v54 = vld [vmem:[%s15312_s4 + $0xe8] sm:$0xff]  }
 0x246   : > { %v11712_v9 = vpop.f32.mrf.mxu0  ;;  %9862 = vmatmul.mubr.msk.bf16.vlgmr.msra.gmra.mxu0 %vm1708_vm2, %v11091_v44  ;;  %v11716_v40 = vpop.f32.mrf.mxu1  ;;  %9799 = vmatprep.subr.bf16.mxu1 %v10379_v31 }
 0x247   : > { %15515 = vst [vmem:[#allocation93_spill] sm:$0xff] %v11712_v9  ;;  %9865 = vmatprep.mubr.msk.bf16.mxu0 %vm1708_vm2, %v11105_v59 }
 0x248   : > { %v11723_v25 = vpop.f32.mrf.mxu0  ;;  %v11725_v8 = vpop.f32.mrf.mxu1 }
 0x249   : > { %15516 = vst [vmem:[#allocation94_spill] sm:$0xff] %v11723_v25  ;;  %9800 = vmatpush3.bf16.msra.mxu1 %v10379_v31 }
 0x24a   : > { %v11727_v36 = vpop.f32.mrf.mxu0  ;;  %v11729_v32 = vpop.f32.mrf.mxu1  ;;  %9801 = vmatprep.subr.bf16.mxu1 %v10380_v54 }
 0x24b   : > { %15517 = vst [vmem:[#allocation95_spill] sm:$0xff] %v11727_v36 }
 0x24c   : > { %v11734_v1 = vpop.f32.mrf.mxu0  ;;  %v11736_v30 = vpop.f32.mrf.mxu1  ;;  %9698 = vmatmul.mubr.msk.bf16.gmra.mxu1 %vm1708_vm2, %v11089_v43 }
 0x24d   : > { %15518 = vst [vmem:[#allocation96_spill] sm:$0xff] %v11734_v1  ;;  %9701 = vmatprep.mubr.msk.bf16.mxu1 %vm1708_vm2, %v11091_v44  ;;  %9802 = vmatpush3.bf16.msra.mxu1 %v10380_v54  ;;  %v11751_v1 = vld [vmem:[%s15312_s4 + $0x138] sm:$0xff]  }
 0x24e   : > { %v11742_v31 = vpop.f32.mrf.mxu0  ;;  %9866 = vmatmul.mubr.msk.bf16.gmra.mxu0 %vm1708_vm2, %v11107_v60  ;;  %v11746_v36 = vpop.f32.mrf.mxu1  ;;  %9803 = vmatprep.subr.bf16.mxu1 %v10381_v35 }
 0x24f   : > { %15519 = vst [vmem:[#allocation97_spill] sm:$0xff] %v11742_v31  ;;  %9869 = vmatprep.mubr.msk.bf16.mxu0 %vm1708_vm2, %v11121_v11 }
 0x250   : > { %v11755_v25 = vpop.f32.mrf.mxu0  ;;  %v11757_v9 = vpop.f32.mrf.mxu1 }
 0x251   : > { %15520 = vst [vmem:[#allocation98_spill] sm:$0xff] %v11755_v25  ;;  %9804 = vmatpush3.bf16.msra.mxu1 %v10381_v35 }
 0x252   : > { %v11759_v54 = vpop.f32.mrf.mxu0  ;;  %v11761_v31 = vpop.f32.mrf.mxu1  ;;  %9909 = vmatprep.subr.bf16.mxu1 %v11751_v1 }
 0x253   : > { %15521 = vst [vmem:[#allocation99_spill] sm:$0xff] %v11759_v54 }
 0x254   : > { %v11764_v41 = vpop.f32.mrf.mxu0  ;;  %v11766_v0 = vpop.f32.mrf.mxu1  ;;  %9702 = vmatmul.mubr.msk.bf16.gmra.mxu1 %vm1708_vm2, %v11105_v59 }
 0x255   : > { %15522 = vst [vmem:[#allocation100_spill] sm:$0xff] %v11764_v41  ;;  %9705 = vmatprep.mubr.msk.bf16.mxu1 %vm1708_vm2, %v11107_v60 }
 0x256   : > { %v11772_v25 = vpop.f32.mrf.mxu0  ;;  %9870 = vmatmul.mubr.msk.bf16.gmra.mxu0 %vm1708_vm2, %v11123_v12  ;;  %v11776_v35 = vpop.f32.mrf.mxu1 }
 0x257   : > { %15523 = vst [vmem:[#allocation101_spill] sm:$0xff] %v11772_v25  ;;  %9873 = vmatprep.mubr.msk.bf16.mxu0 %vm1708_vm2, %v11137_v28 }
 0x258   : > { %v11780_v54 = vpop.f32.mrf.mxu0  ;;  %v11782_v41 = vpop.f32.mrf.mxu1 }
 0x259   : > { %15524 = vst [vmem:[#allocation102_spill] sm:$0xff] %v11780_v54 }
 0x25a   : > { %v11784_v38 = vpop.f32.mrf.mxu0  ;;  %v11786_v42 = vpop.f32.mrf.mxu1 }
 0x25b   : > { %15525 = vst [vmem:[#allocation103_spill] sm:$0xff] %v11784_v38  ;;  %15526 = vst [vmem:[#allocation104_spill] sm:$0xff] %v11786_v42 }
 0x25c   : > { %v11788_v34 = vpop.f32.mrf.mxu0  ;;  %v11790_v39 = vpop.f32.mrf.mxu1  ;;  %9706 = vmatmul.mubr.msk.bf16.gmra.mxu1 %vm1708_vm2, %v11121_v11 }
 0x25d   : > { %15527 = vst [vmem:[#allocation105_spill] sm:$0xff] %v11788_v34  ;;  %15528 = vst [vmem:[#allocation106_spill] sm:$0xff] %v11790_v39  ;;  %9709 = vmatprep.mubr.msk.bf16.mxu1 %vm1708_vm2, %v11123_v12 }
 0x25e   : > { %v11796_v25 = vpop.f32.mrf.mxu0  ;;  %9874 = vmatmul.mubr.msk.bf16.gmra.mxu0 %vm1708_vm2, %v11139_v29  ;;  %v11800_v54 = vpop.f32.mrf.mxu1 }
 0x25f   : > { %15529 = vst [vmem:[#allocation107_spill] sm:$0xff] %v11796_v25  ;;  %9877 = vmatprep.mubr.msk.bf16.mxu0 %vm1708_vm2, %v11159_v49 }
 0x260   : > { %v11804_v38 = vpop.f32.mrf.mxu0  ;;  %v11806_v34 = vpop.f32.mrf.mxu1 }
 0x261   : > { %15530 = vst [vmem:[#allocation108_spill] sm:$0xff] %v11804_v38 }
 0x262   : > { %v11808_v39 = vpop.f32.mrf.mxu0  ;;  %v11810_v42 = vpop.f32.mrf.mxu1 }
 0x263   : > { %15531 = vst [vmem:[#allocation109_spill] sm:$0xff] %v11808_v39  ;;  %15532 = vst [vmem:[#allocation110_spill] sm:$0xff] %v11810_v42 }
 0x264   : > { %v11812_v11 = vpop.f32.mrf.mxu0  ;;  %v11814_v12 = vpop.f32.mrf.mxu1  ;;  %9710 = vmatmul.mubr.msk.bf16.gmra.mxu1 %vm1708_vm2, %v11137_v28 }
 0x265   : > { %15533 = vst [vmem:[#allocation111_spill] sm:$0xff] %v11812_v11  ;;  %15534 = vst [vmem:[#allocation112_spill] sm:$0xff] %v11814_v12  ;;  %9713 = vmatprep.mubr.msk.bf16.mxu1 %vm1708_vm2, %v11139_v29 }
 0x266   : > { %v11820_v25 = vpop.f32.mrf.mxu0  ;;  %9878 = vmatmul.mubr.msk.bf16.gmra.mxu0 %vm1708_vm2, %v11161_v50  ;;  %v11824_v38 = vpop.f32.mrf.mxu1 }
 0x267   : > { %15535 = vst [vmem:[#allocation113_spill] sm:$0xff] %v11820_v25  ;;  %9881 = vmatprep.mubr.msk.bf16.mxu0 %vm1708_vm2, %v11175_v3 }
 0x268   : > { %v11828_v39 = vpop.f32.mrf.mxu0  ;;  %v11830_v11 = vpop.f32.mrf.mxu1 }
 0x269   : > { %15536 = vst [vmem:[#allocation114_spill] sm:$0xff] %v11828_v39 }
 0x26a   : > { %v11832_v12 = vpop.f32.mrf.mxu0  ;;  %v11834_v42 = vpop.f32.mrf.mxu1 }
 0x26b   : > { %15537 = vst [vmem:[#allocation115_spill] sm:$0xff] %v11832_v12  ;;  %15538 = vst [vmem:[#allocation116_spill] sm:$0xff] %v11834_v42 }
 0x26c   : > { %v11836_v28 = vpop.f32.mrf.mxu0  ;;  %v11838_v29 = vpop.f32.mrf.mxu1  ;;  %9714 = vmatmul.mubr.msk.bf16.gmra.mxu1 %vm1708_vm2, %v11159_v49 }
 0x26d   : > { %15539 = vst [vmem:[#allocation117_spill] sm:$0xff] %v11836_v28  ;;  %15540 = vst [vmem:[#allocation118_spill] sm:$0xff] %v11838_v29  ;;  %9717 = vmatprep.mubr.msk.bf16.mxu1 %vm1708_vm2, %v11161_v50 }
 0x26e   : > { %v11844_v25 = vpop.f32.mrf.mxu0  ;;  %9882 = vmatmul.mubr.msk.bf16.gmra.mxu0 %vm1708_vm2, %v11177_v4  ;;  %v11848_v39 = vpop.f32.mrf.mxu1 }
 0x26f   : > { %15541 = vst [vmem:[#allocation119_spill] sm:$0xff] %v11844_v25  ;;  %9885 = vmatprep.mubr.msk.bf16.mxu0 %vm1708_vm2, %v11191_v22 }
 0x270   : > { %v11852_v12 = vpop.f32.mrf.mxu0  ;;  %v11854_v28 = vpop.f32.mrf.mxu1 }
 0x271   : > { %15542 = vst [vmem:[#allocation120_spill] sm:$0xff] %v11852_v12 }
 0x272   : > { %v11856_v29 = vpop.f32.mrf.mxu0  ;;  %v11858_v42 = vpop.f32.mrf.mxu1 }
 0x273   : > { %15543 = vst [vmem:[#allocation121_spill] sm:$0xff] %v11856_v29  ;;  %15544 = vst [vmem:[#allocation122_spill] sm:$0xff] %v11858_v42 }
 0x274   : > { %v11860_v49 = vpop.f32.mrf.mxu0  ;;  %v11862_v50 = vpop.f32.mrf.mxu1  ;;  %9718 = vmatmul.mubr.msk.bf16.gmra.mxu1 %vm1708_vm2, %v11175_v3 }
 0x275   : > { %15545 = vst [vmem:[#allocation123_spill] sm:$0xff] %v11860_v49  ;;  %15546 = vst [vmem:[#allocation124_spill] sm:$0xff] %v11862_v50  ;;  %9721 = vmatprep.mubr.msk.bf16.mxu1 %vm1708_vm2, %v11177_v4 }
 0x276   : > { %v11868_v25 = vpop.f32.mrf.mxu0  ;;  %9886 = vmatmul.mubr.msk.bf16.gmra.mxu0 %vm1708_vm2, %v11193_v23  ;;  %v11872_v12 = vpop.f32.mrf.mxu1 }
 0x277   : > { %15547 = vst [vmem:[#allocation125_spill] sm:$0xff] %v11868_v25  ;;  %9889 = vmatprep.mubr.msk.bf16.mxu0 %vm1708_vm2, %v11207_v47 }
 0x278   : > { %v11876_v29 = vpop.f32.mrf.mxu0  ;;  %v11878_v49 = vpop.f32.mrf.mxu1 }
 0x279   : > { %15548 = vst [vmem:[#allocation126_spill] sm:$0xff] %v11876_v29 }
 0x27a   : > { %v11880_v50 = vpop.f32.mrf.mxu0  ;;  %v11882_v42 = vpop.f32.mrf.mxu1 }
 0x27b   : > { %15549 = vst [vmem:[#allocation127_spill] sm:$0xff] %v11880_v50  ;;  %15550 = vst [vmem:[#allocation128_spill] sm:$0xff] %v11882_v42 }
 0x27c   : > { %v11884_v3 = vpop.f32.mrf.mxu0  ;;  %v11886_v4 = vpop.f32.mrf.mxu1  ;;  %9722 = vmatmul.mubr.msk.bf16.gmra.mxu1 %vm1708_vm2, %v11191_v22 }
 0x27d   : > { %15551 = vst [vmem:[#allocation129_spill] sm:$0xff] %v11884_v3  ;;  %15552 = vst [vmem:[#allocation130_spill] sm:$0xff] %v11886_v4  ;;  %9725 = vmatprep.mubr.msk.bf16.mxu1 %vm1708_vm2, %v11193_v23 }
 0x27e   : > { %v11892_v25 = vpop.f32.mrf.mxu0  ;;  %9890 = vmatmul.mubr.msk.bf16.gmra.mxu0 %vm1708_vm2, %v11211_v51  ;;  %v11896_v29 = vpop.f32.mrf.mxu1 }
 0x27f   : > { %15553 = vst [vmem:[#allocation131_spill] sm:$0xff] %v11892_v25  ;;  %9893 = vmatprep.mubr.msk.bf16.mxu0 %vm1708_vm2, %v11230_v10 }
 0x280   : > { %v11900_v50 = vpop.f32.mrf.mxu0  ;;  %v11902_v3 = vpop.f32.mrf.mxu1 }
 0x281   : > { %15554 = vst [vmem:[#allocation132_spill] sm:$0xff] %v11900_v50 }
 0x282   : > { %v11904_v4 = vpop.f32.mrf.mxu0  ;;  %v11906_v42 = vpop.f32.mrf.mxu1 }
 0x283   : > { %15555 = vst [vmem:[#allocation133_spill] sm:$0xff] %v11904_v4  ;;  %15556 = vst [vmem:[#allocation134_spill] sm:$0xff] %v11906_v42 }
 0x284   : > { %v11908_v22 = vpop.f32.mrf.mxu0  ;;  %v11910_v23 = vpop.f32.mrf.mxu1  ;;  %9726 = vmatmul.mubr.msk.bf16.gmra.mxu1 %vm1708_vm2, %v11207_v47 }
 0x285   : > { %15557 = vst [vmem:[#allocation135_spill] sm:$0xff] %v11908_v22  ;;  %15558 = vst [vmem:[#allocation136_spill] sm:$0xff] %v11910_v23  ;;  %9729 = vmatprep.mubr.msk.bf16.mxu1 %vm1708_vm2, %v11211_v51 }
 0x286   : > { %v11916_v25 = vpop.f32.mrf.mxu0  ;;  %9894 = vmatmul.mubr.msk.bf16.gmra.mxu0 %vm1708_vm2, %v11232_v15  ;;  %v11920_v50 = vpop.f32.mrf.mxu1 }
 0x287   : > { %15559 = vst [vmem:[#allocation137_spill] sm:$0xff] %v11916_v25  ;;  %9897 = vmatprep.mubr.msk.bf16.mxu0 %vm1708_vm2, %v11381_v45  ;;  %v11941_v25 = vld [vmem:[%s15427_s3] ss:$0 sm:$0xff]  ;;  %s793_s3 = scalar_lea.vmem %s15309_s1, %s8100_s29  ;;  %s15262_s29 = scalar_lea.hbm %s15320_s12, %s8896_s18 }
 0x288   : > { %v11924_v4 = vpop.f32.mrf.mxu0  ;;  %v11926_v22 = vpop.f32.mrf.mxu1  ;;  %15566 = vst [vmem:[#allocation144_spill] sm:$0xff] %v11941_v25 }
 0x289   : > { %15560 = vst [vmem:[#allocation138_spill] sm:$0xff] %v11924_v4  ;;  %15561 = vst [vmem:[#allocation139_spill] sm:$0xff] %v11926_v22  ;;  %v1504_v4 = vadd.f32 %v11941_v25, %v11279_v48 }
 0x28a   : > { %v11928_v23 = vpop.f32.mrf.mxu0  ;;  %v11930_v42 = vpop.f32.mrf.mxu1 }
 0x28b   : > { %15562 = vst [vmem:[#allocation140_spill] sm:$0xff] %v11928_v23  ;;  %15563 = vst [vmem:[#allocation141_spill] sm:$0xff] %v11930_v42  ;;  %v1507_v23 = vadd.f32 %v11941_v25, %v11292_v58  ;;  %v1628_v48 = vmax.f32 %v1504_v4, 0.0 }
 0x28c   : > { %v11932_v47 = vpop.f32.mrf.mxu0  ;;  %v11934_v51 = vpop.f32.mrf.mxu1  ;;  %9730 = vmatmul.mubr.msk.bf16.gmra.mxu1 %vm1708_vm2, %v11230_v10 }
 0x28d   : > { %15564 = vst [vmem:[#allocation142_spill] sm:$0xff] %v11932_v47  ;;  %15565 = vst [vmem:[#allocation143_spill] sm:$0xff] %v11934_v51  ;;  %9733 = vmatprep.mubr.msk.bf16.mxu1 %vm1708_vm2, %v11232_v15  ;;  %v1629_v22 = vmax.f32 %v1507_v23, 0.0 }
 0x28e   : > { %v11949_v47 = vpop.f32.mrf.mxu0  ;;  %9898 = vmatmul.mubr.msk.bf16.gmra.mxu0 %vm1708_vm2, %v11246_v24  ;;  %v11953_v51 = vpop.f32.mrf.mxu1 }
 0x28f   : > { %15567 = vst [vmem:[#allocation145_spill] sm:$0xff] %v11949_v47  ;;  %15568 = vst [vmem:[#allocation146_spill] sm:$0xff] %v11953_v51  ;;  %9901 = vmatprep.mubr.msk.bf16.mxu0 %vm1708_vm2, %v11666_v2  ;;  %v11971_v51 = vpack.c.bf16 %v1629_v22, %v1628_v48 }
 0x290   : > { %v11957_v42 = vpop.f32.mrf.mxu0  ;;  %v11959_v10 = vpop.f32.mrf.mxu1 }
 0x291   : > { %15569 = vst [vmem:[#allocation147_spill] sm:$0xff] %v11957_v42  ;;  %15573 = vst [vmem:[#allocation151_spill] sm:$0xff] %v11971_v51 }
 0x292   : > { %v11961_v58 = vpop.f32.mrf.mxu0  ;;  %v11963_v25 = vpop.f32.mrf.mxu1 }
 0x293   : > { %15570 = vst [vmem:[#allocation148_spill] sm:$0xff] %v11961_v58 }
 0x294   : > { %v11965_v15 = vpop.f32.mrf.mxu0  ;;  %v11967_v47 = vpop.f32.mrf.mxu1  ;;  %9734 = vmatmul.mubr.msk.bf16.gmra.mxu1 %vm1708_vm2, %v11381_v45 }
 0x295   : > { %15571 = vst [vmem:[#allocation149_spill] sm:$0xff] %v11965_v15  ;;  %15572 = vst [vmem:[#allocation150_spill] sm:$0xff] %v11967_v47  ;;  %9737 = vmatprep.mubr.msk.bf16.mxu1 %vm1708_vm2, %v11246_v24 }
 0x296   : > { %v11975_v42 = vpop.f32.mrf.mxu0  ;;  %9902 = vmatmul.mubr.msk.bf16.gmra.mxu0 %vm1708_vm2, %v11273_v18  ;;  %v11979_v4 = vpop.f32.mrf.mxu1 }
 0x297   : > { %15574 = vst [vmem:[#allocation152_spill] sm:$0xff] %v11975_v42  ;;  %9905 = vmatprep.mubr.msk.bf16.mxu0 %vm1708_vm2, %v11971_v51  ;;  %v2072_v51 = vadd.f32 %v11705_v7, %v11402_v19 }
 0x298   : > { %v11983_v23 = vpop.f32.mrf.mxu0  ;;  %v11985_v15 = vpop.f32.mrf.mxu1 }
 0x299   : > { %15575 = vst [vmem:[#allocation153_spill] sm:$0xff] %v11983_v23 }
 0x29a   : > { %v11987_v58 = vpop.f32.mrf.mxu0  ;;  %v11989_v22 = vpop.f32.mrf.mxu1 }
 0x29b   : > { %15576 = vst [vmem:[#allocation154_spill] sm:$0xff] %v11987_v58  ;;  %15577 = vst [vmem:[#allocation155_spill] sm:$0xff] %v11989_v22 }
 0x29c   : > { %v11991_v48 = vpop.f32.mrf.mxu0  ;;  %v9515_v47 = vpop.f32.mrf.mxu1  ;;  %9738 = vmatmul.mubr.msk.bf16.gmra.mxu1 %vm1708_vm2, %v11666_v2  ;;  %v10383_v2 = vld [vmem:[%s15312_s4 + $0x130] sm:$0xff]  }
 0x29d   : > { %15578 = vst [vmem:[#allocation156_spill] sm:$0xff] %v11991_v48  ;;  %9805 = vmatprep.mubr.msk.bf16.mxu1 %vm1708_vm2, %v11075_v26  ;;  %v2064_v48 = vadd.f32 %v11716_v40, %v11416_v46  ;;  %v2075_v26 = vadd.f32 %v11725_v8, %v11425_v53 }
 0x29e   : > { %v9683_v42 = vpop.f32.mrf.mxu0  ;;  %9906 = vmatmul.mubr.msk.bf16.gmra.mxu0 %vm1708_vm2, %v11303_v63  ;;  %v2239_v23 = vpop.f32.mrf.mxu1 }
 0x29f   : > { %v2509_v42 = vadd.f32 %v11412_v56, %v2072_v51  ;;  %v2507_v46 = vadd.f32 %v11423_v52, %v2064_v48  ;;  %v2088_v56 = vadd.f32 %v11736_v30, %v11439_v62  ;;  %v2080_v52 = vadd.f32 %v11746_v36, %v11452_v6  ;;  %v10385_v62 = vld [vmem:[%s15312_s4 + $0x120] sm:$0xff]  }
 0x2a0   : > { %v3098_v58 = vpop.f32.mrf.mxu0  ;;  %v9516_v18 = vpop.f32.mrf.mxu1  ;;  %v2104_v48 = vadd.f32 %v11766_v0, %v11472_v21  ;;  %v2107_v0 = vadd.f32 %v11782_v41, %v11488_v37 }
 0x2a1   : > { %v2067_v18 = vadd.f32 %v11729_v32, %v11432_v57  ;;  %v2510_v57 = vadd.f32 %v11430_v55, %v2075_v26  ;;  %v2091_v55 = vadd.f32 %v11757_v9, %v11463_v14  ;;  %v2513_v6 = vadd.f32 %v11448_v5, %v2088_v56  ;;  %v15587_v56 = vld [vmem:[#allocation6_spill] sm:$0xff] }
 0x2a2   : > { %v9684_v47 = vpop.f32.mrf.mxu0  ;;  %v2241_v22 = vpop.f32.mrf.mxu1  ;;  %v2511_v14 = vadd.f32 %v11461_v13, %v2080_v52  ;;  %v15591_v52 = vld [vmem:[#allocation24_spill] sm:$0xff] }
 0x2a3   : > { %v2508_v32 = vadd.f32 %v11437_v61, %v2067_v18  ;;  %v2514_v26 = vadd.f32 %v11465_v16, %v2091_v55  ;;  %v2517_v16 = vadd.f32 %v11478_v27, %v2104_v48  ;;  %v15593_v27 = vld [vmem:[#allocation28_spill] sm:$0xff] }
 0x2a4   : > { %v3100_v23 = vpop.f32.mrf.mxu0  ;;  %v9583_v63 = vpop.f32.mrf.mxu1  ;;  %9806 = vmatmul.mubr.msk.bf16.vlgmr.msra.gmra.mxu1 %vm1708_vm2, %v11089_v43  ;;  %v10384_v43 = vld [vmem:[%s15312_s4 + $0x128] sm:$0xff]  }
 0x2a5   : > { %v12013_v19 = vadd.f32 %v9583_v63, %v2509_v42  ;;  %9910 = vmatpush3.bf16.msra.mxu1 %v11751_v1  ;;  %9809 = vmatprep.mubr.msk.bf16.mxu1 %vm1708_vm2, %v11091_v44  ;;  %v2096_v42 = vadd.f32 %v11776_v35, %v11482_v33  ;;  %v15588_v33 = vld [vmem:[#allocation26_spill] sm:$0xff]  ;;  %v15589_v35 = vld [vmem:[#allocation104_spill] sm:$0xff] }
 0x2a6   : > { %v12019_v53 = vpop.f32.mrf.mxu0  ;;  %v2621_v51 = vpop.f32.mrf.mxu1  ;;  %9911 = vmatprep.subr.bf16.mxu1 %v10383_v2 }
 0x2a7   : > { %15579 = vst [vmem:[#allocation157_spill] sm:$0xff] %v12019_v53  ;;  %v12026_v63 = vadd.f32 %v2621_v51, %v2507_v46  ;;  %v2515_v37 = vadd.f32 %v15591_v52, %v2096_v42 }
 0x2a8   : > { %v12029_v7 = vpop.f32.mrf.mxu0  ;;  %v9584_v40 = vpop.f32.mrf.mxu1 }
 0x2a9   : > { %15580 = vst [vmem:[#allocation158_spill] sm:$0xff] %v12029_v7  ;;  %v12033_v8 = vadd.f32 %v9584_v40, %v2510_v57  ;;  %9912 = vmatpush3.bf16.msra.mxu1 %v10383_v2  ;;  %v2083_v2 = vadd.f32 %v11761_v31, %v11467_v17  ;;  %v15590_v40 = vld [vmem:[#allocation7_spill] sm:$0xff]  ;;  %v15649_v7 = vld [vmem:[#allocation56_spill] sm:$0xff] }
 0x2aa   : > { %v12036_v1 = vpop.f32.mrf.mxu0  ;;  %v2624_v58 = vpop.f32.mrf.mxu1  ;;  %9913 = vmatprep.subr.bf16.mxu1 %v10384_v43 }
 0x2ab   : > { %15581 = vst [vmem:[#allocation159_spill] sm:$0xff] %v12036_v1  ;;  %v12043_v30 = vadd.f32 %v2624_v58, %v2508_v32  ;;  %v2512_v13 = vadd.f32 %v11470_v20, %v2083_v2  ;;  %v2099_v20 = vadd.f32 %v15589_v35, %v15588_v33  ;;  %v15594_v58 = vld [vmem:[#allocation106_spill] sm:$0xff]  ;;  %v15601_v35 = vld [vmem:[#allocation29_spill] sm:$0xff]  ;;  %v15647_v1 = vld [vmem:[#allocation51_spill] sm:$0xff] }
 0x2ac   : > { %v12046_v36 = vpop.f32.mrf.mxu0  ;;  %v9587_v22 = vpop.f32.mrf.mxu1  ;;  %9810 = vmatmul.mubr.msk.bf16.gmra.mxu1 %vm1708_vm2, %v11105_v59 }
 0x2ad   : > { %15582 = vst [vmem:[#allocation160_spill] sm:$0xff] %v12046_v36  ;;  %v12052_v61 = vadd.f32 %v9587_v22, %v2513_v6  ;;  %9813 = vmatprep.mubr.msk.bf16.mxu1 %vm1708_vm2, %v11107_v60  ;;  %9914 = vmatpush3.bf16.msra.mxu1 %v10384_v43  ;;  %v15595_v6 = vld [vmem:[#allocation25_spill] sm:$0xff]  ;;  %v15614_v36 = vld [vmem:[#allocation35_spill] sm:$0xff] }
 0x2ae   : > { %v12057_v9 = vpop.f32.mrf.mxu0  ;;  %v2637_v5 = vpop.f32.mrf.mxu1  ;;  %9915 = vmatprep.subr.bf16.mxu1 %v10385_v62  ;;  %v2518_v22 = vadd.f32 %v15595_v6, %v2107_v0  ;;  %v15606_v6 = vld [vmem:[#allocation9_spill] sm:$0xff] }
 0x2af   : > { %15583 = vst [vmem:[#allocation161_spill] sm:$0xff] %v12057_v9  ;;  %v12061_v47 = vadd.f32 %v2637_v5, %v2511_v14  ;;  %v15597_v5 = vld [vmem:[#allocation30_spill] sm:$0xff] }
 0x2b0   : > { %v12064_v17 = vpop.f32.mrf.mxu0  ;;  %v9588_v31 = vpop.f32.mrf.mxu1  ;;  %v2112_v48 = vadd.f32 %v11800_v54, %v15597_v5  ;;  %v15604_v54 = vld [vmem:[#allocation34_spill] sm:$0xff] }
 0x2b1   : > { %15584 = vst [vmem:[#allocation162_spill] sm:$0xff] %v12064_v17  ;;  %v12068_v23 = vadd.f32 %v9588_v31, %v2514_v26  ;;  %9916 = vmatpush3.bf16.msra.mxu1 %v10385_v62  ;;  %v2120_v62 = vadd.f32 %v15594_v58, %v15593_v27  ;;  %v15598_v31 = vld [vmem:[#allocation27_spill] sm:$0xff]  ;;  %v15605_v27 = vld [vmem:[#allocation110_spill] sm:$0xff] }
 0x2b2   : > { %v12071_v18 = vpop.f32.mrf.mxu0  ;;  %v2640_v46 = vpop.f32.mrf.mxu1  ;;  %v2516_v42 = vadd.f32 %v15598_v31, %v2099_v20  ;;  %v2115_v58 = vadd.f32 %v15605_v27, %v15604_v54  ;;  %v15610_v31 = vld [vmem:[#allocation112_spill] sm:$0xff] }
 0x2b3   : > { %15585 = vst [vmem:[#allocation163_spill] sm:$0xff] %v12071_v18  ;;  %v12075_v21 = vadd.f32 %v2640_v46, %v2512_v13  ;;  %v2521_v0 = vadd.f32 %v15601_v35, %v2120_v62  ;;  %v15609_v62 = vld [vmem:[#allocation36_spill] sm:$0xff] }
 0x2b4   : > { %v12078_v51 = vpop.f32.mrf.mxu0  ;;  %v9591_v43 = vpop.f32.mrf.mxu1  ;;  %9814 = vmatmul.mubr.msk.bf16.gmra.mxu1 %vm1708_vm2, %v15587_v56  ;;  %v15632_v18 = vld [vmem:[#allocation48_spill] sm:$0xff] }
 0x2b5   : > { %15586 = vst [vmem:[#allocation164_spill] sm:$0xff] %v12078_v51  ;;  %v12084_v57 = vadd.f32 %v9591_v43, %v2517_v16  ;;  %9817 = vmatprep.mubr.msk.bf16.mxu1 %vm1708_vm2, %v15590_v40  ;;  %v15600_v16 = vld [vmem:[#allocation32_spill] sm:$0xff] }
 0x2b6   : > { %v12089_v41 = vpop.f32.mrf.mxu0  ;;  %v2653_v32 = vpop.f32.mrf.mxu1  ;;  %v2123_v43 = vadd.f32 %v11806_v34, %v15600_v16  ;;  %v15611_v16 = vld [vmem:[#allocation33_spill] sm:$0xff] }
 0x2b7   : > { %15592 = vst [vmem:[#allocation6_spill] sm:$0xff] %v12089_v41  ;;  %v12093_v55 = vadd.f32 %v2653_v32, %v2515_v37  ;;  %v15603_v32 = vld [vmem:[#allocation8_spill] sm:$0xff]  ;;  %v15630_v41 = vld [vmem:[#allocation43_spill] sm:$0xff] }
 0x2b8   : > { %v12096_v2 = vpop.f32.mrf.mxu0  ;;  %v9592_v14 = vpop.f32.mrf.mxu1  ;;  %v2522_v35 = vadd.f32 %v15611_v16, %v2123_v43 }
 0x2b9   : > { %15596 = vst [vmem:[#allocation26_spill] sm:$0xff] %v12096_v2  ;;  %v12100_v26 = vadd.f32 %v9592_v14, %v2518_v22  ;;  %v15607_v22 = vld [vmem:[#allocation31_spill] sm:$0xff] }
 0x2ba   : > { %v12103_v13 = vpop.f32.mrf.mxu0  ;;  %v2656_v46 = vpop.f32.mrf.mxu1  ;;  %v2519_v34 = vadd.f32 %v15607_v22, %v2112_v48  ;;  %v2520_v48 = vadd.f32 %v15614_v36, %v2115_v58  ;;  %v15622_v58 = vld [vmem:[#allocation11_spill] sm:$0xff] }
 0x2bb   : > { %15599 = vst [vmem:[#allocation104_spill] sm:$0xff] %v12103_v13  ;;  %v12107_v33 = vadd.f32 %v2656_v46, %v2516_v42  ;;  %v2136_v42 = vadd.f32 %v15610_v31, %v15609_v62 }
 0x2bc   : > { %v12110_v52 = vpop.f32.mrf.mxu0  ;;  %v9595_v37 = vpop.f32.mrf.mxu1  ;;  %9818 = vmatmul.mubr.msk.bf16.gmra.mxu1 %vm1708_vm2, %v15603_v32 }
 0x2bd   : > { %15602 = vst [vmem:[#allocation7_spill] sm:$0xff] %v12110_v52  ;;  %v12116_v20 = vadd.f32 %v9595_v37, %v2521_v0  ;;  %9821 = vmatprep.mubr.msk.bf16.mxu1 %vm1708_vm2, %v15606_v6  ;;  %v15613_v0 = vld [vmem:[#allocation38_spill] sm:$0xff]  ;;  %v15616_v52 = vld [vmem:[#allocation40_spill] sm:$0xff] }
 0x2be   : > { %v12121_v14 = vpop.f32.mrf.mxu0  ;;  %v2669_v5 = vpop.f32.mrf.mxu1  ;;  %v2128_v37 = vadd.f32 %v11824_v38, %v15613_v0  ;;  %v2139_v62 = vadd.f32 %v11830_v11, %v15616_v52  ;;  %v15620_v38 = vld [vmem:[#allocation42_spill] sm:$0xff]  ;;  %v15623_v0 = vld [vmem:[#allocation39_spill] sm:$0xff] }
 0x2bf   : > { %15608 = vst [vmem:[#allocation24_spill] sm:$0xff] %v12121_v14  ;;  %v12125_v46 = vadd.f32 %v2669_v5, %v2519_v34  ;;  %v15617_v5 = vld [vmem:[#allocation37_spill] sm:$0xff] }
 0x2c0   : > { %v12128_v51 = vpop.f32.mrf.mxu0  ;;  %v9596_v54 = vpop.f32.mrf.mxu1  ;;  %v2525_v43 = vadd.f32 %v15617_v5, %v2136_v42  ;;  %v2523_v11 = vadd.f32 %v15623_v0, %v2128_v37  ;;  %v15625_v42 = vld [vmem:[#allocation44_spill] sm:$0xff] }
 0x2c1   : > { %15612 = vst [vmem:[#allocation28_spill] sm:$0xff] %v12128_v51  ;;  %v12132_v27 = vadd.f32 %v9596_v54, %v2522_v35  ;;  %v15619_v51 = vld [vmem:[#allocation10_spill] sm:$0xff]  ;;  %v15621_v35 = vld [vmem:[#allocation116_spill] sm:$0xff] }
 0x2c2   : > { %v12135_v22 = vpop.f32.mrf.mxu0  ;;  %v2672_v14 = vpop.f32.mrf.mxu1  ;;  %v2131_v54 = vadd.f32 %v15621_v35, %v15620_v38 }
 0x2c3   : > { %15615 = vst [vmem:[#allocation106_spill] sm:$0xff] %v12135_v22  ;;  %v12139_v34 = vadd.f32 %v2672_v14, %v2520_v48  ;;  %v15626_v48 = vld [vmem:[#allocation118_spill] sm:$0xff]  ;;  %v15627_v22 = vld [vmem:[#allocation41_spill] sm:$0xff] }
 0x2c4   : > { %v12142_v31 = vpop.f32.mrf.mxu0  ;;  %v9599_v16 = vpop.f32.mrf.mxu1  ;;  %9822 = vmatmul.mubr.msk.bf16.gmra.mxu1 %vm1708_vm2, %v15619_v51  ;;  %v2152_v5 = vadd.f32 %v15626_v48, %v15625_v42  ;;  %v2526_v13 = vadd.f32 %v15627_v22, %v2139_v62  ;;  %v2524_v37 = vadd.f32 %v15630_v41, %v2131_v54  ;;  %v2155_v42 = vadd.f32 %v11854_v28, %v15632_v18  ;;  %v15638_v54 = vld [vmem:[#allocation13_spill] sm:$0xff] }
 0x2c5   : > { %15618 = vst [vmem:[#allocation25_spill] sm:$0xff] %v12142_v31  ;;  %v12148_v36 = vadd.f32 %v9599_v16, %v2525_v43  ;;  %9825 = vmatprep.mubr.msk.bf16.mxu1 %vm1708_vm2, %v15622_v58  ;;  %v15629_v43 = vld [vmem:[#allocation46_spill] sm:$0xff] }
 0x2c6   : > { %v12153_v52 = vpop.f32.mrf.mxu0  ;;  %v2685_v14 = vpop.f32.mrf.mxu1  ;;  %v2144_v16 = vadd.f32 %v11848_v39, %v15629_v43  ;;  %v15636_v39 = vld [vmem:[#allocation50_spill] sm:$0xff]  ;;  %v15639_v43 = vld [vmem:[#allocation47_spill] sm:$0xff] }
 0x2c7   : > { %15624 = vst [vmem:[#allocation30_spill] sm:$0xff] %v12153_v52  ;;  %v12157_v31 = vadd.f32 %v2685_v14, %v2523_v11  ;;  %v15633_v14 = vld [vmem:[#allocation45_spill] sm:$0xff] }
 0x2c8   : > { %v12160_v2 = vpop.f32.mrf.mxu0  ;;  %v9600_v38 = vpop.f32.mrf.mxu1  ;;  %v2529_v22 = vadd.f32 %v15633_v14, %v2152_v5  ;;  %v2527_v28 = vadd.f32 %v15639_v43, %v2144_v16  ;;  %v15641_v5 = vld [vmem:[#allocation52_spill] sm:$0xff] }
 0x2c9   : > { %15628 = vst [vmem:[#allocation27_spill] sm:$0xff] %v12160_v2  ;;  %v12164_v35 = vadd.f32 %v9600_v38, %v2526_v13  ;;  %v15635_v2 = vld [vmem:[#allocation12_spill] sm:$0xff]  ;;  %v15637_v13 = vld [vmem:[#allocation122_spill] sm:$0xff] }
 0x2ca   : > { %v12167_v0 = vpop.f32.mrf.mxu0  ;;  %v2688_v52 = vpop.f32.mrf.mxu1  ;;  %v2147_v38 = vadd.f32 %v15637_v13, %v15636_v39 }
 0x2cb   : > { %15631 = vst [vmem:[#allocation32_spill] sm:$0xff] %v12167_v0  ;;  %v12171_v11 = vadd.f32 %v2688_v52, %v2524_v37  ;;  %v15642_v37 = vld [vmem:[#allocation124_spill] sm:$0xff]  ;;  %v15643_v0 = vld [vmem:[#allocation49_spill] sm:$0xff] }
 0x2cc   : > { %v12174_v62 = vpop.f32.mrf.mxu0  ;;  %v9603_v48 = vpop.f32.mrf.mxu1  ;;  %9826 = vmatmul.mubr.msk.bf16.gmra.mxu1 %vm1708_vm2, %v15635_v2  ;;  %v2168_v14 = vadd.f32 %v15642_v37, %v15641_v5  ;;  %v2530_v17 = vadd.f32 %v15643_v0, %v2155_v42  ;;  %v2528_v16 = vadd.f32 %v15647_v1, %v2147_v38  ;;  %v2171_v5 = vadd.f32 %v11878_v49, %v15649_v7  ;;  %v15657_v38 = vld [vmem:[#allocation15_spill] sm:$0xff] }
 0x2cd   : > { %15634 = vst [vmem:[#allocation29_spill] sm:$0xff] %v12174_v62  ;;  %v12180_v41 = vadd.f32 %v9603_v48, %v2529_v22  ;;  %9829 = vmatprep.mubr.msk.bf16.mxu1 %vm1708_vm2, %v15638_v54  ;;  %v15645_v22 = vld [vmem:[#allocation54_spill] sm:$0xff] }
 0x2ce   : > { %v12185_v18 = vpop.f32.mrf.mxu0  ;;  %v2701_v52 = vpop.f32.mrf.mxu1  ;;  %v2160_v48 = vadd.f32 %v11872_v12, %v15645_v22  ;;  %v15654_v12 = vld [vmem:[#allocation58_spill] sm:$0xff]  ;;  %v15658_v22 = vld [vmem:[#allocation55_spill] sm:$0xff] }
 0x2cf   : > { %15640 = vst [vmem:[#allocation8_spill] sm:$0xff] %v12185_v18  ;;  %v12189_v62 = vadd.f32 %v2701_v52, %v2527_v28  ;;  %v15651_v52 = vld [vmem:[#allocation53_spill] sm:$0xff] }
 0x2d0   : > { %v12192_v9 = vpop.f32.mrf.mxu0  ;;  %v9604_v39 = vpop.f32.mrf.mxu1  ;;  %v2533_v0 = vadd.f32 %v15651_v52, %v2168_v14  ;;  %v2531_v49 = vadd.f32 %v15658_v22, %v2160_v48  ;;  %v15660_v14 = vld [vmem:[#allocation60_spill] sm:$0xff] }
 0x2d1   : > { %15644 = vst [vmem:[#allocation34_spill] sm:$0xff] %v12192_v9  ;;  %v12196_v13 = vadd.f32 %v9604_v39, %v2530_v17  ;;  %v15653_v9 = vld [vmem:[#allocation14_spill] sm:$0xff]  ;;  %v15655_v17 = vld [vmem:[#allocation128_spill] sm:$0xff] }
 0x2d2   : > { %v12199_v43 = vpop.f32.mrf.mxu0  ;;  %v2704_v18 = vpop.f32.mrf.mxu1  ;;  %v2163_v39 = vadd.f32 %v15655_v17, %v15654_v12 }
 0x2d3   : > { %15646 = vst [vmem:[#allocation110_spill] sm:$0xff] %v12196_v13  ;;  %15648 = vst [vmem:[#allocation9_spill] sm:$0xff] %v12199_v43  ;;  %v12203_v28 = vadd.f32 %v2704_v18, %v2528_v16  ;;  %v15661_v16 = vld [vmem:[#allocation130_spill] sm:$0xff]  ;;  %v15663_v43 = vld [vmem:[#allocation57_spill] sm:$0xff] }
 0x2d4   : > { %v12206_v42 = vpop.f32.mrf.mxu0  ;;  %v9607_v37 = vpop.f32.mrf.mxu1  ;;  %9830 = vmatmul.mubr.msk.bf16.gmra.mxu1 %vm1708_vm2, %v15653_v9  ;;  %v2184_v52 = vadd.f32 %v15661_v16, %v15660_v14  ;;  %v2534_v53 = vadd.f32 %v15663_v43, %v2171_v5  ;;  %v15669_v13 = vld [vmem:[#allocation64_spill] sm:$0xff] }
 0x2d5   : > { %15650 = vst [vmem:[#allocation31_spill] sm:$0xff] %v12203_v28  ;;  %15652 = vst [vmem:[#allocation36_spill] sm:$0xff] %v12206_v42  ;;  %v12212_v1 = vadd.f32 %v9607_v37, %v2533_v0  ;;  %9833 = vmatprep.mubr.msk.bf16.mxu1 %vm1708_vm2, %v15657_v38  ;;  %v15665_v0 = vld [vmem:[#allocation62_spill] sm:$0xff]  ;;  %v2187_v14 = vadd.f32 %v11902_v3, %v15669_v13 }
 0x2d6   : > { %v12217_v7 = vpop.f32.mrf.mxu0  ;;  %v2717_v18 = vpop.f32.mrf.mxu1  ;;  %v2176_v37 = vadd.f32 %v11896_v29, %v15665_v0  ;;  %v15674_v29 = vld [vmem:[#allocation66_spill] sm:$0xff]  ;;  %v15678_v0 = vld [vmem:[#allocation63_spill] sm:$0xff] }
 0x2d7   : > { %15656 = vst [vmem:[#allocation112_spill] sm:$0xff] %v12212_v1  ;;  %15659 = vst [vmem:[#allocation33_spill] sm:$0xff] %v12217_v7  ;;  %v12221_v42 = vadd.f32 %v2717_v18, %v2531_v49  ;;  %v15667_v1 = vld [vmem:[#allocation59_spill] sm:$0xff]  ;;  %v15671_v18 = vld [vmem:[#allocation61_spill] sm:$0xff] }
 0x2d8   : > { %v12224_v28 = vpop.f32.mrf.mxu0  ;;  %v9608_v12 = vpop.f32.mrf.mxu1  ;;  %v2532_v48 = vadd.f32 %v15667_v1, %v2163_v39  ;;  %v2537_v43 = vadd.f32 %v15671_v18, %v2184_v52  ;;  %v15677_v1 = vld [vmem:[#allocation17_spill] sm:$0xff]  ;;  %v2535_v3 = vadd.f32 %v15678_v0, %v2176_v37  ;;  %v15680_v52 = vld [vmem:[#allocation68_spill] sm:$0xff] }
 0x2d9   : > { %15662 = vst [vmem:[#allocation38_spill] sm:$0xff] %v12221_v42  ;;  %15664 = vst [vmem:[#allocation35_spill] sm:$0xff] %v12224_v28  ;;  %v12228_v17 = vadd.f32 %v9608_v12, %v2534_v53  ;;  %v15673_v28 = vld [vmem:[#allocation16_spill] sm:$0xff]  ;;  %v15675_v53 = vld [vmem:[#allocation134_spill] sm:$0xff] }
 0x2da   : > { %v12231_v22 = vpop.f32.mrf.mxu0  ;;  %v2720_v7 = vpop.f32.mrf.mxu1  ;;  %v2179_v12 = vadd.f32 %v15675_v53, %v15674_v29  ;;  %v15689_v42 = vld [vmem:[#allocation72_spill] sm:$0xff] }
 0x2db   : > { %15666 = vst [vmem:[#allocation40_spill] sm:$0xff] %v12228_v17  ;;  %15668 = vst [vmem:[#allocation37_spill] sm:$0xff] %v12231_v22  ;;  %v12235_v49 = vadd.f32 %v2720_v7, %v2532_v48  ;;  %v15681_v48 = vld [vmem:[#allocation136_spill] sm:$0xff]  ;;  %v15683_v22 = vld [vmem:[#allocation65_spill] sm:$0xff] }
 0x2dc   : > { %v12238_v5 = vpop.f32.mrf.mxu0  ;;  %v9611_v16 = vpop.f32.mrf.mxu1  ;;  %9834 = vmatmul.mubr.msk.bf16.gmra.mxu1 %vm1708_vm2, %v15673_v28  ;;  %v2200_v18 = vadd.f32 %v15681_v48, %v15680_v52 }
 0x2dd   : > { %15670 = vst [vmem:[#allocation10_spill] sm:$0xff] %v12235_v49  ;;  %15672 = vst [vmem:[#allocation42_spill] sm:$0xff] %v12238_v5  ;;  %v12244_v39 = vadd.f32 %v9611_v16, %v2537_v43  ;;  %9837 = vmatprep.mubr.msk.bf16.mxu1 %vm1708_vm2, %v15677_v1  ;;  %v2538_v49 = vadd.f32 %v15683_v22, %v2187_v14  ;;  %v15685_v43 = vld [vmem:[#allocation70_spill] sm:$0xff]  ;;  %v15690_v1 = vld [vmem:[#allocation139_spill] sm:$0xff] }
 0x2de   : > { %v12249_v13 = vpop.f32.mrf.mxu0  ;;  %v2733_v7 = vpop.f32.mrf.mxu1  ;;  %v2192_v16 = vadd.f32 %v11920_v50, %v15685_v43  ;;  %v2203_v52 = vadd.f32 %v15690_v1, %v15689_v42  ;;  %v15695_v50 = vld [vmem:[#allocation74_spill] sm:$0xff]  ;;  %v15699_v43 = vld [vmem:[#allocation71_spill] sm:$0xff] }
 0x2df   : > { %15676 = vst [vmem:[#allocation116_spill] sm:$0xff] %v12244_v39  ;;  %15679 = vst [vmem:[#allocation11_spill] sm:$0xff] %v12249_v13  ;;  %v12253_v5 = vadd.f32 %v2733_v7, %v2535_v3  ;;  %v15687_v39 = vld [vmem:[#allocation67_spill] sm:$0xff]  ;;  %v15692_v7 = vld [vmem:[#allocation69_spill] sm:$0xff] }
 0x2e0   : > { %v12256_v17 = vpop.f32.mrf.mxu0  ;;  %v9612_v29 = vpop.f32.mrf.mxu1  ;;  %v2536_v37 = vadd.f32 %v15687_v39, %v2179_v12  ;;  %v2541_v22 = vadd.f32 %v15692_v7, %v2200_v18  ;;  %v15698_v39 = vld [vmem:[#allocation19_spill] sm:$0xff]  ;;  %v2539_v42 = vadd.f32 %v15699_v43, %v2192_v16  ;;  %v15701_v18 = vld [vmem:[#allocation76_spill] sm:$0xff] }
 0x2e1   : > { %15682 = vst [vmem:[#allocation39_spill] sm:$0xff] %v12253_v5  ;;  %15684 = vst [vmem:[#allocation44_spill] sm:$0xff] %v12256_v17  ;;  %v12260_v53 = vadd.f32 %v9612_v29, %v2538_v49  ;;  %v15694_v17 = vld [vmem:[#allocation18_spill] sm:$0xff]  ;;  %v15696_v49 = vld [vmem:[#allocation141_spill] sm:$0xff] }
 0x2e2   : > { %v12263_v0 = vpop.f32.mrf.mxu0  ;;  %v2736_v13 = vpop.f32.mrf.mxu1  ;;  %v2195_v29 = vadd.f32 %v15696_v49, %v15695_v50  ;;  %v15707_v5 = vld [vmem:[#allocation75_spill] sm:$0xff] }
 0x2e3   : > { %15686 = vst [vmem:[#allocation118_spill] sm:$0xff] %v12260_v53  ;;  %15688 = vst [vmem:[#allocation41_spill] sm:$0xff] %v12263_v0  ;;  %v12267_v3 = vadd.f32 %v2736_v13, %v2536_v37  ;;  %v15702_v37 = vld [vmem:[#allocation143_spill] sm:$0xff]  ;;  %v15703_v0 = vld [vmem:[#allocation73_spill] sm:$0xff] }
 0x2e4   : > { %v12270_v14 = vpop.f32.mrf.mxu0  ;;  %v9615_v48 = vpop.f32.mrf.mxu1  ;;  %9838 = vmatmul.mubr.msk.bf16.gmra.mxu1 %vm1708_vm2, %v15694_v17  ;;  %v2216_v7 = vadd.f32 %v15702_v37, %v15701_v18  ;;  %v2540_v16 = vadd.f32 %v15707_v5, %v2195_v29  ;;  %v15714_v29 = vld [vmem:[#allocation79_spill] sm:$0xff] }
 0x2e5   : > { %15691 = vst [vmem:[#allocation46_spill] sm:$0xff] %v12267_v3  ;;  %15693 = vst [vmem:[#allocation43_spill] sm:$0xff] %v12270_v14  ;;  %v12276_v12 = vadd.f32 %v9615_v48, %v2541_v22  ;;  %9841 = vmatprep.mubr.msk.bf16.mxu1 %vm1708_vm2, %v15698_v39  ;;  %v2542_v3 = vadd.f32 %v15703_v0, %v2203_v52  ;;  %v15705_v22 = vld [vmem:[#allocation78_spill] sm:$0xff]  ;;  %v15709_v39 = vld [vmem:[#allocation80_spill] sm:$0xff] }
 0x2e6   : > { %v12281_v1 = vpop.f32.mrf.mxu0  ;;  %v2749_v13 = vpop.f32.mrf.mxu1  ;;  %v15706_v48 = vld [vmem:[#allocation146_spill] sm:$0xff]  ;;  %v2219_v18 = vadd.f32 %v11959_v10, %v15709_v39 }
 0x2e7   : > { %15697 = vst [vmem:[#allocation48_spill] sm:$0xff] %v12276_v12  ;;  %15700 = vst [vmem:[#allocation45_spill] sm:$0xff] %v12281_v1  ;;  %v12285_v14 = vadd.f32 %v2749_v13, %v2539_v42  ;;  %v2208_v49 = vadd.f32 %v15706_v48, %v15705_v22  ;;  %v15711_v13 = vld [vmem:[#allocation77_spill] sm:$0xff]  ;;  %v15717_v22 = vld [vmem:[#allocation150_spill] sm:$0xff] }
 0x2e8   : > { %v12288_v53 = vpop.f32.mrf.mxu0  ;;  %v9616_v50 = vpop.f32.mrf.mxu1  ;;  %v2545_v0 = vadd.f32 %v15711_v13, %v2216_v7  ;;  %v15716_v7 = vld [vmem:[#allocation85_spill] sm:$0xff] }
 0x2e9   : > { %15704 = vst [vmem:[#allocation12_spill] sm:$0xff] %v12288_v53  ;;  %v12292_v12 = vadd.f32 %v9616_v50, %v2542_v3  ;;  %v15713_v3 = vld [vmem:[#allocation82_spill] sm:$0xff]  ;;  %v2543_v10 = vadd.f32 %v15714_v29, %v2208_v49  ;;  %v2232_v48 = vadd.f32 %v15717_v22, %v15716_v7  ;;  %v15718_v13 = vld [vmem:[#allocation81_spill] sm:$0xff]  ;;  %v15721_v53 = vld [vmem:[#allocation84_spill] sm:$0xff] }
 0x2ea   : > { %v12295_v43 = vpop.f32.mrf.mxu0  ;;  %v2752_v1 = vpop.f32.mrf.mxu1  ;;  %v2211_v50 = vadd.f32 %v11963_v25, %v15713_v3 }
 0x2eb   : > { %15708 = vst [vmem:[#allocation50_spill] sm:$0xff] %v12295_v43  ;;  %v12299_v42 = vadd.f32 %v2752_v1, %v2540_v16 }
 0x2ec   : > { %v12302_v52 = vpop.f32.mrf.mxu0  ;;  %v9619_v37 = vpop.f32.mrf.mxu1  ;;  %9842 = vmatmul.mubr.msk.bf16.gmra.mxu1 %vm1708_vm2, %v11381_v45  ;;  %v2544_v49 = vadd.f32 %v15721_v53, %v2211_v50  ;;  %v15731_v50 = vld [vmem:[#allocation20_spill] sm:$0xff] }
 0x2ed   : > { %15710 = vst [vmem:[#allocation122_spill] sm:$0xff] %v12299_v42  ;;  %15712 = vst [vmem:[#allocation13_spill] sm:$0xff] %v12302_v52  ;;  %v12308_v5 = vadd.f32 %v9619_v37, %v2545_v0  ;;  %9845 = vmatprep.mubr.msk.bf16.mxu1 %vm1708_vm2, %v11246_v24  ;;  %v2546_v52 = vadd.f32 %v15718_v13, %v2219_v18  ;;  %v15720_v0 = vld [vmem:[#allocation87_spill] sm:$0xff]  ;;  %v15723_v42 = vld [vmem:[#allocation89_spill] sm:$0xff] }
 0x2ee   : > { %v12313_v39 = vpop.f32.mrf.mxu0  ;;  %v2765_v1 = vpop.f32.mrf.mxu1  ;;  %v2224_v37 = vadd.f32 %v11979_v4, %v15720_v0  ;;  %v2235_v7 = vadd.f32 %v11985_v15, %v15723_v42  ;;  %v15728_v4 = vld [vmem:[#allocation91_spill] sm:$0xff]  ;;  %v15732_v0 = vld [vmem:[#allocation88_spill] sm:$0xff] }
 0x2ef   : > { %15715 = vst [vmem:[#allocation47_spill] sm:$0xff] %v12313_v39  ;;  %v12317_v16 = vadd.f32 %v2765_v1, %v2543_v10  ;;  %v15725_v1 = vld [vmem:[#allocation86_spill] sm:$0xff] }
 0x2f0   : > { %v12320_v43 = vpop.f32.mrf.mxu0  ;;  %v9620_v25 = vpop.f32.mrf.mxu1  ;;  %v2549_v18 = vadd.f32 %v15725_v1, %v2232_v48  ;;  %v2547_v15 = vadd.f32 %v15732_v0, %v2224_v37 }
 0x2f1   : > { %15719 = vst [vmem:[#allocation52_spill] sm:$0xff] %v12320_v43  ;;  %v12324_v3 = vadd.f32 %v9620_v25, %v2546_v52  ;;  %v15727_v43 = vld [vmem:[#allocation83_spill] sm:$0xff] }
 0x2f2   : > { %v12327_v29 = vpop.f32.mrf.mxu0  ;;  %v2768_v39 = vpop.f32.mrf.mxu1  ;;  %v15729_v52 = vld [vmem:[#allocation155_spill] sm:$0xff] }
 0x2f3   : > { %15722 = vst [vmem:[#allocation124_spill] sm:$0xff] %v12327_v29  ;;  %v12331_v10 = vadd.f32 %v2768_v39, %v2544_v49  ;;  %v2227_v25 = vadd.f32 %v15729_v52, %v15728_v4  ;;  %v15734_v49 = vld [vmem:[#allocation90_spill] sm:$0xff]  ;;  %v15735_v4 = vld [vmem:[#allocation92_spill] sm:$0xff] }
 0x2f4   : > { %v12334_v22 = vpop.f32.mrf.mxu0  ;;  %v9623_v13 = vpop.f32.mrf.mxu1  ;;  %9846 = vmatmul.mubr.msk.bf16.gmra.mxu1 %vm1708_vm2, %v15727_v43  ;;  %v2550_v1 = vadd.f32 %v15734_v49, %v2235_v7 }
 0x2f5   : > { %15724 = vst [vmem:[#allocation49_spill] sm:$0xff] %v12331_v10  ;;  %15726 = vst [vmem:[#allocation54_spill] sm:$0xff] %v12334_v22  ;;  %v12340_v53 = vadd.f32 %v9623_v13, %v2549_v18  ;;  %9849 = vmatprep.mubr.msk.bf16.mxu1 %vm1708_vm2, %v15731_v50  ;;  %v2548_v18 = vadd.f32 %v15735_v4, %v2227_v25 }
 0x2f6   : > { %v12345_v42 = vpop.f32.mrf.mxu0  ;;  %v2781_v39 = vpop.f32.mrf.mxu1 }
 0x2f7   : > { %15730 = vst [vmem:[#allocation51_spill] sm:$0xff] %v12340_v53  ;;  %15733 = vst [vmem:[#allocation56_spill] sm:$0xff] %v12345_v42  ;;  %v12347_v48 = vadd.f32 %v2781_v39, %v2547_v15  ;;  %v15736_v42 = vld [vmem:[#allocation151_spill] sm:$0xff]  ;;  %v15358_v15 = vmov 0.0  }
 0x2f8   : > { %v12350_v22 = vpop.f32.mrf.mxu0  ;;  %v9624_v29 = vpop.f32.mrf.mxu1  ;;  %9965 = vmatprep.subr.bf16.mxu0 %v15358_v15  ;;  %10005 = vmatprep.subr.bf16.mxu1 %v15358_v15 }
 0x2f9   : > { %v12352_v10 = vadd.f32 %v9624_v29, %v2550_v1  ;;  %v10386_v29 = vld [vmem:[%s15314_s6 + $0x78] sm:$0xff]  }
 0x2fa   : > { %v12355_v13 = vpop.f32.mrf.mxu0  ;;  %v2784_v52 = vpop.f32.mrf.mxu1  ;;  %9966 = vmatpush3.bf16.msra.mxu0 %v10386_v29  ;;  %v15738_v29 = vld [vmem:[#allocation94_spill] sm:$0xff] }
 0x2fb   : > { %v12357_v53 = vadd.f32 %v2784_v52, %v2548_v18  ;;  %9967 = vmatprep.subr.bf16.mxu0 %v15358_v15 }
 0x2fc   : > { %v12359_v37 = vpop.f32.mrf.mxu0  ;;  %v9627_v0 = vpop.f32.mrf.mxu1  ;;  %9850 = vmatmul.mubr.msk.bf16.gmra.mxu1 %vm1708_vm2, %v15736_v42 }
 0x2fd   : > { %9917 = vmatprep.mubr.msk.bf16.mxu1 %vm1708_vm2, %v11091_v44  ;;  %v15737_v44 = vld [vmem:[#allocation93_spill] sm:$0xff] }
 0x2fe   : > { %v9795_v7 = vpop.f32.mrf.mxu0  ;;  %v2797_v25 = vpop.f32.mrf.mxu1  ;;  %v3111_v18 = vadd.f32 %v15737_v44, %v12013_v19  ;;  %v15739_v19 = vld [vmem:[#allocation95_spill] sm:$0xff] }
 0x2ff   : > { %v3109_v25 = vadd.f32 %v15738_v29, %v12026_v63 }
 0x300   : > { %v3700_v39 = vpop.f32.mrf.mxu0  ;;  %v9628_v49 = vpop.f32.mrf.mxu1 }
 0x302   : > { %v9796_v1 = vpop.f32.mrf.mxu0  ;;  %v2799_v4 = vpop.f32.mrf.mxu1 }
 0x303   : > { %v3112_v4 = vadd.f32 %v15739_v19, %v12033_v8 }
 0x304   : > { %v3702_v52 = vpop.f32.mrf.mxu0  ;;  %v9695_v0 = vpop.f32.mrf.mxu1  ;;  %9918 = vmatmul.mubr.msk.bf16.vlgmr.msra.gmra.mxu1 %vm1708_vm2, %v11105_v59 }
 0x305   : > { %v12375_v7 = vadd.f32 %v9695_v0, %v3111_v18  ;;  %9921 = vmatprep.mubr.msk.bf16.mxu1 %vm1708_vm2, %v11107_v60  ;;  %v15740_v18 = vld [vmem:[#allocation96_spill] sm:$0xff] }
 0x306   : > { %v12381_v39 = vpop.f32.mrf.mxu0  ;;  %v3223_v49 = vpop.f32.mrf.mxu1  ;;  %v3110_v0 = vadd.f32 %v15740_v18, %v12043_v30  ;;  %v10387_v60 = vld [vmem:[%s15314_s6 + $0x70] sm:$0xff]  }
 0x307   : > { %v12383_v1 = vadd.f32 %v3223_v49, %v3109_v25  ;;  %v15742_v49 = vld [vmem:[#allocation97_spill] sm:$0xff]  ;;  %9968 = vmatpush3.bf16.msra.mxu0 %v10387_v60 }
 0x308   : > { %v12387_v44 = vpop.f32.mrf.mxu0  ;;  %v9696_v52 = vpop.f32.mrf.mxu1  ;;  %v3115_v8 = vadd.f32 %v15742_v49, %v12052_v61  ;;  %9969 = vmatprep.subr.bf16.mxu0 %v15358_v15 }
 0x309   : > { %v12389_v59 = vadd.f32 %v9696_v52, %v3112_v4  ;;  %v15744_v52 = vld [vmem:[#allocation98_spill] sm:$0xff] }
 0x30a   : > { %v12396_v63 = vpop.f32.mrf.mxu0  ;;  %v3226_v29 = vpop.f32.mrf.mxu1  ;;  %v3113_v18 = vadd.f32 %v15744_v52, %v12061_v47  ;;  %v15751_v52 = vld [vmem:[#allocation101_spill] sm:$0xff] }
 0x30b   : > { %15741 = vst [vmem:[#allocation53_spill] sm:$0xff] %v12396_v63  ;;  %v12398_v25 = vadd.f32 %v3226_v29, %v3110_v0  ;;  %v15746_v29 = vld [vmem:[#allocation99_spill] sm:$0xff] }
 0x30c   : > { %v12402_v19 = vpop.f32.mrf.mxu0  ;;  %v9699_v4 = vpop.f32.mrf.mxu1  ;;  %9922 = vmatmul.mubr.msk.bf16.gmra.mxu1 %vm1708_vm2, %v15587_v56  ;;  %v3116_v49 = vadd.f32 %v15746_v29, %v12068_v23 }
 0x30d   : > { %15743 = vst [vmem:[#allocation14_spill] sm:$0xff] %v12402_v19  ;;  %v12407_v30 = vadd.f32 %v9699_v4, %v3115_v8  ;;  %9925 = vmatprep.mubr.msk.bf16.mxu1 %vm1708_vm2, %v15590_v40  ;;  %v15748_v8 = vld [vmem:[#allocation100_spill] sm:$0xff] }
 0x30e   : > { %v12413_v0 = vpop.f32.mrf.mxu0  ;;  %v3239_v61 = vpop.f32.mrf.mxu1  ;;  %v3114_v4 = vadd.f32 %v15748_v8, %v12075_v21  ;;  %v15753_v21 = vld [vmem:[#allocation102_spill] sm:$0xff]  ;;  %v15755_v8 = vld [vmem:[#allocation103_spill] sm:$0xff] }
 0x30f   : > { %15745 = vst [vmem:[#allocation58_spill] sm:$0xff] %v12413_v0  ;;  %v12415_v60 = vadd.f32 %v3239_v61, %v3113_v18  ;;  %v3119_v18 = vadd.f32 %v15751_v52, %v12084_v57  ;;  %v3117_v29 = vadd.f32 %v15753_v21, %v12093_v55  ;;  %v15758_v55 = vld [vmem:[#allocation105_spill] sm:$0xff] }
 0x310   : > { %v12419_v19 = vpop.f32.mrf.mxu0  ;;  %v9700_v56 = vpop.f32.mrf.mxu1 }
 0x311   : > { %15747 = vst [vmem:[#allocation128_spill] sm:$0xff] %v12419_v19  ;;  %v12421_v15 = vadd.f32 %v9700_v56, %v3116_v49 }
 0x312   : > { %v12425_v40 = vpop.f32.mrf.mxu0  ;;  %v3242_v63 = vpop.f32.mrf.mxu1 }
 0x313   : > { %15749 = vst [vmem:[#allocation15_spill] sm:$0xff] %v12425_v40  ;;  %v12427_v47 = vadd.f32 %v3242_v63, %v3114_v4  ;;  %v10388_v63 = vld [vmem:[%s15314_s6 + $0x68] sm:$0xff]  }
 0x314   : > { %v12431_v61 = vpop.f32.mrf.mxu0  ;;  %v9703_v0 = vpop.f32.mrf.mxu1  ;;  %9926 = vmatmul.mubr.msk.bf16.gmra.mxu1 %vm1708_vm2, %v15603_v32  ;;  %v3120_v32 = vadd.f32 %v15755_v8, %v12100_v26  ;;  %9970 = vmatpush3.bf16.msra.mxu0 %v10388_v63 }
 0x315   : > { %15750 = vst [vmem:[#allocation55_spill] sm:$0xff] %v12427_v47  ;;  %15752 = vst [vmem:[#allocation60_spill] sm:$0xff] %v12431_v61  ;;  %v12435_v23 = vadd.f32 %v9703_v0, %v3119_v18  ;;  %9929 = vmatprep.mubr.msk.bf16.mxu1 %vm1708_vm2, %v15606_v6  ;;  %v15757_v6 = vmov 0.0   ;;  %v3118_v18 = vadd.f32 %v15758_v55, %v12107_v33  ;;  %v15762_v33 = vld [vmem:[#allocation108_spill] sm:$0xff] }
 0x316   : > { %v12444_v49 = vpop.f32.mrf.mxu0  ;;  %v3255_v57 = vpop.f32.mrf.mxu1  ;;  %9971 = vmatprep.subr.bf16.mxu0 %v15757_v6  ;;  %9981 = vmatprep.mubr.msk.bf16.mxu0 %vm10651_vm3, %v15757_v6 }
 0x317   : > { %15754 = vst [vmem:[#allocation130_spill] sm:$0xff] %v12444_v49  ;;  %v12446_v56 = vadd.f32 %v3255_v57, %v3117_v29  ;;  %v15760_v29 = vld [vmem:[#allocation107_spill] sm:$0xff] }
 0x318   : > { %v12450_v0 = vpop.f32.mrf.mxu0  ;;  %v9704_v4 = vpop.f32.mrf.mxu1  ;;  %v3123_v57 = vadd.f32 %v15760_v29, %v12116_v20  ;;  %v15764_v20 = vld [vmem:[#allocation109_spill] sm:$0xff] }
 0x319   : > { %15756 = vst [vmem:[#allocation57_spill] sm:$0xff] %v12450_v0  ;;  %v12453_v52 = vadd.f32 %v9704_v4, %v3120_v32  ;;  %v3121_v32 = vadd.f32 %v15762_v33, %v12125_v46  ;;  %v10390_v33 = vld [vmem:[%s15314_s6 + $0x60] sm:$0xff]  }
 0x31a   : > { %v12457_v21 = vpop.f32.mrf.mxu0  ;;  %v3258_v49 = vpop.f32.mrf.mxu1  ;;  %9972 = vmatpush3.bf16.msra.mxu0 %v10390_v33 }
 0x31b   : > { %15759 = vst [vmem:[#allocation62_spill] sm:$0xff] %v12457_v21  ;;  %v12459_v61 = vadd.f32 %v3258_v49, %v3118_v18  ;;  %v3124_v18 = vadd.f32 %v15764_v20, %v12132_v27  ;;  %v15768_v20 = vld [vmem:[#allocation113_spill] sm:$0xff]  ;;  %9973 = vmatprep.subr.bf16.mxu0 %v15757_v6 }
 0x31c   : > { %v12463_v26 = vpop.f32.mrf.mxu0  ;;  %v9707_v63 = vpop.f32.mrf.mxu1  ;;  %9930 = vmatmul.mubr.msk.bf16.gmra.mxu1 %vm1708_vm2, %v15619_v51  ;;  %v10389_v51 = vld [vmem:[%s15314_s6 + $0xb8] sm:$0xff]  }
 0x31d   : > { %15761 = vst [vmem:[#allocation59_spill] sm:$0xff] %v12463_v26  ;;  %v12467_v8 = vadd.f32 %v9707_v63, %v3123_v57  ;;  %9933 = vmatprep.mubr.msk.bf16.mxu1 %vm1708_vm2, %v15622_v58  ;;  %v15766_v58 = vld [vmem:[#allocation111_spill] sm:$0xff]  ;;  %10006 = vmatpush3.bf16.msra.mxu1 %v10389_v51  ;;  %v15770_v51 = vld [vmem:[#allocation114_spill] sm:$0xff]  ;;  %v15797_v26 = vld [vmem:[#allocation129_spill] sm:$0xff] }
 0x31e   : > { %v12473_v4 = vpop.f32.mrf.mxu0  ;;  %v3271_v49 = vpop.f32.mrf.mxu1  ;;  %v3122_v46 = vadd.f32 %v15766_v58, %v12139_v34  ;;  %10007 = vmatprep.subr.bf16.mxu1 %v15757_v6  ;;  %v3125_v58 = vadd.f32 %v15770_v51, %v12157_v31  ;;  %v15776_v51 = vld [vmem:[#allocation119_spill] sm:$0xff] }
 0x31f   : > { %15763 = vst [vmem:[#allocation64_spill] sm:$0xff] %v12473_v4  ;;  %v12475_v55 = vadd.f32 %v3271_v49, %v3121_v32 }
 0x320   : > { %v12482_v29 = vpop.f32.mrf.mxu0  ;;  %v9708_v57 = vpop.f32.mrf.mxu1 }
 0x321   : > { %15765 = vst [vmem:[#allocation61_spill] sm:$0xff] %v12482_v29  ;;  %v12484_v63 = vadd.f32 %v9708_v57, %v3124_v18  ;;  %v3127_v29 = vadd.f32 %v15768_v20, %v12148_v36 }
 0x322   : > { %v12491_v32 = vpop.f32.mrf.mxu0  ;;  %v3274_v27 = vpop.f32.mrf.mxu1 }
 0x323   : > { %15767 = vst [vmem:[#allocation16_spill] sm:$0xff] %v12491_v32  ;;  %v12494_v49 = vadd.f32 %v3274_v27, %v3122_v46  ;;  %v15772_v27 = vld [vmem:[#allocation115_spill] sm:$0xff] }
 0x324   : > { %v12498_v18 = vpop.f32.mrf.mxu0  ;;  %v9711_v57 = vpop.f32.mrf.mxu1  ;;  %9934 = vmatmul.mubr.msk.bf16.gmra.mxu1 %vm1708_vm2, %v15635_v2  ;;  %v3128_v20 = vadd.f32 %v15772_v27, %v12164_v35  ;;  %v10391_v35 = vld [vmem:[%s15314_s6 + $0xb0] sm:$0xff]  }
 0x325   : > { %15769 = vst [vmem:[#allocation66_spill] sm:$0xff] %v12498_v18  ;;  %v12503_v34 = vadd.f32 %v9711_v57, %v3127_v29  ;;  %9937 = vmatprep.mubr.msk.bf16.mxu1 %vm1708_vm2, %v15638_v54  ;;  %v15774_v29 = vld [vmem:[#allocation117_spill] sm:$0xff]  ;;  %10008 = vmatpush3.bf16.msra.mxu1 %v10391_v35  ;;  %v15783_v35 = vld [vmem:[#allocation31_spill] sm:$0xff] }
 0x326   : > { %v12509_v46 = vpop.f32.mrf.mxu0  ;;  %v3287_v36 = vpop.f32.mrf.mxu1  ;;  %v3126_v57 = vadd.f32 %v15774_v29, %v12171_v11  ;;  %v15778_v11 = vld [vmem:[#allocation120_spill] sm:$0xff]  ;;  %10009 = vmatprep.subr.bf16.mxu1 %v15757_v6 }
 0x327   : > { %15771 = vst [vmem:[#allocation134_spill] sm:$0xff] %v12509_v46  ;;  %v12511_v33 = vadd.f32 %v3287_v36, %v3125_v58  ;;  %v3131_v58 = vadd.f32 %v15776_v51, %v12180_v41  ;;  %v10392_v41 = vld [vmem:[%s15314_s6 + $0x58] sm:$0xff]  }
 0x328   : > { %v12515_v18 = vpop.f32.mrf.mxu0  ;;  %v9712_v2 = vpop.f32.mrf.mxu1  ;;  %v15781_v51 = vld [vmem:[#allocation121_spill] sm:$0xff]  ;;  %9974 = vmatpush3.bf16.msra.mxu0 %v10392_v41 }
 0x329   : > { %15773 = vst [vmem:[#allocation63_spill] sm:$0xff] %v12515_v18  ;;  %v12517_v32 = vadd.f32 %v9712_v2, %v3128_v20  ;;  %9975 = vmatprep.subr.bf16.mxu0 %v15757_v6 }
 0x32a   : > { %v12521_v54 = vpop.f32.mrf.mxu0  ;;  %v3290_v4 = vpop.f32.mrf.mxu1 }
 0x32b   : > { %15775 = vst [vmem:[#allocation68_spill] sm:$0xff] %v12521_v54  ;;  %v12523_v31 = vadd.f32 %v3290_v4, %v3126_v57  ;;  %v3129_v4 = vadd.f32 %v15778_v11, %v12189_v62  ;;  %v15784_v11 = vld [vmem:[#allocation123_spill] sm:$0xff] }
 0x32c   : > { %v12530_v36 = vpop.f32.mrf.mxu0  ;;  %v9715_v27 = vpop.f32.mrf.mxu1  ;;  %9938 = vmatmul.mubr.msk.bf16.gmra.mxu1 %vm1708_vm2, %v15653_v9  ;;  %v15780_v9 = vld [vmem:[#allocation110_spill] sm:$0xff] }
 0x32d   : > { %15777 = vst [vmem:[#allocation136_spill] sm:$0xff] %v12530_v36  ;;  %v12534_v20 = vadd.f32 %v9715_v27, %v3131_v58  ;;  %9941 = vmatprep.mubr.msk.bf16.mxu1 %vm1708_vm2, %v15657_v38  ;;  %v3132_v58 = vadd.f32 %v15781_v51, %v15780_v9  ;;  %v3130_v36 = vadd.f32 %v15784_v11, %v15783_v35  ;;  %v15791_v35 = vld [vmem:[#allocation126_spill] sm:$0xff] }
 0x32e   : > { %v12543_v2 = vpop.f32.mrf.mxu0  ;;  %v3303_v29 = vpop.f32.mrf.mxu1 }
 0x32f   : > { %15779 = vst [vmem:[#allocation65_spill] sm:$0xff] %v12543_v2  ;;  %v12546_v57 = vadd.f32 %v3303_v29, %v3129_v4  ;;  %v15786_v4 = vld [vmem:[#allocation112_spill] sm:$0xff]  ;;  %v15787_v29 = vld [vmem:[#allocation125_spill] sm:$0xff] }
 0x330   : > { %v12550_v38 = vpop.f32.mrf.mxu0  ;;  %v9716_v27 = vpop.f32.mrf.mxu1  ;;  %v3135_v46 = vadd.f32 %v15787_v29, %v15786_v4  ;;  %v15793_v4 = vld [vmem:[#allocation40_spill] sm:$0xff]  ;;  %v15794_v29 = vld [vmem:[#allocation127_spill] sm:$0xff] }
 0x331   : > { %15782 = vst [vmem:[#allocation70_spill] sm:$0xff] %v12550_v38  ;;  %v12553_v62 = vadd.f32 %v9716_v27, %v3132_v58  ;;  %v15789_v58 = vld [vmem:[#allocation17_spill] sm:$0xff]  ;;  %v15790_v27 = vld [vmem:[#allocation38_spill] sm:$0xff] }
 0x332   : > { %v12557_v2 = vpop.f32.mrf.mxu0  ;;  %v3306_v54 = vpop.f32.mrf.mxu1  ;;  %v3133_v11 = vadd.f32 %v15791_v35, %v15790_v27  ;;  %v10394_v35 = vld [vmem:[%s15314_s6 + $0x50] sm:$0xff]  }
 0x333   : > { %15785 = vst [vmem:[#allocation67_spill] sm:$0xff] %v12557_v2  ;;  %v12559_v18 = vadd.f32 %v3306_v54, %v3130_v36  ;;  %9976 = vmatpush3.bf16.msra.mxu0 %v10394_v35 }
 0x334   : > { %v12563_v9 = vpop.f32.mrf.mxu0  ;;  %v9719_v41 = vpop.f32.mrf.mxu1  ;;  %9942 = vmatmul.mubr.msk.bf16.gmra.mxu1 %vm1708_vm2, %v15673_v28  ;;  %v10393_v28 = vld [vmem:[%s15314_s6 + $0xa8] sm:$0xff]   ;;  %9977 = vmatprep.subr.bf16.mxu0 %v15757_v6 }
 0x335   : > { %15788 = vst [vmem:[#allocation72_spill] sm:$0xff] %v12563_v9  ;;  %v12567_v51 = vadd.f32 %v9719_v41, %v3135_v46  ;;  %9945 = vmatprep.mubr.msk.bf16.mxu1 %vm1708_vm2, %v15789_v58  ;;  %v3136_v9 = vadd.f32 %v15794_v29, %v15793_v4  ;;  %v15796_v58 = vld [vmem:[#allocation10_spill] sm:$0xff]  ;;  %10010 = vmatpush3.bf16.msra.mxu1 %v10393_v28  ;;  %v15799_v29 = vld [vmem:[#allocation116_spill] sm:$0xff]  ;;  %v15802_v28 = vld [vmem:[#allocation19_spill] sm:$0xff] }
 0x336   : > { %v12573_v2 = vpop.f32.mrf.mxu0  ;;  %v3319_v54 = vpop.f32.mrf.mxu1  ;;  %v3134_v27 = vadd.f32 %v15797_v26, %v15796_v58  ;;  %10011 = vmatprep.subr.bf16.mxu1 %v15757_v6  ;;  %v15803_v58 = vld [vmem:[#allocation39_spill] sm:$0xff] }
 0x337   : > { %15792 = vst [vmem:[#allocation139_spill] sm:$0xff] %v12573_v2  ;;  %v12575_v36 = vadd.f32 %v3319_v54, %v3133_v11 }
 0x338   : > { %v12582_v46 = vpop.f32.mrf.mxu0  ;;  %v9720_v41 = vpop.f32.mrf.mxu1 }
 0x339   : > { %15795 = vst [vmem:[#allocation69_spill] sm:$0xff] %v12582_v46  ;;  %v12584_v38 = vadd.f32 %v9720_v41, %v3136_v9  ;;  %v15800_v46 = vld [vmem:[#allocation131_spill] sm:$0xff] }
 0x33a   : > { %v12591_v11 = vpop.f32.mrf.mxu0  ;;  %v3322_v54 = vpop.f32.mrf.mxu1  ;;  %v3139_v2 = vadd.f32 %v15800_v46, %v15799_v29  ;;  %v15806_v29 = vld [vmem:[#allocation118_spill] sm:$0xff] }
 0x33b   : > { %15798 = vst [vmem:[#allocation18_spill] sm:$0xff] %v12591_v11  ;;  %v12594_v4 = vadd.f32 %v3322_v54, %v3134_v27  ;;  %v15804_v27 = vld [vmem:[#allocation132_spill] sm:$0xff] }
 0x33c   : > { %v12598_v9 = vpop.f32.mrf.mxu0  ;;  %v9723_v41 = vpop.f32.mrf.mxu1  ;;  %9946 = vmatmul.mubr.msk.bf16.gmra.mxu1 %vm1708_vm2, %v15694_v17  ;;  %v3137_v54 = vadd.f32 %v15804_v27, %v15803_v58  ;;  %v10395_v58 = vld [vmem:[%s15314_s6 + $0xa0] sm:$0xff]  }
 0x33d   : > { %15801 = vst [vmem:[#allocation74_spill] sm:$0xff] %v12598_v9  ;;  %v12603_v26 = vadd.f32 %v9723_v41, %v3139_v2  ;;  %9949 = vmatprep.mubr.msk.bf16.mxu1 %vm1708_vm2, %v15802_v28  ;;  %v15807_v9 = vld [vmem:[#allocation133_spill] sm:$0xff]  ;;  %v15809_v2 = vld [vmem:[#allocation46_spill] sm:$0xff]  ;;  %v15810_v41 = vld [vmem:[#allocation135_spill] sm:$0xff]  ;;  %10012 = vmatpush3.bf16.msra.mxu1 %v10395_v58 }
 0x33e   : > { %v12609_v11 = vpop.f32.mrf.mxu0  ;;  %v3335_v46 = vpop.f32.mrf.mxu1  ;;  %v3140_v21 = vadd.f32 %v15807_v9, %v15806_v29  ;;  %v3138_v19 = vadd.f32 %v15810_v41, %v15809_v2  ;;  %10013 = vmatprep.subr.bf16.mxu1 %v15757_v6 }
 0x33f   : > { %15805 = vst [vmem:[#allocation141_spill] sm:$0xff] %v12609_v11  ;;  %v12611_v35 = vadd.f32 %v3335_v46, %v3137_v54  ;;  %v15812_v54 = vld [vmem:[#allocation48_spill] sm:$0xff]  ;;  %v15813_v46 = vld [vmem:[#allocation137_spill] sm:$0xff] }
 0x340   : > { %v12615_v0 = vpop.f32.mrf.mxu0  ;;  %v9724_v17 = vpop.f32.mrf.mxu1  ;;  %v3143_v9 = vadd.f32 %v15813_v46, %v15812_v54  ;;  %v15817_v54 = vld [vmem:[#allocation140_spill] sm:$0xff] }
 0x341   : > { %15808 = vst [vmem:[#allocation71_spill] sm:$0xff] %v12615_v0  ;;  %v12617_v40 = vadd.f32 %v9724_v17, %v3140_v21  ;;  %v15815_v17 = vld [vmem:[#allocation138_spill] sm:$0xff]  ;;  %v3144_v46 = vadd.f32 %v15817_v54, %v12292_v12 }
 0x342   : > { %v12621_v28 = vpop.f32.mrf.mxu0  ;;  %v3338_v47 = vpop.f32.mrf.mxu1  ;;  %v3141_v2 = vadd.f32 %v15815_v17, %v12285_v14  ;;  %v15820_v17 = vld [vmem:[#allocation145_spill] sm:$0xff] }
 0x343   : > { %15811 = vst [vmem:[#allocation76_spill] sm:$0xff] %v12621_v28  ;;  %v12626_v27 = vadd.f32 %v3338_v47, %v3138_v19 }
 0x344   : > { %v12630_v29 = vpop.f32.mrf.mxu0  ;;  %v9727_v0 = vpop.f32.mrf.mxu1  ;;  %9950 = vmatmul.mubr.msk.bf16.gmra.mxu1 %vm1708_vm2, %v11381_v45 }
 0x345   : > { %15814 = vst [vmem:[#allocation143_spill] sm:$0xff] %v12630_v29  ;;  %v12634_v21 = vadd.f32 %v9727_v0, %v3143_v9  ;;  %9953 = vmatprep.mubr.msk.bf16.mxu1 %vm1708_vm2, %v11246_v24  ;;  %v10396_v24 = vld [vmem:[%s15314_s6 + $0x48] sm:$0xff]  }
 0x346   : > { %v12640_v19 = vpop.f32.mrf.mxu0  ;;  %v3351_v47 = vpop.f32.mrf.mxu1  ;;  %9978 = vmatpush3.bf16.msra.mxu0 %v10396_v24 }
 0x347   : > { %15816 = vst [vmem:[#allocation73_spill] sm:$0xff] %v12640_v19  ;;  %v12643_v41 = vadd.f32 %v3351_v47, %v3141_v2  ;;  %v3147_v2 = vadd.f32 %v15820_v17, %v12308_v5  ;;  %9979 = vmatprep.subr.bf16.mxu0 %v15757_v6  ;;  %v15824_v17 = vld [vmem:[#allocation148_spill] sm:$0xff] }
 0x348   : > { %v12647_v45 = vpop.f32.mrf.mxu0  ;;  %v9728_v0 = vpop.f32.mrf.mxu1 }
 0x349   : > { %15818 = vst [vmem:[#allocation78_spill] sm:$0xff] %v12647_v45  ;;  %v12649_v9 = vadd.f32 %v9728_v0, %v3144_v46  ;;  %v15822_v46 = vld [vmem:[#allocation147_spill] sm:$0xff] }
 0x34a   : > { %v12654_v14 = vpop.f32.mrf.mxu0  ;;  %v12656_v58 = vpop.f32.mrf.mxu1  ;;  %v3145_v0 = vadd.f32 %v15822_v46, %v12317_v16 }
 0x34b   : > { %15819 = vst [vmem:[#allocation146_spill] sm:$0xff] %v12654_v14 }
 0x34c   : > { %v12660_v47 = vpop.f32.mrf.mxu0  ;;  %v9731_v12 = vpop.f32.mrf.mxu1  ;;  %9954 = vmatmul.mubr.msk.bf16.gmra.mxu1 %vm1708_vm2, %v15727_v43 }
 0x34d   : > { %15821 = vst [vmem:[#allocation75_spill] sm:$0xff] %v12660_v47  ;;  %v12665_v54 = vadd.f32 %v9731_v12, %v3147_v2  ;;  %9957 = vmatprep.mubr.msk.bf16.mxu1 %vm1708_vm2, %v15731_v50  ;;  %v3148_v47 = vadd.f32 %v15824_v17, %v12324_v3  ;;  %v15826_v2 = vld [vmem:[#allocation22_spill] sm:$0xff]  ;;  %v15827_v12 = vld [vmem:[#allocation144_spill] sm:$0xff]  ;;  %v15828_v50 = vld [vmem:[#allocation23_spill] sm:$0xff] }
 0x34e   : > { %v12671_v14 = vpop.f32.mrf.mxu0  ;;  %v3367_v5 = vpop.f32.mrf.mxu1  ;;  %v1520_v29 = vadd.f32 %v15827_v12, %v15826_v2  ;;  %v1523_v28 = vadd.f32 %v15827_v12, %v15828_v50  ;;  %v15834_v2 = vld [vmem:[#allocation153_spill] sm:$0xff]  ;;  %v10398_v50 = vld [vmem:[%s15314_s6 + $0x40] sm:$0xff]  }
 0x34f   : > { %15823 = vst [vmem:[#allocation80_spill] sm:$0xff] %v12671_v14  ;;  %v12673_v24 = vadd.f32 %v3367_v5, %v3145_v0  ;;  %v15830_v0 = vld [vmem:[#allocation51_spill] sm:$0xff]  ;;  %v15831_v5 = vld [vmem:[#allocation152_spill] sm:$0xff]  ;;  %v3149_v12 = vadd.f32 %v15834_v2, %v12347_v48  ;;  %9980 = vmatpush3.bf16.msra.mxu0 %v10398_v50 }
 0x350   : > { %v12677_v45 = vpop.f32.mrf.mxu0  ;;  %v9732_v43 = vpop.f32.mrf.mxu1  ;;  %v3151_v14 = vadd.f32 %v15831_v5, %v15830_v0  ;;  %v1632_v0 = vmax.f32 %v1520_v29, 0.0  ;;  %v1633_v5 = vmax.f32 %v1523_v28, 0.0  ;;  %v10399_v29 = vld [vmem:[%s15314_s6 + $0x90] sm:$0xff]   ;;  %9985 = vmatprep.subr.bf16.mxu0 %v15757_v6 }
 0x351   : > { %15825 = vst [vmem:[#allocation77_spill] sm:$0xff] %v12677_v45  ;;  %v12679_v19 = vadd.f32 %v9732_v43, %v3148_v47  ;;  %v10397_v47 = vld [vmem:[%s15314_s6 + $0x98] sm:$0xff]  }
 0x352   : > { %v12685_v16 = vpop.f32.mrf.mxu0  ;;  %v12687_v46 = vpop.f32.mrf.mxu1  ;;  %v15833_v43 = vld [vmem:[#allocation21_spill] sm:$0xff]  ;;  %10014 = vmatpush3.bf16.msra.mxu1 %v10397_v47  ;;  %v1666_v47 = vpack.c.bf16 %v1633_v5, %v1632_v0 }
 0x353   : > { %15829 = vst [vmem:[#allocation82_spill] sm:$0xff] %v12685_v16  ;;  %10015 = vmatprep.subr.bf16.mxu1 %v15757_v6 }
 0x354   : > { %v12691_v11 = vpop.f32.mrf.mxu0  ;;  %v9735_v3 = vpop.f32.mrf.mxu1  ;;  %9958 = vmatmul.mubr.msk.bf16.gmra.mxu1 %vm1708_vm2, %v15736_v42 }
 0x355   : > { %15832 = vst [vmem:[#allocation79_spill] sm:$0xff] %v12691_v11  ;;  %v12698_v17 = vadd.f32 %v9735_v3, %v3151_v14  ;;  %9961 = vmatprep.mubr.msk.bf16.mxu1 %vm1708_vm2, %v15833_v43  ;;  %v15836_v14 = vld [vmem:[#allocation154_spill] sm:$0xff] }
 0x356   : > { %v12707_v11 = vpop.f32.mrf.mxu0  ;;  %v3383_v42 = vpop.f32.mrf.mxu1  ;;  %v3152_v3 = vadd.f32 %v15836_v14, %v12352_v10  ;;  %10016 = vmatpush3.bf16.msra.mxu1 %v10399_v29 }
 0x357   : > { %15835 = vst [vmem:[#allocation85_spill] sm:$0xff] %v12707_v11  ;;  %v12709_v16 = vadd.f32 %v3383_v42, %v3149_v12  ;;  %10017 = vmatprep.subr.bf16.mxu1 %v15757_v6  ;;  %v10401_v42 = vld [vmem:[%s15314_s6 + $0x88] sm:$0xff]  }
 0x358   : > { %v12714_v43 = vpop.f32.mrf.mxu0  ;;  %v9736_v48 = vpop.f32.mrf.mxu1  ;;  %v15842_v11 = vld [vmem:[#allocation159_spill] sm:$0xff] }
 0x359   : > { %15837 = vst [vmem:[#allocation150_spill] sm:$0xff] %v12714_v43  ;;  %v12720_v28 = vadd.f32 %v9736_v48, %v3152_v3  ;;  %v10403_v48 = vld [vmem:[%s15314_s6 + $0x80] sm:$0xff]  }
 0x35a   : > { %v12722_v2 = vpop.f32.mrf.mxu0  ;;  %v12724_v12 = vpop.f32.mrf.mxu1  ;;  %10018 = vmatpush3.bf16.msra.mxu1 %v10401_v42  ;;  %v15841_v42 = vld [vmem:[#allocation158_spill] sm:$0xff] }
 0x35b   : > { %15838 = vst [vmem:[#allocation81_spill] sm:$0xff] %v12722_v2  ;;  %10019 = vmatprep.subr.bf16.mxu1 %v15757_v6 }
 0x35c   : > { %v12727_v10 = vpop.f32.mrf.mxu0  ;;  %v9739_v50 = vpop.f32.mrf.mxu1  ;;  %9962 = vmatmul.mubr.msk.bf16.gmra.mxu1 %vm1708_vm2, %v1666_v47 }
 0x35d   : > { %15839 = vst [vmem:[#allocation87_spill] sm:$0xff] %v12727_v10  ;;  %10021 = vmatprep.mubr.msk.bf16.mxu1 %vm10651_vm3, %v15757_v6  ;;  %v15840_v50 = vld [vmem:[#allocation157_spill] sm:$0xff] }
 0x35e   : > { %v9907_v0 = vpop.f32.mrf.mxu0  ;;  %v3399_v5 = vpop.f32.mrf.mxu1  ;;  %10020 = vmatpush3.bf16.msra.mxu1 %v10403_v48  ;;  %v3713_v10 = vadd.f32 %v15840_v50, %v12375_v7  ;;  %v15843_v7 = vld [vmem:[#allocation161_spill] sm:$0xff] }
 0x35f   : > { %10045 = vmatprep.subr.bf16.mxu1 %v15757_v6  ;;  %v15848_v6 = vld [vmem:[#allocation6_spill] sm:$0xff] }
 0x360   : > { %v4302_v14 = vpop.f32.mrf.mxu0  ;;  %v9740_v3 = vpop.f32.mrf.mxu1 }
 0x361   : > { %v3711_v14 = vadd.f32 %v15841_v42, %v12383_v1 }
 0x362   : > { %v9908_v29 = vpop.f32.mrf.mxu0  ;;  %v3401_v47 = vpop.f32.mrf.mxu1 }
 0x363   : > { %v3714_v29 = vadd.f32 %v15842_v11, %v12389_v59 }
 0x364   : > { %v4304_v2 = vpop.f32.mrf.mxu0  ;;  %v9807_v0 = vpop.f32.mrf.mxu1 }
 0x365   : > { %v12744_v5 = vadd.f32 %v9807_v0, %v3713_v10  ;;  %v3717_v2 = vadd.f32 %v15843_v7, %v12407_v30  ;;  %v15844_v0 = vld [vmem:[#allocation162_spill] sm:$0xff]  ;;  %v3721_v30 = vadd.f32 %v15848_v6, %v12435_v23  ;;  %v15852_v6 = vld [vmem:[#allocation24_spill] sm:$0xff] }
 0x366   : > { %v3825_v3 = vpop.f32.mrf.mxu1  ;;  %v3715_v1 = vadd.f32 %v15844_v0, %v12415_v60 }
 0x367   : > { %v12748_v43 = vadd.f32 %v3825_v3, %v3711_v14  ;;  %v15845_v3 = vld [vmem:[#allocation163_spill] sm:$0xff] }
 0x368   : > { %v9808_v47 = vpop.f32.mrf.mxu1  ;;  %v3718_v59 = vadd.f32 %v15845_v3, %v12421_v15 }
 0x369   : > { %v12752_v48 = vadd.f32 %v9808_v47, %v3714_v29 }
 0x36a   : > { %v12754_v45 = vpop.f32.mrf.mxu1 }
 0x36c   : > { %v9811_v50 = vpop.f32.mrf.mxu1 }
 0x36d   : > { %v12758_v10 = vadd.f32 %v9811_v50, %v3717_v2  ;;  %v15849_v50 = vld [vmem:[#allocation26_spill] sm:$0xff] }
 0x36e   : > { %v3841_v42 = vpop.f32.mrf.mxu1  ;;  %v3719_v60 = vadd.f32 %v15849_v50, %v12446_v56  ;;  %v15853_v50 = vld [vmem:[#allocation28_spill] sm:$0xff] }
 0x36f   : > { %v12762_v14 = vadd.f32 %v3841_v42, %v3715_v1  ;;  %v15850_v42 = vld [vmem:[#allocation104_spill] sm:$0xff] }
 0x370   : > { %v9812_v11 = vpop.f32.mrf.mxu1  ;;  %v3722_v15 = vadd.f32 %v15850_v42, %v12453_v52  ;;  %v15854_v42 = vld [vmem:[#allocation106_spill] sm:$0xff] }
 0x371   : > { %v12766_v29 = vadd.f32 %v9812_v11, %v3718_v59  ;;  %v15851_v11 = vld [vmem:[#allocation7_spill] sm:$0xff] }
 0x372   : > { %v12768_v47 = vpop.f32.mrf.mxu1 }
 0x373   : > { %15846 = vst [vmem:[#allocation84_spill] sm:$0xff] %v12766_v29  ;;  %15847 = vst [vmem:[#allocation89_spill] sm:$0xff] %v12768_v47  ;;  %v3720_v29 = vadd.f32 %v15851_v11, %v12459_v61 }
 0x374   : > { %v9815_v7 = vpop.f32.mrf.mxu1 }
 0x375   : > { %v12772_v2 = vadd.f32 %v9815_v7, %v3721_v30  ;;  %v3725_v30 = vadd.f32 %v15852_v6, %v12467_v8  ;;  %v15856_v6 = vld [vmem:[#allocation30_spill] sm:$0xff] }
 0x376   : > { %v3857_v0 = vpop.f32.mrf.mxu1 }
 0x377   : > { %v12776_v1 = vadd.f32 %v3857_v0, %v3719_v60  ;;  %v3723_v60 = vadd.f32 %v15853_v50, %v12475_v55  ;;  %v15857_v50 = vld [vmem:[#allocation27_spill] sm:$0xff] }
 0x378   : > { %v9816_v3 = vpop.f32.mrf.mxu1 }
 0x379   : > { %v12780_v59 = vadd.f32 %v9816_v3, %v3722_v15  ;;  %v3726_v15 = vadd.f32 %v15854_v42, %v12484_v63  ;;  %v15858_v42 = vld [vmem:[#allocation32_spill] sm:$0xff] }
 0x37a   : > { %v3860_v47 = vpop.f32.mrf.mxu1 }
 0x37b   : > { %v12784_v23 = vadd.f32 %v3860_v47, %v3720_v29  ;;  %v15855_v29 = vld [vmem:[#allocation25_spill] sm:$0xff] }
 0x37c   : > { %v9819_v7 = vpop.f32.mrf.mxu1  ;;  %v3724_v47 = vadd.f32 %v15855_v29, %v12494_v49  ;;  %v15859_v29 = vld [vmem:[#allocation29_spill] sm:$0xff] }
 0x37d   : > { %v12788_v56 = vadd.f32 %v9819_v7, %v3725_v30  ;;  %v3729_v30 = vadd.f32 %v15856_v6, %v12503_v34  ;;  %v15860_v6 = vld [vmem:[#allocation8_spill] sm:$0xff] }
 0x37e   : > { %v3873_v0 = vpop.f32.mrf.mxu1 }
 0x37f   : > { %v12792_v52 = vadd.f32 %v3873_v0, %v3723_v60  ;;  %v3727_v60 = vadd.f32 %v15857_v50, %v12511_v33  ;;  %v15861_v50 = vld [vmem:[#allocation34_spill] sm:$0xff] }
 0x380   : > { %v9820_v3 = vpop.f32.mrf.mxu1 }
 0x381   : > { %v12796_v61 = vadd.f32 %v9820_v3, %v3726_v15  ;;  %v3730_v15 = vadd.f32 %v15858_v42, %v12517_v32  ;;  %v15862_v42 = vld [vmem:[#allocation9_spill] sm:$0xff] }
 0x382   : > { %v3876_v11 = vpop.f32.mrf.mxu1 }
 0x383   : > { %v12800_v8 = vadd.f32 %v3876_v11, %v3724_v47  ;;  %v3728_v47 = vadd.f32 %v15859_v29, %v12523_v31  ;;  %v15863_v29 = vld [vmem:[#allocation36_spill] sm:$0xff] }
 0x384   : > { %v9823_v7 = vpop.f32.mrf.mxu1 }
 0x385   : > { %v12804_v55 = vadd.f32 %v9823_v7, %v3729_v30  ;;  %v3733_v30 = vadd.f32 %v15860_v6, %v12534_v20  ;;  %v15864_v6 = vld [vmem:[#allocation33_spill] sm:$0xff] }
 0x386   : > { %v3889_v0 = vpop.f32.mrf.mxu1 }
 0x387   : > { %v12808_v63 = vadd.f32 %v3889_v0, %v3727_v60  ;;  %v3731_v60 = vadd.f32 %v15861_v50, %v12546_v57  ;;  %v15865_v50 = vld [vmem:[#allocation35_spill] sm:$0xff] }
 0x388   : > { %v9824_v3 = vpop.f32.mrf.mxu1 }
 0x389   : > { %v12812_v49 = vadd.f32 %v9824_v3, %v3730_v15  ;;  %v3734_v15 = vadd.f32 %v15862_v42, %v12553_v62  ;;  %v15866_v42 = vld [vmem:[#allocation37_spill] sm:$0xff] }
 0x38a   : > { %v3892_v11 = vpop.f32.mrf.mxu1 }
 0x38b   : > { %v12816_v34 = vadd.f32 %v3892_v11, %v3728_v47  ;;  %v3732_v47 = vadd.f32 %v15863_v29, %v12559_v18  ;;  %v15867_v29 = vld [vmem:[#allocation42_spill] sm:$0xff] }
 0x38c   : > { %v9827_v7 = vpop.f32.mrf.mxu1 }
 0x38d   : > { %v12820_v33 = vadd.f32 %v9827_v7, %v3733_v30  ;;  %v3737_v30 = vadd.f32 %v15864_v6, %v12567_v51  ;;  %v15868_v6 = vld [vmem:[#allocation11_spill] sm:$0xff] }
 0x38e   : > { %v3905_v0 = vpop.f32.mrf.mxu1 }
 0x38f   : > { %v12824_v32 = vadd.f32 %v3905_v0, %v3731_v60  ;;  %v3735_v60 = vadd.f32 %v15865_v50, %v12575_v36  ;;  %v15869_v50 = vld [vmem:[#allocation44_spill] sm:$0xff] }
 0x390   : > { %v9828_v3 = vpop.f32.mrf.mxu1 }
 0x391   : > { %v12828_v31 = vadd.f32 %v9828_v3, %v3734_v15  ;;  %v3738_v15 = vadd.f32 %v15866_v42, %v12584_v38  ;;  %v15871_v42 = vld [vmem:[#allocation41_spill] sm:$0xff] }
 0x392   : > { %v3908_v11 = vpop.f32.mrf.mxu1 }
 0x393   : > { %v12832_v20 = vadd.f32 %v3908_v11, %v3732_v47  ;;  %v3736_v47 = vadd.f32 %v15867_v29, %v12594_v4  ;;  %v15872_v29 = vld [vmem:[#allocation43_spill] sm:$0xff] }
 0x394   : > { %v9831_v7 = vpop.f32.mrf.mxu1 }
 0x395   : > { %v12836_v57 = vadd.f32 %v9831_v7, %v3737_v30  ;;  %v3741_v30 = vadd.f32 %v15868_v6, %v12603_v26  ;;  %v15873_v26 = vld [vmem:[#allocation122_spill] sm:$0xff] }
 0x396   : > { %v3921_v0 = vpop.f32.mrf.mxu1  ;;  %v15874_v6 = vld [vmem:[#allocation142_spill] sm:$0xff] }
 0x397   : > { %v12840_v62 = vadd.f32 %v3921_v0, %v3735_v60  ;;  %v3739_v60 = vadd.f32 %v15869_v50, %v12611_v35  ;;  %v15876_v35 = vld [vmem:[#allocation45_spill] sm:$0xff] }
 0x398   : > { %v9832_v3 = vpop.f32.mrf.mxu1  ;;  %v3745_v50 = vadd.f32 %v15876_v35, %v12634_v21  ;;  %v15880_v35 = vld [vmem:[#allocation49_spill] sm:$0xff] }
 0x399   : > { %v12844_v18 = vadd.f32 %v9832_v3, %v3738_v15  ;;  %v3742_v15 = vadd.f32 %v15871_v42, %v12617_v40  ;;  %v15877_v40 = vld [vmem:[#allocation12_spill] sm:$0xff] }
 0x39a   : > { %v3924_v11 = vpop.f32.mrf.mxu1  ;;  %v3743_v42 = vadd.f32 %v15877_v40, %v12643_v41 }
 0x39b   : > { %v12848_v51 = vadd.f32 %v3924_v11, %v3736_v47  ;;  %v3740_v47 = vadd.f32 %v15872_v29, %v12626_v27  ;;  %v15878_v27 = vld [vmem:[#allocation50_spill] sm:$0xff] }
 0x39c   : > { %v9835_v7 = vpop.f32.mrf.mxu1  ;;  %v3746_v29 = vadd.f32 %v15878_v27, %v12649_v9  ;;  %v15883_v9 = vld [vmem:[#allocation52_spill] sm:$0xff] }
 0x39d   : > { %v12852_v36 = vadd.f32 %v9835_v7, %v3741_v30  ;;  %v3142_v30 = vadd.f32 %v15874_v6, %v15873_v26 }
 0x39e   : > { %v3937_v0 = vpop.f32.mrf.mxu1 }
 0x39f   : > { %v12856_v38 = vadd.f32 %v3937_v0, %v3739_v60  ;;  %v3443_v0 = vadd.f32 %v12656_v58, %v3142_v30 }
 0x3a0   : > { %v9836_v3 = vpop.f32.mrf.mxu1 }
 0x3a1   : > { %15870 = vst [vmem:[#allocation86_spill] sm:$0xff] %v12856_v38  ;;  %v12860_v4 = vadd.f32 %v9836_v3, %v3742_v15 }
 0x3a2   : > { %v3940_v11 = vpop.f32.mrf.mxu1 }
 0x3a3   : > { %v12866_v7 = vadd.f32 %v3940_v11, %v3740_v47  ;;  %v15879_v11 = vld [vmem:[#allocation13_spill] sm:$0xff] }
 0x3a4   : > { %v9839_v60 = vpop.f32.mrf.mxu1  ;;  %v3744_v6 = vadd.f32 %v15879_v11, %v3443_v0  ;;  %v15884_v0 = vld [vmem:[#allocation124_spill] sm:$0xff] }
 0x3a5   : > { %15875 = vst [vmem:[#allocation83_spill] sm:$0xff] %v12866_v7  ;;  %v12871_v38 = vadd.f32 %v9839_v60, %v3745_v50  ;;  %v15881_v7 = vld [vmem:[#allocation149_spill] sm:$0xff]  ;;  %v15882_v50 = vld [vmem:[#allocation47_spill] sm:$0xff] }
 0x3a6   : > { %v3953_v15 = vpop.f32.mrf.mxu1  ;;  %v3146_v58 = vadd.f32 %v15881_v7, %v15880_v35  ;;  %v3749_v41 = vadd.f32 %v15882_v50, %v12665_v54  ;;  %v15886_v35 = vld [vmem:[#allocation156_spill] sm:$0xff] }
 0x3a7   : > { %v12875_v3 = vadd.f32 %v3953_v15, %v3743_v42  ;;  %v3747_v15 = vadd.f32 %v15883_v9, %v12673_v24  ;;  %v15887_v50 = vld [vmem:[#allocation56_spill] sm:$0xff] }
 0x3a8   : > { %v9840_v26 = vpop.f32.mrf.mxu1  ;;  %v3447_v40 = vadd.f32 %v12687_v46, %v3146_v58  ;;  %v3150_v46 = vadd.f32 %v15886_v35, %v12357_v53  ;;  %v3753_v24 = vadd.f32 %v15887_v50, %v12698_v17  ;;  %v4315_v35 = vadd.f32 %v12381_v39, %v12744_v5 }
 0x3a9   : > { %v12879_v47 = vadd.f32 %v9840_v26, %v3746_v29  ;;  %v3750_v26 = vadd.f32 %v15884_v0, %v12679_v19  ;;  %v3751_v19 = vadd.f32 %v12350_v22, %v12709_v16  ;;  %v15888_v22 = vld [vmem:[#allocation160_spill] sm:$0xff]  ;;  %v4313_v50 = vadd.f32 %v12387_v44, %v12748_v43 }
 0x3aa   : > { %v3956_v21 = vpop.f32.mrf.mxu1  ;;  %v3712_v16 = vadd.f32 %v15888_v22, %v12398_v25  ;;  %v15889_v25 = vld [vmem:[#allocation53_spill] sm:$0xff] }
 0x3ab   : > { %v12884_v30 = vadd.f32 %v3956_v21, %v3744_v6  ;;  %v15885_v6 = vld [vmem:[#allocation54_spill] sm:$0xff] }
 0x3ac   : > { %v9843_v60 = vpop.f32.mrf.mxu1  ;;  %v3748_v21 = vadd.f32 %v15885_v6, %v3447_v40  ;;  %v3754_v40 = vadd.f32 %v12355_v13, %v12720_v28  ;;  %v12927_v13 = vld [vmem:[%s15313_s5] ss:$0 sm:$0xff] }
 0x3ad   : > { %v12889_v42 = vadd.f32 %v9843_v60, %v3749_v41  ;;  %v3451_v60 = vadd.f32 %v12724_v12, %v3150_v46 }
 0x3ae   : > { %v3969_v27 = vpop.f32.mrf.mxu1 }
 0x3af   : > { %v12893_v29 = vadd.f32 %v3969_v27, %v3747_v15 }
 0x3b0   : > { %v9844_v7 = vpop.f32.mrf.mxu1 }
 0x3b1   : > { %v12897_v11 = vadd.f32 %v9844_v7, %v3750_v26  ;;  %v3752_v26 = vadd.f32 %v12359_v37, %v3451_v60  ;;  %v4013_v37 = vadd.f32 %v12754_v45, %v3712_v16 }
 0x3b2   : > { %v3972_v54 = vpop.f32.mrf.mxu1 }
 0x3b3   : > { %v12902_v58 = vadd.f32 %v3972_v54, %v3748_v21 }
 0x3b4   : > { %v9847_v41 = vpop.f32.mrf.mxu1 }
 0x3b5   : > { %v12907_v9 = vadd.f32 %v9847_v41, %v3753_v24 }
 0x3b6   : > { %v3985_v15 = vpop.f32.mrf.mxu1 }
 0x3b7   : > { %v12911_v27 = vadd.f32 %v3985_v15, %v3751_v19  ;;  %v4316_v19 = vadd.f32 %v15889_v25, %v12752_v48  ;;  %v15894_v48 = vld [vmem:[#allocation128_spill] sm:$0xff] }
 0x3b8   : > { %v9848_v53 = vpop.f32.mrf.mxu1  ;;  %v15896_v25 = vld [vmem:[#allocation84_spill] sm:$0xff] }
 0x3b9   : > { %v12915_v0 = vadd.f32 %v9848_v53, %v3754_v40  ;;  %v15890_v40 = vld [vmem:[#allocation14_spill] sm:$0xff] }
 0x3ba   : > { %v3988_v17 = vpop.f32.mrf.mxu1  ;;  %v4314_v53 = vadd.f32 %v15890_v40, %v4013_v37 }
 0x3bb   : > { %v12918_v7 = vadd.f32 %v3988_v17, %v3752_v26  ;;  %v15891_v26 = vld [vmem:[#allocation55_spill] sm:$0xff]  ;;  %v15892_v17 = vld [vmem:[#allocation164_spill] sm:$0xff] }
 0x3bc   : > { %v9851_v12 = vpop.f32.mrf.mxu1  ;;  %v3716_v45 = vadd.f32 %v15892_v17, %v15891_v26  ;;  %v15898_v17 = vld [vmem:[#allocation60_spill] sm:$0xff] }
 0x3be   : > { %v4001_v6 = vpop.f32.mrf.mxu1 }
 0x3bf   : > { %v15893_v6 = vld [vmem:[#allocation58_spill] sm:$0xff] }
 0x3c0   : > { %v9852_v21 = vpop.f32.mrf.mxu1  ;;  %v4319_v44 = vadd.f32 %v15893_v6, %v12758_v10 }
 0x3c2   : > { %v4003_v54 = vpop.f32.mrf.mxu1 }
 0x3c4   : > { %v9919_v46 = vpop.f32.mrf.mxu1 }
 0x3c5   : > { %v4616_v28 = vadd.f32 %v9919_v46, %v4315_v35  ;;  %v4317_v35 = vadd.f32 %v15894_v48, %v12762_v14  ;;  %v15895_v46 = vld [vmem:[#allocation89_spill] sm:$0xff] }
 0x3c6   : > { %v4427_v24 = vpop.f32.mrf.mxu1 }
 0x3c7   : > { %v4667_v41 = vadd.f32 %v12927_v13, %v4616_v28  ;;  %v4614_v60 = vadd.f32 %v4427_v24, %v4313_v50  ;;  %v4017_v28 = vadd.f32 %v15895_v46, %v3716_v45 }
 0x3c8   : > { %v9920_v39 = vpop.f32.mrf.mxu1 }
 0x3c9   : > { %v4665_v5 = vadd.f32 %v12927_v13, %v4614_v60  ;;  %v4617_v15 = vadd.f32 %v9920_v39, %v4316_v19  ;;  %v4711_v43 = vmax.f32 %v4667_v41, 0.0  ;;  %v15897_v19 = vld [vmem:[#allocation15_spill] sm:$0xff]  ;;  %v4318_v45 = vadd.f32 %v15898_v17, %v4017_v28 }
 0x3ca   : > { %v4430_v12 = vpop.f32.mrf.mxu1  ;;  %v4320_v10 = vadd.f32 %v15897_v19, %v15896_v25  ;;  %v15901_v25 = vld [vmem:[#allocation62_spill] sm:$0xff] }
 0x3cb   : > { %v4709_v21 = vmax.f32 %v4665_v5, 0.0  ;;  %v4668_v54 = vadd.f32 %v12927_v13, %v4617_v15  ;;  %v4615_v22 = vadd.f32 %v4430_v12, %v4314_v53  ;;  %v4324_v19 = vadd.f32 %v15901_v25, %v12780_v59  ;;  %v10400_v59 = vld [vmem:[%s15314_s6 + $0x38] sm:$0xff]  }
 0x3cc   : > { %v9923_v16 = vpop.f32.mrf.mxu1  ;;  %v15906_v25 = vmov 0.0  }
 0x3cd   : > { %v12945_v50 = vmax.f32 %v4709_v21, %v4711_v43  ;;  %v4666_v37 = vadd.f32 %v12927_v13, %v4615_v22  ;;  %v4620_v24 = vadd.f32 %v9923_v16, %v4319_v44  ;;  %v4712_v41 = vmax.f32 %v4668_v54, 0.0  ;;  %v15899_v44 = vld [vmem:[#allocation130_spill] sm:$0xff] }
 0x3ce   : > { %v4443_v60 = vpop.f32.mrf.mxu1  ;;  %v4323_v43 = vadd.f32 %v15899_v44, %v12772_v2 }
 0x3cf   : > { %v4710_v39 = vmax.f32 %v4666_v37, 0.0  ;;  %v4671_v5 = vadd.f32 %v12927_v13, %v4620_v24  ;;  %v4618_v15 = vadd.f32 %v4443_v60, %v4317_v35  ;;  %v15900_v24 = vld [vmem:[#allocation57_spill] sm:$0xff] }
 0x3d0   : > { %v9924_v40 = vpop.f32.mrf.mxu1  ;;  %v4321_v28 = vadd.f32 %v15900_v24, %v12776_v1  ;;  %v15903_v1 = vld [vmem:[#allocation64_spill] sm:$0xff] }
 0x3d1   : > { %v12951_v53 = vmax.f32 %v4710_v39, %v4712_v41  ;;  %v4669_v14 = vadd.f32 %v12927_v13, %v4618_v15  ;;  %v4621_v26 = vadd.f32 %v9924_v40, %v4320_v10  ;;  %v4715_v12 = vmax.f32 %v4671_v5, 0.0 }
 0x3d2   : > { %v4446_v6 = vpop.f32.mrf.mxu1 }
 0x3d3   : > { %v4755_v21 = vpack.c.bf16 %v12951_v53, %v12945_v50  ;;  %v4713_v54 = vmax.f32 %v4669_v14, 0.0  ;;  %v4672_v22 = vadd.f32 %v12927_v13, %v4621_v26  ;;  %v4619_v16 = vadd.f32 %v4446_v6, %v4318_v45  ;;  %v15902_v26 = vld [vmem:[#allocation59_spill] sm:$0xff] }
 0x3d4   : > { %v9927_v48 = vpop.f32.mrf.mxu1  ;;  %v4322_v17 = vadd.f32 %v15902_v26, %v12784_v23  ;;  %v4327_v6 = vadd.f32 %v15903_v1, %v12788_v56  ;;  %v15904_v23 = vld [vmem:[#allocation61_spill] sm:$0xff] }
 0x3d5   : > { %v4772_v35 = vmax.f32 %v4713_v54, %v4715_v12  ;;  %v4670_v46 = vadd.f32 %v12927_v13, %v4619_v16  ;;  %v4624_v37 = vadd.f32 %v9927_v48, %v4323_v43  ;;  %v4716_v2 = vmax.f32 %v4672_v22, 0.0  ;;  %v10405_v1 = vld [vmem:[%s15314_s6 + $0x138] sm:$0xff]  }
 0x3d6   : > { %v4459_v60 = vpop.f32.mrf.mxu1  ;;  %v4325_v24 = vadd.f32 %v15904_v23, %v12792_v52 }
 0x3d7   : > { %v4714_v10 = vmax.f32 %v4670_v46, 0.0  ;;  %v4675_v41 = vadd.f32 %v12927_v13, %v4624_v37  ;;  %v4622_v39 = vadd.f32 %v4459_v60, %v4321_v28  ;;  %v15905_v28 = vld [vmem:[#allocation16_spill] sm:$0xff] }
 0x3d8   : > { %v9928_v5 = vpop.f32.mrf.mxu1  ;;  %v4328_v60 = vadd.f32 %v15905_v28, %v12796_v61  ;;  %v15907_v61 = vld [vmem:[#allocation66_spill] sm:$0xff] }
 0x3d9   : > { %v4773_v15 = vmax.f32 %v4714_v10, %v4716_v2  ;;  %v4673_v40 = vadd.f32 %v12927_v13, %v4622_v39  ;;  %v4625_v14 = vadd.f32 %v9928_v5, %v4324_v19  ;;  %v4719_v45 = vmax.f32 %v4675_v41, 0.0 }
 0x3da   : > { %v4462_v12 = vpop.f32.mrf.mxu1 }
 0x3db   : > { %v4774_v44 = vpack.c.bf16 %v4773_v15, %v4772_v35  ;;  %v4717_v43 = vmax.f32 %v4673_v40, 0.0  ;;  %v4676_v54 = vadd.f32 %v12927_v13, %v4625_v14  ;;  %v4623_v22 = vadd.f32 %v4462_v12, %v4322_v17  ;;  %v10402_v35 = vld [vmem:[%s15314_s6 + $0x30] sm:$0xff]   ;;  %v15908_v17 = vld [vmem:[#allocation134_spill] sm:$0xff]  ;;  %v10404_v12 = vld [vmem:[%s15314_s6 + $0x28] sm:$0xff]  }
 0x3dc   : > { %v9931_v16 = vpop.f32.mrf.mxu1  ;;  %v4326_v40 = vadd.f32 %v15907_v61, %v12800_v8 }
 0x3dd   : > { %v4970_v48 = vmax.f32 %v4717_v43, %v4719_v45  ;;  %v4674_v46 = vadd.f32 %v12927_v13, %v4623_v22  ;;  %v4628_v37 = vadd.f32 %v9931_v16, %v4327_v6  ;;  %9982 = vmatmul.mubr.bf16.vlgmr.msra.gmra.mxu0 %v4774_v44  ;;  %v4720_v19 = vmax.f32 %v4676_v54, 0.0  ;;  %v15909_v16 = vld [vmem:[#allocation63_spill] sm:$0xff] }
 0x3de   : > { %9986 = vmatpush3.bf16.msra.mxu0 %v10400_v59  ;;  %v4475_v56 = vpop.f32.mrf.mxu1  ;;  %10001 = vmatprep.mubr.msk.bf16.mxu0 %vm10651_vm3, %v15906_v25  ;;  %v4331_v45 = vadd.f32 %v15908_v17, %v12804_v55 }
 0x3df   : > { %v4718_v2 = vmax.f32 %v4674_v46, 0.0  ;;  %v4679_v10 = vadd.f32 %v12927_v13, %v4628_v37  ;;  %v4626_v41 = vadd.f32 %v4475_v56, %v4325_v24  ;;  %9987 = vmatprep.subr.bf16.mxu0 %v15906_v25  ;;  %v4329_v46 = vadd.f32 %v15909_v16, %v12808_v63  ;;  %v10406_v24 = vld [vmem:[%s15314_s6 + $0x20] sm:$0xff]   ;;  %v10407_v56 = vld [vmem:[%s15314_s6 + $0x130] sm:$0xff]  }
 0x3e0   : > { %v9932_v52 = vpop.f32.mrf.mxu1  ;;  %v10411_v16 = vld [vmem:[%s15314_s6 + $0x120] sm:$0xff]  }
 0x3e1   : > { %v4971_v39 = vmax.f32 %v4718_v2, %v4720_v19  ;;  %v4677_v5 = vadd.f32 %v12927_v13, %v4626_v41  ;;  %v4629_v15 = vadd.f32 %v9932_v52, %v4328_v60  ;;  %v4723_v14 = vmax.f32 %v4679_v10, 0.0  ;;  %v15911_v41 = vld [vmem:[#allocation136_spill] sm:$0xff] }
 0x3e2   : > { %9988 = vmatpush3.bf16.msra.mxu0 %v10402_v35  ;;  %v4478_v26 = vpop.f32.mrf.mxu1  ;;  %v4330_v52 = vadd.f32 %v15911_v41, %v12816_v34  ;;  %v10413_v41 = vld [vmem:[%s15314_s6 + $0x118] sm:$0xff]  }
 0x3e3   : > { %v4972_v6 = vpack.c.bf16 %v4971_v39, %v4970_v48  ;;  %v4721_v59 = vmax.f32 %v4677_v5, 0.0  ;;  %v4680_v44 = vadd.f32 %v12927_v13, %v4629_v15  ;;  %v4627_v43 = vadd.f32 %v4478_v26, %v4326_v40  ;;  %9989 = vmatprep.subr.bf16.mxu0 %v15906_v25  ;;  %v15910_v48 = vld [vmem:[#allocation68_spill] sm:$0xff]  ;;  %v15912_v15 = vld [vmem:[#allocation65_spill] sm:$0xff] }
 0x3e4   : > { %v9935_v8 = vpop.f32.mrf.mxu1  ;;  %v4332_v23 = vadd.f32 %v15910_v48, %v12812_v49  ;;  %v4335_v61 = vadd.f32 %v15912_v15, %v12820_v33  ;;  %v10408_v40 = vld [vmem:[%s15314_s6 + $0x18] sm:$0xff]  }
 0x3e5   : > { %v13000_v54 = vmax.f32 %v4721_v59, %v4723_v14  ;;  %v4678_v55 = vadd.f32 %v12927_v13, %v4627_v43  ;;  %v4632_v22 = vadd.f32 %v9935_v8, %v4331_v45  ;;  %10022 = vmatmul.mubr.bf16.vlgmr.msra.gmra.mxu1 %v4972_v6  ;;  %v4724_v28 = vmax.f32 %v4680_v44, 0.0  ;;  %v10409_v14 = vld [vmem:[%s15314_s6 + $0x128] sm:$0xff]   ;;  %v15913_v59 = vld [vmem:[#allocation70_spill] sm:$0xff] }
 0x3e6   : > { %9990 = vmatpush3.bf16.msra.mxu0 %v10404_v12  ;;  %10046 = vmatpush3.bf16.msra.mxu1 %v10405_v1  ;;  %v4491_v37 = vpop.f32.mrf.mxu1  ;;  %v4333_v44 = vadd.f32 %v15913_v59, %v12824_v32  ;;  %v15914_v8 = vld [vmem:[#allocation67_spill] sm:$0xff] }
 0x3e7   : > { %v4722_v60 = vmax.f32 %v4678_v55, 0.0  ;;  %v4683_v35 = vadd.f32 %v12927_v13, %v4632_v22  ;;  %v4630_v19 = vadd.f32 %v4491_v37, %v4329_v46  ;;  %9991 = vmatprep.subr.bf16.mxu0 %v15906_v25  ;;  %10047 = vmatprep.subr.bf16.mxu1 %v15906_v25  ;;  %v4336_v55 = vadd.f32 %v15914_v8, %v12828_v31  ;;  %v10410_v22 = vld [vmem:[%s15314_s6 + $0x10] sm:$0xff]  }
 0x3e8   : > { %v9936_v63 = vpop.f32.mrf.mxu1  ;;  %10061 = vmatprep.mubr.msk.bf16.mxu1 %vm10651_vm3, %v15906_v25 }
 0x3e9   : > { %v13018_v49 = vmax.f32 %v4722_v60, %v4724_v28  ;;  %v4681_v2 = vadd.f32 %v12927_v13, %v4630_v19  ;;  %v4633_v10 = vadd.f32 %v9936_v63, %v4332_v23  ;;  %v4727_v39 = vmax.f32 %v4683_v35, 0.0  ;;  %v15915_v28 = vld [vmem:[#allocation72_spill] sm:$0xff]  ;;  %v15916_v63 = vld [vmem:[#allocation139_spill] sm:$0xff] }
 0x3ea   : > { %9992 = vmatpush3.bf16.msra.mxu0 %v10406_v24  ;;  %10048 = vmatpush3.bf16.msra.mxu1 %v10407_v56  ;;  %v4494_v5 = vpop.f32.mrf.mxu1  ;;  %v4334_v60 = vadd.f32 %v15915_v28, %v12832_v20 }
 0x3eb   : > { %v5083_v26 = vpack.c.bf16 %v13018_v49, %v13000_v54  ;;  %v4725_v17 = vmax.f32 %v4681_v2, 0.0  ;;  %v4684_v34 = vadd.f32 %v12927_v13, %v4633_v10  ;;  %v4631_v45 = vadd.f32 %v4494_v5, %v4330_v52  ;;  %9993 = vmatprep.subr.bf16.mxu0 %v15906_v25  ;;  %10049 = vmatprep.subr.bf16.mxu1 %v15906_v25  ;;  %v10412_v10 = vld [vmem:[%s15314_s6 + $0x8] sm:$0xff]  }
 0x3ec   : > { %v9939_v33 = vpop.f32.mrf.mxu1  ;;  %v4339_v2 = vadd.f32 %v15916_v63, %v12836_v57 }
 0x3ed   : > { %v13036_v12 = vmax.f32 %v4725_v17, %v4727_v39  ;;  %v4682_v1 = vadd.f32 %v12927_v13, %v4631_v45  ;;  %v4636_v6 = vadd.f32 %v9939_v33, %v4335_v61  ;;  %v4728_v46 = vmax.f32 %v4684_v34, 0.0  ;;  %v15918_v45 = vld [vmem:[#allocation18_spill] sm:$0xff] }
 0x3ee   : > { %9994 = vmatpush3.bf16.msra.mxu0 %v10408_v40  ;;  %10050 = vmatpush3.bf16.msra.mxu1 %v10409_v14  ;;  %v4507_v43 = vpop.f32.mrf.mxu1  ;;  %v15917_v14 = vld [vmem:[#allocation69_spill] sm:$0xff]  ;;  %v4340_v33 = vadd.f32 %v15918_v45, %v12844_v18 }
 0x3ef   : > { %v4726_v37 = vmax.f32 %v4682_v1, 0.0  ;;  %v4687_v48 = vadd.f32 %v12927_v13, %v4636_v6  ;;  %v4634_v23 = vadd.f32 %v4507_v43, %v4333_v44  ;;  %9995 = vmatprep.subr.bf16.mxu0 %v15906_v25  ;;  %10051 = vmatprep.subr.bf16.mxu1 %v15906_v25  ;;  %v4337_v17 = vadd.f32 %v15917_v14, %v12840_v62  ;;  %v10414_v1 = vld [vmem:[%s15314_s6] sm:$0xff]   ;;  %v10415_v6 = vld [vmem:[%s15314_s6 + $0x110] sm:$0xff]  }
 0x3f0   : > { %v9940_v32 = vpop.f32.mrf.mxu1 }
 0x3f1   : > { %v13052_v24 = vmax.f32 %v4726_v37, %v4728_v46  ;;  %v4685_v31 = vadd.f32 %v12927_v13, %v4634_v23  ;;  %v4637_v56 = vadd.f32 %v9940_v32, %v4336_v55  ;;  %v4731_v35 = vmax.f32 %v4687_v48, 0.0  ;;  %v15920_v23 = vld [vmem:[#allocation141_spill] sm:$0xff] }
 0x3f2   : > { %9996 = vmatpush3.bf16.msra.mxu0 %v10410_v22  ;;  %10052 = vmatpush3.bf16.msra.mxu1 %v10411_v16  ;;  %v4510_v19 = vpop.f32.mrf.mxu1  ;;  %v15919_v16 = vld [vmem:[#allocation74_spill] sm:$0xff]  ;;  %v4343_v32 = vadd.f32 %v15920_v23, %v12852_v36 }
 0x3f3   : > { %v5194_v52 = vpack.c.bf16 %v13052_v24, %v13036_v12  ;;  %v4729_v39 = vmax.f32 %v4685_v31, 0.0  ;;  %v4688_v20 = vadd.f32 %v12927_v13, %v4637_v56  ;;  %v4635_v5 = vadd.f32 %v4510_v19, %v4334_v60  ;;  %9997 = vmatprep.subr.bf16.mxu0 %v15906_v25  ;;  %10053 = vmatprep.subr.bf16.mxu1 %v15906_v25  ;;  %v10416_v31 = vld [vmem:[%s15314_s6 + $0xf8] sm:$0xff]   ;;  %v10417_v56 = vld [vmem:[%s15314_s6 + $0x108] sm:$0xff]  }
 0x3f4   : > { %v9943_v57 = vpop.f32.mrf.mxu1  ;;  %v4338_v46 = vadd.f32 %v15919_v16, %v12848_v51 }
 0x3f5   : > { %v13070_v15 = vmax.f32 %v4729_v39, %v4731_v35  ;;  %v4686_v61 = vadd.f32 %v12927_v13, %v4635_v5  ;;  %v4640_v40 = vadd.f32 %v9943_v57, %v4339_v2  ;;  %v4732_v59 = vmax.f32 %v4688_v20, 0.0  ;;  %v15923_v5 = vld [vmem:[#allocation76_spill] sm:$0xff] }
 0x3f6   : > { %9998 = vmatpush3.bf16.msra.mxu0 %v10412_v10  ;;  %10054 = vmatpush3.bf16.msra.mxu1 %v10413_v41  ;;  %v4523_v34 = vpop.f32.mrf.mxu1  ;;  %v15921_v10 = vld [vmem:[#allocation86_spill] sm:$0xff]  ;;  %v15922_v41 = vld [vmem:[#allocation71_spill] sm:$0xff]  ;;  %v4344_v57 = vadd.f32 %v15923_v5, %v12860_v4 }
 0x3f7   : > { %v4730_v44 = vmax.f32 %v4686_v61, 0.0  ;;  %v4691_v43 = vadd.f32 %v12927_v13, %v4640_v40  ;;  %v4638_v8 = vadd.f32 %v4523_v34, %v4337_v17  ;;  %9999 = vmatprep.subr.bf16.mxu0 %v15906_v25  ;;  %10055 = vmatprep.subr.bf16.mxu1 %v15906_v25  ;;  %v4341_v39 = vadd.f32 %v15922_v41, %v15921_v10  ;;  %v10418_v61 = vld [vmem:[%s15314_s6 + $0xf0] sm:$0xff]   ;;  %v10419_v40 = vld [vmem:[%s15314_s6 + $0x100] sm:$0xff]  }
 0x3f8   : > { %v9944_v62 = vpop.f32.mrf.mxu1 }
 0x3f9   : > { %v13086_v55 = vmax.f32 %v4730_v44, %v4732_v59  ;;  %v4689_v18 = vadd.f32 %v12927_v13, %v4638_v8  ;;  %v4641_v22 = vadd.f32 %v9944_v62, %v4340_v33  ;;  %v4735_v37 = vmax.f32 %v4691_v43, 0.0  ;;  %v15924_v33 = vld [vmem:[#allocation83_spill] sm:$0xff]  ;;  %v15926_v43 = vld [vmem:[#allocation73_spill] sm:$0xff] }
 0x3fa   : > { %10000 = vmatpush3.bf16.msra.mxu0 %v10414_v1  ;;  %10056 = vmatpush3.bf16.msra.mxu1 %v10415_v6  ;;  %v4526_v48 = vpop.f32.mrf.mxu1  ;;  %v15925_v1 = vld [vmem:[#allocation143_spill] sm:$0xff]  ;;  %v4347_v8 = vadd.f32 %v15926_v43, %v12871_v38 }
 0x3fb   : > { %v5305_v28 = vpack.c.bf16 %v13086_v55, %v13070_v15  ;;  %v4733_v60 = vmax.f32 %v4689_v18, 0.0  ;;  %v4692_v51 = vadd.f32 %v12927_v13, %v4641_v22  ;;  %v4639_v35 = vadd.f32 %v4526_v48, %v4338_v46  ;;  %10025 = vmatprep.subr.bf16.mxu0 %v15906_v25  ;;  %10057 = vmatprep.subr.bf16.mxu1 %v15906_v25  ;;  %v10420_v62 = vld [vmem:[%s15314_s6 + $0xe8] sm:$0xff]   ;;  %v10421_v18 = vld [vmem:[%s15314_s6 + $0x1b8] sm:$0xff]  }
 0x3fc   : > { %v9947_v36 = vpop.f32.mrf.mxu1  ;;  %v4342_v6 = vadd.f32 %v15925_v1, %v15924_v33  ;;  %v15931_v1 = vld [vmem:[#allocation77_spill] sm:$0xff]  ;;  %v10452_v15 = vld [vmem:[%s15314_s6 + $0x1e8] sm:$0xff]  }
 0x3fd   : > { %v13104_v19 = vmax.f32 %v4733_v60, %v4735_v37  ;;  %v4690_v63 = vadd.f32 %v12927_v13, %v4639_v35  ;;  %v4644_v2 = vadd.f32 %v9947_v36, %v4343_v32  ;;  %10002 = vmatmul.mubr.bf16.vlgmr.msra.gmra.mxu0 %v4755_v21  ;;  %v4736_v14 = vmax.f32 %v4692_v51, 0.0  ;;  %v15928_v51 = vld [vmem:[#allocation146_spill] sm:$0xff]  ;;  %v10453_v55 = vld [vmem:[%s15314_s6 + $0x2b8] sm:$0xff]  }
 0x3fe   : > { %10026 = vmatpush3.bf16.msra.mxu0 %v10416_v31  ;;  %10058 = vmatpush3.bf16.msra.mxu1 %v10417_v56  ;;  %v4539_v20 = vpop.f32.mrf.mxu1  ;;  %v15927_v31 = vld [vmem:[#allocation78_spill] sm:$0xff]  ;;  %v4348_v35 = vadd.f32 %v15928_v51, %v12879_v47  ;;  %v15934_v51 = vld [vmem:[#allocation85_spill] sm:$0xff] }
 0x3ff   : > { %v4734_v50 = vmax.f32 %v4690_v63, 0.0  ;;  %v4695_v53 = vadd.f32 %v12927_v13, %v4644_v2  ;;  %v4642_v21 = vadd.f32 %v4539_v20, %v4341_v39  ;;  %10027 = vmatprep.subr.bf16.mxu0 %v15906_v25  ;;  %10059 = vmatprep.subr.bf16.mxu1 %v15906_v25  ;;  %v4345_v56 = vadd.f32 %v15927_v31, %v12875_v3  ;;  %v10422_v36 = vld [vmem:[%s15314_s6 + $0xe0] sm:$0xff]   ;;  %v10423_v63 = vld [vmem:[%s15314_s6 + $0x1b0] sm:$0xff]   ;;  %v15929_v39 = vld [vmem:[#allocation75_spill] sm:$0xff] }
 0x400   : > { %v9948_v17 = vpop.f32.mrf.mxu1  ;;  %10041 = vmatprep.mubr.msk.bf16.mxu0 %vm10651_vm3, %v15906_v25  ;;  %v4346_v20 = vadd.f32 %v15929_v39, %v12884_v30 }
 0x401   : > { %v13125_v4 = vmax.f32 %v4734_v50, %v4736_v14  ;;  %v4693_v34 = vadd.f32 %v12927_v13, %v4642_v21  ;;  %v4645_v45 = vadd.f32 %v9948_v17, %v4344_v57  ;;  %v4739_v59 = vmax.f32 %v4695_v53, 0.0  ;;  %v10424_v14 = vld [vmem:[%s15314_s6 + $0xd8] sm:$0xff]   ;;  %v10425_v50 = vld [vmem:[%s15314_s6 + $0x1a8] sm:$0xff]  }
 0x402   : > { %10028 = vmatpush3.bf16.msra.mxu0 %v10418_v61  ;;  %10060 = vmatpush3.bf16.msra.mxu1 %v10419_v40  ;;  %v4542_v44 = vpop.f32.mrf.mxu1  ;;  %v15930_v61 = vld [vmem:[#allocation80_spill] sm:$0xff] }
 0x403   : > { %v5416_v22 = vpack.c.bf16 %v13125_v4, %v13104_v19  ;;  %v4737_v16 = vmax.f32 %v4693_v34, 0.0  ;;  %v4696_v46 = vadd.f32 %v12927_v13, %v4645_v45  ;;  %v4643_v37 = vadd.f32 %v4542_v44, %v4342_v6  ;;  %10029 = vmatprep.subr.bf16.mxu0 %v15906_v25  ;;  %10085 = vmatprep.subr.bf16.mxu1 %v15906_v25  ;;  %v15932_v44 = vld [vmem:[#allocation82_spill] sm:$0xff]  ;;  %v10440_v19 = vld [vmem:[%s15314_s6 + $0x158] sm:$0xff]   ;;  %v10441_v4 = vld [vmem:[%s15314_s6 + $0x228] sm:$0xff]  }
 0x404   : > { %v9951_v38 = vpop.f32.mrf.mxu1  ;;  %v4351_v40 = vadd.f32 %v15930_v61, %v12889_v42  ;;  %v4349_v6 = vadd.f32 %v15931_v1, %v12893_v29  ;;  %v4352_v43 = vadd.f32 %v15932_v44, %v12897_v11  ;;  %v10430_v61 = vld [vmem:[%s15314_s6 + $0xc0] sm:$0xff]   ;;  %v10433_v44 = vld [vmem:[%s15314_s6 + $0x188] sm:$0xff]  }
 0x405   : > { %v13143_v48 = vmax.f32 %v4737_v16, %v4739_v59  ;;  %v4694_v23 = vadd.f32 %v12927_v13, %v4643_v37  ;;  %v4648_v32 = vadd.f32 %v9951_v38, %v4347_v8  ;;  %10062 = vmatmul.mubr.bf16.vlgmr.msra.gmra.mxu1 %v5194_v52  ;;  %v4740_v2 = vmax.f32 %v4696_v46, 0.0  ;;  %v10426_v8 = vld [vmem:[%s15314_s6 + $0xd0] sm:$0xff]  }
 0x406   : > { %10030 = vmatpush3.bf16.msra.mxu0 %v10420_v62  ;;  %10086 = vmatpush3.bf16.msra.mxu1 %v10421_v18  ;;  %v4555_v60 = vpop.f32.mrf.mxu1  ;;  %v10427_v62 = vld [vmem:[%s15314_s6 + $0x1a0] sm:$0xff]  }
 0x407   : > { %v4738_v12 = vmax.f32 %v4694_v23, 0.0  ;;  %v4699_v24 = vadd.f32 %v12927_v13, %v4648_v32  ;;  %v4646_v52 = vadd.f32 %v4555_v60, %v4345_v56  ;;  %10031 = vmatprep.subr.bf16.mxu0 %v15906_v25  ;;  %10087 = vmatprep.subr.bf16.mxu1 %v15906_v25  ;;  %v15933_v32 = vld [vmem:[#allocation79_spill] sm:$0xff] }
 0x408   : > { %v9952_v3 = vpop.f32.mrf.mxu1  ;;  %10101 = vmatprep.mubr.msk.bf16.mxu1 %vm10651_vm3, %v15906_v25  ;;  %v4350_v31 = vadd.f32 %v15933_v32, %v12902_v58 }
 0x409   : > { %v13164_v47 = vmax.f32 %v4738_v12, %v4740_v2  ;;  %v4697_v10 = vadd.f32 %v12927_v13, %v4646_v52  ;;  %v4649_v41 = vadd.f32 %v9952_v3, %v4348_v35  ;;  %v4743_v5 = vmax.f32 %v4699_v24, 0.0 }
 0x40a   : > { %10032 = vmatpush3.bf16.msra.mxu0 %v10422_v36  ;;  %10088 = vmatpush3.bf16.msra.mxu1 %v10423_v63  ;;  %v4558_v57 = vpop.f32.mrf.mxu1  ;;  %v4355_v35 = vadd.f32 %v15934_v51, %v12907_v9  ;;  %v10428_v36 = vld [vmem:[%s15314_s6 + $0xc8] sm:$0xff]   ;;  %v10429_v63 = vld [vmem:[%s15314_s6 + $0x198] sm:$0xff]   ;;  %v10439_v51 = vld [vmem:[%s15314_s6 + $0x230] sm:$0xff]  }
 0x40b   : > { %v5527_v53 = vpack.c.bf16 %v13164_v47, %v13143_v48  ;;  %v4741_v21 = vmax.f32 %v4697_v10, 0.0  ;;  %v4700_v30 = vadd.f32 %v12927_v13, %v4649_v41  ;;  %v4647_v17 = vadd.f32 %v4558_v57, %v4346_v20  ;;  %10033 = vmatprep.subr.bf16.mxu0 %v15906_v25  ;;  %10089 = vmatprep.subr.bf16.mxu1 %v15906_v25  ;;  %v15935_v41 = vld [vmem:[#allocation150_spill] sm:$0xff]  ;;  %v10468_v48 = vld [vmem:[%s15314_s6 + $0x268] sm:$0xff]   ;;  %v10474_v47 = vld [vmem:[%s15318_s10 + $0x70] ss:$8 sps:$4 sm:$0xff]  }
 0x40c   : > { %v9955_v42 = vpop.f32.mrf.mxu1  ;;  %v4353_v39 = vadd.f32 %v15935_v41, %v12911_v27  ;;  %v10455_v41 = vld [vmem:[%s15314_s6 + $0x2b0] sm:$0xff]  }
 0x40d   : > { %v13182_v34 = vmax.f32 %v4741_v21, %v4743_v5  ;;  %v4698_v45 = vadd.f32 %v12927_v13, %v4647_v17  ;;  %v4652_v33 = vadd.f32 %v9955_v42, %v4351_v40  ;;  %v4744_v18 = vmax.f32 %v4700_v30, 0.0  ;;  %v15936_v5 = vld [vmem:[#allocation81_spill] sm:$0xff]  ;;  %v10431_v40 = vld [vmem:[%s15314_s6 + $0x190] sm:$0xff]  }
 0x40e   : > { %10034 = vmatpush3.bf16.msra.mxu0 %v10424_v14  ;;  %10090 = vmatpush3.bf16.msra.mxu1 %v10425_v50  ;;  %v4571_v59 = vpop.f32.mrf.mxu1  ;;  %v4356_v57 = vadd.f32 %v15936_v5, %v12915_v0  ;;  %v10461_v5 = vld [vmem:[%s15314_s6 + $0x298] sm:$0xff]  }
 0x40f   : > { %v4742_v16 = vmax.f32 %v4698_v45, 0.0  ;;  %v4703_v46 = vadd.f32 %v12927_v13, %v4652_v33  ;;  %v4650_v37 = vadd.f32 %v4571_v59, %v4349_v6  ;;  %10035 = vmatprep.subr.bf16.mxu0 %v15906_v25  ;;  %10091 = vmatprep.subr.bf16.mxu1 %v15906_v25  ;;  %v15937_v45 = vld [vmem:[#allocation87_spill] sm:$0xff]  ;;  %v10432_v59 = vld [vmem:[%s15314_s6 + $0x178] sm:$0xff]  }
 0x410   : > { %v9956_v29 = vpop.f32.mrf.mxu1  ;;  %v4354_v33 = vadd.f32 %v15937_v45, %v12918_v7  ;;  %v10470_v45 = vld [vmem:[%s15314_s6 + $0x258] sm:$0xff]  }
 0x411   : > { %v13198_v38 = vmax.f32 %v4742_v16, %v4744_v18  ;;  %v4701_v11 = vadd.f32 %v12927_v13, %v4650_v37  ;;  %v4653_v23 = vadd.f32 %v9956_v29, %v4352_v43  ;;  %v4747_v56 = vmax.f32 %v4703_v46, 0.0  ;;  %v10434_v29 = vld [vmem:[%s15314_s6 + $0x170] sm:$0xff]  }
 0x412   : > { %10036 = vmatpush3.bf16.msra.mxu0 %v10426_v8  ;;  %10092 = vmatpush3.bf16.msra.mxu1 %v10427_v62  ;;  %v4574_v60 = vpop.f32.mrf.mxu1 }
 0x413   : > { %v5638_v2 = vpack.c.bf16 %v13198_v38, %v13182_v34  ;;  %v4745_v12 = vmax.f32 %v4701_v11, 0.0  ;;  %v4704_v58 = vadd.f32 %v12927_v13, %v4653_v23  ;;  %v4651_v24 = vadd.f32 %v4574_v60, %v4350_v31  ;;  %10037 = vmatprep.subr.bf16.mxu0 %v15906_v25  ;;  %10093 = vmatprep.subr.bf16.mxu1 %v15906_v25  ;;  %v10435_v11 = vld [vmem:[%s15314_s6 + $0x180] sm:$0xff]   ;;  %v10437_v31 = vld [vmem:[%s15314_s6 + $0x238] sm:$0xff]   ;;  %v10457_v38 = vld [vmem:[%s15314_s6 + $0x2a8] sm:$0xff]  }
 0x414   : > { %v9959_v9 = vpop.f32.mrf.mxu1  ;;  %v10438_v60 = vld [vmem:[%s15314_s6 + $0x160] sm:$0xff]   ;;  %v10456_v34 = vld [vmem:[%s15314_s6 + $0x1d8] sm:$0xff]  }
 0x415   : > { %v13216_v52 = vmax.f32 %v4745_v12, %v4747_v56  ;;  %v4702_v3 = vadd.f32 %v12927_v13, %v4651_v24  ;;  %v4656_v10 = vadd.f32 %v9959_v9, %v4355_v35  ;;  %v4748_v14 = vmax.f32 %v4704_v58, 0.0  ;;  %v10443_v35 = vld [vmem:[%s15314_s6 + $0x220] sm:$0xff]   ;;  %v10447_v58 = vld [vmem:[%s15314_s6 + $0x210] sm:$0xff]   ;;  %v10448_v24 = vld [vmem:[%s15314_s6 + $0x1f8] sm:$0xff]  }
 0x416   : > { %10038 = vmatpush3.bf16.msra.mxu0 %v10428_v36  ;;  %10094 = vmatpush3.bf16.msra.mxu1 %v10429_v63  ;;  %v4587_v20 = vpop.f32.mrf.mxu1  ;;  %v10444_v36 = vld [vmem:[%s15314_s6 + $0x148] sm:$0xff]   ;;  %v10445_v63 = vld [vmem:[%s15314_s6 + $0x218] sm:$0xff]   ;;  %v10446_v12 = vld [vmem:[%s15314_s6 + $0x140] sm:$0xff]  }
 0x417   : > { %v4746_v50 = vmax.f32 %v4702_v3, 0.0  ;;  %v4707_v21 = vadd.f32 %v12927_v13, %v4656_v10  ;;  %v4654_v30 = vadd.f32 %v4587_v20, %v4353_v39  ;;  %10039 = vmatprep.subr.bf16.mxu0 %v15906_v25  ;;  %10095 = vmatprep.subr.bf16.mxu1 %v15906_v25  ;;  %v10449_v9 = vld [vmem:[%s15314_s6 + $0x208] sm:$0xff]   ;;  %v10450_v3 = vld [vmem:[%s15314_s6 + $0x1f0] sm:$0xff]   ;;  %v10451_v10 = vld [vmem:[%s15314_s6 + $0x200] sm:$0xff]  }
 0x418   : > { %v9960_v27 = vpop.f32.mrf.mxu1  ;;  %v10459_v39 = vld [vmem:[%s15314_s6 + $0x2a0] sm:$0xff]   ;;  %v10460_v20 = vld [vmem:[%s15314_s6 + $0x1c8] sm:$0xff]  }
 0x419   : > { %v13232_v17 = vmax.f32 %v4746_v50, %v4748_v14  ;;  %v4705_v0 = vadd.f32 %v12927_v13, %v4654_v30  ;;  %v4657_v42 = vadd.f32 %v9960_v27, %v4356_v57  ;;  %v4751_v1 = vmax.f32 %v4707_v21, 0.0  ;;  %v10462_v57 = vld [vmem:[%s15314_s6 + $0x1c0] sm:$0xff]   ;;  %v10465_v14 = vld [vmem:[%s15314_s6 + $0x288] sm:$0xff]   ;;  %v10466_v50 = vld [vmem:[%s15314_s6 + $0x270] sm:$0xff]  }
 0x41a   : > { %10040 = vmatpush3.bf16.msra.mxu0 %v10430_v61  ;;  %10096 = vmatpush3.bf16.msra.mxu1 %v10431_v40  ;;  %v4590_v6 = vpop.f32.mrf.mxu1  ;;  %v10463_v61 = vld [vmem:[%s15314_s6 + $0x290] sm:$0xff]   ;;  %v10464_v40 = vld [vmem:[%s15314_s6 + $0x278] sm:$0xff]   ;;  %v10467_v21 = vld [vmem:[%s15314_s6 + $0x280] sm:$0xff]  }
 0x41b   : > { %v5749_v43 = vpack.c.bf16 %v13232_v17, %v13216_v52  ;;  %v4749_v8 = vmax.f32 %v4705_v0, 0.0  ;;  %v4708_v62 = vadd.f32 %v12927_v13, %v4657_v42  ;;  %v4655_v18 = vadd.f32 %v4590_v6, %v4354_v33  ;;  %10065 = vmatprep.subr.bf16.mxu0 %v15906_v25  ;;  %10097 = vmatprep.subr.bf16.mxu1 %v15906_v25  ;;  %v10476_v30 = vld [vmem:[%s15318_s10 + $0x74] ss:$8 sps:$4 sm:$0xff]   ;;  %v10469_v27 = vld [vmem:[%s15314_s6 + $0x260] sm:$0xff]   ;;  %v10480_v33 = vld [vmem:[%s15318_s10 + $0x50] ss:$8 sps:$4 sm:$0xff]  }
 0x41c   : > { %v9963_v7 = vpop.f32.mrf.mxu1  ;;  %v10477_v0 = vld [vmem:[%s15318_s10 + $0x60] ss:$8 sps:$4 sm:$0xff]   ;;  %v10482_v42 = vld [vmem:[%s15318_s10 + $0x54] ss:$8 sps:$4 sm:$0xff]   ;;  %v10652_v6 = vmov 0  }
 0x41d   : > { %v13248_v16 = vmax.f32 %v4749_v8, %v4751_v1  ;;  %v4706_v46 = vadd.f32 %v12927_v13, %v4655_v18  ;;  %10042 = vmatmul.mubr.bf16.vlgmr.msra.gmra.mxu0 %v5083_v26  ;;  %v4752_v23 = vmax.f32 %v4708_v62, 0.0  ;;  %v10436_v26 = vld [vmem:[%s15314_s6 + $0x168] sm:$0xff]   ;;  %v10488_v8 = vld [vmem:[%s15318_s10 + $0x34] ss:$8 sps:$4 sm:$0xff]   ;;  %v10486_v18 = vld [vmem:[%s15318_s10 + $0x30] ss:$8 sps:$4 sm:$0xff]  }
 0x41e   : > { %10066 = vmatpush3.bf16.msra.mxu0 %v10432_v59  ;;  %10098 = vmatpush3.bf16.msra.mxu1 %v10433_v44  ;;  %v4603_v37 = vpop.f32.mrf.mxu1  ;;  %v10485_v1 = vld [vmem:[%s15318_s10 + $0x44] ss:$8 sps:$4 sm:$0xff]   ;;  %v10471_v59 = vld [vmem:[%s15314_s6 + $0x250] sm:$0xff]   ;;  %v10483_v44 = vld [vmem:[%s15318_s10 + $0x40] ss:$8 sps:$4 sm:$0xff]  }
 0x41f   : > { %v4750_v32 = vmax.f32 %v4706_v46, 0.0  ;;  %10067 = vmatprep.subr.bf16.mxu0 %v15906_v25  ;;  %10099 = vmatprep.subr.bf16.mxu1 %v15906_v25  ;;  %v10472_v62 = vld [vmem:[%s15314_s6 + $0x248] sm:$0xff]   ;;  %v10494_v37 = vld [vmem:[%s15318_s10 + $0x14] ss:$8 sps:$4 sm:$0xff]  }
 0x420   : > { %v9964_v13 = vpop.f32.mrf.mxu1  ;;  %10081 = vmatprep.mubr.msk.bf16.mxu0 %vm10651_vm3, %v15906_v25  ;;  %v10491_v7 = vld [vmem:[%s15318_s10 + $0x24] ss:$8 sps:$4 sm:$0xff]   ;;  %v10489_v46 = vld [vmem:[%s15318_s10 + $0x20] ss:$8 sps:$4 sm:$0xff]   ;;  %v10501_v52 = vld [vmem:[%s15316_s8 + $0x74] ss:$8 sps:$4 sm:$0xff]  }
 0x421   : > { %v13264_v54 = vmax.f32 %v4750_v32, %v4752_v23  ;;  %v10498_v23 = vld [vmem:[%s793_s3] sm:$0xff]   ;;  %s8098_s3 = sshll.u32 %s10879_s19, 4 }
 0x422   : > { %10068 = vmatpush3.bf16.msra.mxu0 %v10434_v29  ;;  %10100 = vmatpush3.bf16.msra.mxu1 %v10435_v11  ;;  %v4605_v49 = vpop.f32.mrf.mxu1  ;;  %v10492_v29 = vld [vmem:[%s15318_s10 + $0x10] ss:$8 sps:$4 sm:$0xff]   ;;  %v10497_v11 = vld [vmem:[%s15318_s10 + $0x4] ss:$8 sps:$4 sm:$0xff]   ;;  %s15187_s26 = scalar_lea.vmem [#allocation3], %s8098_s3 }
 0x423   : > { %v5860_v56 = vpack.c.bf16 %v13264_v54, %v13248_v16  ;;  %10069 = vmatprep.subr.bf16.mxu0 %v15906_v25  ;;  %10125 = vmatprep.subr.bf16.mxu1 %v15906_v25  ;;  %v10473_v16 = vld [vmem:[%s15314_s6 + $0x240] sm:$0xff]   ;;  %s8012_s20 = sshll.u32 %s15187_s26, 4  ;;  %s15264_s20 = int_to_ptr.vmem [resolvable:$true] %s8012_s20 }
 0x424   : > { %s10588_s25 = scalar_lea.vmem %s15264_s20, 256  ;;  %p10595_p3 = scmp.lt.s32.totalorder %s15264_s20, %s10593_s0 }
 0x425   : > { %10102 = vmatmul.mubr.bf16.vlgmr.msra.gmra.mxu1 %v5416_v22  ;;  %v10442_v22 = vld [vmem:[%s15314_s6 + $0x150] sm:$0xff]   ;;  %p10589_p0 = scmp.ne.s32.totalorder %s15264_s20, %s10588_s25  ;;  %p10596_p4 = scmp.lt.s32.totalorder %s10594_s17, %s10588_s25 }
 0x426   : > { %10070 = vmatpush3.bf16.msra.mxu0 %v10436_v26  ;;  %10126 = vmatpush3.bf16.msra.mxu1 %v10437_v31 }
 0x427   : > { %10071 = vmatprep.subr.bf16.mxu0 %v15906_v25  ;;  %10127 = vmatprep.subr.bf16.mxu1 %v15906_v25  ;;  %p10590_p1 = pnand %p10589_p0, %p10767_p6  ;;  %p10597_p5 = por %p10596_p4, %p10595_p3 }
 0x428   : > { %10141 = vmatprep.mubr.msk.bf16.mxu1 %vm10651_vm3, %v15906_v25 }
 0x429   : > { %p10591_p2 = pneg %p10590_p1 }
 0x42a   : > { %10072 = vmatpush3.bf16.msra.mxu0 %v10438_v60  ;;  %10128 = vmatpush3.bf16.msra.mxu1 %v10439_v51  ;;  %v10504_v60 = vld [vmem:[%s15316_s8 + $0x64] ss:$8 sps:$4 sm:$0xff]   ;;  %v10502_v51 = vld [vmem:[%s15316_s8 + $0x60] ss:$8 sps:$4 sm:$0xff]  }
 0x42b   : > { %10073 = vmatprep.subr.bf16.mxu0 %v15906_v25  ;;  %10129 = vmatprep.subr.bf16.mxu1 %v15906_v25  ;;  %p10598_p7 = pnand %p10597_p5, %p10591_p2 }
 0x42e   : > { %10074 = vmatpush3.bf16.msra.mxu0 %v10440_v19  ;;  %10130 = vmatpush3.bf16.msra.mxu1 %v10441_v4  ;;  %v10507_v19 = vld [vmem:[%s15316_s8 + $0x54] ss:$8 sps:$4 sm:$0xff]   ;;  %v10505_v4 = vld [vmem:[%s15316_s8 + $0x50] ss:$8 sps:$4 sm:$0xff]  }
 0x42f   : > { %10075 = vmatprep.subr.bf16.mxu0 %v15906_v25  ;;  %10131 = vmatprep.subr.bf16.mxu1 %v15906_v25 }
 0x432   : > { %10076 = vmatpush3.bf16.msra.mxu0 %v10442_v22  ;;  %10132 = vmatpush3.bf16.msra.mxu1 %v10443_v35  ;;  %v10510_v22 = vld [vmem:[%s15316_s8 + $0x44] ss:$8 sps:$4 sm:$0xff]   ;;  %v10508_v35 = vld [vmem:[%s15316_s8 + $0x40] ss:$8 sps:$4 sm:$0xff]  }
 0x433   : > { %10077 = vmatprep.subr.bf16.mxu0 %v15906_v25  ;;  %10133 = vmatprep.subr.bf16.mxu1 %v15906_v25 }
 0x436   : > { %10078 = vmatpush3.bf16.msra.mxu0 %v10444_v36  ;;  %10134 = vmatpush3.bf16.msra.mxu1 %v10445_v63  ;;  %v10513_v36 = vld [vmem:[%s15316_s8 + $0x34] ss:$8 sps:$4 sm:$0xff]   ;;  %v10511_v63 = vld [vmem:[%s15316_s8 + $0x30] ss:$8 sps:$4 sm:$0xff]  }
 0x437   : > { %10079 = vmatprep.subr.bf16.mxu0 %v15906_v25  ;;  %10135 = vmatprep.subr.bf16.mxu1 %v15906_v25 }
 0x43a   : > { %10080 = vmatpush3.bf16.msra.mxu0 %v10446_v12  ;;  %10136 = vmatpush3.bf16.msra.mxu1 %v10447_v58 }
 0x43b   : > { %10105 = vmatprep.subr.bf16.mxu0 %v15906_v25  ;;  %10137 = vmatprep.subr.bf16.mxu1 %v15906_v25 }
 0x43d   : > { %10082 = vmatmul.mubr.bf16.vlgmr.msra.gmra.mxu0 %v5305_v28  ;;  %v10454_v28 = vld [vmem:[%s15314_s6 + $0x1e0] sm:$0xff]  }
 0x43e   : > { %10106 = vmatpush3.bf16.msra.mxu0 %v10448_v24  ;;  %10138 = vmatpush3.bf16.msra.mxu1 %v10449_v9  ;;  %v10516_v24 = vld [vmem:[%s15316_s8 + $0x24] ss:$8 sps:$4 sm:$0xff]  }
 0x43f   : > { %10107 = vmatprep.subr.bf16.mxu0 %v15906_v25  ;;  %10139 = vmatprep.subr.bf16.mxu1 %v15906_v25 }
 0x440   : > { %10121 = vmatprep.mubr.msk.bf16.mxu0 %vm10651_vm3, %v15906_v25 }
 0x442   : > { %10108 = vmatpush3.bf16.msra.mxu0 %v10450_v3  ;;  %10140 = vmatpush3.bf16.msra.mxu1 %v10451_v10  ;;  %v10514_v3 = vld [vmem:[%s15316_s8 + $0x20] ss:$8 sps:$4 sm:$0xff]  }
 0x443   : > { %10109 = vmatprep.subr.bf16.mxu0 %v15906_v25  ;;  %10165 = vmatprep.subr.bf16.mxu1 %v15906_v25 }
 0x445   : > { %10142 = vmatmul.mubr.bf16.vlgmr.msra.gmra.mxu1 %v5638_v2  ;;  %v10458_v2 = vld [vmem:[%s15314_s6 + $0x1d0] sm:$0xff]  }
 0x446   : > { %10110 = vmatpush3.bf16.msra.mxu0 %v10452_v15  ;;  %10166 = vmatpush3.bf16.msra.mxu1 %v10453_v55 }
 0x447   : > { %10111 = vmatprep.subr.bf16.mxu0 %v15906_v25  ;;  %10167 = vmatprep.subr.bf16.mxu1 %v15906_v25 }
 0x448   : > { %10181 = vmatprep.mubr.msk.bf16.mxu1 %vm10651_vm3, %v15906_v25 }
 0x44a   : > { %10112 = vmatpush3.bf16.msra.mxu0 %v10454_v28  ;;  %10168 = vmatpush3.bf16.msra.mxu1 %v10455_v41  ;;  %v10519_v28 = vld [vmem:[%s15316_s8 + $0x14] ss:$8 sps:$4 sm:$0xff]  }
 0x44b   : > { %10113 = vmatprep.subr.bf16.mxu0 %v15906_v25  ;;  %10169 = vmatprep.subr.bf16.mxu1 %v15906_v25 }
 0x44e   : > { %10114 = vmatpush3.bf16.msra.mxu0 %v10456_v34  ;;  %10170 = vmatpush3.bf16.msra.mxu1 %v10457_v38  ;;  %v10517_v34 = vld [vmem:[%s15316_s8 + $0x10] ss:$8 sps:$4 sm:$0xff]  }
 0x44f   : > { %10115 = vmatprep.subr.bf16.mxu0 %v15906_v25  ;;  %10171 = vmatprep.subr.bf16.mxu1 %v15906_v25 }
 0x452   : > { %10116 = vmatpush3.bf16.msra.mxu0 %v10458_v2  ;;  %10172 = vmatpush3.bf16.msra.mxu1 %v10459_v39  ;;  %v10522_v39 = vld [vmem:[%s15316_s8 + $0x4] ss:$8 sps:$4 sm:$0xff]  }
 0x453   : > { %10117 = vmatprep.subr.bf16.mxu0 %v15906_v25  ;;  %10173 = vmatprep.subr.bf16.mxu1 %v15906_v25 }
 0x456   : > { %10118 = vmatpush3.bf16.msra.mxu0 %v10460_v20  ;;  %10174 = vmatpush3.bf16.msra.mxu1 %v10461_v5  ;;  %v10520_v5 = vld [vmem:[%s15316_s8] ss:$8 sps:$4 sm:$0xff]  }
 0x457   : > { %10119 = vmatprep.subr.bf16.mxu0 %v15906_v25  ;;  %10175 = vmatprep.subr.bf16.mxu1 %v15906_v25 }
 0x45a   : > { %10120 = vmatpush3.bf16.msra.mxu0 %v10462_v57  ;;  %10176 = vmatpush3.bf16.msra.mxu1 %v10463_v61 }
 0x45b   : > { %10145 = vmatprep.subr.bf16.mxu0 %v15906_v25  ;;  %10177 = vmatprep.subr.bf16.mxu1 %v15906_v25 }
 0x45d   : > { %10122 = vmatmul.mubr.bf16.vlgmr.msra.gmra.mxu0 %v5527_v53  ;;  %v10479_v53 = vld [vmem:[%s15318_s10 + $0x64] ss:$8 sps:$4 sm:$0xff]  }
 0x45e   : > { %10146 = vmatpush3.bf16.msra.mxu0 %v10464_v40  ;;  %10178 = vmatpush3.bf16.msra.mxu1 %v10465_v14 }
 0x45f   : > { %10147 = vmatprep.subr.bf16.mxu0 %v15906_v25  ;;  %10179 = vmatprep.subr.bf16.mxu1 %v15906_v25 }
 0x460   : > { %10161 = vmatprep.mubr.msk.bf16.mxu0 %vm10651_vm3, %v15906_v25 }
 0x462   : > { %10148 = vmatpush3.bf16.msra.mxu0 %v10466_v50  ;;  %10180 = vmatpush3.bf16.msra.mxu1 %v10467_v21 }
 0x463   : > { %10149 = vmatprep.subr.bf16.mxu0 %v15906_v25  ;;  %7072 = vmatprep.subr.bf16.mxu1 %v10476_v30 }
 0x465   : > { %10182 = vmatmul.mubr.bf16.vlgmr.msra.gmra.mxu1 %v5860_v56 }
 0x466   : > { %10150 = vmatpush3.bf16.msra.mxu0 %v10468_v48  ;;  %7073 = vmatpush1.bf16.msra.mxu1 %v10474_v47 }
 0x467   : > { %10151 = vmatprep.subr.bf16.mxu0 %v15906_v25  ;;  %7074 = vmatprep.subr.bf16.mxu1 %v10479_v53 }
 0x468   : > { %7104 = vmatprep.mubr.bf16.mxu1 %v10652_v6 }
 0x46a   : > { %10152 = vmatpush3.bf16.msra.mxu0 %v10469_v27  ;;  %7075 = vmatpush1.bf16.msra.mxu1 %v10477_v0 }
 0x46b   : > { %10153 = vmatprep.subr.bf16.mxu0 %v15906_v25  ;;  %7076 = vmatprep.subr.bf16.mxu1 %v10482_v42 }
 0x46e   : > { %10154 = vmatpush3.bf16.msra.mxu0 %v10470_v45  ;;  %7077 = vmatpush1.bf16.msra.mxu1 %v10480_v33 }
 0x46f   : > { %10155 = vmatprep.subr.bf16.mxu0 %v15906_v25  ;;  %7078 = vmatprep.subr.bf16.mxu1 %v10485_v1 }
 0x472   : > { %10156 = vmatpush3.bf16.msra.mxu0 %v10471_v59  ;;  %7079 = vmatpush1.bf16.msra.mxu1 %v10483_v44 }
 0x473   : > { %10157 = vmatprep.subr.bf16.mxu0 %v15906_v25  ;;  %7080 = vmatprep.subr.bf16.mxu1 %v10488_v8 }
 0x476   : > { %10158 = vmatpush3.bf16.msra.mxu0 %v10472_v62  ;;  %7081 = vmatpush1.bf16.msra.mxu1 %v10486_v18 }
 0x477   : > { %10159 = vmatprep.subr.bf16.mxu0 %v15906_v25  ;;  %7082 = vmatprep.subr.bf16.mxu1 %v10491_v7  ;;  %v10495_v25 = vld [vmem:[%s15318_s10] ss:$8 sps:$4 sm:$0xff]  }
 0x47a   : > { %10160 = vmatpush3.bf16.msra.mxu0 %v10473_v16  ;;  %7083 = vmatpush1.bf16.msra.mxu1 %v10489_v46 }
 0x47b   : > { %7084 = vmatprep.subr.bf16.mxu1 %v10494_v37  ;;  %6077 = vmatprep.subr.bf16.mxu0 %v10501_v52 }
 0x47d   : > { %10162 = vmatmul.mubr.bf16.vlgmr.msra.gmra.mxu0 %v5749_v43  ;;  %v10499_v43 = vld [vmem:[%s15316_s8 + $0x70] ss:$8 sps:$4 sm:$0xff]  }
 0x47e   : > { %7085 = vmatpush1.bf16.msra.mxu1 %v10492_v29  ;;  %6109 = vmatprep.mubr.bf16.mxu0 %v10652_v6 }
 0x47f   : > { %7086 = vmatprep.subr.bf16.mxu1 %v10497_v11  ;;  %6078 = vmatpush1.bf16.msra.mxu0 %v10499_v43 }
 0x480   : > { %6079 = vmatprep.subr.bf16.mxu0 %v10504_v60 }
 0x482   : > { %7087 = vmatpush1.bf16.msra.mxu1 %v10495_v25 }
 0x483   : > { %6080 = vmatpush1.bf16.msra.mxu0 %v10502_v51 }
 0x484   : > { %6081 = vmatprep.subr.bf16.mxu0 %v10507_v19  ;;  %v8786_v19 = vld [vmem:[%s15315_s7] ss:$0 sm:$0xff] }
 0x485   : > { %7105 = vmatmul.mubr.bf16.vlgmr.msra.gmra.mxu1 %v10498_v23 }
 0x487   : > { %6082 = vmatpush1.bf16.msra.mxu0 %v10505_v4 }
 0x488   : > { %6083 = vmatprep.subr.bf16.mxu0 %v10510_v22 }
 0x48b   : > { %6084 = vmatpush1.bf16.msra.mxu0 %v10508_v35 }
 0x48c   : > { %6085 = vmatprep.subr.bf16.mxu0 %v10513_v36 }
 0x48f   : > { %6086 = vmatpush1.bf16.msra.mxu0 %v10511_v63 }
 0x490   : > { %6087 = vmatprep.subr.bf16.mxu0 %v10516_v24 }
 0x493   : > { %6088 = vmatpush1.bf16.msra.mxu0 %v10514_v3 }
 0x494   : > { %6089 = vmatprep.subr.bf16.mxu0 %v10519_v28 }
 0x497   : > { %6090 = vmatpush1.bf16.msra.mxu0 %v10517_v34 }
 0x498   : > { %6091 = vmatprep.subr.bf16.mxu0 %v10522_v39 }
 0x49b   : > { %6092 = vmatpush1.bf16.msra.mxu0 %v10520_v5 }
 0x49d   : > { %v4874_v32 = vpop.f32.mrf.mxu0 }
 0x49f   : > { %v9983_v13 = vpop.f32.mrf.mxu0 }
 0x4a1   : > { %v4877_v54 = vpop.f32.mrf.mxu0 }
 0x4a3   : > { %v9984_v49 = vpop.f32.mrf.mxu0 }
 0x4a5   : > { %v5072_v26 = vpop.f32.mrf.mxu1 }
 0x4a7   : > { %v10023_v31 = vpop.f32.mrf.mxu1 }
 0x4a9   : > { %v5075_v56 = vpop.f32.mrf.mxu1 }
 0x4ab   : > { %v10024_v17 = vpop.f32.mrf.mxu1 }
 0x4bd   : > { %v4963_v12 = vpop.f32.mrf.mxu0 }
 0x4be   : > { %v4964_v58 = vadd.f32 %v4963_v12, %v4874_v32 }
 0x4bf   : > { %v10003_v9 = vpop.f32.mrf.mxu0 }
 0x4c0   : > { %v5079_v10 = vadd.f32 %v5072_v26, %v4964_v58 }
 0x4c1   : > { %v4966_v15 = vpop.f32.mrf.mxu0 }
 0x4c2   : > { %v4967_v55 = vadd.f32 %v4966_v15, %v4877_v54 }
 0x4c3   : > { %v10004_v41 = vpop.f32.mrf.mxu0 }
 0x4c4   : > { %v5080_v38 = vadd.f32 %v5075_v56, %v4967_v55 }
 0x4c5   : > { %v5294_v2 = vpop.f32.mrf.mxu1 }
 0x4c7   : > { %v10063_v20 = vpop.f32.mrf.mxu1 }
 0x4c9   : > { %v5297_v57 = vpop.f32.mrf.mxu1 }
 0x4cb   : > { %v10064_v61 = vpop.f32.mrf.mxu1 }
 0x4dd   : > { %v5183_v40 = vpop.f32.mrf.mxu0 }
 0x4de   : > { %v5190_v14 = vadd.f32 %v5183_v40, %v5079_v10  ;;  %v15376_v40 = vmov 920167782  }
 0x4df   : > { %v10043_v50 = vpop.f32.mrf.mxu0 }
 0x4e0   : > { %v5301_v21 = vadd.f32 %v5294_v2, %v5190_v14 }
 0x4e1   : > { %v5186_v30 = vpop.f32.mrf.mxu0 }
 0x4e2   : > { %v5191_v48 = vadd.f32 %v5186_v30, %v5080_v38 }
 0x4e3   : > { %v10044_v47 = vpop.f32.mrf.mxu0 }
 0x4e4   : > { %v5302_v53 = vadd.f32 %v5297_v57, %v5191_v48  ;;  %v15370_v57 = vmov 2102212464   ;;  %v15378_v48 = vmov 1326507024  }
 0x4e5   : > { %v5516_v27 = vpop.f32.mrf.mxu1 }
 0x4e7   : > { %v10103_v0 = vpop.f32.mrf.mxu1 }
 0x4e8   : > { %v15374_v0 = vmov 2475754826  }
 0x4e9   : > { %v5519_v42 = vpop.f32.mrf.mxu1 }
 0x4eb   : > { %v10104_v45 = vpop.f32.mrf.mxu1 }
 0x4fd   : > { %v5405_v33 = vpop.f32.mrf.mxu0 }
 0x4fe   : > { %v5412_v1 = vadd.f32 %v5405_v33, %v5301_v21 }
 0x4ff   : > { %v10083_v6 = vpop.f32.mrf.mxu0 }
 0x500   : > { %v5523_v59 = vadd.f32 %v5516_v27, %v5412_v1  ;;  %v15372_v1 = vmov 2131351028  }
 0x501   : > { %v5408_v44 = vpop.f32.mrf.mxu0 }
 0x502   : > { %v5413_v8 = vadd.f32 %v5408_v44, %v5302_v53  ;;  %v15381_v53 = vmov 683565275  }
 0x503   : > { %v10084_v62 = vpop.f32.mrf.mxu0 }
 0x504   : > { %v5524_v18 = vadd.f32 %v5519_v42, %v5413_v8 }
 0x505   : > { %v5738_v7 = vpop.f32.mrf.mxu1 }
 0x507   : > { %v10143_v16 = vpop.f32.mrf.mxu1 }
 0x509   : > { %v5741_v46 = vpop.f32.mrf.mxu1 }
 0x50b   : > { %v10144_v37 = vpop.f32.mrf.mxu1 }
 0x51d   : > { %v5627_v29 = vpop.f32.mrf.mxu0 }
 0x51e   : > { %v5634_v26 = vadd.f32 %v5627_v29, %v5523_v59 }
 0x51f   : > { %v10123_v11 = vpop.f32.mrf.mxu0 }
 0x520   : > { %v5745_v56 = vadd.f32 %v5738_v7, %v5634_v26 }
 0x521   : > { %v5630_v25 = vpop.f32.mrf.mxu0 }
 0x522   : > { %v5635_v31 = vadd.f32 %v5630_v25, %v5524_v18 }
 0x523   : > { %v10124_v23 = vpop.f32.mrf.mxu0 }
 0x524   : > { %v5746_v51 = vadd.f32 %v5741_v46, %v5635_v31 }
 0x525   : > { %v5960_v32 = vpop.f32.mrf.mxu1 }
 0x527   : > { %v10183_v13 = vpop.f32.mrf.mxu1 }
 0x529   : > { %v5963_v54 = vpop.f32.mrf.mxu1 }
 0x52b   : > { %v10184_v49 = vpop.f32.mrf.mxu1 }
 0x53d   : > { %v5849_v52 = vpop.f32.mrf.mxu0 }
 0x53e   : > { %v5856_v17 = vadd.f32 %v5849_v52, %v5745_v56 }
 0x53f   : > { %v10163_v43 = vpop.f32.mrf.mxu0 }
 0x540   : > { %v5967_v60 = vadd.f32 %v5960_v32, %v5856_v17 }
 0x541   : > { %v5852_v4 = vpop.f32.mrf.mxu0 }
 0x542   : > { %v5857_v22 = vadd.f32 %v5852_v4, %v5746_v51  ;;  %v5976_v36 = vadd.f32 %v8786_v19, %v5967_v60 }
 0x543   : > { %v10164_v35 = vpop.f32.mrf.mxu0 }
 0x544   : > { %v5968_v63 = vadd.f32 %v5963_v54, %v5857_v22  ;;  %v5978_v9 = vmax.f32 %v5976_v36, 0.0 }
 0x545   : > { %v13549_v12 = vpop.f32.mrf.mxu1 }
 0x546   : > { %v5977_v58 = vadd.f32 %v8786_v19, %v5968_v63  ;;  %v7546_v24 = vand.u32 2139095040, %v13549_v12  ;;  %v15367_v50 = vand.u32 2147483647, %v13549_v12 }
 0x547   : > { %v13552_v41 = vpop.f32.mrf.mxu1 }
 0x548   : > { %v5979_v3 = vmax.f32 %v5977_v58, 0.0  ;;  %v7547_v10 = vshrl.u32 %v7546_v24, 23  ;;  %v7650_v34 = vand.u32 2139095040, %v13552_v41  ;;  %v7550_v62 = vand.u32 8388607, %v15367_v50 }
 0x549   : > { %v13575_v56 = vpop.f32.mrf.mxu1 }
 0x54a   : > { %v5980_v15 = vpack.c.bf16 %v5979_v3, %v5978_v9  ;;  %v8868_v55 = vadd.s32 4294967169, %v7547_v10  ;;  %v7651_v39 = vshrl.u32 %v7650_v34, 23  ;;  %v7551_v29 = vor.u32 8388608, %v7550_v62  ;;  %15938 = vst [vmem:[#allocation91_spill] sm:$0xff] %v13575_v56 }
 0x54b   : > { %v7754_v17 = vand.u32 2139095040, %v13575_v56  ;;  %v6122_v3 = vlaneseq  ;;  %v15366_v10 = vand.u32 2147483647, %v13552_v41 }
 0x54c   : > { %6110 = vmatmul.mubr.bf16.vlgmr.msra.gmra.mxu0 %v5980_v15  ;;  %v7553_v28 = vadd.s32 1, %v8868_v55  ;;  %v8872_v5 = vadd.s32 4294967169, %v7651_v39  ;;  %v7591_v49 = vshll.u32 %v7551_v29, 8 }
 0x54d   : > { %v7755_v36 = vshrl.u32 %v7754_v17, 23 }
 0x54e   : > { %vm7554_vm4 = vcmp.gt.s32.totalorder %v7553_v28, 0  ;;  %v7657_v45 = vadd.s32 1, %v8872_v5 }
 0x54f   : > { %v7555_v38 = vsel %vm7554_vm4, %v7553_v28, 0  ;;  %v8876_v39 = vadd.s32 4294967169, %v7755_v36 }
 0x550   : > { %v7557_v2 = vand.u32 31, %v7555_v38  ;;  %v7556_v21 = vshrl.u32 %v7555_v38, 5  ;;  %vm7658_vm6 = vcmp.gt.s32.totalorder %v7657_v45, 0 }
 0x551   : > { %v7659_v25 = vsel %vm7658_vm6, %v7657_v45, 0  ;;  %v13607_v45 = vshrl.u32 %v6122_v3, 7 }
 0x552   : > { %v7558_v20 = vsub.s32 32, %v7557_v2  ;;  %v7569_v61 = vshll.u32 %v15370_v57, %v7557_v2  ;;  %v7572_v30 = vshll.u32 %v15376_v40, %v7557_v2  ;;  %v7560_v27 = vshll.u32 %v15381_v53, %v7557_v2 }
 0x553   : > { %v7563_v42 = vshll.u32 %v15374_v0, %v7557_v2  ;;  %v7566_v59 = vshll.u32 %v15372_v1, %v7557_v2  ;;  %vm7578_vm5 = vcmp.lt.s32.totalorder %v7556_v21, 4  ;;  %vm7575_vm7 = vcmp.lt.s32.totalorder %v7556_v21, 1  ;;  %15939 = vst [vmem:[#allocation155_spill] sm:$0xff] %v13607_v45 }
 0x554   : > { %v7570_v14 = vshrl.u32 %v15376_v40, %v7558_v20  ;;  %v7573_v47 = vshrl.u32 %v15378_v48, %v7558_v20  ;;  %v7561_v33 = vshrl.u32 %v15374_v0, %v7558_v20  ;;  %v7564_v6 = vshrl.u32 %v15372_v1, %v7558_v20 }
 0x555   : > { %v7567_v44 = vshrl.u32 %v15370_v57, %v7558_v20  ;;  %vm7577_vm8 = vcmp.lt.s32.totalorder %v7556_v21, 3  ;;  %vm7576_vm9 = vcmp.lt.s32.totalorder %v7556_v21, 2  ;;  %v7661_v26 = vand.u32 31, %v7659_v25 }
 0x556   : > { %v7571_v8 = vor.u32 %v7570_v14, %v7569_v61  ;;  %v7574_v18 = vor.u32 %v7573_v47, %v7572_v30  ;;  %v7562_v7 = vor.u32 %v7561_v33, %v7560_v27  ;;  %v7565_v16 = vor.u32 %v7564_v6, %v7563_v42 }
 0x557   : > { %v7568_v46 = vor.u32 %v7567_v44, %v7566_v59  ;;  %v7559_v43 = vshrl.u32 %v15381_v53, %v7558_v20  ;;  %v7662_v4 = vsub.s32 32, %v7661_v26  ;;  %v7673_v24 = vshll.u32 %v15370_v57, %v7661_v26 }
 0x558   : > { %v7584_v37 = vsel %vm7578_vm5, %v7571_v8, 920167782  ;;  %v7588_v11 = vsel %vm7578_vm5, %v7574_v18, 1326507024  ;;  %v7583_v23 = vsel %vm7575_vm7, %v7562_v7, %v7565_v16  ;;  %v7660_v15 = vshrl.u32 %v7659_v25, 5 }
 0x559   : > { %v7585_v32 = vsel %vm7577_vm8, %v7568_v46, %v7584_v37  ;;  %v7587_v13 = vsel %vm7575_vm7, %v7565_v16, %v7568_v46  ;;  %v7589_v54 = vsel %vm7577_vm8, %v7571_v8, %v7588_v11  ;;  %v7580_v60 = vsel %vm7578_vm5, %v7568_v46, 2102212464 }
 0x55a   : > { %v7586_v31 = vsel %vm7576_vm9, %v7583_v23, %v7585_v32  ;;  %v7590_v52 = vsel %vm7576_vm9, %v7587_v13, %v7589_v54  ;;  %v7579_v63 = vsel %vm7575_vm7, %v7559_v43, %v7562_v7  ;;  %v7581_v58 = vsel %vm7577_vm8, %v7565_v16, %v7580_v60  ;;  %v13620_v32 = vld [vmem:[%s15319_s11] sm:$0x3] }
 0x55b   : > { %v13581_v51 = vmul.u32.u64.low %v7591_v49, %v7586_v31  ;;  %v13582_v19 = vmul.u32.u64.high %v7591_v49, %v7586_v31, %v13581_v51  ;;  %v13585_v22 = vmul.u32.u64.low %v7591_v49, %v7590_v52  ;;  %v13586_v35 = vmul.u32.u64.high %v7591_v49, %v7590_v52, %v13585_v22 }
 0x55c   : > { %v7674_v9 = vshrl.u32 %v15376_v40, %v7662_v4  ;;  %v7676_v55 = vshll.u32 %v15376_v40, %v7661_v26  ;;  %v7677_v28 = vshrl.u32 %v15378_v48, %v7662_v4  ;;  %v7582_v34 = vsel %vm7576_vm9, %v7579_v63, %v7581_v58 }
 0x55d   : > { %v7664_v38 = vshll.u32 %v15381_v53, %v7661_v26  ;;  %v7665_v2 = vshrl.u32 %v15374_v0, %v7662_v4  ;;  %v7667_v20 = vshll.u32 %v15374_v0, %v7661_v26  ;;  %v7668_v5 = vshrl.u32 %v15372_v1, %v7662_v4 }
 0x55e   : > { %v7670_v61 = vshll.u32 %v15372_v1, %v7661_v26  ;;  %v7671_v14 = vshrl.u32 %v15370_v57, %v7662_v4  ;;  %v7601_v30 = vadd.s32 1, %v13582_v19  ;;  %v7675_v47 = vor.u32 %v7674_v9, %v7673_v24 }
 0x55f   : > { %vm7600_vm10 = vc.u32 %v13586_v35, %v13581_v51  ;;  %v7654_v21 = vand.u32 8388607, %v15366_v10  ;;  %v7678_v27 = vor.u32 %v7677_v28, %v7676_v55  ;;  %vm7682_vm11 = vcmp.lt.s32.totalorder %v7660_v15, 4 }
 0x560   : > { %v7598_v42 = vmul.u32 %v7591_v49, %v7582_v34  ;;  %v7666_v33 = vor.u32 %v7665_v2, %v7664_v38  ;;  %v7669_v6 = vor.u32 %v7668_v5, %v7667_v20  ;;  %v7672_v59 = vor.u32 %v7671_v14, %v7670_v61 }
 0x561   : > { %v7761_v44 = vadd.s32 1, %v8876_v39  ;;  %v7602_v8 = vsel %vm7600_vm10, %v7601_v30, %v13582_v19  ;;  %vm7679_vm12 = vcmp.lt.s32.totalorder %v7660_v15, 1  ;;  %vm7681_vm13 = vcmp.lt.s32.totalorder %v7660_v15, 3 }
 0x562   : > { %v7688_v62 = vsel %vm7682_vm11, %v7675_v47, 920167782  ;;  %v7655_v18 = vor.u32 8388608, %v7654_v21  ;;  %v7692_v7 = vsel %vm7682_vm11, %v7678_v27, 1326507024  ;;  %vm7680_vm14 = vcmp.lt.s32.totalorder %v7660_v15, 2 }
 0x563   : > { %v7603_v16 = vadd.s32 %v7602_v8, %v7598_v42  ;;  %v7687_v46 = vsel %vm7679_vm12, %v7666_v33, %v7669_v6  ;;  %v7689_v37 = vsel %vm7681_vm13, %v7672_v59, %v7688_v62  ;;  %vm7762_vm15 = vcmp.gt.s32.totalorder %v7761_v44, 0 }
 0x564   : > { %v7691_v29 = vsel %vm7679_vm12, %v7669_v6, %v7672_v59  ;;  %v7693_v11 = vsel %vm7681_vm13, %v7675_v47, %v7692_v7  ;;  %v15362_v25 = vsub.s32 0, %v13607_v45  ;;  %v7695_v23 = vshll.u32 %v7655_v18, 8 }
 0x565   : > { %v7690_v13 = vsel %vm7680_vm14, %v7687_v46, %v7689_v37  ;;  %v7763_v54 = vsel %vm7762_vm15, %v7761_v44, 0  ;;  %v7604_v49 = vadd.s32 536870912, %v7603_v16  ;;  %v7694_v26 = vsel %vm7680_vm14, %v7691_v29, %v7693_v11 }
 0x566   : > { %v13627_v31 = vrot.slane %v13620_v32, %v15362_v25  ;;  %v7663_v52 = vshrl.u32 %v15381_v53, %v7662_v4  ;;  %v13630_v17 = vmul.u32.u64.low %v7695_v23, %v7690_v13  ;;  %v13631_v43 = vmul.u32.u64.high %v7695_v23, %v7690_v13, %v13630_v17 }
 0x567   : > { %v7765_v60 = vand.u32 31, %v7763_v54  ;;  %v7684_v19 = vsel %vm7682_vm11, %v7672_v59, 2102212464  ;;  %v13635_v22 = vmul.u32.u64.low %v7695_v23, %v7694_v26  ;;  %v13636_v36 = vmul.u32.u64.high %v7695_v23, %v7694_v26, %v13635_v22 }
 0x568   : > { %v13638_v63 = vshrl.u32 %v7604_v49, 30  ;;  %v7683_v58 = vsel %vm7679_vm12, %v7663_v52, %v7666_v33  ;;  %v7685_v24 = vsel %vm7681_vm13, %v7669_v6, %v7684_v19  ;;  %v13644_v4 = vadd.f32 %v13627_v31, %v13549_v12 }
 0x569   : > { %v7766_v9 = vsub.s32 32, %v7765_v60  ;;  %v7686_v55 = vsel %vm7680_vm14, %v7683_v58, %v7685_v24  ;;  %v15365_v28 = vand.u32 2147483647, %v13575_v56  ;;  %v7705_v34 = vadd.s32 1, %v13631_v43 }
 0x56a   : > { %15940 = vst [vmem:[#allocation20_spill] sm:$0xff] %v13644_v4  ;;  %v7606_v3 = vshll.u32 %v13638_v63, 30  ;;  %v7777_v38 = vshll.u32 %v15370_v57, %v7765_v60  ;;  %v7134_v39 = vand.u32 2139095040, %v13644_v4  ;;  %vm7704_vm0 = vc.u32 %v13636_v36, %v13630_v17 }
 0x56b   : > { %v7778_v2 = vshrl.u32 %v15376_v40, %v7766_v9  ;;  %v13655_v20 = vshrl.u32 %v7763_v54, 5  ;;  %v7780_v5 = vshll.u32 %v15376_v40, %v7765_v60  ;;  %v7781_v15 = vshrl.u32 %v15378_v48, %v7766_v9 }
 0x56c   : > { %v13659_v61 = vsub.s32 %v7603_v16, %v7606_v3  ;;  %v7702_v14 = vmul.u32 %v7695_v23, %v7686_v55  ;;  %v7768_v30 = vshll.u32 %v15381_v53, %v7765_v60  ;;  %v7771_v47 = vshll.u32 %v15374_v0, %v7765_v60 }
 0x56d   : > { %v7769_v21 = vshrl.u32 %v15374_v0, %v7766_v9  ;;  %v7772_v27 = vshrl.u32 %v15372_v1, %v7766_v9  ;;  %v7774_v42 = vshll.u32 %v15372_v1, %v7765_v60  ;;  %v7775_v33 = vshrl.u32 %v15370_v57, %v7766_v9 }
 0x56e   : > { %v7706_v6 = vsel %vm7704_vm0, %v7705_v34, %v13631_v43  ;;  %v7779_v59 = vor.u32 %v7778_v2, %v7777_v38  ;;  %v7758_v44 = vand.u32 8388607, %v15365_v28  ;;  %v7782_v8 = vor.u32 %v7781_v15, %v7780_v5 }
 0x56f   : > { %vm7786_vm1 = vcmp.lt.s32.totalorder %v13655_v20, 4  ;;  %v7135_v62 = vshrl.u32 %v7134_v39, 23  ;;  %v7609_v18 = vsub.s32 0, %v13659_v61  ;;  %v7707_v7 = vadd.s32 %v7706_v6, %v7702_v14 }
 0x570   : > { %v7770_v16 = vor.u32 %v7769_v21, %v7768_v30  ;;  %v7773_v46 = vor.u32 %v7772_v27, %v7771_v47  ;;  %v7776_v37 = vor.u32 %v7775_v33, %v7774_v42  ;;  %vm7783_vm2 = vcmp.lt.s32.totalorder %v13655_v20, 1 }
 0x571   : > { %vm7785_vm3 = vcmp.lt.s32.totalorder %v13655_v20, 3  ;;  %v7792_v29 = vsel %vm7786_vm1, %v7779_v59, 920167782  ;;  %v7759_v11 = vor.u32 8388608, %v7758_v44  ;;  %v7796_v23 = vsel %vm7786_vm1, %v7782_v8, 1326507024 }
 0x572   : > { %v15361_v13 = vsub.s32 1, %v13607_v45  ;;  %v8852_v54 = vadd.s32 4294967169, %v7135_v62  ;;  %v8869_v49 = vmin.u32 %v7609_v18, %v13659_v61  ;;  %v7708_v26 = vadd.s32 536870912, %v7707_v7 }
 0x573   : > { %vm7784_vm4 = vcmp.lt.s32.totalorder %v13655_v20, 2  ;;  %v7791_v52 = vsel %vm7783_vm2, %v7770_v16, %v7773_v46  ;;  %v7793_v43 = vsel %vm7785_vm3, %v7776_v37, %v7792_v29  ;;  %v7795_v60 = vsel %vm7783_vm2, %v7773_v46, %v7776_v37 }
 0x574   : > { %v7797_v19 = vsel %vm7785_vm3, %v7779_v59, %v7796_v23  ;;  %v7799_v22 = vshll.u32 %v7759_v11, 8  ;;  %v13692_v58 = vrot.slane %v13620_v32, %v15361_v13  ;;  %v7141_v24 = vadd.s32 1, %v8852_v54 }
 0x575   : > { %v7611_v3 = vclz %v8869_v49  ;;  %v7794_v55 = vsel %vm7784_vm4, %v7791_v52, %v7793_v43  ;;  %v13696_v34 = vshrl.u32 %v7708_v26, 30  ;;  %v7798_v38 = vsel %vm7784_vm4, %v7795_v60, %v7797_v19 }
 0x576   : > { %v13700_v2 = vmul.u32.u64.low %v7799_v22, %v7794_v55  ;;  %v13701_v39 = vmul.u32.u64.high %v7799_v22, %v7794_v55, %v13700_v2  ;;  %v13706_v5 = vadd.f32 %v13692_v58, %v13552_v41  ;;  %vm7142_vm5 = vcmp.gt.s32.totalorder %v7141_v24, 0 }
 0x577   : > { %v8870_v32 = vadd.s32 4294967294, %v7611_v3  ;;  %v7767_v15 = vshrl.u32 %v15381_v53, %v7766_v9  ;;  %v13709_v14 = vmul.u32.u64.low %v7799_v22, %v7798_v38  ;;  %v13710_v30 = vmul.u32.u64.high %v7799_v22, %v7798_v38, %v13709_v14 }
 0x578   : > { %15941 = vst [vmem:[#allocation88_spill] sm:$0xff] %v13706_v5  ;;  %v7710_v47 = vshll.u32 %v13696_v34, 30  ;;  %v7788_v21 = vsel %vm7786_vm1, %v7776_v37, 2102212464  ;;  %v7143_v27 = vsel %vm7142_vm5, %v7141_v24, 0  ;;  %v7237_v6 = vand.u32 2139095040, %v13706_v5 }
 0x579   : > { %vm8871_vm6 = vcmp.lt.s32.totalorder %v8870_v32, 0  ;;  %v7787_v42 = vsel %vm7783_vm2, %v7767_v15, %v7770_v16  ;;  %v7789_v33 = vsel %vm7785_vm3, %v7773_v46, %v7788_v21  ;;  %v7145_v9 = vand.u32 31, %v7143_v27 }
 0x57a   : > { %v13720_v59 = vsub.s32 %v7707_v7, %v7710_v47  ;;  %v7614_v44 = vsel %vm8871_vm6, 0, %v8870_v32  ;;  %v7790_v8 = vsel %vm7784_vm4, %v7787_v42, %v7789_v33  ;;  %v7809_v62 = vadd.s32 1, %v13701_v39 }
 0x57b   : > { %vm7808_vm7 = vc.u32 %v13710_v30, %v13700_v2  ;;  %v7238_v18 = vshrl.u32 %v7237_v6, 23  ;;  %v7146_v37 = vsub.s32 32, %v7145_v9  ;;  %v7619_v29 = vsub.s32 4294967266, %v7614_v44  ;;  %v13756_v6 = vpop.f32.mrf.mxu1 }
 0x57c   : > { %v7713_v16 = vsub.s32 0, %v13720_v59  ;;  %v7806_v46 = vmul.u32 %v7799_v22, %v7790_v8  ;;  %v7810_v11 = vsel %vm7808_vm7, %v7809_v62, %v13701_v39  ;;  %v7599_v7 = vadd.s32 %v13581_v51, %v13586_v35  ;;  %15943 = vst [vmem:[#allocation92_spill] sm:$0xff] %v13756_v6 }
 0x57d   : > { %v13733_v20 = vadd.f32 %v13627_v31, %v13575_v56  ;;  %v15364_v23 = vand.u32 2147483647, %v13644_v4  ;;  %v8856_v54 = vadd.s32 4294967169, %v7238_v18  ;;  %v7615_v49 = vsub.s32 32, %v7614_v44 }
 0x57e   : > { %v8873_v26 = vmin.u32 %v7713_v16, %v13720_v59  ;;  %v7157_v52 = vshll.u32 %v15370_v57, %v7145_v9  ;;  %v7158_v43 = vshrl.u32 %v15376_v40, %v7146_v37  ;;  %v7620_v60 = vadd.s32 127, %v7619_v29 }
 0x57f   : > { %15942 = vst [vmem:[#allocation90_spill] sm:$0xff] %v13733_v20  ;;  %v13739_v19 = vadd.s32 %v7810_v11, %v7806_v46  ;;  %v13741_v22 = vshrl.u32 %v7143_v27, 5  ;;  %v7148_v51 = vshll.u32 %v15381_v53, %v7145_v9  ;;  %v7149_v35 = vshrl.u32 %v15374_v0, %v7146_v37 }
 0x580   : > { %v7151_v31 = vshll.u32 %v15374_v0, %v7145_v9  ;;  %v7160_v24 = vshll.u32 %v15376_v40, %v7145_v9  ;;  %v7161_v3 = vshrl.u32 %v15378_v48, %v7146_v37  ;;  %v7152_v55 = vshrl.u32 %v15372_v1, %v7146_v37 }
 0x581   : > { %v7154_v38 = vshll.u32 %v15372_v1, %v7145_v9  ;;  %v7155_v39 = vshrl.u32 %v15370_v57, %v7146_v37  ;;  %v7244_v32 = vadd.s32 1, %v8856_v54  ;;  %v7715_v15 = vclz %v8873_v26 }
 0x582   : > { %v7159_v14 = vor.u32 %v7158_v43, %v7157_v52  ;;  %v7616_v47 = vshll.u32 %v13659_v61, %v7614_v44  ;;  %v7617_v21 = vshrl.u32 %v7599_v7, %v7615_v49  ;;  %v7138_v27 = vand.u32 8388607, %v15364_v23 }
 0x583   : > { %vm7166_vm8 = vcmp.lt.s32.totalorder %v13741_v22, 4  ;;  %v7621_v42 = vshll.u32 %v7620_v60, 23  ;;  %v7812_v33 = vadd.s32 536870912, %v13739_v19  ;;  %v7162_v8 = vor.u32 %v7161_v3, %v7160_v24 }
 0x584   : > { %v7340_v9 = vand.u32 2139095040, %v13733_v20  ;;  %v7150_v62 = vor.u32 %v7149_v35, %v7148_v51  ;;  %v7153_v18 = vor.u32 %v7152_v55, %v7151_v31  ;;  %v7156_v16 = vor.u32 %v7155_v39, %v7154_v38 }
 0x585   : > { %vm7245_vm9 = vcmp.gt.s32.totalorder %v7244_v32, 0  ;;  %v8874_v29 = vadd.s32 4294967294, %v7715_v15  ;;  %vm7163_vm10 = vcmp.lt.s32.totalorder %v13741_v22, 1  ;;  %vm7165_vm11 = vcmp.lt.s32.totalorder %v13741_v22, 3 }
 0x586   : > { %v7172_v61 = vsel %vm7166_vm8, %v7159_v14, 920167782  ;;  %v13765_v44 = vadd.f32 %v13692_v58, %v13756_v6  ;;  %v7139_v46 = vor.u32 8388608, %v7138_v27  ;;  %v13767_v11 = vshrl.u32 %v7812_v33, 30 }
 0x587   : > { %v7176_v7 = vsel %vm7166_vm8, %v7162_v8, 1326507024  ;;  %v7246_v54 = vsel %vm7245_vm9, %v7244_v32, 0  ;;  %v7341_v49 = vshrl.u32 %v7340_v9, 23  ;;  %v13771_v26 = vor.u32 %v7617_v21, %v7616_v47 }
 0x588   : > { %15944 = vst [vmem:[#allocation151_spill] sm:$0xff] %v13765_v44  ;;  %vm7164_vm12 = vcmp.lt.s32.totalorder %v13741_v22, 2  ;;  %v7171_v52 = vsel %vm7163_vm10, %v7150_v62, %v7153_v18  ;;  %v7173_v43 = vsel %vm7165_vm11, %v7156_v16, %v7172_v61  ;;  %v13778_v58 = vor.u32 4788187, %v7621_v42 }
 0x589   : > { %vm8875_vm13 = vcmp.lt.s32.totalorder %v8874_v29, 0  ;;  %v15363_v60 = vand.u32 2147483647, %v13706_v5  ;;  %v8860_v51 = vadd.s32 4294967169, %v7341_v49  ;;  %v7175_v35 = vsel %vm7163_vm10, %v7153_v18, %v7156_v16 }
 0x58a   : > { %v7177_v31 = vsel %vm7165_vm11, %v7159_v14, %v7176_v7  ;;  %v13785_v24 = vshll.u32 %v7139_v46, 8  ;;  %v7248_v3 = vand.u32 31, %v7246_v54  ;;  %v7814_v55 = vshll.u32 %v13767_v11, 30 }
 0x58b   : > { %v7147_v38 = vshrl.u32 %v15381_v53, %v7146_v37  ;;  %v7174_v39 = vsel %vm7164_vm12, %v7171_v52, %v7173_v43  ;;  %v7347_v32 = vadd.s32 1, %v8860_v51  ;;  %v13794_v47 = vadd.s32 %v13630_v17, %v13636_v36 }
 0x58c   : > { %v13796_v21 = vsel %vm8875_vm13, 0, %v8874_v29  ;;  %v7168_v14 = vsel %vm7166_vm8, %v7156_v16, 2102212464  ;;  %v7178_v37 = vsel %vm7164_vm12, %v7175_v35, %v7177_v31  ;;  %v7241_v42 = vand.u32 8388607, %v15363_v60 }
 0x58d   : > { %vm7348_vm14 = vcmp.gt.s32.totalorder %v7347_v32, 0  ;;  %v13806_v33 = vmul.u32.u64.low %v13785_v24, %v7174_v39  ;;  %v13807_v8 = vmul.u32.u64.high %v13785_v24, %v7174_v39, %v13806_v33  ;;  %v7249_v17 = vsub.s32 32, %v7248_v3 }
 0x58e   : > { %v7349_v36 = vsel %vm7348_vm14, %v7347_v32, 0  ;;  %v7723_v9 = vsub.s32 4294967266, %v13796_v21  ;;  %v13812_v16 = vsub.s32 %v13739_v19, %v7814_v55  ;;  %v7167_v29 = vsel %vm7163_vm10, %v7147_v38, %v7150_v62 }
 0x58f   : > { %v7169_v61 = vsel %vm7165_vm11, %v7153_v18, %v7168_v14  ;;  %v13819_v46 = vmul.u32.u64.low %v13785_v24, %v7178_v37  ;;  %v13820_v7 = vmul.u32.u64.high %v13785_v24, %v7178_v37, %v13819_v46  ;;  %v7351_v49 = vand.u32 31, %v7349_v36 }
 0x590   : > { %v7443_v52 = vand.u32 2139095040, %v13765_v44  ;;  %v7242_v43 = vor.u32 8388608, %v7241_v42  ;;  %v13823_v51 = vshrl.u32 %v7246_v54, 5  ;;  %v7251_v35 = vshll.u32 %v15381_v53, %v7248_v3 }
 0x591   : > { %v7254_v19 = vshll.u32 %v15374_v0, %v7248_v3  ;;  %v7260_v31 = vshll.u32 %v15370_v57, %v7248_v3  ;;  %v7261_v62 = vshrl.u32 %v15376_v40, %v7249_v17  ;;  %v7263_v18 = vshll.u32 %v15376_v40, %v7248_v3 }
 0x592   : > { %v7264_v55 = vshrl.u32 %v15378_v48, %v7249_v17  ;;  %v7252_v38 = vshrl.u32 %v15374_v0, %v7249_v17  ;;  %v7255_v39 = vshrl.u32 %v15372_v1, %v7249_v17  ;;  %v7257_v32 = vshll.u32 %v15372_v1, %v7248_v3 }
 0x593   : > { %v7258_v54 = vshrl.u32 %v15370_v57, %v7249_v17  ;;  %v13836_v37 = vadd.s32 127, %v7723_v9  ;;  %v13838_v42 = vsub.s32 32, %v7351_v49  ;;  %v7444_v46 = vshrl.u32 %v7443_v52, 23 }
 0x594   : > { %v13843_v25 = vsel %vm7164_vm12, %v7167_v29, %v7169_v61  ;;  %v13845_v60 = vshll.u32 %v7242_v43, 8  ;;  %v15369_v23 = vand.u32 2147483647, %v13733_v20  ;;  %v7189_v3 = vadd.s32 1, %v13807_v8 }
 0x595   : > { %v7250_v28 = vshrl.u32 %v15381_v53, %v7249_v17  ;;  %v7262_v10 = vor.u32 %v7261_v62, %v7260_v31  ;;  %v7265_v9 = vor.u32 %v7264_v55, %v7263_v18  ;;  %v7253_v50 = vor.u32 %v7252_v38, %v7251_v35 }
 0x596   : > { %v7256_v14 = vor.u32 %v7255_v39, %v7254_v19  ;;  %v7259_v15 = vor.u32 %v7258_v54, %v7257_v32  ;;  %vm7269_vm15 = vcmp.lt.s32.totalorder %v13823_v51, 4  ;;  %v7363_v52 = vshll.u32 %v15370_v57, %v7351_v49 }
 0x597   : > { %v7364_v22 = vshrl.u32 %v15376_v40, %v13838_v42  ;;  %v7366_v29 = vshll.u32 %v15376_v40, %v7351_v49  ;;  %v8864_v61 = vadd.s32 4294967169, %v7444_v46  ;;  %vm7266_vm0 = vcmp.lt.s32.totalorder %v13823_v51, 1 }
 0x598   : > { %vm7268_vm1 = vcmp.lt.s32.totalorder %v13823_v51, 3  ;;  %v13857_v17 = vshrl.u32 %v7349_v36, 5  ;;  %v7367_v43 = vshrl.u32 %v15378_v48, %v13838_v42  ;;  %vm7188_vm2 = vc.u32 %v13820_v7, %v13806_v33 }
 0x599   : > { %v7275_v35 = vsel %vm7269_vm15, %v7262_v10, 920167782  ;;  %v7279_v19 = vsel %vm7269_vm15, %v7265_v9, 1326507024  ;;  %v7354_v31 = vshll.u32 %v15381_v53, %v7351_v49  ;;  %v7357_v62 = vshll.u32 %v15374_v0, %v7351_v49 }
 0x59a   : > { %v7355_v36 = vshrl.u32 %v15374_v0, %v13838_v42  ;;  %v7358_v18 = vshrl.u32 %v15372_v1, %v13838_v42  ;;  %v7360_v55 = vshll.u32 %v15372_v1, %v7351_v49  ;;  %v7361_v38 = vshrl.u32 %v15370_v57, %v13838_v42 }
 0x59b   : > { %vm7267_vm3 = vcmp.lt.s32.totalorder %v13823_v51, 2  ;;  %v7365_v39 = vor.u32 %v7364_v22, %v7363_v52  ;;  %v7368_v32 = vor.u32 %v7367_v43, %v7366_v29  ;;  %v7450_v54 = vadd.s32 1, %v8864_v61 }
 0x59c   : > { %v7270_v46 = vsel %vm7266_vm0, %v7250_v28, %v7253_v50  ;;  %v7271_v9 = vsel %vm7269_vm15, %v7259_v15, 2102212464  ;;  %v7344_v27 = vand.u32 8388607, %v15369_v23  ;;  %vm7372_vm4 = vcmp.lt.s32.totalorder %v13857_v17, 4 }
 0x59d   : > { %v7274_v49 = vsel %vm7266_vm0, %v7253_v50, %v7256_v14  ;;  %v7276_v13 = vsel %vm7268_vm1, %v7259_v15, %v7275_v35  ;;  %v7278_v52 = vsel %vm7266_vm0, %v7256_v14, %v7259_v15  ;;  %v7280_v28 = vsel %vm7268_vm1, %v7262_v10, %v7279_v19 }
 0x59e   : > { %v13892_v22 = vor.u32 %v7355_v36, %v7354_v31  ;;  %v13894_v29 = vor.u32 %v7358_v18, %v7357_v62  ;;  %v7362_v61 = vor.u32 %v7361_v38, %v7360_v55  ;;  %vm7369_vm5 = vcmp.lt.s32.totalorder %v13857_v17, 1 }
 0x59f   : > { %vm7371_vm6 = vcmp.lt.s32.totalorder %v13857_v17, 3  ;;  %v7378_v50 = vsel %vm7372_vm4, %v7365_v39, 920167782  ;;  %v7382_v43 = vsel %vm7372_vm4, %v7368_v32, 1326507024  ;;  %vm7451_vm7 = vcmp.gt.s32.totalorder %v7450_v54, 0 }
 0x5a0   : > { %v7272_v15 = vsel %vm7268_vm1, %v7256_v14, %v7271_v9  ;;  %v7277_v10 = vsel %vm7267_vm3, %v7274_v49, %v7276_v13  ;;  %v7345_v35 = vor.u32 8388608, %v7344_v27  ;;  %v7452_v19 = vsel %vm7451_vm7, %v7450_v54, 0 }
 0x5a1   : > { %v7281_v31 = vsel %vm7267_vm3, %v7278_v52, %v7280_v28  ;;  %vm7370_vm8 = vcmp.lt.s32.totalorder %v13857_v17, 2  ;;  %v15368_v62 = vand.u32 2147483647, %v13765_v44  ;;  %v7454_v36 = vand.u32 31, %v7452_v19 }
 0x5a2   : > { %v7377_v18 = vsel %vm7369_vm5, %v13892_v22, %v13894_v29  ;;  %v7379_v14 = vsel %vm7371_vm6, %v7362_v61, %v7378_v50  ;;  %v7381_v13 = vsel %vm7369_vm5, %v13894_v29, %v7362_v61  ;;  %v7383_v27 = vsel %vm7371_vm6, %v7365_v39, %v7382_v43 }
 0x5a3   : > { %v7186_v55 = vmul.u32 %v13785_v24, %v13843_v25  ;;  %v13924_v38 = vmul.u32.u64.low %v13845_v60, %v7277_v10  ;;  %v13925_v32 = vmul.u32.u64.high %v13845_v60, %v7277_v10, %v13924_v38  ;;  %v13928_v54 = vsub.s32 32, %v7454_v36 }
 0x5a4   : > { %v7190_v9 = vsel %vm7188_vm2, %v7189_v3, %v13807_v8  ;;  %v13935_v49 = vmul.u32.u64.low %v13845_v60, %v7281_v31  ;;  %v13936_v52 = vmul.u32.u64.high %v13845_v60, %v7281_v31, %v13935_v49  ;;  %v13938_v39 = vshll.u32 %v7345_v35, 8 }
 0x5a5   : > { %v7273_v25 = vsel %vm7267_vm3, %v7270_v46, %v7272_v15  ;;  %v7380_v24 = vsel %vm7370_vm8, %v7377_v18, %v7379_v14  ;;  %v7384_v28 = vsel %vm7370_vm8, %v7381_v13, %v7383_v27  ;;  %v7447_v50 = vand.u32 8388607, %v15368_v62 }
 0x5a6   : > { %v7457_v8 = vshll.u32 %v15381_v53, %v7454_v36  ;;  %v7458_v3 = vshrl.u32 %v15374_v0, %v13928_v54  ;;  %v7460_v43 = vshll.u32 %v15374_v0, %v7454_v36  ;;  %v7461_v51 = vshrl.u32 %v15372_v1, %v13928_v54 }
 0x5a7   : > { %v13954_v46 = vshrl.u32 %v7452_v19, 5  ;;  %v7463_v15 = vshll.u32 %v15372_v1, %v7454_v36  ;;  %v7464_v10 = vshrl.u32 %v15370_v57, %v13928_v54  ;;  %v7466_v35 = vshll.u32 %v15370_v57, %v7454_v36 }
 0x5a8   : > { %v7353_v31 = vshrl.u32 %v15381_v53, %v13838_v42  ;;  %v13963_v18 = vmul.u32.u64.low %v13938_v39, %v7380_v24  ;;  %v13964_v14 = vmul.u32.u64.high %v13938_v39, %v7380_v24, %v13963_v18  ;;  %v7467_v13 = vshrl.u32 %v15376_v40, %v13928_v54 }
 0x5a9   : > { %v13970_v19 = vmul.u32.u64.low %v13938_v39, %v7384_v28  ;;  %v13971_v27 = vmul.u32.u64.high %v13938_v39, %v7384_v28, %v13970_v19  ;;  %v7469_v49 = vshll.u32 %v15376_v40, %v7454_v36  ;;  %v7470_v62 = vshrl.u32 %v15378_v48, %v13928_v54 }
 0x5aa   : > { %v7374_v42 = vsel %vm7372_vm4, %v7362_v61, 2102212464  ;;  %v7459_v23 = vor.u32 %v7458_v3, %v7457_v8  ;;  %v7462_v57 = vor.u32 %v7461_v51, %v7460_v43  ;;  %v7468_v24 = vor.u32 %v7467_v13, %v7466_v35 }
 0x5ab   : > { %v7465_v1 = vor.u32 %v7464_v10, %v7463_v15  ;;  %v7471_v0 = vor.u32 %v7470_v62, %v7469_v49  ;;  %vm7472_vm9 = vcmp.lt.s32.totalorder %v13954_v46, 1  ;;  %vm7475_vm10 = vcmp.lt.s32.totalorder %v13954_v46, 4 }
 0x5ac   : > { %v15945_v28 = vsub.s32 0, %v13812_v16  ;;  %v7292_v36 = vadd.s32 1, %v13925_v32  ;;  %v7448_v40 = vor.u32 8388608, %v7447_v50  ;;  %vm7474_vm11 = vcmp.lt.s32.totalorder %v13954_v46, 3 }
 0x5ad   : > { %v13985_v48 = vadd.s32 %v7190_v9, %v7186_v55  ;;  %v7289_v61 = vmul.u32 %v13845_v60, %v7273_v25  ;;  %vm7291_vm12 = vc.u32 %v13936_v52, %v13924_v38  ;;  %v7481_v62 = vsel %vm7475_vm10, %v7468_v24, 920167782 }
 0x5ae   : > { %v8877_v19 = vmin.u32 %v15945_v28, %v13812_v16  ;;  %v7373_v8 = vsel %vm7369_vm5, %v7353_v31, %v13892_v22  ;;  %v7375_v50 = vsel %vm7371_vm6, %v13894_v29, %v7374_v42  ;;  %vm7473_vm13 = vcmp.lt.s32.totalorder %v13954_v46, 2 }
 0x5af   : > { %v7480_v55 = vsel %vm7472_vm9, %v7459_v23, %v7462_v57  ;;  %v7482_v60 = vsel %vm7474_vm11, %v7465_v1, %v7481_v62  ;;  %v7484_v9 = vsel %vm7472_vm9, %v7462_v57, %v7465_v1  ;;  %v7485_v25 = vsel %vm7475_vm10, %v7471_v0, 1326507024 }
 0x5b0   : > { %v7858_v22 = vand.u32 2139095040, %v13756_v6  ;;  %v7293_v3 = vsel %vm7291_vm12, %v7292_v36, %v13925_v32  ;;  %v7395_v29 = vadd.s32 1, %v13964_v14  ;;  %v7486_v43 = vsel %vm7474_vm11, %v7468_v24, %v7485_v25 }
 0x5b1   : > { %v14012_v51 = vshll.u32 %v7448_v40, 8  ;;  %v15946_v15 = vand.u32 2147483647, %v13778_v58  ;;  %v15947_v10 = vcvt.s32.f32 %v13771_v26  ;;  %v7376_v31 = vsel %vm7370_vm8, %v7373_v8, %v7375_v50 }
 0x5b2   : > { %vm7394_vm14 = vc.u32 %v13971_v27, %v13963_v18  ;;  %v7483_v0 = vsel %vm7473_vm13, %v7480_v55, %v7482_v60  ;;  %v7720_v32 = vshll.u32 %v13720_v59, %v13796_v21  ;;  %v15948_v40 = vsub.s32 32, %v13796_v21 }
 0x5b3   : > { %v7626_v35 = vmul.f32 %v15947_v10, %v15946_v15  ;;  %v7725_v58 = vshll.u32 %v13836_v37, 23  ;;  %v7487_v26 = vsel %vm7473_vm13, %v7484_v9, %v7486_v43  ;;  %v7819_v17 = vclz %v8877_v19 }
 0x5b4   : > { %v7721_v13 = vshrl.u32 %v13794_v47, %v15948_v40  ;;  %v7192_v49 = vadd.s32 536870912, %v13985_v48  ;;  %v14033_v42 = vadd.s32 %v7293_v3, %v7289_v61  ;;  %v7859_v24 = vshrl.u32 %v7858_v22, 23 }
 0x5b5   : > { %v7392_v28 = vmul.u32 %v13938_v39, %v7376_v31  ;;  %v7396_v36 = vsel %vm7394_vm14, %v7395_v29, %v13964_v14  ;;  %v14038_v59 = vmul.u32.u64.low %v14012_v51, %v7483_v0  ;;  %v14039_v21 = vmul.u32.u64.high %v14012_v51, %v7483_v0, %v14038_v59 }
 0x5b6   : > { %v7456_v47 = vshrl.u32 %v15381_v53, %v13928_v54  ;;  %v14045_v37 = vmul.u32.u64.low %v14012_v51, %v7487_v26  ;;  %v14046_v19 = vmul.u32.u64.high %v14012_v51, %v7487_v26, %v14045_v37  ;;  %v8880_v62 = vadd.s32 4294967169, %v7859_v24 }
 0x5b7   : > { %vm7545_vm15 = vcmp.lt.s32.totalorder %v13549_v12, 0  ;;  %v7627_v61 = vxor.u32 2147483648, %v7626_v35  ;;  %v7722_v8 = vor.u32 %v7721_v13, %v7720_v32  ;;  %v7477_v39 = vsel %vm7475_vm10, %v7465_v1, 2102212464 }
 0x5b8   : > { %v7726_v14 = vor.u32 4788187, %v7725_v58  ;;  %v8878_v50 = vadd.s32 4294967294, %v7819_v17  ;;  %v14051_v55 = vshrl.u32 %v7192_v49, 30  ;;  %v7865_v60 = vadd.s32 1, %v8880_v62 }
 0x5b9   : > { %v7295_v9 = vadd.s32 536870912, %v14033_v42  ;;  %v14054_v54 = vadd.s32 %v7396_v36, %v7392_v28  ;;  %v7629_v25 = vsub.s32 4, %v13638_v63  ;;  %v7476_v22 = vsel %vm7472_vm9, %v7456_v47, %v7459_v23 }
 0x5ba   : > { %v7478_v3 = vsel %vm7474_vm11, %v7462_v57, %v7477_v39  ;;  %vm7866_vm0 = vcmp.gt.s32.totalorder %v7865_v60, 0  ;;  %v15949_v1 = vand.u32 2147483647, %v13549_v12  ;;  %v7628_v43 = vsel %vm7545_vm15, %v7627_v61, %v7626_v35 }
 0x5bb   : > { %v7729_v15 = vcvt.s32.f32 %v7722_v8  ;;  %v7727_v10 = vand.u32 2147483647, %v7726_v14  ;;  %vm8879_vm2 = vcmp.lt.s32.totalorder %v8878_v50, 0  ;;  %v7194_v31 = vshll.u32 %v14051_v55, 30 }
 0x5bc   : > { %vm14063_vm1 = vcmp.le.f32.partialorder %v15949_v1, 0.7853982  ;;  %v7867_v0 = vsel %vm7866_vm0, %v7865_v60, 0  ;;  %v14070_v23 = vshrl.u32 %v7295_v9, 30  ;;  %v7398_v57 = vadd.s32 536870912, %v14054_v54 }
 0x5bd   : > { %v7479_v32 = vsel %vm7473_vm13, %v7476_v22, %v7478_v3  ;;  %v7498_v40 = vadd.s32 1, %v14039_v21  ;;  %v14079_v13 = vsel %vm7545_vm15, %v7629_v25, %v13638_v63  ;;  %vm7649_vm3 = vcmp.lt.s32.totalorder %v13552_v41, 0 }
 0x5be   : > { %vm7497_vm4 = vc.u32 %v14046_v19, %v14038_v59  ;;  %v7869_v35 = vand.u32 31, %v7867_v0  ;;  %v7631_v58 = vsel %vm14063_vm1, %v13549_v12, %v7628_v43  ;;  %v7807_v26 = vadd.s32 %v13700_v2, %v13710_v30 }
 0x5bf   : > { %v15380_v17 = vand.u32 2147483647, %v13756_v6  ;;  %v7730_v49 = vmul.f32 %v7729_v15, %v7727_v10  ;;  %v14092_v63 = vsel %vm8879_vm2, 0, %v8878_v50  ;;  %v7495_v24 = vmul.u32 %v14012_v51, %v7479_v32 }
 0x5c0   : > { %v7870_v28 = vsub.s32 32, %v7869_v35  ;;  %v14096_v36 = vsub.s32 %v13985_v48, %v7194_v31  ;;  %v7297_v47 = vshll.u32 %v14070_v23, 30  ;;  %v14099_v37 = vshrl.u32 %v7398_v57, 30 }
 0x5c1   : > { %v7499_v62 = vsel %vm7497_vm4, %v7498_v40, %v14039_v21  ;;  %v15952_v2 = vand.u32 2147483647, %v13552_v41  ;;  %v7872_v61 = vshll.u32 %v15381_v53, %v7869_v35  ;;  %v15955_v8 = vmov 2475754826  }
 0x5c2   : > { %v7873_v51 = vshrl.u32 %v15955_v8, %v7870_v28  ;;  %v7875_v39 = vshll.u32 %v15955_v8, %v7869_v35  ;;  %v15956_v48 = vmov 2131351028   ;;  %v7862_v50 = vand.u32 8388607, %v15380_v17 }
 0x5c3   : > { %vm14104_vm5 = vcmp.le.f32.partialorder %v15952_v2, 0.7853982  ;;  %v7876_v14 = vshrl.u32 %v15956_v48, %v7870_v28  ;;  %v14114_v60 = vshrl.u32 %v7867_v0, 5  ;;  %v7878_v21 = vshll.u32 %v15956_v48, %v7869_v35 }
 0x5c4   : > { %v15957_v9 = vmov 2102212464   ;;  %v7731_v22 = vxor.u32 2147483648, %v7730_v49  ;;  %v7500_v3 = vadd.s32 %v7499_v62, %v7495_v24  ;;  %v15958_v43 = vmov 920167782  }
 0x5c5   : > { %v7879_v25 = vshrl.u32 %v15957_v9, %v7870_v28  ;;  %v7881_v1 = vshll.u32 %v15957_v9, %v7869_v35  ;;  %v7882_v15 = vshrl.u32 %v15958_v43, %v7870_v28  ;;  %v7827_v10 = vsub.s32 4294967266, %v14092_v63 }
 0x5c6   : > { %v7197_v31 = vsub.s32 0, %v14096_v36  ;;  %v14123_v57 = vsub.s32 %v14033_v42, %v7297_v47  ;;  %v7400_v0 = vshll.u32 %v14099_v37, 30  ;;  %v7874_v32 = vor.u32 %v7873_v51, %v7872_v61 }
 0x5c7   : > { %v7877_v40 = vor.u32 %v7876_v14, %v7875_v39  ;;  %v7883_v2 = vor.u32 %v7882_v15, %v7881_v1  ;;  %v7884_v17 = vshll.u32 %v15958_v43, %v7869_v35  ;;  %v7863_v46 = vor.u32 8388608, %v7862_v50 }
 0x5c8   : > { %v7880_v24 = vor.u32 %v7879_v25, %v7878_v21  ;;  %v15959_v62 = vmov 1326507024   ;;  %vm7887_vm6 = vcmp.lt.s32.totalorder %v14114_v60, 1  ;;  %v7732_v6 = vsel %vm7649_vm3, %v7731_v22, %v7730_v49 }
 0x5c9   : > { %v7885_v53 = vshrl.u32 %v15959_v62, %v7870_v28  ;;  %v7501_v45 = vadd.s32 536870912, %v7500_v3  ;;  %vm7889_vm7 = vcmp.lt.s32.totalorder %v14114_v60, 3  ;;  %vm7890_vm8 = vcmp.lt.s32.totalorder %v14114_v60, 4 }
 0x5ca   : > { %v7823_v42 = vsub.s32 32, %v14092_v63  ;;  %v8853_v47 = vmin.u32 %v7197_v31, %v14096_v36  ;;  %vm7888_vm9 = vcmp.lt.s32.totalorder %v14114_v60, 2  ;;  %v7828_v35 = vadd.s32 127, %v7827_v10 }
 0x5cb   : > { %v7886_v61 = vor.u32 %v7885_v53, %v7884_v17  ;;  %v7300_v51 = vsub.s32 0, %v14123_v57  ;;  %v7895_v39 = vsel %vm7887_vm6, %v7874_v32, %v7877_v40  ;;  %v7896_v49 = vsel %vm7890_vm8, %v7883_v2, 920167782 }
 0x5cc   : > { %10523 = vcosq.f32 %v7631_v58  ;;  %v14142_v14 = vsub.s32 %v14054_v54, %v7400_v0  ;;  %v7897_v50 = vsel %vm7889_vm7, %v7880_v24, %v7896_v49  ;;  %v14146_v21 = vshll.u32 %v7863_v46, 8 }
 0x5cd   : > { %10525 = vsinq.f32 %v7631_v58  ;;  %v14148_v53 = vshrl.u32 %v7501_v45, 30  ;;  %v7898_v17 = vsel %vm7888_vm9, %v7895_v39, %v7897_v50  ;;  %v7899_v25 = vsel %vm7887_vm6, %v7877_v40, %v7880_v24 }
 0x5ce   : > { %v7735_v22 = vsel %vm14104_vm5, %v13552_v41, %v7732_v6  ;;  %v7824_v54 = vshll.u32 %v13812_v16, %v14092_v63  ;;  %v7199_v1 = vclz %v8853_v47  ;;  %v7900_v46 = vsel %vm7890_vm8, %v7886_v61, 1326507024 }
 0x5cf   : > { %v7825_v58 = vshrl.u32 %v7807_v26, %v7823_v42  ;;  %v7829_v45 = vshll.u32 %v7828_v35, 23  ;;  %v8857_v15 = vmin.u32 %v7300_v51, %v14123_v57  ;;  %v7901_v10 = vsel %vm7889_vm7, %v7883_v2, %v7900_v46 }
 0x5d0   : > { %v7403_v31 = vsub.s32 0, %v14142_v14  ;;  %v7902_v0 = vsel %vm7888_vm9, %v7899_v25, %v7901_v10  ;;  %v14168_v6 = vmul.u32.u64.low %v14146_v21, %v7898_v17  ;;  %v14169_v39 = vmul.u32.u64.high %v14146_v21, %v7898_v17, %v14168_v6 }
 0x5d1   : > { %v7503_v16 = vshll.u32 %v14148_v53, 30  ;;  %v15960_v63 = vmov 683565275   ;;  %v14175_v42 = vmul.u32.u64.low %v14146_v21, %v7902_v0  ;;  %v14176_v47 = vmul.u32.u64.high %v14146_v21, %v7902_v0, %v14175_v42 }
 0x5d2   : > { %v7871_v26 = vshrl.u32 %v15960_v63, %v7870_v28  ;;  %v7632_v2 = vsel %vm14063_vm1, 0, %v14079_v13  ;;  %v8854_v61 = vadd.s32 4294967294, %v7199_v1  ;;  %v7892_v35 = vsel %vm7890_vm8, %v7880_v24, 2102212464 }
 0x5d3   : > { %v15961_v51 = vsub.s32 4, %v13696_v34  ;;  %10527 = vcosq.f32 %v7735_v22  ;;  %v7826_v28 = vor.u32 %v7825_v58, %v7824_v54  ;;  %v7302_v50 = vclz %v8857_v15 }
 0x5d4   : > { %v7830_v17 = vor.u32 4788187, %v7829_v45  ;;  %v8861_v25 = vmin.u32 %v7403_v31, %v14142_v14  ;;  %v7636_v46 = vadd.s32 3, %v7632_v2  ;;  %v14189_v10 = vsub.s32 %v7500_v3, %v7503_v16 }
 0x5d5   : > { %v7734_v49 = vsel %vm7649_vm3, %v15961_v51, %v13696_v34  ;;  %v7891_v29 = vsel %vm7887_vm6, %v7871_v26, %v7874_v32  ;;  %v7893_v13 = vsel %vm7889_vm7, %v7877_v40, %v7892_v35  ;;  %vm8855_vm10 = vcmp.lt.s32.totalorder %v8854_v61, 0 }
 0x5d6   : > { %v7736_v24 = vsel %vm14104_vm5, 0, %v7734_v49  ;;  %10529 = vsinq.f32 %v7735_v22  ;;  %v7833_v34 = vcvt.s32.f32 %v7826_v28  ;;  %v7837_v54 = vsub.s32 4, %v13767_v11 }
 0x5d7   : > { %v8858_v1 = vadd.s32 4294967294, %v7302_v50  ;;  %v7831_v58 = vand.u32 2147483647, %v7830_v17  ;;  %v7405_v45 = vclz %v8861_v25  ;;  %v7894_v3 = vsel %vm7888_vm9, %v7891_v29, %v7893_v13 }
 0x5d8   : > { %v7913_v15 = vadd.s32 1, %v14169_v39  ;;  %v7637_v31 = vand.u32 3, %v7636_v46  ;;  %v7202_v0 = vsel %vm8855_vm10, 0, %v8854_v61  ;;  %v7506_v40 = vsub.s32 0, %v14189_v10 }
 0x5d9   : > { %v10524_v32 = vpop.eup %10523  ;;  %vm7912_vm11 = vc.u32 %v14176_v47, %v14168_v6  ;;  %v7740_v22 = vadd.s32 3, %v7736_v24  ;;  %vm7753_vm12 = vcmp.lt.s32.totalorder %v13575_v56, 0  ;;  %vm8859_vm13 = vcmp.lt.s32.totalorder %v8858_v1, 0 }
 0x5da   : > { %v10526_v30 = vpop.eup %10525  ;;  %v7838_v16 = vsel %vm7753_vm12, %v7837_v54, %v13767_v11  ;;  %v7910_v60 = vmul.u32 %v14146_v21, %v7894_v3  ;;  %v7834_v26 = vmul.f32 %v7833_v34, %v7831_v58  ;;  %v7207_v42 = vsub.s32 4294967266, %v7202_v0 }
 0x5db   : > { %v8862_v2 = vadd.s32 4294967294, %v7405_v45  ;;  %v7914_v61 = vsel %vm7912_vm11, %v7913_v15, %v14169_v39  ;;  %vm7639_vm14 = vcmp.eq.s32.totalorder %v7637_v31, 0  ;;  %v15962_v35 = vand.u32 2147483647, %v13575_v56 }
 0x5dc   : > { %v8865_v49 = vmin.u32 %v7506_v40, %v14189_v10  ;;  %vm7642_vm0 = vcmp.eq.s32.totalorder %v7637_v31, 2  ;;  %v7643_v28 = vxor.u32 2147483648, %v10524_v32  ;;  %v14217_v11 = vand.u32 3, %v7740_v22 }
 0x5dd   : > { %vm14212_vm15 = vcmp.le.f32.partialorder %v15962_v35, 0.7853982  ;;  %v7305_v50 = vsel %vm8859_vm13, 0, %v8858_v1  ;;  %v7640_v21 = vxor.u32 2147483648, %v10526_v30  ;;  %v7187_v39 = vadd.s32 %v13806_v33, %v13820_v7 }
 0x5de   : > { %v7840_v17 = vsel %vm14212_vm15, 0, %v7838_v16  ;;  %v14223_v25 = vadd.s32 %v7914_v61, %v7910_v60  ;;  %v7835_v29 = vxor.u32 2147483648, %v7834_v26  ;;  %v7203_v13 = vsub.s32 32, %v7202_v0 }
 0x5df   : > { %v7208_v24 = vadd.s32 127, %v7207_v42  ;;  %vm8863_vm1 = vcmp.lt.s32.totalorder %v8862_v2, 0  ;;  %v7310_v34 = vsub.s32 4294967266, %v7305_v50  ;;  %v7508_v54 = vclz %v8865_v49 }
 0x5e0   : > { %v10528_v46 = vpop.eup %10527  ;;  %vm7638_vm2 = vcmp.lt.s32.totalorder %v7637_v31, 2  ;;  %v7644_v58 = vsel %vm7642_vm0, %v7643_v28, %v10526_v30  ;;  %vm7746_vm3 = vcmp.eq.s32.totalorder %v14217_v11, 2  ;;  %v7844_v1 = vadd.s32 3, %v7840_v17 }
 0x5e1   : > { %v7641_v45 = vsel %vm7639_vm14, %v10524_v32, %v7640_v21  ;;  %v7747_v3 = vxor.u32 2147483648, %v10528_v46  ;;  %v7408_v15 = vsel %vm8863_vm1, 0, %v8862_v2  ;;  %v7916_v33 = vadd.s32 536870912, %v14223_v25 }
 0x5e2   : > { %v7836_v40 = vsel %vm7753_vm12, %v7835_v29, %v7834_v26  ;;  %v7204_v22 = vshll.u32 %v14096_v36, %v7202_v0  ;;  %v7205_v16 = vshrl.u32 %v7187_v39, %v7203_v13  ;;  %v7209_v60 = vshll.u32 %v7208_v24, 23 }
 0x5e3   : > { %v10530_v7 = vpop.eup %10529  ;;  %v7290_v30 = vadd.s32 %v13924_v38, %v13936_v52  ;;  %v7306_v42 = vsub.s32 32, %v7305_v50  ;;  %v7311_v61 = vadd.s32 127, %v7310_v34  ;;  %v8866_v35 = vadd.s32 4294967294, %v7508_v54 }
 0x5e4   : > { %v14235_v32 = vsel %vm7638_vm2, %v7641_v45, %v7644_v58  ;;  %vm7743_vm4 = vcmp.eq.s32.totalorder %v14217_v11, 0  ;;  %v14238_v2 = vand.u32 3, %v7844_v1  ;;  %v7413_v49 = vsub.s32 4294967266, %v7408_v15 }
 0x5e5   : > { %v7744_v26 = vxor.u32 2147483648, %v10530_v7  ;;  %v14244_v36 = vsel %vm7746_vm3, %v7747_v3, %v10530_v7  ;;  %v14246_v0 = vshrl.u32 %v7916_v33, 30  ;;  %v7839_v52 = vsel %vm14212_vm15, %v13575_v56, %v7836_v40 }
 0x5e6   : > { %15965 = vst [vmem:[#allocation93_spill] sm:$0xff] %v14238_v2  ;;  %v7206_v31 = vor.u32 %v7205_v16, %v7204_v22  ;;  %v7210_v21 = vor.u32 4788187, %v7209_v60  ;;  %v7307_v17 = vshll.u32 %v14123_v57, %v7305_v50  ;;  %v7308_v29 = vshrl.u32 %v7290_v30, %v7306_v42 }
 0x5e7   : > { %15966 = vst [vmem:[#allocation94_spill] sm:$0xff] %v14246_v0  ;;  %v7312_v13 = vshll.u32 %v7311_v61, 23  ;;  %vm8867_vm5 = vcmp.lt.s32.totalorder %v8866_v35, 0  ;;  %v7393_v34 = vadd.s32 %v13963_v18, %v13971_v27  ;;  %v7409_v54 = vsub.s32 32, %v7408_v15 }
 0x5e8   : > { %v7414_v58 = vadd.s32 127, %v7413_v49  ;;  %v14260_v51 = vsel %vm7743_vm4, %v10528_v46, %v7744_v26  ;;  %10531 = vcosq.f32 %v7839_v52  ;;  %v7918_v57 = vshll.u32 %v14246_v0, 30 }
 0x5e9   : > { %v7213_v45 = vcvt.s32.f32 %v7206_v31  ;;  %v14263_v3 = vsel %vm8867_vm5, 0, %v8866_v35  ;;  %v7211_v40 = vand.u32 2147483647, %v7210_v21  ;;  %v14266_v18 = vor.u32 %v7308_v29, %v7307_v17 }
 0x5ea   : > { %v14268_v27 = vor.u32 4788187, %v7312_v13  ;;  %v7410_v16 = vshll.u32 %v14142_v14, %v7408_v15  ;;  %v7411_v46 = vshrl.u32 %v7393_v34, %v7409_v54  ;;  %v7415_v60 = vshll.u32 %v7414_v58, 23 }
 0x5eb   : > { %10533 = vsinq.f32 %v7839_v52  ;;  %v7516_v42 = vsub.s32 4294967266, %v14263_v3  ;;  %v14273_v61 = vsub.s32 %v14223_v25, %v7918_v57  ;;  %v14278_v31 = vmul.f32 %v7213_v45, %v7211_v40 }
 0x5ec   : > { %v14282_v21 = vor.u32 %v7411_v46, %v7410_v16  ;;  %v14284_v17 = vor.u32 4788187, %v7415_v60  ;;  %v14288_v25 = vadd.s32 %v14038_v59, %v14046_v19  ;;  %vm7635_vm12 = vweird.f32 %v13549_v12 }
 0x5ed   : > { %v14293_v34 = vadd.s32 127, %v7516_v42  ;;  %vm7742_vm13 = vcmp.lt.s32.totalorder %v14217_v11, 2  ;;  %vm7133_vm0 = vcmp.lt.s32.totalorder %v13644_v4, 0  ;;  %vm7739_vm3 = vweird.f32 %v13552_v41 }
 0x5ee   : > { %v7417_v12 = vand.u32 2147483647, %v14284_v17  ;;  %v7217_v11 = vsub.s32 4, %v14051_v55 }
 0x5f0   : > { %v14462_v41 = vsel %vm7133_vm0, %v7217_v11, %v14051_v55 }
 0x5f5   : > { %v14310_v42 = vpop.eup %10531 }
 0x60c   : > { %v14240_v28 = vpop.f32.mrf.mxu0 }
 0x60d   : > { %v6551_v38 = vand.u32 2139095040, %v14240_v28  ;;  %v15388_v33 = vand.u32 2147483647, %v14240_v28 }
 0x60e   : > { %v14253_v39 = vpop.f32.mrf.mxu0 }
 0x60f   : > { %v6552_v24 = vshrl.u32 %v6551_v38, 23  ;;  %v6655_v1 = vand.u32 2139095040, %v14253_v39  ;;  %v6555_v35 = vand.u32 8388607, %v15388_v33  ;;  %v15387_v26 = vand.u32 2147483647, %v14253_v39 }
 0x611   : > { %v8819_v50 = vadd.s32 4294967169, %v6552_v24  ;;  %v6656_v7 = vshrl.u32 %v6655_v1, 23  ;;  %v6556_v58 = vor.u32 8388608, %v6555_v35  ;;  %v14298_v57 = vand.u32 8388607, %v15387_v26 }
 0x613   : > { %v6558_v22 = vadd.s32 1, %v8819_v50  ;;  %v8823_v30 = vadd.s32 4294967169, %v6656_v7 }
 0x615   : > { %vm6559_vm6 = vcmp.gt.s32.totalorder %v6558_v22, 0  ;;  %v6662_v38 = vadd.s32 1, %v8823_v30 }
 0x616   : > { %v6560_v49 = vsel %vm6559_vm6, %v6558_v22, 0  ;;  %vm7236_vm6 = vcmp.lt.s32.totalorder %v13706_v5, 0 }
 0x617   : > { %v6561_v52 = vshrl.u32 %v6560_v49, 5  ;;  %v6562_v29 = vand.u32 31, %v6560_v49  ;;  %vm6663_vm7 = vcmp.gt.s32.totalorder %v6662_v38, 0 }
 0x618   : > { %v6664_v30 = vsel %vm6663_vm7, %v6662_v38, 0  ;;  %vm7850_vm7 = vcmp.eq.s32.totalorder %v14238_v2, 2 }
 0x619   : > { %v6563_v1 = vsub.s32 32, %v6562_v29  ;;  %v6565_v59 = vshll.u32 %v15960_v63, %v6562_v29  ;;  %v6568_v19 = vshll.u32 %v15955_v8, %v6562_v29  ;;  %v6571_v50 = vshll.u32 %v15956_v48, %v6562_v29 }
 0x61a   : > { %vm6580_vm8 = vcmp.lt.s32.totalorder %v6561_v52, 1  ;;  %v6574_v22 = vshll.u32 %v15957_v9, %v6562_v29  ;;  %v6577_v46 = vshll.u32 %v15958_v43, %v6562_v29  ;;  %vm6583_vm9 = vcmp.lt.s32.totalorder %v6561_v52, 4 }
 0x61b   : > { %v6566_v45 = vshrl.u32 %v15955_v8, %v6563_v1  ;;  %v6569_v7 = vshrl.u32 %v15956_v48, %v6563_v1  ;;  %v6572_v40 = vshrl.u32 %v15957_v9, %v6563_v1  ;;  %v6575_v16 = vshrl.u32 %v15958_v43, %v6563_v1 }
 0x61c   : > { %v6578_v60 = vshrl.u32 %v15959_v62, %v6563_v1  ;;  %v6564_v33 = vshrl.u32 %v15960_v63, %v6563_v1  ;;  %v6666_v14 = vand.u32 31, %v6664_v30  ;;  %vm6582_vm10 = vcmp.lt.s32.totalorder %v6561_v52, 3 }
 0x61d   : > { %v6567_v35 = vor.u32 %v6566_v45, %v6565_v59  ;;  %v6570_v49 = vor.u32 %v6569_v7, %v6568_v19  ;;  %v6573_v26 = vor.u32 %v6572_v40, %v6571_v50  ;;  %v6576_v24 = vor.u32 %v6575_v16, %v6574_v22  ;;  %v14318_v19 = vpop.eup %10533 }
 0x61e   : > { %v6579_v15 = vor.u32 %v6578_v60, %v6577_v46  ;;  %v6596_v29 = vshll.u32 %v6556_v58, 8  ;;  %vm6581_vm11 = vcmp.lt.s32.totalorder %v6561_v52, 2  ;;  %v6660_v45 = vor.u32 8388608, %v14298_v57 }
 0x61f   : > { %v6585_v13 = vsel %vm6583_vm9, %v6573_v26, 2102212464  ;;  %v6588_v54 = vsel %vm6580_vm8, %v6567_v35, %v6570_v49  ;;  %v6584_v56 = vsel %vm6580_vm8, %v6564_v33, %v6567_v35  ;;  %v6589_v0 = vsel %vm6583_vm9, %v6576_v24, 920167782 }
 0x620   : > { %v6586_v38 = vsel %vm6582_vm10, %v6570_v49, %v6585_v13  ;;  %v6592_v59 = vsel %vm6580_vm8, %v6570_v49, %v6573_v26  ;;  %v6590_v1 = vsel %vm6582_vm10, %v6573_v26, %v6589_v0  ;;  %v6593_v50 = vsel %vm6583_vm9, %v6579_v15, 1326507024 }
 0x621   : > { %v6591_v7 = vsel %vm6581_vm11, %v6588_v54, %v6590_v1  ;;  %v6594_v40 = vsel %vm6582_vm10, %v6576_v24, %v6593_v50  ;;  %v14322_v22 = vshrl.u32 %v6664_v30, 5  ;;  %v6667_v58 = vsub.s32 32, %v6666_v14 }
 0x622   : > { %v6587_v16 = vsel %vm6581_vm11, %v6584_v56, %v6586_v38  ;;  %v6595_v33 = vsel %vm6581_vm11, %v6592_v59, %v6594_v40  ;;  %v14324_v13 = vmul.u32.u64.low %v6596_v29, %v6591_v7  ;;  %v14325_v46 = vmul.u32.u64.high %v6596_v29, %v6591_v7, %v14324_v13 }
 0x623   : > { %v14328_v60 = vmul.u32.u64.low %v6596_v29, %v6595_v33  ;;  %v14329_v35 = vmul.u32.u64.high %v6596_v29, %v6595_v33, %v14328_v60  ;;  %v6669_v0 = vshll.u32 %v15960_v63, %v6666_v14  ;;  %v6670_v26 = vshrl.u32 %v15955_v8, %v6667_v58 }
 0x624   : > { %v6672_v15 = vshll.u32 %v15955_v8, %v6666_v14  ;;  %v6673_v52 = vshrl.u32 %v15956_v48, %v6667_v58  ;;  %v6675_v56 = vshll.u32 %v15956_v48, %v6666_v14  ;;  %v6676_v24 = vshrl.u32 %v15957_v9, %v6667_v58 }
 0x625   : > { %v6671_v54 = vor.u32 %v6670_v26, %v6669_v0  ;;  %v6678_v57 = vshll.u32 %v15957_v9, %v6666_v14  ;;  %v6679_v30 = vshrl.u32 %v15958_v43, %v6667_v58  ;;  %v6681_v49 = vshll.u32 %v15958_v43, %v6666_v14 }
 0x626   : > { %v6606_v38 = vadd.s32 1, %v14325_v46  ;;  %v6674_v59 = vor.u32 %v6673_v52, %v6672_v15  ;;  %v6677_v1 = vor.u32 %v6676_v24, %v6675_v56  ;;  %v6682_v50 = vshrl.u32 %v15959_v62, %v6667_v58 }
 0x627   : > { %v6603_v7 = vmul.u32 %v6596_v29, %v6587_v16  ;;  %vm6605_vm14 = vc.u32 %v14329_v35, %v14324_v13  ;;  %v6680_v40 = vor.u32 %v6679_v30, %v6678_v57  ;;  %v14346_v33 = vshll.u32 %v6660_v45, 8 }
 0x628   : > { %v6607_v60 = vsel %vm6605_vm14, %v6606_v38, %v14325_v46  ;;  %v6668_v0 = vshrl.u32 %v15960_v63, %v6667_v58  ;;  %v6683_v14 = vor.u32 %v6682_v50, %v6681_v49  ;;  %vm6684_vm15 = vcmp.lt.s32.totalorder %v14322_v22, 1 }
 0x629   : > { %v6608_v26 = vadd.s32 %v6607_v60, %v6603_v7  ;;  %vm6686_vm1 = vcmp.lt.s32.totalorder %v14322_v22, 3  ;;  %vm6687_vm2 = vcmp.lt.s32.totalorder %v14322_v22, 4  ;;  %v6692_v29 = vsel %vm6684_vm15, %v6671_v54, %v6674_v59 }
 0x62a   : > { %v6689_v16 = vsel %vm6687_vm2, %v6677_v1, 2102212464  ;;  %v6693_v45 = vsel %vm6687_vm2, %v6680_v40, 920167782  ;;  %v6696_v46 = vsel %vm6684_vm15, %v6674_v59, %v6677_v1  ;;  %v6697_v15 = vsel %vm6687_vm2, %v6683_v14, 1326507024 }
 0x62b   : > { %v6609_v58 = vadd.s32 536870912, %v6608_v26  ;;  %vm6685_vm4 = vcmp.lt.s32.totalorder %v14322_v22, 2  ;;  %v6694_v52 = vsel %vm6686_vm1, %v6677_v1, %v6693_v45  ;;  %v6698_v56 = vsel %vm6686_vm1, %v6680_v40, %v6697_v15 }
 0x62c   : > { %v15967_v24 = vsub.s32 0, %v14273_v61  ;;  %v6688_v30 = vsel %vm6684_vm15, %v6668_v0, %v6671_v54  ;;  %v6695_v49 = vsel %vm6685_vm4, %v6692_v29, %v6694_v52  ;;  %v6699_v38 = vsel %vm6685_vm4, %v6696_v46, %v6698_v56  ;;  %v14388_v0 = vpop.f32.mrf.mxu0 }
 0x62d   : > { %v15968_v50 = vand.u32 2147483647, %v13644_v4  ;;  %v15969_v1 = vmov 0  ;;  %v14380_v7 = vshrl.u32 %v6609_v58, 30  ;;  %v6690_v40 = vsel %vm6686_vm1, %v6674_v59, %v6689_v16 }
 0x62e   : > { %v8881_v57 = vmin.u32 %v15967_v24, %v14273_v61  ;;  %v14385_v54 = vmul.u32.u64.low %v14346_v33, %v6699_v38  ;;  %v14386_v60 = vmul.u32.u64.high %v14346_v33, %v6699_v38, %v14385_v54  ;;  %v15972_v14 = vsub.s32 32, %v14263_v3  ;;  %v6120_v24 = vld [vmem:[%s15317_s9] sm:$0x3] }
 0x62f   : > { %vm14375_vm5 = vcmp.le.f32.partialorder %v15968_v50, 0.7853982  ;;  %v7518_v45 = vshll.u32 %v14293_v34, 23  ;;  %v14395_v46 = vmul.u32.u64.low %v14346_v33, %v6695_v49  ;;  %v14396_v15 = vmul.u32.u64.high %v14346_v33, %v6695_v49, %v14395_v46 }
 0x630   : > { %v15970_v1 = vsel %vm14375_vm5, 4294967295, %v15969_v1  ;;  %v7514_v29 = vshrl.u32 %v14288_v25, %v15972_v14  ;;  %v14402_v59 = vsel %vm7635_vm12, nan, %v14235_v32  ;;  %v7215_v16 = vxor.u32 2147483648, %v14278_v31 }
 0x631   : > { %15971 = vst [vmem:[#allocation95_spill] sm:$0xff] %v15970_v1  ;;  %15973 = vst [vmem:[#allocation96_spill] sm:$0xff] %v14402_v59  ;;  %v15974_v58 = vand.u32 2147483647, %v14268_v27  ;;  %v15975_v52 = vcvt.s32.f32 %v14266_v18  ;;  %v6611_v25 = vshll.u32 %v14380_v7, 30  ;;  %v7419_v32 = vcvt.s32.f32 %v14282_v21 }
 0x632   : > { %v15976_v34 = vand.u32 2147483647, %v13706_v5  ;;  %v6691_v27 = vsel %vm6685_vm4, %v6688_v30, %v6690_v40  ;;  %v6759_v18 = vand.u32 2139095040, %v14388_v0  ;;  %v7749_v49 = vsel %vm7742_vm13, %v14260_v51, %v14244_v36 }
 0x633   : > { %v7317_v56 = vmul.f32 %v15975_v52, %v15974_v58  ;;  %v7320_v38 = vsub.s32 4, %v14070_v23  ;;  %v7923_v50 = vclz %v8881_v57  ;;  %v14427_v54 = vsub.s32 %v6608_v26, %v6611_v25 }
 0x634   : > { %vm14413_vm8 = vcmp.le.f32.partialorder %v15976_v34, 0.7853982  ;;  %vm7847_vm9 = vcmp.eq.s32.totalorder %v14238_v2, 0  ;;  %v15979_v21 = vshll.u32 %v14189_v10, %v14263_v3  ;;  %v7519_v22 = vor.u32 4788187, %v7518_v45 }
 0x635   : > { %vm6709_vm10 = vc.u32 %v14386_v60, %v14395_v46  ;;  %v6710_v30 = vadd.s32 1, %v14396_v15  ;;  %vm7339_vm11 = vcmp.lt.s32.totalorder %v13733_v20, 0  ;;  %v6614_v36 = vsub.s32 0, %v14427_v54 }
 0x636   : > { %v7515_v17 = vor.u32 %v7514_v29, %v15979_v21  ;;  %v6707_v51 = vmul.u32 %v14346_v33, %v6691_v27  ;;  %v6760_v26 = vshrl.u32 %v6759_v18, 23  ;;  %v7216_v10 = vsel %vm7133_vm0, %v7215_v16, %v14278_v31 }
 0x637   : > { %v7318_v3 = vxor.u32 2147483648, %v7317_v56  ;;  %v7420_v57 = vmul.f32 %v7419_v32, %v7417_v12  ;;  %v6711_v40 = vsel %vm6709_vm10, %v6710_v30, %v14396_v15  ;;  %v8882_v14 = vadd.s32 4294967294, %v7923_v50 }
 0x638   : > { %v8820_v29 = vmin.u32 %v6614_v36, %v14427_v54  ;;  %v6712_v45 = vadd.s32 %v6711_v40, %v6707_v51  ;;  %v8827_v58 = vadd.s32 4294967169, %v6760_v26  ;;  %v14447_v52 = vsel %vm7739_vm3, nan, %v7749_v49 }
 0x639   : > { %15980 = vst [vmem:[#allocation97_spill] sm:$0xff] %v14447_v52  ;;  %v7321_v33 = vsel %vm7236_vm6, %v7320_v38, %v14070_v23  ;;  %v15981_v25 = vand.u32 2147483647, %v13733_v20  ;;  %v15982_v31 = vmov 0  ;;  %v7520_v15 = vand.u32 2147483647, %v7519_v22 }
 0x63a   : > { %v7522_v16 = vcvt.s32.f32 %v7515_v17  ;;  %v7851_v34 = vxor.u32 2147483648, %v14310_v42  ;;  %vm7442_vm13 = vcmp.lt.s32.totalorder %v13765_v44, 0  ;;  %v6616_v12 = vclz %v8820_v29 }
 0x63b   : > { %vm14454_vm12 = vcmp.le.f32.partialorder %v15981_v25, 0.7853982  ;;  %v7848_v23 = vxor.u32 2147483648, %v14318_v19  ;;  %v7219_v32 = vsel %vm14375_vm5, %v13644_v4, %v7216_v10  ;;  %v6713_v27 = vadd.s32 536870912, %v6712_v45 }
 0x63c   : > { %v15983_v31 = vsel %vm14454_vm12, 4294967295, %v15982_v31  ;;  %v6766_v18 = vadd.s32 1, %v8827_v58  ;;  %v7319_v49 = vsel %vm7236_vm6, %v7318_v3, %v7317_v56  ;;  %v7323_v38 = vsel %vm14413_vm8, 0, %v7321_v33 }
 0x63d   : > { %15984 = vst [vmem:[#allocation98_spill] sm:$0xff] %v15983_v31  ;;  %v7421_v50 = vxor.u32 2147483648, %v7420_v57  ;;  %vm8883_vm14 = vcmp.lt.s32.totalorder %v8882_v14, 0  ;;  %v7523_v55 = vmul.f32 %v7522_v16, %v7520_v15  ;;  %v8821_v21 = vadd.s32 4294967294, %v6616_v12  ;;  %v15989_v15 = vld [vmem:[#allocation155_spill] sm:$0xff] }
 0x63e   : > { %v14473_v17 = vshrl.u32 %v6713_v27, 30  ;;  %vm6767_vm15 = vcmp.gt.s32.totalorder %v6766_v18, 0  ;;  %v14478_v22 = vsel %vm7850_vm7, %v7851_v34, %v14318_v19  ;;  %10535 = vcosq.f32 %v7219_v32 }
 0x63f   : > { %15985 = vst [vmem:[#allocation99_spill] sm:$0xff] %v14478_v22  ;;  %v7423_v30 = vsub.s32 4, %v14099_v37  ;;  %v6768_v11 = vsel %vm6767_vm15, %v6766_v18, 0  ;;  %v7322_v56 = vsel %vm14413_vm8, %v13706_v5, %v7319_v49  ;;  %v14484_v36 = vsel %vm8883_vm14, 0, %v8882_v14 }
 0x640   : > { %v6715_v51 = vshll.u32 %v14473_v17, 30  ;;  %v15392_v26 = vand.u32 2147483647, %v14388_v0  ;;  %v14491_v10 = vsel %vm7847_vm9, %v14310_v42, %v7848_v23  ;;  %10537 = vsinq.f32 %v7219_v32 }
 0x641   : > { %15986 = vst [vmem:[#allocation100_spill] sm:$0xff] %v14491_v10  ;;  %v14493_v19 = vand.u32 3, %v7323_v38  ;;  %v6770_v3 = vand.u32 31, %v6768_v11  ;;  %v7422_v40 = vsel %vm7339_vm11, %v7421_v50, %v7420_v57  ;;  %v7524_v14 = vxor.u32 2147483648, %v7523_v55 }
 0x642   : > { %vm8822_vm0 = vcmp.lt.s32.totalorder %v8821_v21, 0  ;;  %v14500_v29 = vsub.s32 %v6712_v45, %v6715_v51  ;;  %10539 = vcosq.f32 %v7322_v56  ;;  %v14505_v42 = vsel %vm7339_vm11, %v7423_v30, %v14099_v37 }
 0x643   : > { %15987 = vst [vmem:[#allocation101_spill] sm:$0xff] %v14493_v19  ;;  %15988 = vst [vmem:[#allocation102_spill] sm:$0xff] %v14505_v42  ;;  %v7931_v58 = vsub.s32 4294967266, %v14484_v36  ;;  %v6771_v33 = vsub.s32 32, %v6770_v3  ;;  %10541 = vsinq.f32 %v7322_v56  ;;  %v6763_v25 = vand.u32 8388607, %v15392_v26 }
 0x644   : > { %v15990_v16 = vsub.s32 0, %v15989_v15  ;;  %v15991_v45 = vsub.s32 1, %v15989_v15  ;;  %v14521_v37 = vsel %vm14454_vm12, %v13733_v20, %v7422_v40  ;;  %v14523_v12 = vsel %vm8822_vm0, 0, %v8821_v21 }
 0x645   : > { %v6718_v23 = vsub.s32 0, %v14500_v29  ;;  %v6774_v32 = vshrl.u32 %v15955_v8, %v6771_v33  ;;  %v14529_v27 = vsel %vm7442_vm13, %v7524_v14, %v7523_v55  ;;  %v7911_v18 = vadd.s32 %v14168_v6, %v14176_v47 }
 0x646   : > { %v14512_v57 = vrot.slane %v6120_v24, %v15990_v16  ;;  %v14516_v34 = vrot.slane %v6120_v24, %v15991_v45  ;;  %v7927_v49 = vsub.s32 32, %v14484_v36  ;;  %v6777_v38 = vshrl.u32 %v15956_v48, %v6771_v33 }
 0x647   : > { %v7932_v50 = vadd.s32 127, %v7931_v58  ;;  %v6773_v30 = vshll.u32 %v15960_v63, %v6770_v3  ;;  %v6776_v21 = vshll.u32 %v15955_v8, %v6770_v3  ;;  %v6780_v56 = vshrl.u32 %v15957_v9, %v6771_v33 }
 0x648   : > { %v6624_v51 = vsub.s32 4294967266, %v14523_v12  ;;  %v6764_v24 = vor.u32 8388608, %v6763_v25  ;;  %v6769_v40 = vshrl.u32 %v6768_v11, 5  ;;  %v14541_v55 = vadd.f32 %v14512_v57, %v14240_v28 }
 0x649   : > { %v8824_v6 = vmin.u32 %v6718_v23, %v14500_v29  ;;  %v6775_v47 = vor.u32 %v6774_v32, %v6773_v30  ;;  %v6778_v14 = vor.u32 %v6777_v38, %v6776_v21  ;;  %v6779_v58 = vshll.u32 %v15956_v48, %v6770_v3 }
 0x64a   : > { %v15992_v15 = vand.u32 2147483647, %v13765_v44  ;;  %v15993_v16 = vmov 0  ;;  %v6782_v45 = vshll.u32 %v15957_v9, %v6770_v3  ;;  %v6783_v11 = vshrl.u32 %v15958_v43, %v6771_v33 }
 0x64b   : > { %v6785_v25 = vshll.u32 %v15958_v43, %v6770_v3  ;;  %v6786_v26 = vshrl.u32 %v15959_v62, %v6771_v33  ;;  %v7928_v23 = vshll.u32 %v14273_v61, %v14484_v36  ;;  %v7929_v32 = vshrl.u32 %v7911_v18, %v7927_v49  ;;  %v14557_v21 = vpop.eup %10535 }
 0x64c   : > { %vm14547_vm1 = vcmp.le.f32.partialorder %v15992_v15, 0.7853982  ;;  %v7933_v38 = vshll.u32 %v7932_v50, 23  ;;  %v6781_v30 = vor.u32 %v6780_v56, %v6779_v58  ;;  %15996 = vst [vmem:[#allocation105_spill] sm:$0xff] %v14557_v21  ;;  %v6604_v15 = vadd.s32 %v14324_v13, %v14329_v35 }
 0x64d   : > { %v15994_v16 = vsel %vm14547_vm1, 4294967295, %v15993_v16  ;;  %v6784_v20 = vor.u32 %v6783_v11, %v6782_v45  ;;  %v6787_v31 = vor.u32 %v6786_v26, %v6785_v25  ;;  %v6139_v42 = vand.u32 2139095040, %v14541_v55  ;;  %v14566_v61 = vpop.eup %10537 }
 0x64e   : > { %15995 = vst [vmem:[#allocation103_spill] sm:$0xff] %v15994_v16  ;;  %v6625_v10 = vadd.s32 127, %v6624_v51  ;;  %vm6788_vm2 = vcmp.lt.s32.totalorder %v6769_v40, 1  ;;  %v6804_v3 = vshll.u32 %v6764_v24, 8  ;;  %v14564_v22 = vadd.f32 %v14516_v34, %v14253_v39  ;;  %15997 = vst [vmem:[#allocation107_spill] sm:$0xff] %v14566_v61 }
 0x64f   : > { %v6720_v36 = vclz %v8824_v6  ;;  %vm6790_vm3 = vcmp.lt.s32.totalorder %v6769_v40, 3  ;;  %vm6791_vm4 = vcmp.lt.s32.totalorder %v6769_v40, 4  ;;  %v6796_v18 = vsel %vm6788_vm2, %v6775_v47, %v6778_v14  ;;  %v14570_v50 = vpop.eup %10539 }
 0x650   : > { %v6793_v49 = vsel %vm6791_vm4, %v6781_v30, 2102212464  ;;  %v6797_v13 = vsel %vm6791_vm4, %v6784_v20, 920167782  ;;  %v6800_v35 = vsel %vm6788_vm2, %v6778_v14, %v6781_v30  ;;  %v6801_v26 = vsel %vm6791_vm4, %v6787_v31, 1326507024  ;;  %v14574_v58 = vpop.eup %10541 }
 0x651   : > { %15998 = vst [vmem:[#allocation108_spill] sm:$0xff] %v14570_v50  ;;  %v6772_v56 = vshrl.u32 %v15960_v63, %v6771_v33  ;;  %vm6789_vm6 = vcmp.lt.s32.totalorder %v6769_v40, 2  ;;  %v6798_v51 = vsel %vm6790_vm3, %v6781_v30, %v6797_v13  ;;  %v6140_v24 = vshrl.u32 %v6139_v42, 23  ;;  %15999 = vst [vmem:[#allocation109_spill] sm:$0xff] %v14574_v58 }
 0x652   : > { %v6620_v6 = vsub.s32 32, %v14523_v12  ;;  %v6626_v45 = vshll.u32 %v6625_v10, 23  ;;  %v6799_v11 = vsel %vm6789_vm6, %v6796_v18, %v6798_v51  ;;  %v6802_v25 = vsel %vm6790_vm3, %v6784_v20, %v6801_v26  ;;  %v16000_v18 = vld [vmem:[#allocation92_spill] sm:$0xff] }
 0x653   : > { %v8825_v52 = vadd.s32 4294967294, %v6720_v36  ;;  %v6792_v31 = vsel %vm6788_vm2, %v6772_v56, %v6775_v47  ;;  %v6794_v59 = vsel %vm6790_vm3, %v6778_v14, %v6793_v49  ;;  %v6803_v33 = vsel %vm6789_vm6, %v6800_v35, %v6802_v25 }
 0x654   : > { %v14582_v2 = vmul.u32.u64.low %v6804_v3, %v6803_v33  ;;  %v14583_v5 = vmul.u32.u64.high %v6804_v3, %v6803_v33, %v14582_v2  ;;  %v14585_v42 = vmul.u32.u64.low %v6804_v3, %v6799_v11  ;;  %v14586_v30 = vmul.u32.u64.high %v6804_v3, %v6799_v11, %v14585_v42 }
 0x655   : > { %10543 = vcosq.f32 %v14521_v37  ;;  %v7526_v10 = vsub.s32 4, %v14148_v53  ;;  %vm7857_vm7 = vcmp.lt.s32.totalorder %v16000_v18, 0  ;;  %v7930_v20 = vor.u32 %v7929_v32, %v7928_v23 }
 0x656   : > { %v8803_v36 = vadd.s32 4294967169, %v6140_v24  ;;  %v7528_v47 = vsel %vm14547_vm1, %v13765_v44, %v14529_v27  ;;  %v7934_v14 = vor.u32 4788187, %v7933_v38  ;;  %v6622_v49 = vshrl.u32 %v6604_v15, %v6620_v6  ;;  %v16001_v38 = vld [vmem:[#allocation94_spill] sm:$0xff] }
 0x657   : > { %v6795_v2 = vsel %vm6789_vm6, %v6792_v31, %v6794_v59  ;;  %vm8826_vm8 = vcmp.lt.s32.totalorder %v8825_v52, 0  ;;  %v15398_v13 = vand.u32 2147483647, %v14541_v55  ;;  %v6242_v26 = vand.u32 2139095040, %v14564_v22 }
 0x658   : > { %v6146_v35 = vadd.s32 1, %v8803_v36  ;;  %v6621_v56 = vshll.u32 %v14427_v54, %v14523_v12  ;;  %v6627_v23 = vor.u32 4788187, %v6626_v45  ;;  %vm6813_vm9 = vc.u32 %v14583_v5, %v14585_v42 }
 0x659   : > { %v6814_v32 = vadd.s32 1, %v14586_v30  ;;  %v7937_v27 = vcvt.s32.f32 %v7930_v20  ;;  %v7941_v15 = vsub.s32 4, %v16001_v38  ;;  %v6811_v40 = vmul.u32 %v6804_v3, %v6795_v2 }
 0x65a   : > { %vm6147_vm10 = vcmp.gt.s32.totalorder %v6146_v35, 0  ;;  %v6623_v59 = vor.u32 %v6622_v49, %v6621_v56  ;;  %v14605_v51 = vsel %vm8826_vm8, 0, %v8825_v52  ;;  %v7935_v11 = vand.u32 2147483647, %v7934_v14 }
 0x65b   : > { %v6815_v24 = vsel %vm6813_vm9, %v6814_v32, %v14586_v30  ;;  %v6148_v6 = vsel %vm6147_vm10, %v6146_v35, 0  ;;  %v6243_v12 = vshrl.u32 %v6242_v26, 23  ;;  %10545 = vsinq.f32 %v14521_v37 }
 0x65c   : > { %v6816_v25 = vadd.s32 %v6815_v24, %v6811_v40  ;;  %v6150_v54 = vand.u32 31, %v6148_v6  ;;  %v14612_v45 = vsel %vm7442_vm13, %v7526_v10, %v14148_v53  ;;  %v6628_v31 = vand.u32 2147483647, %v6627_v23 }
 0x65d   : > { %16002 = vst [vmem:[#allocation111_spill] sm:$0xff] %v14612_v45  ;;  %v6143_v3 = vand.u32 8388607, %v15398_v13  ;;  %10547 = vcosq.f32 %v7528_v47  ;;  %v6728_v52 = vsub.s32 4294967266, %v14605_v51  ;;  %v14620_v20 = vsel %vm7857_vm7, %v7941_v15, %v16001_v38 }
 0x65e   : > { %v6817_v33 = vadd.s32 536870912, %v6816_v25  ;;  %v6151_v30 = vsub.s32 32, %v6150_v54  ;;  %10549 = vsinq.f32 %v7528_v47  ;;  %16003 = vst [vmem:[#allocation113_spill] sm:$0xff] %v14620_v20  ;;  %vm6550_vm11 = vcmp.lt.s32.totalorder %v14240_v28, 0 }
 0x65f   : > { %v6630_v37 = vcvt.s32.f32 %v6623_v59  ;;  %v14623_v53 = vmul.f32 %v7937_v27, %v7935_v11  ;;  %v8807_v14 = vadd.s32 4294967169, %v6243_v12  ;;  %v6634_v2 = vsub.s32 4, %v14380_v7 }
 0x660   : > { %v14625_v10 = vshrl.u32 %v6817_v33, 30  ;;  %v6154_v36 = vshrl.u32 %v15955_v8, %v6151_v30  ;;  %v6144_v35 = vor.u32 8388608, %v6143_v3  ;;  %v6157_v47 = vshrl.u32 %v15956_v48, %v6151_v30 }
 0x661   : > { %v6631_v49 = vmul.f32 %v6630_v37, %v6628_v31  ;;  %v6724_v26 = vsub.s32 32, %v14605_v51  ;;  %v6729_v56 = vadd.s32 127, %v6728_v52  ;;  %v6153_v23 = vshll.u32 %v15960_v63, %v6150_v54 }
 0x662   : > { %v6160_v32 = vshrl.u32 %v15957_v9, %v6151_v30  ;;  %v14633_v27 = vpop.eup %10543  ;;  %v6819_v38 = vshll.u32 %v14625_v10, 30  ;;  %v6156_v15 = vshll.u32 %v15955_v8, %v6150_v54  ;;  %v6162_v40 = vshll.u32 %v15957_v9, %v6150_v54 }
 0x663   : > { %16004 = vst [vmem:[#allocation114_spill] sm:$0xff] %v14633_v27  ;;  %v6163_v59 = vshrl.u32 %v15958_v43, %v6151_v30  ;;  %v6149_v24 = vshrl.u32 %v6148_v6, 5  ;;  %v6155_v11 = vor.u32 %v6154_v36, %v6153_v23  ;;  %v6159_v12 = vshll.u32 %v15956_v48, %v6150_v54 }
 0x664   : > { %v6249_v31 = vadd.s32 1, %v8807_v14  ;;  %v6158_v3 = vor.u32 %v6157_v47, %v6156_v15  ;;  %v6165_v33 = vshll.u32 %v15958_v43, %v6150_v54  ;;  %v6166_v37 = vshrl.u32 %v15959_v62, %v6151_v30 }
 0x665   : > { %v6164_v52 = vor.u32 %v6163_v59, %v6162_v40  ;;  %v16005_v13 = vand.u32 2147483647, %v14240_v28  ;;  %v6635_v6 = vsel %vm6550_vm11, %v6634_v2, %v14380_v7  ;;  %v6708_v36 = vadd.s32 %v14395_v46, %v14386_v60 }
 0x666   : > { %v14655_v14 = vadd.f32 %v14512_v57, %v14388_v0  ;;  %v6161_v54 = vor.u32 %v6160_v32, %v6159_v12  ;;  %v6632_v47 = vxor.u32 2147483648, %v6631_v49  ;;  %v6725_v23 = vshll.u32 %v14500_v29, %v14605_v51 }
 0x667   : > { %vm14644_vm13 = vcmp.le.f32.partialorder %v16005_v13, 0.7853982  ;;  %v14659_v13 = vsub.s32 %v6816_v25, %v6819_v38  ;;  %v6167_v15 = vor.u32 %v6166_v37, %v6165_v33  ;;  %v6726_v40 = vshrl.u32 %v6708_v36, %v6724_v26 }
 0x668   : > { %v6730_v59 = vshll.u32 %v6729_v56, 23  ;;  %vm6168_vm14 = vcmp.lt.s32.totalorder %v6149_v24, 1  ;;  %vm6171_vm15 = vcmp.lt.s32.totalorder %v6149_v24, 4  ;;  %v6184_v60 = vshll.u32 %v6144_v35, 8  ;;  %v14662_v46 = vpop.eup %10545 }
 0x669   : > { %v6176_v7 = vsel %vm6168_vm14, %v6155_v11, %v6158_v3  ;;  %v6177_v2 = vsel %vm6171_vm15, %v6164_v52, 920167782  ;;  %vm6250_vm0 = vcmp.gt.s32.totalorder %v6249_v31, 0  ;;  %16008 = vst [vmem:[#allocation115_spill] sm:$0xff] %v14662_v46  ;;  %v6152_v57 = vshrl.u32 %v15960_v63, %v6151_v30 }
 0x66a   : > { %vm6170_vm2 = vcmp.lt.s32.totalorder %v6149_v24, 3  ;;  %v6173_v32 = vsel %vm6171_vm15, %v6161_v54, 2102212464  ;;  %v6180_v29 = vsel %vm6168_vm14, %v6158_v3, %v6161_v54  ;;  %v14666_v51 = vpop.eup %10547  ;;  %v6822_v25 = vsub.s32 0, %v14659_v13 }
 0x66b   : > { %16009 = vst [vmem:[#allocation117_spill] sm:$0xff] %v14666_v51  ;;  %vm6169_vm3 = vcmp.lt.s32.totalorder %v6149_v24, 2  ;;  %v6178_v26 = vsel %vm6170_vm2, %v6161_v54, %v6177_v2  ;;  %v6181_v56 = vsel %vm6171_vm15, %v6167_v15, 1326507024  ;;  %v14669_v38 = vpop.eup %10549  ;;  %v6172_v35 = vsel %vm6168_vm14, %v6152_v57, %v6155_v11 }
 0x66c   : > { %16010 = vst [vmem:[#allocation119_spill] sm:$0xff] %v14669_v38  ;;  %v6179_v12 = vsel %vm6169_vm3, %v6176_v7, %v6178_v26  ;;  %v6182_v33 = vsel %vm6170_vm2, %v6164_v52, %v6181_v56  ;;  %v6251_v37 = vsel %vm6250_vm0, %v6249_v31, 0  ;;  %v6174_v30 = vsel %vm6170_vm2, %v6158_v3, %v6173_v32 }
 0x66d   : > { %v6183_v36 = vsel %vm6169_vm3, %v6180_v29, %v6182_v33  ;;  %v14674_v27 = vmul.u32.u64.low %v6184_v60, %v6179_v12  ;;  %v14675_v46 = vmul.u32.u64.high %v6184_v60, %v6179_v12, %v14674_v27  ;;  %v6727_v51 = vor.u32 %v6726_v40, %v6725_v23 }
 0x66e   : > { %v6738_v16 = vsub.s32 4, %v14473_v17  ;;  %v14679_v54 = vmul.u32.u64.low %v6184_v60, %v6183_v36  ;;  %v14680_v15 = vmul.u32.u64.high %v6184_v60, %v6183_v36, %v14679_v54  ;;  %v6633_v11 = vsel %vm6550_vm11, %v6632_v47, %v6631_v49 }
 0x66f   : > { %v6637_v52 = vsel %vm14644_vm13, 0, %v6635_v6  ;;  %v15404_v31 = vand.u32 2147483647, %v14564_v22  ;;  %v6253_v3 = vand.u32 31, %v6251_v37  ;;  %vm6654_vm4 = vcmp.lt.s32.totalorder %v14253_v39, 0 }
 0x670   : > { %v6731_v7 = vor.u32 4788187, %v6730_v59  ;;  %v6175_v2 = vsel %vm6169_vm3, %v6172_v35, %v6174_v30  ;;  %v6345_v23 = vand.u32 2139095040, %v14655_v14  ;;  %v8828_v57 = vmin.u32 %v6822_v25, %v14659_v13 }
 0x671   : > { %v6194_v32 = vadd.s32 1, %v14675_v46  ;;  %v6254_v49 = vsub.s32 32, %v6253_v3  ;;  %v14696_v6 = vsel %vm14644_vm13, %v14240_v28, %v6633_v11  ;;  %v14698_v47 = vadd.s32 3, %v6637_v52 }
 0x672   : > { %v6734_v29 = vcvt.s32.f32 %v6727_v51  ;;  %v14703_v24 = vsel %vm6654_vm4, %v6738_v16, %v14473_v17  ;;  %v6191_v59 = vmul.u32 %v6184_v60, %v6175_v2  ;;  %vm6193_vm6 = vc.u32 %v14680_v15, %v14674_v27 }
 0x673   : > { %v6246_v25 = vand.u32 8388607, %v15404_v31  ;;  %v6257_v26 = vshrl.u32 %v15955_v8, %v6254_v49  ;;  %v6732_v44 = vand.u32 2147483647, %v6731_v7  ;;  %v6195_v56 = vsel %vm6193_vm6, %v6194_v32, %v14675_v46 }
 0x674   : > { %v6256_v35 = vshll.u32 %v15960_v63, %v6253_v3  ;;  %v6346_v51 = vshrl.u32 %v6345_v23, 23  ;;  %v6824_v12 = vclz %v8828_v57  ;;  %v6196_v33 = vadd.s32 %v6195_v56, %v6191_v59 }
 0x675   : > { %v6259_v17 = vshll.u32 %v15955_v8, %v6253_v3  ;;  %v6260_v16 = vshrl.u32 %v15956_v48, %v6254_v49  ;;  %v6252_v60 = vshrl.u32 %v6251_v37, 5  ;;  %v6262_v36 = vshll.u32 %v15956_v48, %v6253_v3 }
 0x676   : > { %v6258_v30 = vor.u32 %v6257_v26, %v6256_v35  ;;  %v6263_v54 = vshrl.u32 %v15957_v9, %v6254_v49  ;;  %v6197_v11 = vadd.s32 536870912, %v6196_v33  ;;  %v6265_v7 = vshll.u32 %v15957_v9, %v6253_v3 }
 0x677   : > { %v6261_v52 = vor.u32 %v6260_v16, %v6259_v17  ;;  %v6266_v46 = vshrl.u32 %v15958_v43, %v6254_v49  ;;  %10551 = vcosq.f32 %v14696_v6  ;;  %v16011_v2 = vand.u32 2147483647, %v14253_v39 }
 0x678   : > { %v6264_v37 = vor.u32 %v6263_v54, %v6262_v36  ;;  %v6268_v57 = vshll.u32 %v15958_v43, %v6253_v3  ;;  %v6269_v32 = vshrl.u32 %v15959_v62, %v6254_v49  ;;  %v6735_v59 = vmul.f32 %v6734_v29, %v6732_v44 }
 0x679   : > { %vm14721_vm8 = vcmp.le.f32.partialorder %v16011_v2, 0.7853982  ;;  %v14727_v26 = vshrl.u32 %v6197_v11, 30  ;;  %v6247_v56 = vor.u32 8388608, %v6246_v25  ;;  %v6267_v35 = vor.u32 %v6266_v46, %v6265_v7 }
 0x67a   : > { %v16014_v17 = vand.u32 2147483647, %v16000_v18  ;;  %v16015_v16 = vmov 0  ;;  %v8829_v2 = vadd.s32 4294967294, %v6824_v12  ;;  %v6270_v31 = vor.u32 %v6269_v32, %v6268_v57 }
 0x67b   : > { %vm6271_vm10 = vcmp.lt.s32.totalorder %v6252_v60, 1  ;;  %v8811_v40 = vadd.s32 4294967169, %v6346_v51  ;;  %v6199_v36 = vshll.u32 %v14727_v26, 30  ;;  %v6255_v3 = vshrl.u32 %v15960_v63, %v6254_v49 }
 0x67c   : > { %vm14731_vm9 = vcmp.le.f32.partialorder %v16014_v17, 0.7853982  ;;  %vm6274_vm11 = vcmp.lt.s32.totalorder %v6252_v60, 4  ;;  %v6279_v29 = vsel %vm6271_vm10, %v6258_v30, %v6261_v52  ;;  %vm6272_vm13 = vcmp.lt.s32.totalorder %v6252_v60, 2 }
 0x67d   : > { %v16016_v16 = vsel %vm14731_vm9, 4294967295, %v16015_v16  ;;  %vm6273_vm14 = vcmp.lt.s32.totalorder %v6252_v60, 3  ;;  %v6280_v25 = vsel %vm6274_vm11, %v6267_v35, 920167782  ;;  %v6283_v44 = vsel %vm6271_vm10, %v6261_v52, %v6264_v37 }
 0x67e   : > { %16017 = vst [vmem:[#allocation120_spill] sm:$0xff] %v16016_v16  ;;  %v14739_v54 = vsub.s32 %v6196_v33, %v6199_v36  ;;  %v6276_v11 = vsel %vm6274_vm11, %v6264_v37, 2102212464  ;;  %v6281_v7 = vsel %vm6273_vm14, %v6264_v37, %v6280_v25  ;;  %v6284_v12 = vsel %vm6274_vm11, %v6270_v31, 1326507024 }
 0x67f   : > { %v6736_v46 = vxor.u32 2147483648, %v6735_v59  ;;  %v6282_v51 = vsel %vm6272_vm13, %v6279_v29, %v6281_v7  ;;  %v6285_v57 = vsel %vm6273_vm14, %v6267_v35, %v6284_v12  ;;  %v6287_v32 = vshll.u32 %v6247_v56, 8 }
 0x680   : > { %vm8830_vm15 = vcmp.lt.s32.totalorder %v8829_v2, 0  ;;  %v6202_v49 = vsub.s32 0, %v14739_v54  ;;  %v6275_v17 = vsel %vm6271_vm10, %v6255_v3, %v6258_v30  ;;  %v6286_v38 = vsel %vm6272_vm13, %v6283_v44, %v6285_v57  ;;  %v14770_v44 = vpop.f32.mrf.mxu0 }
 0x681   : > { %v6277_v45 = vsel %vm6273_vm14, %v6261_v52, %v6276_v11  ;;  %v14745_v50 = vmul.u32.u64.low %v6287_v32, %v6286_v38  ;;  %v14746_v58 = vmul.u32.u64.high %v6287_v32, %v6286_v38, %v14745_v50  ;;  %v6352_v33 = vadd.s32 1, %v8811_v40 }
 0x682   : > { %v6741_v31 = vsel %vm14721_vm8, 0, %v14703_v24  ;;  %v8804_v37 = vmin.u32 %v6202_v49, %v14739_v54  ;;  %v14752_v35 = vmul.u32.u64.low %v6287_v32, %v6282_v51  ;;  %v14753_v56 = vmul.u32.u64.high %v6287_v32, %v6282_v51, %v14752_v35 }
 0x683   : > { %v16018_v30 = vxor.u32 2147483648, %v14623_v53  ;;  %v6737_v50 = vsel %vm6654_vm4, %v6736_v46, %v6735_v59  ;;  %v15408_v38 = vand.u32 2147483647, %v14655_v14  ;;  %vm6353_vm0 = vcmp.gt.s32.totalorder %v6352_v33, 0 }
 0x684   : > { %v14764_v40 = vsel %vm8830_vm15, 0, %v8829_v2  ;;  %v6204_v24 = vclz %v8804_v37  ;;  %v6278_v36 = vsel %vm6272_vm13, %v6275_v17, %v6277_v45  ;;  %v6354_v3 = vsel %vm6353_vm0, %v6352_v33, 0  ;;  %v14774_v59 = vpop.eup %10551 }
 0x685   : > { %v7940_v52 = vsel %vm7857_vm7, %v16018_v30, %v14623_v53  ;;  %v6745_v25 = vadd.s32 3, %v6741_v31  ;;  %vm6296_vm7 = vc.u32 %v14746_v58, %v14752_v35  ;;  %v6356_v53 = vand.u32 31, %v6354_v3 }
 0x686   : > { %v14779_v2 = vsel %vm14731_vm9, %v16000_v18, %v7940_v52  ;;  %v14782_v45 = vand.u32 3, %v14698_v47  ;;  %v8805_v60 = vadd.s32 4294967294, %v6204_v24  ;;  %v6297_v11 = vadd.s32 1, %v14753_v56 }
 0x687   : > { %16019 = vst [vmem:[#allocation110_spill] sm:$0xff] %v14779_v2  ;;  %v14788_v7 = vsel %vm14721_vm8, %v14253_v39, %v6737_v50  ;;  %v6832_v12 = vsub.s32 4294967266, %v14764_v40  ;;  %v6294_v46 = vmul.u32 %v6287_v32, %v6278_v36  ;;  %v6349_v51 = vand.u32 8388607, %v15408_v38 }
 0x688   : > { %v14795_v57 = vadd.f32 %v14516_v34, %v14770_v44  ;;  %vm8806_vm2 = vcmp.lt.s32.totalorder %v8805_v60, 0  ;;  %v6298_v47 = vsel %vm6296_vm7, %v6297_v11, %v14753_v56  ;;  %v6357_v49 = vsub.s32 32, %v6356_v53 }
 0x689   : > { %10553 = vsinq.f32 %v14696_v6  ;;  %v14799_v17 = vand.u32 3, %v6745_v25  ;;  %v6207_v23 = vsel %vm8806_vm2, 0, %v8805_v60  ;;  %v6299_v33 = vadd.s32 %v6298_v47, %v6294_v46 }
 0x68a   : > { %10555 = vcosq.f32 %v14788_v7  ;;  %v14805_v32 = vadd.s32 %v14585_v42, %v14583_v5  ;;  %v6212_v34 = vsub.s32 4294967266, %v6207_v23  ;;  %v14807_v37 = vadd.s32 127, %v6832_v12 }
 0x68b   : > { %v6192_v56 = vadd.s32 %v14674_v27, %v14680_v15  ;;  %v6300_v30 = vadd.s32 536870912, %v6299_v33  ;;  %v6350_v6 = vor.u32 8388608, %v6349_v51  ;;  %v6360_v50 = vshrl.u32 %v15955_v8, %v6357_v49 }
 0x68c   : > { %v6213_v52 = vadd.s32 127, %v6212_v34  ;;  %v6363_v24 = vshrl.u32 %v15956_v48, %v6357_v49  ;;  %v6366_v36 = vshrl.u32 %v15957_v9, %v6357_v49  ;;  %v6369_v5 = vshrl.u32 %v15958_v43, %v6357_v49 }
 0x68d   : > { %v14814_v25 = vshrl.u32 %v6300_v30, 30  ;;  %v6372_v42 = vshrl.u32 %v15959_v62, %v6357_v49  ;;  %v6448_v60 = vand.u32 2139095040, %v14795_v57  ;;  %v6208_v11 = vsub.s32 32, %v6207_v23 }
 0x68e   : > { %v6359_v27 = vshll.u32 %v15960_v63, %v6356_v53  ;;  %v6362_v15 = vshll.u32 %v15955_v8, %v6356_v53  ;;  %v6365_v12 = vshll.u32 %v15956_v48, %v6356_v53  ;;  %v6355_v51 = vshrl.u32 %v6354_v3, 5 }
 0x68f   : > { %v6302_v46 = vshll.u32 %v14814_v25, 30  ;;  %v6368_v47 = vshll.u32 %v15957_v9, %v6356_v53  ;;  %v6371_v34 = vshll.u32 %v15958_v43, %v6356_v53  ;;  %v6214_v30 = vshll.u32 %v6213_v52, 23 }
 0x690   : > { %v6361_v29 = vor.u32 %v6360_v50, %v6359_v27  ;;  %v6364_v38 = vor.u32 %v6363_v24, %v6362_v15  ;;  %v6367_v31 = vor.u32 %v6366_v36, %v6365_v12  ;;  %v6390_v2 = vshll.u32 %v6350_v6, 8 }
 0x691   : > { %v14825_v18 = vsub.s32 %v6299_v33, %v6302_v46  ;;  %v6370_v20 = vor.u32 %v6369_v5, %v6368_v47  ;;  %v6373_v16 = vor.u32 %v6372_v42, %v6371_v34  ;;  %v6210_v19 = vshrl.u32 %v6192_v56, %v6208_v11 }
 0x692   : > { %v6358_v4 = vshrl.u32 %v15960_v63, %v6357_v49  ;;  %v15419_v21 = vand.u32 2147483647, %v14795_v57  ;;  %v6449_v61 = vshrl.u32 %v6448_v60, 23  ;;  %v6209_v3 = vshll.u32 %v14739_v54, %v6207_v23 }
 0x693   : > { %v6305_v1 = vsub.s32 0, %v14825_v18  ;;  %vm6374_vm3 = vcmp.lt.s32.totalorder %v6355_v51, 1  ;;  %vm6377_vm4 = vcmp.lt.s32.totalorder %v6355_v51, 4  ;;  %v6215_v53 = vor.u32 4788187, %v6214_v30 }
 0x694   : > { %vm6376_vm6 = vcmp.lt.s32.totalorder %v6355_v51, 3  ;;  %v6379_v52 = vsel %vm6377_vm4, %v6367_v31, 2102212464  ;;  %v6382_v33 = vsel %vm6374_vm3, %v6361_v29, %v6364_v38  ;;  %v6383_v6 = vsel %vm6377_vm4, %v6370_v20, 920167782 }
 0x695   : > { %v8808_v50 = vmin.u32 %v6305_v1, %v14825_v18  ;;  %v6386_v56 = vsel %vm6374_vm3, %v6364_v38, %v6367_v31  ;;  %v6387_v49 = vsel %vm6377_vm4, %v6373_v16, 1326507024  ;;  %v6211_v36 = vor.u32 %v6210_v19, %v6209_v3 }
 0x696   : > { %v14834_v24 = vpop.eup %10553  ;;  %vm6375_vm8 = vcmp.lt.s32.totalorder %v6355_v51, 2  ;;  %v6384_v54 = vsel %vm6376_vm6, %v6367_v31, %v6383_v6  ;;  %v6388_v23 = vsel %vm6376_vm6, %v6370_v20, %v6387_v49  ;;  %v8815_v1 = vadd.s32 4294967169, %v6449_v61 }
 0x697   : > { %v14838_v5 = vpop.eup %10555  ;;  %v6307_v42 = vclz %v8808_v50  ;;  %v6385_v60 = vsel %vm6375_vm8, %v6382_v33, %v6384_v54  ;;  %v6389_v11 = vsel %vm6375_vm8, %v6386_v56, %v6388_v23  ;;  %v6378_v27 = vsel %vm6374_vm3, %v6358_v4, %v6361_v29 }
 0x698   : > { %v6380_v16 = vsel %vm6376_vm6, %v6364_v38, %v6379_v52  ;;  %v14844_v15 = vmul.u32.u64.low %v6390_v2, %v6389_v11  ;;  %v14845_v12 = vmul.u32.u64.high %v6390_v2, %v6389_v11, %v14844_v15  ;;  %v6216_v19 = vand.u32 2147483647, %v6215_v53 }
 0x699   : > { %v8809_v46 = vadd.s32 4294967294, %v6307_v42  ;;  %v14847_v31 = vmul.u32.u64.low %v6390_v2, %v6385_v60  ;;  %v14848_v47 = vmul.u32.u64.high %v6390_v2, %v6385_v60, %v14847_v31  ;;  %10557 = vsinq.f32 %v14788_v7 }
 0x69a   : > { %v6828_v20 = vsub.s32 32, %v14764_v40  ;;  %v6452_v61 = vand.u32 8388607, %v15419_v21  ;;  %v6455_v34 = vadd.s32 1, %v8815_v1  ;;  %v6834_v4 = vshll.u32 %v14807_v37, 23 }
 0x69b   : > { %v6218_v38 = vcvt.s32.f32 %v6211_v36  ;;  %vm8810_vm10 = vcmp.lt.s32.totalorder %v8809_v46, 0  ;;  %v6381_v29 = vsel %vm6375_vm8, %v6378_v27, %v6380_v16  ;;  %v6295_v30 = vadd.s32 %v14752_v35, %v14746_v58 }
 0x69c   : > { %v6310_v3 = vsel %vm8810_vm10, 0, %v8809_v46  ;;  %vm6399_vm11 = vc.u32 %v14845_v12, %v14847_v31  ;;  %vm6456_vm13 = vcmp.gt.s32.totalorder %v6455_v34, 0  ;;  %v6400_v33 = vadd.s32 1, %v14848_v47 }
 0x69d   : > { %v14861_v7 = vmul.f32 %v6218_v38, %v6216_v19  ;;  %v6311_v53 = vsub.s32 32, %v6310_v3  ;;  %v6315_v52 = vsub.s32 4294967266, %v6310_v3  ;;  %v6397_v50 = vmul.u32 %v6390_v2, %v6381_v29 }
 0x69e   : > { %v6453_v37 = vor.u32 8388608, %v6452_v61  ;;  %v6457_v6 = vsel %vm6456_vm13, %v6455_v34, 0  ;;  %v6863_v51 = vand.u32 2139095040, %v14770_v44  ;;  %v6645_v56 = vxor.u32 2147483648, %v14834_v24 }
 0x69f   : > { %v6313_v49 = vshrl.u32 %v6295_v30, %v6311_v53  ;;  %v6316_v58 = vadd.s32 127, %v6315_v52  ;;  %v6401_v35 = vsel %vm6399_vm11, %v6400_v33, %v14848_v47  ;;  %v6829_v36 = vshll.u32 %v14659_v13, %v14764_v40 }
 0x6a0   : > { %v6830_v54 = vshrl.u32 %v14805_v32, %v6828_v20  ;;  %v6402_v23 = vadd.s32 %v6401_v35, %v6397_v50  ;;  %v6459_v42 = vand.u32 31, %v6457_v6  ;;  %v14870_v60 = vor.u32 4788187, %v6834_v4 }
 0x6a1   : > { %v6220_v2 = vxor.u32 2147483648, %v14861_v7  ;;  %v6312_v11 = vshll.u32 %v14825_v18, %v6310_v3  ;;  %v6317_v1 = vshll.u32 %v6316_v58, 23  ;;  %v14874_v15 = vshll.u32 %v6453_v37, 8 }
 0x6a2   : > { %v6403_v27 = vadd.s32 536870912, %v6402_v23  ;;  %v6460_v16 = vsub.s32 32, %v6459_v42  ;;  %v6864_v19 = vshrl.u32 %v6863_v51, 23  ;;  %v6458_v61 = vshrl.u32 %v6457_v6, 5 }
 0x6a3   : > { %v6314_v46 = vor.u32 %v6313_v49, %v6312_v11  ;;  %v6318_v47 = vor.u32 4788187, %v6317_v1  ;;  %v6462_v34 = vshll.u32 %v15960_v63, %v6459_v42  ;;  %v6465_v4 = vshll.u32 %v15955_v8, %v6459_v42 }
 0x6a4   : > { %v14877_v32 = vshrl.u32 %v6403_v27, 30  ;;  %v6463_v20 = vshrl.u32 %v15955_v8, %v6460_v16  ;;  %v6466_v38 = vshrl.u32 %v15956_v48, %v6460_v16  ;;  %vm6647_vm14 = vcmp.eq.s32.totalorder %v14782_v45, 2 }
 0x6a5   : > { %v6468_v18 = vshll.u32 %v15956_v48, %v6459_v42  ;;  %v6469_v29 = vshrl.u32 %v15957_v9, %v6460_v16  ;;  %v6471_v30 = vshll.u32 %v15957_v9, %v6459_v42  ;;  %v6472_v3 = vshrl.u32 %v15958_v43, %v6460_v16 }
 0x6a6   : > { %vm6644_vm15 = vcmp.eq.s32.totalorder %v14782_v45, 0  ;;  %v6319_v53 = vand.u32 2147483647, %v6318_v47  ;;  %v6405_v52 = vshll.u32 %v14877_v32, 30  ;;  %v6464_v33 = vor.u32 %v6463_v20, %v6462_v34  ;;  %v14889_v37 = vpop.eup %10557 }
 0x6a7   : > { %v6467_v50 = vor.u32 %v6466_v38, %v6465_v4  ;;  %vm6138_vm0 = vcmp.lt.s32.totalorder %v14541_v55, 0  ;;  %v6470_v6 = vor.u32 %v6469_v29, %v6468_v18  ;;  %v6473_v51 = vor.u32 %v6472_v3, %v6471_v30 }
 0x6a8   : > { %v6474_v49 = vshll.u32 %v15958_v43, %v6459_v42  ;;  %v6475_v58 = vshrl.u32 %v15959_v62, %v6460_v16  ;;  %v6321_v35 = vcvt.s32.f32 %v6314_v46  ;;  %v14894_v11 = vsub.s32 %v6402_v23, %v6405_v52 }
 0x6a9   : > { %vm6477_vm7 = vcmp.lt.s32.totalorder %v6458_v61, 1  ;;  %v8831_v1 = vadd.s32 4294967169, %v6864_v19  ;;  %v6461_v27 = vshrl.u32 %v15960_v63, %v6460_v16  ;;  %vm6479_vm2 = vcmp.lt.s32.totalorder %v6458_v61, 3 }
 0x6aa   : > { %v6476_v47 = vor.u32 %v6475_v58, %v6474_v49  ;;  %vm6480_vm3 = vcmp.lt.s32.totalorder %v6458_v61, 4  ;;  %v16020_v34 = vand.u32 2147483647, %v14541_v55  ;;  %v6408_v42 = vsub.s32 0, %v14894_v11 }
 0x6ab   : > { %v6482_v4 = vsel %vm6480_vm3, %v6470_v6, 2102212464  ;;  %v6485_v46 = vsel %vm6477_vm7, %v6464_v33, %v6467_v50  ;;  %v6486_v23 = vsel %vm6480_vm3, %v6473_v51, 920167782  ;;  %v6322_v38 = vmul.f32 %v6321_v35, %v6319_v53 }
 0x6ac   : > { %vm14899_vm4 = vcmp.le.f32.partialorder %v16020_v34, 0.7853982  ;;  %vm6478_vm6 = vcmp.lt.s32.totalorder %v6458_v61, 2  ;;  %v6487_v19 = vsel %vm6479_vm2, %v6470_v6, %v6486_v23  ;;  %v6489_v16 = vsel %vm6477_vm7, %v6467_v50, %v6470_v6 }
 0x6ad   : > { %vm6241_vm8 = vcmp.lt.s32.totalorder %v14564_v22, 0  ;;  %v8812_v18 = vmin.u32 %v6408_v42, %v14894_v11  ;;  %v6481_v29 = vsel %vm6477_vm7, %v6461_v27, %v6464_v33  ;;  %v6488_v30 = vsel %vm6478_vm6, %v6485_v46, %v6487_v19 }
 0x6ae   : > { %v6490_v3 = vsel %vm6480_vm3, %v6476_v47, 1326507024  ;;  %v6483_v52 = vsel %vm6479_vm2, %v6467_v50, %v6482_v4  ;;  %v14914_v53 = vmul.u32.u64.low %v14874_v15, %v6488_v30  ;;  %v14915_v58 = vmul.u32.u64.high %v14874_v15, %v6488_v30, %v14914_v53 }
 0x6af   : > { %v6491_v49 = vsel %vm6479_vm2, %v6473_v51, %v6490_v3  ;;  %v16023_v6 = vxor.u32 2147483648, %v14774_v59  ;;  %v6831_v33 = vor.u32 %v6830_v54, %v6829_v36  ;;  %v6410_v27 = vclz %v8812_v18 }
 0x6b0   : > { %v6492_v50 = vsel %vm6478_vm6, %v6489_v16, %v6491_v49  ;;  %v14934_v51 = vsel %vm6644_vm15, %v14774_v59, %v6645_v56  ;;  %v16024_v47 = vand.u32 2147483647, %v14564_v22  ;;  %v6870_v40 = vadd.s32 1, %v8831_v1 }
 0x6b1   : > { %v14923_v35 = vsel %vm6647_vm14, %v16023_v6, %v14834_v24  ;;  %v14943_v42 = vmul.u32.u64.low %v14874_v15, %v6492_v50  ;;  %v14944_v13 = vmul.u32.u64.high %v14874_v15, %v6492_v50, %v14943_v42  ;;  %v6221_v24 = vsel %vm6138_vm0, %v6220_v2, %v14861_v7 }
 0x6b2   : > { %vm14938_vm10 = vcmp.le.f32.partialorder %v16024_v47, 0.7853982  ;;  %v8813_v36 = vadd.s32 4294967294, %v6410_v27  ;;  %v6484_v59 = vsel %vm6478_vm6, %v6481_v29, %v6483_v52  ;;  %v15418_v56 = vand.u32 2147483647, %v14770_v44 }
 0x6b3   : > { %v6836_v54 = vand.u32 2147483647, %v14870_v60  ;;  %v6323_v4 = vxor.u32 2147483648, %v6322_v38  ;;  %v6503_v46 = vadd.s32 1, %v14915_v58  ;;  %vm6871_vm11 = vcmp.gt.s32.totalorder %v6870_v40, 0 }
 0x6b4   : > { %v6752_v23 = vxor.u32 2147483648, %v14838_v5  ;;  %v6838_v1 = vcvt.s32.f32 %v6831_v33  ;;  %vm8814_vm13 = vcmp.lt.s32.totalorder %v8813_v36, 0  ;;  %v6872_v19 = vsel %vm6871_vm11, %v6870_v40, 0 }
 0x6b5   : > { %v6224_v7 = vsel %vm14899_vm4, %v14541_v55, %v6221_v24  ;;  %v6413_v2 = vsel %vm8814_vm13, 0, %v8813_v36  ;;  %v6500_v61 = vmul.u32 %v14874_v15, %v6484_v59  ;;  %vm6502_vm14 = vc.u32 %v14944_v13, %v14914_v53 }
 0x6b6   : > { %v6749_v60 = vxor.u32 2147483648, %v14889_v37  ;;  %v6418_v16 = vsub.s32 4294967266, %v6413_v2  ;;  %v6504_v18 = vsel %vm6502_vm14, %v6503_v46, %v14915_v58  ;;  %v6867_v29 = vand.u32 8388607, %v15418_v56 }
 0x6b7   : > { %v14966_v30 = vmul.f32 %v6838_v1, %v6836_v54  ;;  %v6324_v3 = vsel %vm6241_vm8, %v6323_v4, %v6322_v38  ;;  %v6505_v52 = vadd.s32 %v6504_v18, %v6500_v61  ;;  %v6874_v49 = vand.u32 31, %v6872_v19 }
 0x6b8   : > { %v6222_v15 = vsub.s32 4, %v14727_v26  ;;  %10559 = vcosq.f32 %v6224_v7  ;;  %v6419_v33 = vadd.s32 127, %v6418_v16  ;;  %v6398_v58 = vadd.s32 %v14847_v31, %v14845_v12 }
 0x6b9   : > { %10561 = vsinq.f32 %v6224_v7  ;;  %v6506_v27 = vadd.s32 536870912, %v6505_v52  ;;  %v6875_v50 = vsub.s32 32, %v6874_v49  ;;  %v6327_v47 = vsel %vm14938_vm10, %v14564_v22, %v6324_v3 }
 0x6ba   : > { %v6414_v42 = vsub.s32 32, %v6413_v2  ;;  %v6868_v38 = vor.u32 8388608, %v6867_v29  ;;  %v6877_v40 = vshll.u32 %v15960_v63, %v6874_v49  ;;  %v6880_v59 = vshll.u32 %v15955_v8, %v6874_v49 }
 0x6bb   : > { %v14978_v24 = vshrl.u32 %v6506_v27, 30  ;;  %v6878_v36 = vshrl.u32 %v15955_v8, %v6875_v50  ;;  %v6881_v54 = vshrl.u32 %v15956_v48, %v6875_v50  ;;  %v6420_v4 = vshll.u32 %v6419_v33, 23 }
 0x6bc   : > { %v6884_v12 = vshrl.u32 %v15957_v9, %v6875_v50  ;;  %v6886_v31 = vshll.u32 %v15957_v9, %v6874_v49  ;;  %v6887_v46 = vshrl.u32 %v15958_v43, %v6875_v50  ;;  %10563 = vcosq.f32 %v6327_v47 }
 0x6bd   : > { %v6508_v1 = vshll.u32 %v14978_v24, 30  ;;  %v6873_v7 = vshrl.u32 %v6872_v19, 5  ;;  %v6883_v61 = vshll.u32 %v15956_v48, %v6874_v49  ;;  %v6416_v16 = vshrl.u32 %v6398_v58, %v6414_v42 }
 0x6be   : > { %v6879_v18 = vor.u32 %v6878_v36, %v6877_v40  ;;  %v6882_v29 = vor.u32 %v6881_v54, %v6880_v59  ;;  %v6888_v3 = vor.u32 %v6887_v46, %v6886_v31  ;;  %v6889_v33 = vshll.u32 %v15958_v43, %v6874_v49 }
 0x6bf   : > { %v14988_v8 = vsub.s32 %v6505_v52, %v6508_v1  ;;  %v6885_v27 = vor.u32 %v6884_v12, %v6883_v61  ;;  %v6890_v56 = vshrl.u32 %v15959_v62, %v6875_v50  ;;  %10565 = vsinq.f32 %v6327_v47 }
 0x6c0   : > { %v6415_v9 = vshll.u32 %v14894_v11, %v6413_v2  ;;  %v6421_v21 = vor.u32 4788187, %v6420_v4  ;;  %v14993_v6 = vshll.u32 %v6868_v38, 8  ;;  %vm6643_vm15 = vcmp.lt.s32.totalorder %v14782_v45, 2 }
 0x6c1   : > { %v6511_v48 = vsub.s32 0, %v14988_v8  ;;  %v6891_v19 = vor.u32 %v6890_v56, %v6889_v33  ;;  %vm6892_vm7 = vcmp.lt.s32.totalorder %v6873_v7, 1  ;;  %vm6895_vm2 = vcmp.lt.s32.totalorder %v6873_v7, 4 }
 0x6c2   : > { %vm6748_vm3 = vcmp.eq.s32.totalorder %v14799_v17, 0  ;;  %v6417_v52 = vor.u32 %v6416_v16, %v6415_v9  ;;  %vm6894_vm6 = vcmp.lt.s32.totalorder %v6873_v7, 3  ;;  %v6900_v43 = vsel %vm6892_vm7, %v6879_v18, %v6882_v29 }
 0x6c3   : > { %v6901_v62 = vsel %vm6895_vm2, %v6888_v3, 920167782  ;;  %v8816_v11 = vmin.u32 %v6511_v48, %v14988_v8  ;;  %v6876_v2 = vshrl.u32 %v15960_v63, %v6875_v50  ;;  %v6897_v49 = vsel %vm6895_vm2, %v6885_v27, 2102212464 }
 0x6c4   : > { %v6904_v58 = vsel %vm6892_vm7, %v6882_v29, %v6885_v27  ;;  %v6422_v47 = vand.u32 2147483647, %v6421_v21  ;;  %vm6893_vm13 = vcmp.lt.s32.totalorder %v6873_v7, 2  ;;  %v6902_v56 = vsel %vm6894_vm6, %v6885_v27, %v6901_v62 }
 0x6c5   : > { %v6905_v42 = vsel %vm6895_vm2, %v6891_v19, 1326507024  ;;  %v15004_v38 = vpop.eup %10559  ;;  %vm6640_vm14 = vweird.f32 %v14240_v28  ;;  %v6513_v40 = vclz %v8816_v11  ;;  %v6896_v36 = vsel %vm6892_vm7, %v6876_v2, %v6879_v18 }
 0x6c6   : > { %v6903_v59 = vsel %vm6893_vm13, %v6900_v43, %v6902_v56  ;;  %v6906_v54 = vsel %vm6894_vm6, %v6888_v3, %v6905_v42  ;;  %v15010_v63 = vpop.eup %10561  ;;  %v6898_v21 = vsel %vm6894_vm6, %v6882_v29, %v6897_v49  ;;  %v16027_v31 = vand.u32 2147483647, %v14388_v0 }
 0x6c7   : > { %v6907_v50 = vsel %vm6893_vm13, %v6904_v58, %v6906_v54  ;;  %v15016_v4 = vmul.u32.u64.low %v14993_v6, %v6903_v59  ;;  %v15017_v12 = vmul.u32.u64.high %v14993_v6, %v6903_v59, %v15016_v4  ;;  %v6424_v1 = vcvt.s32.f32 %v6417_v52 }
 0x6c8   : > { %vm15022_vm7 = vcmp.le.f32.partialorder %v16027_v31, 0.7853982  ;;  %v8817_v61 = vadd.s32 4294967294, %v6513_v40  ;;  %v15027_v16 = vmul.u32.u64.low %v14993_v6, %v6907_v50  ;;  %v15028_v18 = vmul.u32.u64.high %v14993_v6, %v6907_v50, %v15027_v16 }
 0x6c9   : > { %vm6751_vm2 = vcmp.eq.s32.totalorder %v14799_v17, 2  ;;  %v6840_v29 = vxor.u32 2147483648, %v14966_v30  ;;  %v6842_v3 = vsub.s32 4, %v14625_v10  ;;  %vm6344_vm6 = vcmp.lt.s32.totalorder %v14655_v14, 0  ;;  %v10564_v48 = vpop.eup %10563 }
 0x6ca   : > { %v6223_v27 = vsel %vm6138_vm0, %v6222_v15, %v14727_v26  ;;  %v6425_v33 = vmul.f32 %v6424_v1, %v6422_v47  ;;  %vm8818_vm11 = vcmp.lt.s32.totalorder %v8817_v61, 0  ;;  %v6899_v9 = vsel %vm6893_vm13, %v6896_v36, %v6898_v21 }
 0x6cb   : > { %v6650_v19 = vsel %vm6643_vm15, %v14934_v51, %v14923_v35  ;;  %v6753_v52 = vsel %vm6751_vm2, %v6752_v23, %v14889_v37  ;;  %v6516_v43 = vsel %vm8818_vm11, 0, %v8817_v61  ;;  %v6918_v62 = vadd.s32 1, %v15017_v12 }
 0x6cc   : > { %v6750_v26 = vsel %vm6748_vm3, %v14838_v5, %v6749_v60  ;;  %v16030_v15 = vsub.s32 4, %v14814_v25  ;;  %v6517_v35 = vsub.s32 32, %v6516_v43  ;;  %v6521_v51 = vsub.s32 4294967266, %v6516_v43  ;;  %v10566_v37 = vpop.eup %10565 }
 0x6cd   : > { %vm16031_vm0 = vcmp.lt.s32.totalorder %v14388_v0, 0  ;;  %v6915_v7 = vmul.u32 %v14993_v6, %v6899_v9  ;;  %vm6917_vm15 = vc.u32 %v15028_v18, %v15016_v4  ;;  %v6225_v5 = vsel %vm14899_vm4, 0, %v6223_v27  ;;  %v16039_v27 = vld [vmem:[#allocation105_spill] sm:$0xff] }
 0x6ce   : > { %v6326_v45 = vsel %vm6241_vm8, %v16030_v15, %v14814_v25  ;;  %v6841_v23 = vsel %vm16031_vm0, %v6840_v29, %v14966_v30  ;;  %v6426_v60 = vxor.u32 2147483648, %v6425_v33  ;;  %v6501_v11 = vadd.s32 %v14914_v53, %v14944_v13  ;;  %vm16032_vm8 = vmmov %vm16031_vm0  ;;  %v16038_v29 = vld [vmem:[#allocation107_spill] sm:$0xff] }
 0x6cf   : > { %v6522_v25 = vadd.s32 127, %v6521_v51  ;;  %v6919_v2 = vsel %vm6917_vm15, %v6918_v62, %v15017_v12  ;;  %v15071_v49 = vsel %vm6640_vm14, nan, %v6650_v19  ;;  %v15076_v30 = vsel %vm16032_vm8, %v6842_v3, %v14625_v10 }
 0x6d0   : > { %v6328_v20 = vsel %vm14938_vm10, 0, %v6326_v45  ;;  %v6920_v6 = vadd.s32 %v6919_v2, %v6915_v7  ;;  %vm16033_vm4 = vcmp.lt.s32.totalorder %v14799_v17, 2  ;;  %v6519_v53 = vshrl.u32 %v6501_v11, %v6517_v35  ;;  %v16042_v2 = vld [vmem:[#allocation109_spill] sm:$0xff] }
 0x6d1   : > { %v6754_v58 = vsel %vm16033_vm4, %v6750_v26, %v6753_v52  ;;  %v6523_v13 = vshll.u32 %v6522_v25, 23  ;;  %v6229_v47 = vand.u32 3, %v6225_v5  ;;  %vm6744_vm3 = vweird.f32 %v14253_v39  ;;  %v16040_v5 = vld [vmem:[#allocation20_spill] sm:$0xff]  ;;  %v16041_v25 = vld [vmem:[#allocation101_spill] sm:$0xff] }
 0x6d2   : > { %v6844_v28 = vsel %vm15022_vm7, %v14388_v0, %v6841_v23  ;;  %v6921_v56 = vadd.s32 536870912, %v6920_v6  ;;  %v6232_v10 = vxor.u32 2147483648, %v15010_v63  ;;  %v7220_v34 = vsel %vm14375_vm5, 0, %v14462_v41 }
 0x6d3   : > { %v6332_v40 = vand.u32 3, %v6328_v20  ;;  %v6427_v17 = vsel %vm6344_vm6, %v6426_v60, %v6425_v33  ;;  %v6518_v36 = vshll.u32 %v14988_v8, %v6516_v43  ;;  %v6235_v59 = vxor.u32 2147483648, %v15004_v38 }
 0x6d4   : > { %v16035_v54 = vand.u32 2147483647, %v14655_v14  ;;  %v6524_v50 = vor.u32 4788187, %v6523_v13  ;;  %v15100_v12 = vshrl.u32 %v6921_v56, 30  ;;  %v6335_v31 = vxor.u32 2147483648, %v10566_v37 }
 0x6d5   : > { %v6338_v1 = vxor.u32 2147483648, %v10564_v48  ;;  %v6520_v41 = vor.u32 %v6519_v53, %v6518_v36  ;;  %vm6231_vm5 = vcmp.eq.s32.totalorder %v6229_v47, 0  ;;  %vm6234_vm11 = vcmp.eq.s32.totalorder %v6229_v47, 2  ;;  %v16046_v36 = vld [vmem:[#allocation96_spill] sm:$0xff] }
 0x6d6   : > { %vm15096_vm10 = vcmp.le.f32.partialorder %v16035_v54, 0.7853982  ;;  %v7224_v61 = vand.u32 3, %v7220_v34  ;;  %v6923_v16 = vshll.u32 %v15100_v12, 30  ;;  %v6233_v8 = vsel %vm6231_vm5, %v15004_v38, %v6232_v10  ;;  %v16045_v10 = vld [vmem:[#allocation93_spill] sm:$0xff] }
 0x6d7   : > { %v7227_v3 = vxor.u32 2147483648, %v16038_v29  ;;  %v7230_v33 = vxor.u32 2147483648, %v16039_v27  ;;  %v6236_v9 = vsel %vm6234_vm11, %v6235_v59, %v15010_v63  ;;  %vm6334_vm13 = vcmp.eq.s32.totalorder %v6332_v40, 0 }
 0x6d8   : > { %vm6337_vm14 = vcmp.eq.s32.totalorder %v6332_v40, 2  ;;  %vm7226_vm2 = vcmp.eq.s32.totalorder %v7224_v61, 0  ;;  %v6525_v19 = vand.u32 2147483647, %v6524_v50  ;;  %v15107_v52 = vsub.s32 %v6920_v6, %v6923_v16 }
 0x6d9   : > { %v6336_v43 = vsel %vm6334_vm13, %v10564_v48, %v6335_v31  ;;  %v6339_v62 = vsel %vm6337_vm14, %v6338_v1, %v10566_v37  ;;  %v6527_v26 = vcvt.s32.f32 %v6520_v41  ;;  %vm6230_vm0 = vcmp.lt.s32.totalorder %v6229_v47, 2 }
 0x6da   : > { %vm6333_vm15 = vcmp.lt.s32.totalorder %v6332_v40, 2  ;;  %vm7229_vm8 = vcmp.eq.s32.totalorder %v7224_v61, 2  ;;  %v6926_v38 = vsub.s32 0, %v15107_v52  ;;  %vm7225_vm4 = vcmp.lt.s32.totalorder %v7224_v61, 2  ;;  %v16050_v61 = vld [vmem:[#allocation97_spill] sm:$0xff] }
 0x6db   : > { %v7228_v15 = vsel %vm7226_vm2, %v16039_v27, %v7227_v3  ;;  %v7231_v45 = vsel %vm7229_vm8, %v7230_v33, %v16038_v29  ;;  %v6755_v63 = vsel %vm6744_vm3, nan, %v6754_v58  ;;  %10567 = vcosq.f32 %v6844_v28 }
 0x6dc   : > { %v6237_v35 = vsel %vm6230_vm0, %v6233_v8, %v6236_v9  ;;  %v6340_v51 = vsel %vm6333_vm15, %v6336_v43, %v6339_v62  ;;  %10569 = vsinq.f32 %v6844_v28  ;;  %v6528_v48 = vmul.f32 %v6527_v26, %v6525_v19  ;;  %v16051_v26 = vld [vmem:[#allocation110_spill] sm:$0xff] }
 0x6dd   : > { %v8832_v23 = vmin.u32 %v6926_v38, %v15107_v52  ;;  %vm6228_vm5 = vweird.f32 %v14541_v55  ;;  %v6430_v7 = vsel %vm15096_vm10, %v14655_v14, %v6427_v17  ;;  %vm6331_vm11 = vweird.f32 %v14564_v22  ;;  %v16043_v55 = vld [vmem:[#allocation108_spill] sm:$0xff] }
 0x6de   : > { %vm7223_vm13 = vweird.f32 %v16040_v5  ;;  %v7232_v37 = vsel %vm7225_vm4, %v7228_v15, %v7231_v45  ;;  %v6238_v60 = vsel %vm6228_vm5, nan, %v6237_v35  ;;  %v6341_v11 = vsel %vm6331_vm11, nan, %v6340_v51  ;;  %v16044_v22 = vld [vmem:[#allocation88_spill] sm:$0xff]  ;;  %v16052_v35 = vld [vmem:[#allocation111_spill] sm:$0xff] }
 0x6df   : > { %v6928_v39 = vclz %v8832_v23  ;;  %vm7329_vm3 = vcmp.eq.s32.totalorder %v16041_v25, 0  ;;  %vm7328_vm14 = vcmp.lt.s32.totalorder %v16041_v25, 2  ;;  %v7330_v20 = vxor.u32 2147483648, %v16042_v2 }
 0x6e0   : > { %vm7332_vm2 = vcmp.eq.s32.totalorder %v16041_v25, 2  ;;  %v7333_v6 = vxor.u32 2147483648, %v16043_v55  ;;  %v6529_v58 = vxor.u32 2147483648, %v6528_v48  ;;  %v7233_v13 = vsel %vm7223_vm13, nan, %v7232_v37 }
 0x6e1   : > { %v8833_v53 = vadd.s32 4294967294, %v6928_v39  ;;  %vm7326_vm0 = vweird.f32 %v16044_v22  ;;  %10571 = vcosq.f32 %v6430_v7  ;;  %v6964_v47 = vmul.f32 %v15071_v49, %v6238_v60 }
 0x6e2   : > { %v7331_v28 = vsel %vm7329_vm3, %v16043_v55, %v7330_v20  ;;  %v7334_v56 = vsel %vm7332_vm2, %v7333_v6, %v16042_v2  ;;  %vm7846_vm15 = vcmp.lt.s32.totalorder %v16045_v10, 2  ;;  %10573 = vsinq.f32 %v6430_v7  ;;  %v16055_v7 = vld [vmem:[#allocation113_spill] sm:$0xff]  ;;  %v16057_v55 = vld [vmem:[#allocation91_spill] sm:$0xff] }
 0x6e3   : > { %vm6447_vm8 = vcmp.lt.s32.totalorder %v14795_v57, 0  ;;  %vm8834_vm4 = vcmp.lt.s32.totalorder %v8833_v53, 0  ;;  %v7335_v42 = vsel %vm7328_vm14, %v7331_v28, %v7334_v56  ;;  %v6965_v40 = vmul.f32 %v6755_v63, %v6341_v11  ;;  %v16058_v6 = vld [vmem:[#allocation99_spill] sm:$0xff] }
 0x6e4   : > { %v6931_v34 = vsel %vm8834_vm4, 0, %v8833_v53  ;;  %v7336_v17 = vsel %vm7326_vm0, nan, %v7335_v42  ;;  %v7959_v59 = vmul.f32 %v16046_v36, %v7233_v13  ;;  %v6530_v49 = vsel %vm6447_vm8, %v6529_v58, %v6528_v48  ;;  %v16059_v58 = vld [vmem:[#allocation100_spill] sm:$0xff] }
 0x6e5   : > { %v6916_v54 = vadd.s32 %v15016_v4, %v15028_v18  ;;  %v6932_v50 = vsub.s32 32, %v6931_v34  ;;  %v6936_v31 = vsub.s32 4294967266, %v6931_v34  ;;  %v16047_v1 = vand.u32 2147483647, %v14795_v57 }
 0x6e6   : > { %v7960_v16 = vmul.f32 %v16050_v61, %v7336_v17  ;;  %v7963_v8 = vadd.f32 %v7959_v59, %v6964_v47  ;;  %v7967_v29 = vmul.f32 %v7959_v59, %v6964_v47  ;;  %v6428_v3 = vsub.s32 4, %v14877_v32  ;;  %v16070_v17 = vld [vmem:[#allocation151_spill] sm:$0xff] }
 0x6e7   : > { %vm15141_vm5 = vcmp.le.f32.partialorder %v16047_v1, 0.7853982  ;;  %v6933_v27 = vshll.u32 %v15107_v52, %v6931_v34  ;;  %v6934_v33 = vshrl.u32 %v6916_v54, %v6932_v50  ;;  %v6937_v9 = vadd.s32 127, %v6936_v31  ;;  %v16062_v54 = vld [vmem:[#allocation119_spill] sm:$0xff]  ;;  %v16063_v31 = vld [vmem:[#allocation117_spill] sm:$0xff] }
 0x6e8   : > { %v6533_v4 = vsel %vm15141_vm5, %v14795_v57, %v6530_v49  ;;  %v7964_v18 = vadd.f32 %v7960_v16, %v6965_v40  ;;  %v7968_v19 = vmul.f32 %v7960_v16, %v6965_v40  ;;  %v7971_v43 = vadd.f32 %v7967_v29, %v7963_v8  ;;  %v15151_v62 = vpop.eup %10567  ;;  %v16060_v40 = vld [vmem:[#allocation102_spill] sm:$0xff] }
 0x6e9   : > { %10575 = vcosq.f32 %v16051_v26  ;;  %v6845_v38 = vsel %vm15022_vm7, 0, %v15076_v30  ;;  %v6935_v15 = vor.u32 %v6934_v33, %v6933_v27  ;;  %v6938_v45 = vshll.u32 %v6937_v9, 23  ;;  %v15157_v52 = vpop.eup %10569 }
 0x6ea   : > { %10577 = vsinq.f32 %v16051_v26  ;;  %v7972_v63 = vadd.f32 %v7968_v19, %v7964_v18  ;;  %vm7975_vm11 = vcmp.gt.f32.partialorder %v7971_v43, 0.0  ;;  %v7529_v48 = vsel %vm14547_vm1, 0, %v16052_v35 }
 0x6eb   : > { %v16056_v5 = vsel %vm14731_vm9, 0, %v16055_v7  ;;  %10579 = vcosq.f32 %v6533_v4  ;;  %v6939_v46 = vor.u32 4788187, %v6938_v45  ;;  %v6849_v30 = vadd.s32 3, %v6845_v38  ;;  %v16067_v38 = vld [vmem:[#allocation115_spill] sm:$0xff]  ;;  %v16068_v45 = vld [vmem:[#allocation114_spill] sm:$0xff] }
 0x6ec   : > { %v7948_v37 = vadd.s32 3, %v16056_v5  ;;  %v6429_v39 = vsel %vm6344_vm6, %v6428_v3, %v14877_v32  ;;  %10581 = vsinq.f32 %v6533_v4  ;;  %vm7976_vm7 = vcmp.gt.f32.partialorder %v7972_v63, 0.0 }
 0x6ed   : > { %v6940_v60 = vand.u32 2147483647, %v6939_v46  ;;  %v6942_v11 = vcvt.s32.f32 %v6935_v15  ;;  %v10659_v25 = vmov -1.0   ;;  %vm7843_vm1 = vweird.f32 %v16057_v55 }
 0x6ee   : > { %v7979_v2 = vsel %vm7975_vm11, 1.0, %v10659_v25  ;;  %v7980_v20 = vsel %vm7976_vm7, 1.0, %v10659_v25  ;;  %v7853_v53 = vsel %vm7846_vm15, %v16059_v58, %v16058_v6  ;;  %v15178_v13 = vand.u32 3, %v7529_v48  ;;  %v10572_v32 = vpop.eup %10571 }
 0x6ef   : > { %v8893_v22 = vpack.c.bf16 %v7980_v20, %v7979_v2  ;;  %v15180_v47 = vand.u32 3, %v7948_v37  ;;  %v6943_v28 = vmul.f32 %v6942_v11, %v6940_v60  ;;  %v10574_v56 = vpop.eup %10573  ;;  %v6850_v42 = vand.u32 3, %v6849_v30 }
 0x6f0   : > { %v6431_v34 = vsel %vm15096_vm10, 0, %v6429_v39  ;;  %v7426_v36 = vsel %vm14454_vm12, 0, %v16060_v40  ;;  %v15190_v10 = vsel %vm7843_vm1, nan, %v7853_v53  ;;  %v6531_v59 = vsub.s32 4, %v14978_v24 }
 0x6f1   : > { %7995 = vst [vmem:[%s15187_s26] sm:$0xff] %v8893_v22  ;;  %v6944_v49 = vxor.u32 2147483648, %v6943_v28  ;;  %v7536_v50 = vxor.u32 2147483648, %v16062_v54  ;;  %vm7538_vm9 = vcmp.eq.s32.totalorder %v15178_v13, 2  ;;  %v7539_v21 = vxor.u32 2147483648, %v16063_v31 }
 0x6f2   : > { %vm6862_vm6 = vcmp.lt.s32.totalorder %v14770_v44, 0  ;;  %v6946_v1 = vsub.s32 4, %v15100_v12  ;;  %vm7535_vm12 = vcmp.eq.s32.totalorder %v15178_v13, 0  ;;  %vm7954_vm10 = vcmp.eq.s32.totalorder %v15180_v47, 2 }
 0x6f3   : > { %v16064_v61 = vand.u32 2147483647, %v14770_v44  ;;  %v6945_v8 = vsel %vm6862_vm6, %v6944_v49, %v6943_v28  ;;  %v6435_v29 = vand.u32 3, %v6431_v34  ;;  %v7430_v3 = vand.u32 3, %v7426_v36 }
 0x6f4   : > { %vm7951_vm3 = vcmp.eq.s32.totalorder %v15180_v47, 0  ;;  %vm6852_vm14 = vcmp.eq.s32.totalorder %v6850_v42, 0  ;;  %v6438_v33 = vxor.u32 2147483648, %v10574_v56  ;;  %v6441_v9 = vxor.u32 2147483648, %v10572_v32 }
 0x6f5   : > { %vm15202_vm13 = vcmp.le.f32.partialorder %v16064_v61, 0.7853982  ;;  %v6853_v4 = vxor.u32 2147483648, %v15157_v52  ;;  %v6856_v18 = vxor.u32 2147483648, %v15151_v62  ;;  %v6532_v19 = vsel %vm6447_vm8, %v6531_v59, %v14978_v24 }
 0x6f6   : > { %v6948_v27 = vsel %vm15202_vm13, %v14770_v44, %v6945_v8  ;;  %v10576_v43 = vpop.eup %10575  ;;  %vm7534_vm2 = vcmp.lt.s32.totalorder %v15178_v13, 2  ;;  %v6947_v26 = vsel %vm6862_vm6, %v6946_v1, %v15100_v12  ;;  %v7433_v15 = vxor.u32 2147483648, %v16067_v38 }
 0x6f7   : > { %10583 = vcosq.f32 %v6948_v27  ;;  %v7436_v63 = vxor.u32 2147483648, %v16068_v45  ;;  %v10578_v35 = vpop.eup %10577  ;;  %vm6437_vm0 = vcmp.eq.s32.totalorder %v6435_v29, 0  ;;  %vm6440_vm15 = vcmp.eq.s32.totalorder %v6435_v29, 2 }
 0x6f8   : > { %10585 = vsinq.f32 %v6948_v27  ;;  %vm7432_vm4 = vcmp.eq.s32.totalorder %v7430_v3, 0  ;;  %vm7435_vm11 = vcmp.eq.s32.totalorder %v7430_v3, 2  ;;  %v10580_v51 = vpop.eup %10579  ;;  %vm7950_vm8 = vcmp.lt.s32.totalorder %v15180_v47, 2 }
 0x6f9   : > { %vm6855_vm7 = vcmp.eq.s32.totalorder %v6850_v42, 2  ;;  %v6534_v24 = vsel %vm15141_vm5, 0, %v6532_v19  ;;  %v6439_v48 = vsel %vm6437_vm0, %v10572_v32, %v6438_v33  ;;  %v6442_v23 = vsel %vm6440_vm15, %v6441_v9, %v10574_v56  ;;  %v10582_v12 = vpop.eup %10581 }
 0x6fa   : > { %v7955_v7 = vxor.u32 2147483648, %v10576_v43  ;;  %v6854_v5 = vsel %vm6852_vm14, %v15151_v62, %v6853_v4  ;;  %v6857_v37 = vsel %vm6855_vm7, %v6856_v18, %v15157_v52  ;;  %v6949_v46 = vsel %vm15202_vm13, 0, %v6947_v26  ;;  %v16069_v52 = vld [vmem:[#allocation90_spill] sm:$0xff] }
 0x6fb   : > { %vm6436_vm1 = vcmp.lt.s32.totalorder %v6435_v29, 2  ;;  %vm7431_vm6 = vcmp.lt.s32.totalorder %v7430_v3, 2  ;;  %v7434_v30 = vsel %vm7432_vm4, %v16068_v45, %v7433_v15  ;;  %v7437_v39 = vsel %vm7435_vm11, %v7436_v63, %v16067_v38 }
 0x6fc   : > { %v7952_v41 = vxor.u32 2147483648, %v10578_v35  ;;  %vm6851_vm5 = vcmp.lt.s32.totalorder %v6850_v42, 2  ;;  %v6538_v60 = vand.u32 3, %v6534_v24  ;;  %v6443_v11 = vsel %vm6436_vm1, %v6439_v48, %v6442_v23 }
 0x6fd   : > { %v6858_v2 = vsel %vm6851_vm5, %v6854_v5, %v6857_v37  ;;  %v6541_v20 = vxor.u32 2147483648, %v10582_v12  ;;  %v6544_v55 = vxor.u32 2147483648, %v10580_v51  ;;  %v6953_v6 = vadd.s32 3, %v6949_v46 }
 0x6fe   : > { %v7540_v62 = vsel %vm7538_vm9, %v7539_v21, %v16062_v54  ;;  %vm6434_vm13 = vweird.f32 %v14655_v14  ;;  %vm7429_vm14 = vweird.f32 %v16069_v52  ;;  %v7438_v58 = vsel %vm7431_vm6, %v7434_v30, %v7437_v39  ;;  %v16071_v54 = vld [vmem:[#allocation92_spill] sm:$0xff] }
 0x6ff   : > { %v7537_v53 = vsel %vm7535_vm12, %v16063_v31, %v7536_v50  ;;  %v7956_v22 = vsel %vm7954_vm10, %v7955_v7, %v10578_v35  ;;  %vm6848_vm0 = vweird.f32 %v14388_v0  ;;  %v6444_v32 = vsel %vm6434_vm13, nan, %v6443_v11 }
 0x700   : > { %v7953_v28 = vsel %vm7951_vm3, %v10576_v43, %v7952_v41  ;;  %v6859_v56 = vsel %vm6848_vm0, nan, %v6858_v2  ;;  %vm6540_vm9 = vcmp.eq.s32.totalorder %v6538_v60, 0  ;;  %vm6543_vm15 = vcmp.eq.s32.totalorder %v6538_v60, 2 }
 0x701   : > { %v6542_v14 = vsel %vm6540_vm9, %v10580_v51, %v6541_v20  ;;  %v6545_v42 = vsel %vm6543_vm15, %v6544_v55, %v10582_v12  ;;  %v6954_v34 = vand.u32 3, %v6953_v6  ;;  %v7439_v40 = vsel %vm7429_vm14, nan, %v7438_v58 }
 0x702   : > { %vm7532_vm4 = vweird.f32 %v16070_v17  ;;  %v7541_v36 = vsel %vm7534_vm2, %v7537_v53, %v7540_v62  ;;  %v6966_v59 = vmul.f32 %v6859_v56, %v6444_v32  ;;  %vm7947_vm12 = vweird.f32 %v16071_v54 }
 0x703   : > { %vm6539_vm10 = vcmp.lt.s32.totalorder %v6538_v60, 2  ;;  %v7957_v50 = vsel %vm7950_vm8, %v7953_v28, %v7956_v22  ;;  %v7961_v1 = vmul.f32 %v15190_v10, %v7439_v40  ;;  %v7542_v61 = vsel %vm7532_vm4, nan, %v7541_v36 }
 0x704   : > { %v10584_v49 = vpop.eup %10583  ;;  %v6546_v31 = vsel %vm6539_vm10, %v6542_v14, %v6545_v42  ;;  %vm6537_vm3 = vweird.f32 %v14795_v57  ;;  %vm6959_vm11 = vcmp.eq.s32.totalorder %v6954_v34, 2  ;;  %vm6956_vm7 = vcmp.eq.s32.totalorder %v6954_v34, 0 }
 0x705   : > { %v10586_v0 = vpop.eup %10585  ;;  %v6960_v21 = vxor.u32 2147483648, %v10584_v49  ;;  %v7965_v8 = vadd.f32 %v7961_v1, %v6966_v59  ;;  %v7969_v29 = vmul.f32 %v7961_v1, %v6966_v59  ;;  %v7958_v3 = vsel %vm7947_vm12, nan, %v7957_v50 }
 0x706   : > { %v6957_v16 = vxor.u32 2147483648, %v10586_v0  ;;  %v6547_v27 = vsel %vm6537_vm3, nan, %v6546_v31  ;;  %vm6955_vm2 = vcmp.lt.s32.totalorder %v6954_v34, 2  ;;  %vm6952_vm8 = vweird.f32 %v14770_v44 }
 0x707   : > { %v6961_v13 = vsel %vm6959_vm11, %v6960_v21, %v10586_v0  ;;  %v7962_v10 = vmul.f32 %v7958_v3, %v7542_v61  ;;  %v7973_v4 = vadd.f32 %v7969_v29, %v7965_v8 }
 0x708   : > { %v6958_v47 = vsel %vm6956_vm7, %v10584_v49, %v6957_v16 }
 0x709   : > { %v6962_v33 = vsel %vm6955_vm2, %v6958_v47, %v6961_v13  ;;  %vm7977_vm1 = vcmp.gt.f32.partialorder %v7973_v4, 0.0 }
 0x70a   : > { %v6963_v9 = vsel %vm6952_vm8, nan, %v6962_v33  ;;  %v7981_v26 = vsel %vm7977_vm1, 1.0, %v10659_v25 }
 0x70b   : > { %v6967_v57 = vmul.f32 %v6963_v9, %v6547_v27 }
 0x70d   : > { %v7966_v18 = vadd.f32 %v7962_v10, %v6967_v57  ;;  %v7970_v19 = vmul.f32 %v7962_v10, %v6967_v57 }
 0x70f   : > { %v7974_v43 = vadd.f32 %v7970_v19, %v7966_v18 }
 0x711   : > { %vm7978_vm6 = vcmp.gt.f32.partialorder %v7974_v43, 0.0 }
 0x712   : > { %v7982_v38 = vsel %vm7978_vm6, 1.0, %v10659_v25 }
 0x713   : > { %v8894_v44 = vpack.c.bf16 %v7982_v38, %v7981_v26 }
 0x715   : > { %7996 = vst [vmem:[%s15187_s26 + $0x8] sm:$0xff] %v8894_v44 }
 0x716   : > { %10601 = shalt.err (!%p10598_p7)
}
 0x717   : > { %s10602_s3 = scalar_lea.hbm %s15262_s29, 256  ;;  %s10606_s2 = scalar_lea.hbm %s15320_s12, 512 }
 0x718   : > { %p10603_p10 = scmp.ne.s32.totalorder %s15262_s29, %s10602_s3  ;;  %p10607_p13 = scmp.lt.s32.totalorder %s15262_s29, %s15320_s12 }
 0x719   : > { %p10608_p0 = scmp.lt.s32.totalorder %s10606_s2, %s10602_s3 }
 0x71a   : > { %p10604_p11 = pnand %p10603_p10, %p10767_p6 }
 0x71b   : > { %p10609_p1 = por %p10608_p0, %p10607_p13 }
 0x71c   : > { %p10605_p12 = pneg %p10604_p11 }
 0x71e   : > { %p10610_p2 = pnand %p10609_p1, %p10605_p12 }
 0x720   : > { %10613 = shalt.err (!%p10610_p2)
}
 0x721   : > { %s10661_s25 = smov 128   ;;  %s10662_s0 = smov 8  }
 0x722   : > { %10252 = dma.vmem_to_hbm [thread:$0]  (%p10767_p6), %s15264_s20, 256, %s15262_s29, %s7998_s15, %s10661_s25, %s10661_s25, %s10662_s0  }
 0x723 PF: > { %s8027_s17 = sand.u32 1, %s10636_s21   ;;  %p10255_p3 = pnand %p8094_p9, %p10771_p8 }
 0x724   : > { %s8028_s3 = scalar_lea.sflag [#allocation4], %s8027_s17 }
 0x725   : > { %p10256_p4 = pneg %p10255_p3 }
 0x727   : > { %10631 = dma.done.wait (%p10256_p4), %s8028_s3, 256  }
 0x728   : > { %10633 = vsyncadd (%p10256_p4), %s8028_s3, 4294967040  ;;  %p22_p5 = scmp.ge.s32.totalorder %s10753_s27, 4   ;;  %s16072_s21 = smov %s10640_s22 }
 0x729   : > { %s16073_s22 = smov %s10644_s23  ;;  %s16074_s23 = smov %s10765_s30 }
 0x72a   : > { %s16075_s24 = smov %s10753_s27  ;;  %24 = sbr.rel (!%p22_p5) target bundleno = 7 (0x7), region = 171 }
 0x72f   :  { %8033 = vsyncpa [#allocation4], 1 }
 0x730   :  { %8035 = vsyncpa [#allocation4 + $0x1], 1 }

</bundles_post_ra>
